<compile_context>
chip_gen: v7x
topology: tpu7x:2x2x1
jax: 0.10.0
libtpu: 0.0.40
codegen_flags: <defaults>
</compile_context>

<pallas_src>
import functools

import jax
import jax.numpy as jnp
from jax.experimental import pallas as pl
from jax.experimental.pallas import tpu as pltpu

# ---------------------------------------------------------------------------
# Model geometry (fixed by the PyTorch module: fc1 expects 2592 = 32*9*9, which
# forces 84x84 spatial input, i.e. the standard Atari frame stack).
# ---------------------------------------------------------------------------
C_IN, H_IN = 4, 84
K1, S1, C1 = 8, 4, 16
HO1 = (H_IN - K1) // S1 + 1            # 20
HALF1 = HO1 // 2                       # 10
K2, S2, C2 = 4, 2, 32
HO2 = (HO1 - K2) // S2 + 1             # 9
FC1_IN = C2 * HO2 * HO2                # 2592
FC1_OUT = 256
LANES = 128                            # lane-dense padding width


# ---------------------------------------------------------------------------
# Kernel A: fused conv1 + ReLU + conv2 + ReLU, one batch element per grid step.
# ---------------------------------------------------------------------------
def _conv_stack_kernel(cols1_ref, w1_ref, b1_ref, w2_ref, b2_ref, out_ref, h1_s):
    # conv1 as a single MXU matmul: (400, 256) @ (256, 128-padded), f32 accumulate.
    y1 = jnp.dot(cols1_ref[0], w1_ref[...], preferred_element_type=jnp.float32)
    y1 = jnp.maximum(y1 + b1_ref[...], 0.0)                     # (400, 128) f32
    # Stage conv1 output in VMEM; rows are ordered (oh, ow%2, ow//2) (see im2col),
    # padded channel lanes are exactly zero (zero weight cols + zero bias).
    h1_s[...] = y1

    w2 = w2_ref[...]                                            # (2048, 128) bf16
    b2 = b2_ref[...]                                            # (1, 128)    f32

    # conv2: for each output row oh2, gather the 4x4 stride-2 patches.  Thanks to
    # the (oh, parity, ow//2) row ordering, each (kh, kw) group is a CONTIGUOUS
    # static 9-row slice; 16 slices are concatenated along lanes -> K = 2048.
    for oh2 in range(HO2):
        pieces = []
        for kh in range(K2):
            for kw in range(K2):
                start = (2 * oh2 + kh) * HO1 + (kw % 2) * HALF1 + kw // 2
                pieces.append(h1_s[start:start + HO2, :])       # (9, 128) f32
        a2 = jnp.concatenate(pieces, axis=-1).astype(jnp.bfloat16)  # (9, 2048)
        y2 = jnp.dot(a2, w2, preferred_element_type=jnp.float32)
        y2 = jnp.maximum(y2 + b2, 0.0)                          # (9, 128) f32
        out_ref[0, oh2] = y2.astype(out_ref.dtype)              # full (9,128) store


def _conv_stack(cols1, w1, b1, w2, b2):
    n = cols1.shape[0]
    return pl.pallas_call(
        _conv_stack_kernel,
        out_shape=jax.ShapeDtypeStruct((n, HO2, HO2, LANES), jnp.bfloat16),
        grid=(n,),
        in_specs=[
            pl.BlockSpec((1, HO1 * HO1, C_IN * K1 * K1), lambda i: (i, 0, 0)),
            pl.BlockSpec((C_IN * K1 * K1, LANES), lambda i: (0, 0)),
            pl.BlockSpec((1, LANES), lambda i: (0, 0)),
            pl.BlockSpec((K2 * K2 * LANES, LANES), lambda i: (0, 0)),
            pl.BlockSpec((1, LANES), lambda i: (0, 0)),
        ],
        out_specs=pl.BlockSpec((1, HO2, HO2, LANES), lambda i: (i, 0, 0, 0)),
        scratch_shapes=[pltpu.VMEM((HO1 * HO1, LANES), jnp.float32)],
        compiler_params=pltpu.CompilerParams(
            dimension_semantics=("parallel",)),
    )(cols1, w1, b1, w2, b2)


# ---------------------------------------------------------------------------
# Kernel B: fused fc1 + tanh + fc2 + softmax (single block; N is tiny).
# ---------------------------------------------------------------------------
def _mlp_head_kernel(x_ref, w3_ref, b3_ref, w4_ref, b4_ref, out_ref):
    h = jnp.dot(x_ref[...], w3_ref[...], preferred_element_type=jnp.float32)
    h = jnp.tanh(h + b3_ref[...])                                # f32 epilogue
    logits = jnp.dot(h.astype(jnp.bfloat16), w4_ref[...],
                     preferred_element_type=jnp.float32)
    logits = logits + b4_ref[...]       # padded lanes carry bias = -1e30
    logits = logits - jnp.max(logits, axis=-1, keepdims=True)
    e = jnp.exp(logits)
    out_ref[...] = (e / jnp.sum(e, axis=-1, keepdims=True)).astype(out_ref.dtype)


def _mlp_head(x, w3, b3, w4, b4):
    n, k = x.shape
    return pl.pallas_call(
        _mlp_head_kernel,
        out_shape=jax.ShapeDtypeStruct((n, LANES), jnp.float32),
        grid=(1,),
        in_specs=[
            pl.BlockSpec((n, k), lambda i: (0, 0)),
            pl.BlockSpec((k, FC1_OUT), lambda i: (0, 0)),
            pl.BlockSpec((1, FC1_OUT), lambda i: (0, 0)),
            pl.BlockSpec((FC1_OUT, LANES), lambda i: (0, 0)),
            pl.BlockSpec((1, LANES), lambda i: (0, 0)),
        ],
        out_specs=pl.BlockSpec((n, LANES), lambda i: (0, 0)),
        compiler_params=pltpu.CompilerParams(
            dimension_semantics=("arbitrary",)),
    )(x, w3, b3, w4, b4)


# ---------------------------------------------------------------------------
# XLA glue: conv1 im2col on the raw input.
#   rows    ordered (oh, ow % 2, ow // 2)  -> conv2 gathers become contiguous
#   columns ordered (ci, kh, kw)           -> matches the prepared conv1 weight
# ---------------------------------------------------------------------------
def _im2col_conv1(x):
    n = x.shape[0]
    slabs = []
    for kh in range(K1):
        for kw in range(K1):
            slabs.append(x[:, :, kh:kh + S1 * HO1:S1, kw:kw + S1 * HO1:S1])
    p = jnp.stack(slabs, axis=-1)              # (N, C, 20, 20, 64)  last=(kh,kw)
    p = p.transpose(0, 2, 3, 1, 4)             # (N, oh, ow, C, 64)
    # split ow into (ow//2, ow%2), then regroup as (parity, ow//2)
    p = p.reshape(n, HO1, HALF1, 2, C_IN * K1 * K1)   # (N, oh, ow//2, ow%2, 256)
    p = p.transpose(0, 1, 3, 2, 4)                    # (N, oh, ow%2, ow//2, 256)
    return p.reshape(n, HO1 * HO1, C_IN * K1 * K1)    # row = oh*20 + parity*10 + ow//2


def forward(fp, x, *, num_classes):
    n = x.shape[0]
    cols1 = _im2col_conv1(x.astype(jnp.bfloat16))                     # (N,400,256)
    conv_out = _conv_stack(cols1, fp["w1"], fp["b1"], fp["w2"], fp["b2"])
    feats = conv_out[:, :, :, :C2].reshape(n, FC1_IN)                 # NHWC flatten
    probs = _mlp_head(feats, fp["w3"], fp["b3"], fp["w4"], fp["b4"])  # (N,128)
    return probs[:, :num_classes]


# ---------------------------------------------------------------------------
# Parameters: PyTorch-style init, then a one-time "fast" prep (permute, pad to
# 128 lanes, cast to bf16) so the per-forward cost contains no weight shuffles.
# ---------------------------------------------------------------------------
def init_params(key, num_classes):
    ks = jax.random.split(key, 8)

    def u(k, shape, fan_in):
        bound = 1.0 / float(fan_in) ** 0.5
        return jax.random.uniform(k, shape, jnp.float32, -bound, bound)

    return {
        "conv1_w": u(ks[0], (C1, C_IN, K1, K1), C_IN * K1 * K1),
        "conv1_b": u(ks[1], (C1,), C_IN * K1 * K1),
        "conv2_w": u(ks[2], (C2, C1, K2, K2), C1 * K2 * K2),
        "conv2_b": u(ks[3], (C2,), C1 * K2 * K2),
        # Linear weights stored transposed vs PyTorch: (in, out); fc1 rows are
        # in PyTorch's NCHW-flatten order (c*81 + oh*9 + ow).
        "fc1_w": u(ks[4], (FC1_IN, FC1_OUT), FC1_IN),
        "fc1_b": u(ks[5], (FC1_OUT,), FC1_IN),
        "fc2_w": u(ks[6], (FC1_OUT, num_classes), FC1_OUT),
        "fc2_b": u(ks[7], (num_classes,), FC1_OUT),
    }


def prepare_params(p, num_classes):
    assert 1 <= num_classes <= LANES
    # conv1: rows ordered (ci, kh, kw) to match the im2col columns; pad Cout->128.
    w1 = jnp.zeros((C_IN * K1 * K1, LANES), jnp.float32)
    w1 = w1.at[:, :C1].set(p["conv1_w"].reshape(C1, C_IN * K1 * K1).T)
    b1 = jnp.zeros((1, LANES), jnp.float32).at[0, :C1].set(p["conv1_b"])
    # conv2: rows ordered ((kh*4+kw)*128 + ci) to match the in-kernel gather.
    w2t = jnp.transpose(p["conv2_w"], (2, 3, 1, 0)).reshape(K2 * K2, C1, C2)
    w2 = jnp.zeros((K2 * K2, LANES, LANES), jnp.float32)
    w2 = w2.at[:, :C1, :C2].set(w2t).reshape(K2 * K2 * LANES, LANES)
    b2 = jnp.zeros((1, LANES), jnp.float32).at[0, :C2].set(p["conv2_b"])
    # fc1: permute rows from NCHW flatten (c*81+p) to the kernel's NHWC flatten
    # (p*32+c) — one-time cost, preserves PyTorch semantics exactly.
    pos = jnp.arange(HO2 * HO2)
    ch = jnp.arange(C2)
    idx = (ch[None, :] * (HO2 * HO2) + pos[:, None]).reshape(-1)
    w3 = p["fc1_w"][idx, :]
    b3 = p["fc1_b"].reshape(1, FC1_OUT)
    # fc2: pad output lanes to 128; padded lanes get bias -1e30 so softmax is exact.
    w4 = jnp.zeros((FC1_OUT, LANES), jnp.float32).at[:, :num_classes].set(p["fc2_w"])
    b4 = jnp.full((1, LANES), -1e30, jnp.float32).at[0, :num_classes].set(p["fc2_b"])
    return {
        "w1": w1.astype(jnp.bfloat16), "b1": b1,
        "w2": w2.astype(jnp.bfloat16), "b2": b2,
        "w3": w3.astype(jnp.bfloat16), "b3": b3,
        "w4": w4.astype(jnp.bfloat16), "b4": b4,
    }


if __name__ == "__main__":
    num_classes = 10
    key = jax.random.PRNGKey(0)
    pkey, xkey = jax.random.split(key)

    params = init_params(pkey, num_classes)
    fp = prepare_params(params, num_classes)

    # fc1 expects 2592 = 32*9*9 features, which forces 84x84 NCHW input.
    x = jax.random.normal(xkey, (2, C_IN, H_IN, H_IN), dtype=jnp.float32)

    fwd = jax.jit(functools.partial(forward, num_classes=num_classes))
    out = jax.block_until_ready(fwd(fp, x))

    assert out.shape == (2, num_classes), out.shape
    assert bool(jnp.all(jnp.isfinite(out)))
    # softmax rows sum to 1
    assert jnp.allclose(jnp.sum(out, axis=1), 1.0, atol=1e-4)

    print("KERNEL_OK")
</pallas_src>

<mosaic_0001>
module attributes {stable_mosaic.version = 11 : i64} {
  func.func @_conv_stack_kernel(%arg0: i32, %arg1: memref<1x400x256xbf16, #tpu.memory_space<vmem>>, %arg2: memref<256x128xbf16, #tpu.memory_space<vmem>>, %arg3: memref<1x128xf32, #tpu.memory_space<vmem>>, %arg4: memref<2048x128xbf16, #tpu.memory_space<vmem>>, %arg5: memref<1x128xf32, #tpu.memory_space<vmem>>, %arg6: memref<1x9x9x128xbf16, #tpu.memory_space<vmem>>, %arg7: memref<400x128xf32, #tpu.memory_space<vmem>>) attributes {dimension_semantics = [#tpu.dimension_semantics<parallel>], iteration_bounds = array<i64: 2>, scalar_prefetch = 0 : i64, scratch_operands = 1 : i64, tpu.core_type = #tpu.core_type<tc>, window_params = [{transform_indices = @transform_0, window_bounds = array<i64: 1, 400, 256>}, {pipeline_mode = #tpu.pipeline_mode<synchronous>, transform_indices = @transform_1, window_bounds = array<i64: 256, 128>}, {pipeline_mode = #tpu.pipeline_mode<synchronous>, transform_indices = @transform_2, window_bounds = array<i64: 1, 128>}, {pipeline_mode = #tpu.pipeline_mode<synchronous>, transform_indices = @transform_3, window_bounds = array<i64: 2048, 128>}, {pipeline_mode = #tpu.pipeline_mode<synchronous>, transform_indices = @transform_4, window_bounds = array<i64: 1, 128>}, {transform_indices = @transform_5, window_bounds = array<i64: 1, 9, 9, 128>}]} {
    %c0 = arith.constant 0 : index
    %c0_0 = arith.constant 0 : index
    %c0_1 = arith.constant 0 : index
    %0 = vector.load %arg1[%c0, %c0_0, %c0_1] : memref<1x400x256xbf16, #tpu.memory_space<vmem>>, vector<1x400x256xbf16>
    %1 = vector.shape_cast %0 : vector<1x400x256xbf16> to vector<400x256xbf16>
    %c0_2 = arith.constant 0 : index
    %c0_3 = arith.constant 0 : index
    %2 = vector.load %arg2[%c0_2, %c0_3] : memref<256x128xbf16, #tpu.memory_space<vmem>>, vector<256x128xbf16>
    %cst = arith.constant dense<0.000000e+00> : vector<400x128xf32>
    %3 = tpu.matmul %1, %2, %cst {dimension_numbers = #tpu.dot_dimension_numbers<[1], [0], [0], [1], [0, 0, 1, 1], [], []>} : vector<400x256xbf16>, vector<256x128xbf16>, vector<400x128xf32> -> vector<400x128xf32>
    %c0_4 = arith.constant 0 : index
    %c0_5 = arith.constant 0 : index
    %4 = vector.load %arg3[%c0_4, %c0_5] : memref<1x128xf32, #tpu.memory_space<vmem>>, vector<1x128xf32>
    %5 = vector.broadcast %4 : vector<1x128xf32> to vector<400x128xf32>
    %6 = arith.addf %3, %5 : vector<400x128xf32>
    %cst_6 = arith.constant 0.000000e+00 : f32
    %7 = vector.broadcast %cst_6 : f32 to vector<400x128xf32>
    %8 = arith.maximumf %6, %7 : vector<400x128xf32>
    %c0_7 = arith.constant 0 : index
    %c0_8 = arith.constant 0 : index
    %9 = vector.load %arg7[%c0_7, %c0_8] : memref<400x128xf32, #tpu.memory_space<vmem>>, vector<400x128xf32>
    tpu.vector_store %arg7[%c0_7, %c0_8], %8 {strides = array<i32>} : memref<400x128xf32, #tpu.memory_space<vmem>>, vector<400x128xf32>,
    %c0_9 = arith.constant 0 : index
    %c0_10 = arith.constant 0 : index
    %10 = vector.load %arg4[%c0_9, %c0_10] : memref<2048x128xbf16, #tpu.memory_space<vmem>>, vector<2048x128xbf16>
    %c0_11 = arith.constant 0 : index
    %c0_12 = arith.constant 0 : index
    %11 = vector.load %arg5[%c0_11, %c0_12] : memref<1x128xf32, #tpu.memory_space<vmem>>, vector<1x128xf32>
    %c0_13 = arith.constant 0 : index
    %c0_14 = arith.constant 0 : index
    %12 = vector.load %arg7[%c0_13, %c0_14] : memref<400x128xf32, #tpu.memory_space<vmem>>, vector<9x128xf32>
    %c10 = arith.constant 10 : index
    %c0_15 = arith.constant 0 : index
    %13 = vector.load %arg7[%c10, %c0_15] : memref<400x128xf32, #tpu.memory_space<vmem>>, vector<9x128xf32>
    %c1 = arith.constant 1 : index
    %c0_16 = arith.constant 0 : index
    %14 = vector.load %arg7[%c1, %c0_16] : memref<400x128xf32, #tpu.memory_space<vmem>>, vector<9x128xf32>
    %c11 = arith.constant 11 : index
    %c0_17 = arith.constant 0 : index
    %15 = vector.load %arg7[%c11, %c0_17] : memref<400x128xf32, #tpu.memory_space<vmem>>, vector<9x128xf32>
    %c20 = arith.constant 20 : index
    %c0_18 = arith.constant 0 : index
    %16 = vector.load %arg7[%c20, %c0_18] : memref<400x128xf32, #tpu.memory_space<vmem>>, vector<9x128xf32>
    %c30 = arith.constant 30 : index
    %c0_19 = arith.constant 0 : index
    %17 = vector.load %arg7[%c30, %c0_19] : memref<400x128xf32, #tpu.memory_space<vmem>>, vector<9x128xf32>
    %c21 = arith.constant 21 : index
    %c0_20 = arith.constant 0 : index
    %18 = vector.load %arg7[%c21, %c0_20] : memref<400x128xf32, #tpu.memory_space<vmem>>, vector<9x128xf32>
    %c31 = arith.constant 31 : index
    %c0_21 = arith.constant 0 : index
    %19 = vector.load %arg7[%c31, %c0_21] : memref<400x128xf32, #tpu.memory_space<vmem>>, vector<9x128xf32>
    %c40 = arith.constant 40 : index
    %c0_22 = arith.constant 0 : index
    %20 = vector.load %arg7[%c40, %c0_22] : memref<400x128xf32, #tpu.memory_space<vmem>>, vector<9x128xf32>
    %c50 = arith.constant 50 : index
    %c0_23 = arith.constant 0 : index
    %21 = vector.load %arg7[%c50, %c0_23] : memref<400x128xf32, #tpu.memory_space<vmem>>, vector<9x128xf32>
    %c41 = arith.constant 41 : index
    %c0_24 = arith.constant 0 : index
    %22 = vector.load %arg7[%c41, %c0_24] : memref<400x128xf32, #tpu.memory_space<vmem>>, vector<9x128xf32>
    %c51 = arith.constant 51 : index
    %c0_25 = arith.constant 0 : index
    %23 = vector.load %arg7[%c51, %c0_25] : memref<400x128xf32, #tpu.memory_space<vmem>>, vector<9x128xf32>
    %c60 = arith.constant 60 : index
    %c0_26 = arith.constant 0 : index
    %24 = vector.load %arg7[%c60, %c0_26] : memref<400x128xf32, #tpu.memory_space<vmem>>, vector<9x128xf32>
    %c70 = arith.constant 70 : index
    %c0_27 = arith.constant 0 : index
    %25 = vector.load %arg7[%c70, %c0_27] : memref<400x128xf32, #tpu.memory_space<vmem>>, vector<9x128xf32>
    %c61 = arith.constant 61 : index
    %c0_28 = arith.constant 0 : index
    %26 = vector.load %arg7[%c61, %c0_28] : memref<400x128xf32, #tpu.memory_space<vmem>>, vector<9x128xf32>
    %c71 = arith.constant 71 : index
    %c0_29 = arith.constant 0 : index
    %27 = vector.load %arg7[%c71, %c0_29] : memref<400x128xf32, #tpu.memory_space<vmem>>, vector<9x128xf32>
    %28 = tpu.concatenate %12, %13, %14, %15, %16, %17, %18, %19, %20, %21, %22, %23, %24, %25, %26, %27 in 1 : vector<9x128xf32>, vector<9x128xf32>, vector<9x128xf32>, vector<9x128xf32>, vector<9x128xf32>, vector<9x128xf32>, vector<9x128xf32>, vector<9x128xf32>, vector<9x128xf32>, vector<9x128xf32>, vector<9x128xf32>, vector<9x128xf32>, vector<9x128xf32>, vector<9x128xf32>, vector<9x128xf32>, vector<9x128xf32> -> vector<9x2048xf32>
    %29 = arith.truncf %28 : vector<9x2048xf32> to vector<9x2048xbf16>
    %cst_30 = arith.constant dense<0.000000e+00> : vector<9x128xf32>
    %30 = tpu.matmul %29, %10, %cst_30 {dimension_numbers = #tpu.dot_dimension_numbers<[1], [0], [0], [1], [0, 0, 1, 1], [], []>} : vector<9x2048xbf16>, vector<2048x128xbf16>, vector<9x128xf32> -> vector<9x128xf32>
    %31 = vector.broadcast %11 : vector<1x128xf32> to vector<9x128xf32>
    %32 = arith.addf %30, %31 : vector<9x128xf32>
    %cst_31 = arith.constant 0.000000e+00 : f32
    %33 = vector.broadcast %cst_31 : f32 to vector<9x128xf32>
    %34 = arith.maximumf %32, %33 : vector<9x128xf32>
    %35 = arith.truncf %34 : vector<9x128xf32> to vector<9x128xbf16>
    %c0_32 = arith.constant 0 : index
    %c0_33 = arith.constant 0 : index
    %c0_34 = arith.constant 0 : index
    %c0_35 = arith.constant 0 : index
    %36 = vector.load %arg6[%c0_32, %c0_33, %c0_34, %c0_35] : memref<1x9x9x128xbf16, #tpu.memory_space<vmem>>, vector<1x1x9x128xbf16>
    %37 = vector.shape_cast %36 : vector<1x1x9x128xbf16> to vector<9x128xbf16>
    %38 = vector.shape_cast %35 : vector<9x128xbf16> to vector<1x1x9x128xbf16>
    tpu.vector_store %arg6[%c0_32, %c0_33, %c0_34, %c0_35], %38 {strides = array<i32>} : memref<1x9x9x128xbf16, #tpu.memory_space<vmem>>, vector<1x1x9x128xbf16>,
    %c40_36 = arith.constant 40 : index
    %c0_37 = arith.constant 0 : index
    %39 = vector.load %arg7[%c40_36, %c0_37] : memref<400x128xf32, #tpu.memory_space<vmem>>, vector<9x128xf32>
    %c50_38 = arith.constant 50 : index
    %c0_39 = arith.constant 0 : index
    %40 = vector.load %arg7[%c50_38, %c0_39] : memref<400x128xf32, #tpu.memory_space<vmem>>, vector<9x128xf32>
    %c41_40 = arith.constant 41 : index
    %c0_41 = arith.constant 0 : index
    %41 = vector.load %arg7[%c41_40, %c0_41] : memref<400x128xf32, #tpu.memory_space<vmem>>, vector<9x128xf32>
    %c51_42 = arith.constant 51 : index
    %c0_43 = arith.constant 0 : index
    %42 = vector.load %arg7[%c51_42, %c0_43] : memref<400x128xf32, #tpu.memory_space<vmem>>, vector<9x128xf32>
    %c60_44 = arith.constant 60 : index
    %c0_45 = arith.constant 0 : index
    %43 = vector.load %arg7[%c60_44, %c0_45] : memref<400x128xf32, #tpu.memory_space<vmem>>, vector<9x128xf32>
    %c70_46 = arith.constant 70 : index
    %c0_47 = arith.constant 0 : index
    %44 = vector.load %arg7[%c70_46, %c0_47] : memref<400x128xf32, #tpu.memory_space<vmem>>, vector<9x128xf32>
    %c61_48 = arith.constant 61 : index
    %c0_49 = arith.constant 0 : index
    %45 = vector.load %arg7[%c61_48, %c0_49] : memref<400x128xf32, #tpu.memory_space<vmem>>, vector<9x128xf32>
    %c71_50 = arith.constant 71 : index
    %c0_51 = arith.constant 0 : index
    %46 = vector.load %arg7[%c71_50, %c0_51] : memref<400x128xf32, #tpu.memory_space<vmem>>, vector<9x128xf32>
    %c80 = arith.constant 80 : index
    %c0_52 = arith.constant 0 : index
    %47 = vector.load %arg7[%c80, %c0_52] : memref<400x128xf32, #tpu.memory_space<vmem>>, vector<9x128xf32>
    %c90 = arith.constant 90 : index
    %c0_53 = arith.constant 0 : index
    %48 = vector.load %arg7[%c90, %c0_53] : memref<400x128xf32, #tpu.memory_space<vmem>>, vector<9x128xf32>
    %c81 = arith.constant 81 : index
    %c0_54 = arith.constant 0 : index
    %49 = vector.load %arg7[%c81, %c0_54] : memref<400x128xf32, #tpu.memory_space<vmem>>, vector<9x128xf32>
    %c91 = arith.constant 91 : index
    %c0_55 = arith.constant 0 : index
    %50 = vector.load %arg7[%c91, %c0_55] : memref<400x128xf32, #tpu.memory_space<vmem>>, vector<9x128xf32>
    %c100 = arith.constant 100 : index
    %c0_56 = arith.constant 0 : index
    %51 = vector.load %arg7[%c100, %c0_56] : memref<400x128xf32, #tpu.memory_space<vmem>>, vector<9x128xf32>
    %c110 = arith.constant 110 : index
    %c0_57 = arith.constant 0 : index
    %52 = vector.load %arg7[%c110, %c0_57] : memref<400x128xf32, #tpu.memory_space<vmem>>, vector<9x128xf32>
    %c101 = arith.constant 101 : index
    %c0_58 = arith.constant 0 : index
    %53 = vector.load %arg7[%c101, %c0_58] : memref<400x128xf32, #tpu.memory_space<vmem>>, vector<9x128xf32>
    %c111 = arith.constant 111 : index
    %c0_59 = arith.constant 0 : index
    %54 = vector.load %arg7[%c111, %c0_59] : memref<400x128xf32, #tpu.memory_space<vmem>>, vector<9x128xf32>
    %55 = tpu.concatenate %39, %40, %41, %42, %43, %44, %45, %46, %47, %48, %49, %50, %51, %52, %53, %54 in 1 : vector<9x128xf32>, vector<9x128xf32>, vector<9x128xf32>, vector<9x128xf32>, vector<9x128xf32>, vector<9x128xf32>, vector<9x128xf32>, vector<9x128xf32>, vector<9x128xf32>, vector<9x128xf32>, vector<9x128xf32>, vector<9x128xf32>, vector<9x128xf32>, vector<9x128xf32>, vector<9x128xf32>, vector<9x128xf32> -> vector<9x2048xf32>
    %56 = arith.truncf %55 : vector<9x2048xf32> to vector<9x2048xbf16>
    %cst_60 = arith.constant dense<0.000000e+00> : vector<9x128xf32>
    %57 = tpu.matmul %56, %10, %cst_60 {dimension_numbers = #tpu.dot_dimension_numbers<[1], [0], [0], [1], [0, 0, 1, 1], [], []>} : vector<9x2048xbf16>, vector<2048x128xbf16>, vector<9x128xf32> -> vector<9x128xf32>
    %58 = vector.broadcast %11 : vector<1x128xf32> to vector<9x128xf32>
    %59 = arith.addf %57, %58 : vector<9x128xf32>
    %cst_61 = arith.constant 0.000000e+00 : f32
    %60 = vector.broadcast %cst_61 : f32 to vector<9x128xf32>
    %61 = arith.maximumf %59, %60 : vector<9x128xf32>
    %62 = arith.truncf %61 : vector<9x128xf32> to vector<9x128xbf16>
    %c0_62 = arith.constant 0 : index
    %c1_63 = arith.constant 1 : index
    %c0_64 = arith.constant 0 : index
    %c0_65 = arith.constant 0 : index
    %63 = vector.load %arg6[%c0_62, %c1_63, %c0_64, %c0_65] : memref<1x9x9x128xbf16, #tpu.memory_space<vmem>>, vector<1x1x9x128xbf16>
    %64 = vector.shape_cast %63 : vector<1x1x9x128xbf16> to vector<9x128xbf16>
    %65 = vector.shape_cast %62 : vector<9x128xbf16> to vector<1x1x9x128xbf16>
    tpu.vector_store %arg6[%c0_62, %c1_63, %c0_64, %c0_65], %65 {strides = array<i32>} : memref<1x9x9x128xbf16, #tpu.memory_space<vmem>>, vector<1x1x9x128xbf16>,
    %c80_66 = arith.constant 80 : index
    %c0_67 = arith.constant 0 : index
    %66 = vector.load %arg7[%c80_66, %c0_67] : memref<400x128xf32, #tpu.memory_space<vmem>>, vector<9x128xf32>
    %c90_68 = arith.constant 90 : index
    %c0_69 = arith.constant 0 : index
    %67 = vector.load %arg7[%c90_68, %c0_69] : memref<400x128xf32, #tpu.memory_space<vmem>>, vector<9x128xf32>
    %c81_70 = arith.constant 81 : index
    %c0_71 = arith.constant 0 : index
    %68 = vector.load %arg7[%c81_70, %c0_71] : memref<400x128xf32, #tpu.memory_space<vmem>>, vector<9x128xf32>
    %c91_72 = arith.constant 91 : index
    %c0_73 = arith.constant 0 : index
    %69 = vector.load %arg7[%c91_72, %c0_73] : memref<400x128xf32, #tpu.memory_space<vmem>>, vector<9x128xf32>
    %c100_74 = arith.constant 100 : index
    %c0_75 = arith.constant 0 : index
    %70 = vector.load %arg7[%c100_74, %c0_75] : memref<400x128xf32, #tpu.memory_space<vmem>>, vector<9x128xf32>
    %c110_76 = arith.constant 110 : index
    %c0_77 = arith.constant 0 : index
    %71 = vector.load %arg7[%c110_76, %c0_77] : memref<400x128xf32, #tpu.memory_space<vmem>>, vector<9x128xf32>
    %c101_78 = arith.constant 101 : index
    %c0_79 = arith.constant 0 : index
    %72 = vector.load %arg7[%c101_78, %c0_79] : memref<400x128xf32, #tpu.memory_space<vmem>>, vector<9x128xf32>
    %c111_80 = arith.constant 111 : index
    %c0_81 = arith.constant 0 : index
    %73 = vector.load %arg7[%c111_80, %c0_81] : memref<400x128xf32, #tpu.memory_space<vmem>>, vector<9x128xf32>
    %c120 = arith.constant 120 : index
    %c0_82 = arith.constant 0 : index
    %74 = vector.load %arg7[%c120, %c0_82] : memref<400x128xf32, #tpu.memory_space<vmem>>, vector<9x128xf32>
    %c130 = arith.constant 130 : index
    %c0_83 = arith.constant 0 : index
    %75 = vector.load %arg7[%c130, %c0_83] : memref<400x128xf32, #tpu.memory_space<vmem>>, vector<9x128xf32>
    %c121 = arith.constant 121 : index
    %c0_84 = arith.constant 0 : index
    %76 = vector.load %arg7[%c121, %c0_84] : memref<400x128xf32, #tpu.memory_space<vmem>>, vector<9x128xf32>
    %c131 = arith.constant 131 : index
    %c0_85 = arith.constant 0 : index
    %77 = vector.load %arg7[%c131, %c0_85] : memref<400x128xf32, #tpu.memory_space<vmem>>, vector<9x128xf32>
    %c140 = arith.constant 140 : index
    %c0_86 = arith.constant 0 : index
    %78 = vector.load %arg7[%c140, %c0_86] : memref<400x128xf32, #tpu.memory_space<vmem>>, vector<9x128xf32>
    %c150 = arith.constant 150 : index
    %c0_87 = arith.constant 0 : index
    %79 = vector.load %arg7[%c150, %c0_87] : memref<400x128xf32, #tpu.memory_space<vmem>>, vector<9x128xf32>
    %c141 = arith.constant 141 : index
    %c0_88 = arith.constant 0 : index
    %80 = vector.load %arg7[%c141, %c0_88] : memref<400x128xf32, #tpu.memory_space<vmem>>, vector<9x128xf32>
    %c151 = arith.constant 151 : index
    %c0_89 = arith.constant 0 : index
    %81 = vector.load %arg7[%c151, %c0_89] : memref<400x128xf32, #tpu.memory_space<vmem>>, vector<9x128xf32>
    %82 = tpu.concatenate %66, %67, %68, %69, %70, %71, %72, %73, %74, %75, %76, %77, %78, %79, %80, %81 in 1 : vector<9x128xf32>, vector<9x128xf32>, vector<9x128xf32>, vector<9x128xf32>, vector<9x128xf32>, vector<9x128xf32>, vector<9x128xf32>, vector<9x128xf32>, vector<9x128xf32>, vector<9x128xf32>, vector<9x128xf32>, vector<9x128xf32>, vector<9x128xf32>, vector<9x128xf32>, vector<9x128xf32>, vector<9x128xf32> -> vector<9x2048xf32>
    %83 = arith.truncf %82 : vector<9x2048xf32> to vector<9x2048xbf16>
    %cst_90 = arith.constant dense<0.000000e+00> : vector<9x128xf32>
    %84 = tpu.matmul %83, %10, %cst_90 {dimension_numbers = #tpu.dot_dimension_numbers<[1], [0], [0], [1], [0, 0, 1, 1], [], []>} : vector<9x2048xbf16>, vector<2048x128xbf16>, vector<9x128xf32> -> vector<9x128xf32>
    %85 = vector.broadcast %11 : vector<1x128xf32> to vector<9x128xf32>
    %86 = arith.addf %84, %85 : vector<9x128xf32>
    %cst_91 = arith.constant 0.000000e+00 : f32
    %87 = vector.broadcast %cst_91 : f32 to vector<9x128xf32>
    %88 = arith.maximumf %86, %87 : vector<9x128xf32>
    %89 = arith.truncf %88 : vector<9x128xf32> to vector<9x128xbf16>
    %c0_92 = arith.constant 0 : index
    %c2 = arith.constant 2 : index
    %c0_93 = arith.constant 0 : index
    %c0_94 = arith.constant 0 : index
    %90 = vector.load %arg6[%c0_92, %c2, %c0_93, %c0_94] : memref<1x9x9x128xbf16, #tpu.memory_space<vmem>>, vector<1x1x9x128xbf16>
    %91 = vector.shape_cast %90 : vector<1x1x9x128xbf16> to vector<9x128xbf16>
    %92 = vector.shape_cast %89 : vector<9x128xbf16> to vector<1x1x9x128xbf16>
    tpu.vector_store %arg6[%c0_92, %c2, %c0_93, %c0_94], %92 {strides = array<i32>} : memref<1x9x9x128xbf16, #tpu.memory_space<vmem>>, vector<1x1x9x128xbf16>,
    %c120_95 = arith.constant 120 : index
    %c0_96 = arith.constant 0 : index
    %93 = vector.load %arg7[%c120_95, %c0_96] : memref<400x128xf32, #tpu.memory_space<vmem>>, vector<9x128xf32>
    %c130_97 = arith.constant 130 : index
    %c0_98 = arith.constant 0 : index
    %94 = vector.load %arg7[%c130_97, %c0_98] : memref<400x128xf32, #tpu.memory_space<vmem>>, vector<9x128xf32>
    %c121_99 = arith.constant 121 : index
    %c0_100 = arith.constant 0 : index
    %95 = vector.load %arg7[%c121_99, %c0_100] : memref<400x128xf32, #tpu.memory_space<vmem>>, vector<9x128xf32>
    %c131_101 = arith.constant 131 : index
    %c0_102 = arith.constant 0 : index
    %96 = vector.load %arg7[%c131_101, %c0_102] : memref<400x128xf32, #tpu.memory_space<vmem>>, vector<9x128xf32>
    %c140_103 = arith.constant 140 : index
    %c0_104 = arith.constant 0 : index
    %97 = vector.load %arg7[%c140_103, %c0_104] : memref<400x128xf32, #tpu.memory_space<vmem>>, vector<9x128xf32>
    %c150_105 = arith.constant 150 : index
    %c0_106 = arith.constant 0 : index
    %98 = vector.load %arg7[%c150_105, %c0_106] : memref<400x128xf32, #tpu.memory_space<vmem>>, vector<9x128xf32>
    %c141_107 = arith.constant 141 : index
    %c0_108 = arith.constant 0 : index
    %99 = vector.load %arg7[%c141_107, %c0_108] : memref<400x128xf32, #tpu.memory_space<vmem>>, vector<9x128xf32>
    %c151_109 = arith.constant 151 : index
    %c0_110 = arith.constant 0 : index
    %100 = vector.load %arg7[%c151_109, %c0_110] : memref<400x128xf32, #tpu.memory_space<vmem>>, vector<9x128xf32>
    %c160 = arith.constant 160 : index
    %c0_111 = arith.constant 0 : index
    %101 = vector.load %arg7[%c160, %c0_111] : memref<400x128xf32, #tpu.memory_space<vmem>>, vector<9x128xf32>
    %c170 = arith.constant 170 : index
    %c0_112 = arith.constant 0 : index
    %102 = vector.load %arg7[%c170, %c0_112] : memref<400x128xf32, #tpu.memory_space<vmem>>, vector<9x128xf32>
    %c161 = arith.constant 161 : index
    %c0_113 = arith.constant 0 : index
    %103 = vector.load %arg7[%c161, %c0_113] : memref<400x128xf32, #tpu.memory_space<vmem>>, vector<9x128xf32>
    %c171 = arith.constant 171 : index
    %c0_114 = arith.constant 0 : index
    %104 = vector.load %arg7[%c171, %c0_114] : memref<400x128xf32, #tpu.memory_space<vmem>>, vector<9x128xf32>
    %c180 = arith.constant 180 : index
    %c0_115 = arith.constant 0 : index
    %105 = vector.load %arg7[%c180, %c0_115] : memref<400x128xf32, #tpu.memory_space<vmem>>, vector<9x128xf32>
    %c190 = arith.constant 190 : index
    %c0_116 = arith.constant 0 : index
    %106 = vector.load %arg7[%c190, %c0_116] : memref<400x128xf32, #tpu.memory_space<vmem>>, vector<9x128xf32>
    %c181 = arith.constant 181 : index
    %c0_117 = arith.constant 0 : index
    %107 = vector.load %arg7[%c181, %c0_117] : memref<400x128xf32, #tpu.memory_space<vmem>>, vector<9x128xf32>
    %c191 = arith.constant 191 : index
    %c0_118 = arith.constant 0 : index
    %108 = vector.load %arg7[%c191, %c0_118] : memref<400x128xf32, #tpu.memory_space<vmem>>, vector<9x128xf32>
    %109 = tpu.concatenate %93, %94, %95, %96, %97, %98, %99, %100, %101, %102, %103, %104, %105, %106, %107, %108 in 1 : vector<9x128xf32>, vector<9x128xf32>, vector<9x128xf32>, vector<9x128xf32>, vector<9x128xf32>, vector<9x128xf32>, vector<9x128xf32>, vector<9x128xf32>, vector<9x128xf32>, vector<9x128xf32>, vector<9x128xf32>, vector<9x128xf32>, vector<9x128xf32>, vector<9x128xf32>, vector<9x128xf32>, vector<9x128xf32> -> vector<9x2048xf32>
    %110 = arith.truncf %109 : vector<9x2048xf32> to vector<9x2048xbf16>
    %cst_119 = arith.constant dense<0.000000e+00> : vector<9x128xf32>
    %111 = tpu.matmul %110, %10, %cst_119 {dimension_numbers = #tpu.dot_dimension_numbers<[1], [0], [0], [1], [0, 0, 1, 1], [], []>} : vector<9x2048xbf16>, vector<2048x128xbf16>, vector<9x128xf32> -> vector<9x128xf32>
    %112 = vector.broadcast %11 : vector<1x128xf32> to vector<9x128xf32>
    %113 = arith.addf %111, %112 : vector<9x128xf32>
    %cst_120 = arith.constant 0.000000e+00 : f32
    %114 = vector.broadcast %cst_120 : f32 to vector<9x128xf32>
    %115 = arith.maximumf %113, %114 : vector<9x128xf32>
    %116 = arith.truncf %115 : vector<9x128xf32> to vector<9x128xbf16>
    %c0_121 = arith.constant 0 : index
    %c3 = arith.constant 3 : index
    %c0_122 = arith.constant 0 : index
    %c0_123 = arith.constant 0 : index
    %117 = vector.load %arg6[%c0_121, %c3, %c0_122, %c0_123] : memref<1x9x9x128xbf16, #tpu.memory_space<vmem>>, vector<1x1x9x128xbf16>
    %118 = vector.shape_cast %117 : vector<1x1x9x128xbf16> to vector<9x128xbf16>
    %119 = vector.shape_cast %116 : vector<9x128xbf16> to vector<1x1x9x128xbf16>
    tpu.vector_store %arg6[%c0_121, %c3, %c0_122, %c0_123], %119 {strides = array<i32>} : memref<1x9x9x128xbf16, #tpu.memory_space<vmem>>, vector<1x1x9x128xbf16>,
    %c160_124 = arith.constant 160 : index
    %c0_125 = arith.constant 0 : index
    %120 = vector.load %arg7[%c160_124, %c0_125] : memref<400x128xf32, #tpu.memory_space<vmem>>, vector<9x128xf32>
    %c170_126 = arith.constant 170 : index
    %c0_127 = arith.constant 0 : index
    %121 = vector.load %arg7[%c170_126, %c0_127] : memref<400x128xf32, #tpu.memory_space<vmem>>, vector<9x128xf32>
    %c161_128 = arith.constant 161 : index
    %c0_129 = arith.constant 0 : index
    %122 = vector.load %arg7[%c161_128, %c0_129] : memref<400x128xf32, #tpu.memory_space<vmem>>, vector<9x128xf32>
    %c171_130 = arith.constant 171 : index
    %c0_131 = arith.constant 0 : index
    %123 = vector.load %arg7[%c171_130, %c0_131] : memref<400x128xf32, #tpu.memory_space<vmem>>, vector<9x128xf32>
    %c180_132 = arith.constant 180 : index
    %c0_133 = arith.constant 0 : index
    %124 = vector.load %arg7[%c180_132, %c0_133] : memref<400x128xf32, #tpu.memory_space<vmem>>, vector<9x128xf32>
    %c190_134 = arith.constant 190 : index
    %c0_135 = arith.constant 0 : index
    %125 = vector.load %arg7[%c190_134, %c0_135] : memref<400x128xf32, #tpu.memory_space<vmem>>, vector<9x128xf32>
    %c181_136 = arith.constant 181 : index
    %c0_137 = arith.constant 0 : index
    %126 = vector.load %arg7[%c181_136, %c0_137] : memref<400x128xf32, #tpu.memory_space<vmem>>, vector<9x128xf32>
    %c191_138 = arith.constant 191 : index
    %c0_139 = arith.constant 0 : index
    %127 = vector.load %arg7[%c191_138, %c0_139] : memref<400x128xf32, #tpu.memory_space<vmem>>, vector<9x128xf32>
    %c200 = arith.constant 200 : index
    %c0_140 = arith.constant 0 : index
    %128 = vector.load %arg7[%c200, %c0_140] : memref<400x128xf32, #tpu.memory_space<vmem>>, vector<9x128xf32>
    %c210 = arith.constant 210 : index
    %c0_141 = arith.constant 0 : index
    %129 = vector.load %arg7[%c210, %c0_141] : memref<400x128xf32, #tpu.memory_space<vmem>>, vector<9x128xf32>
    %c201 = arith.constant 201 : index
    %c0_142 = arith.constant 0 : index
    %130 = vector.load %arg7[%c201, %c0_142] : memref<400x128xf32, #tpu.memory_space<vmem>>, vector<9x128xf32>
    %c211 = arith.constant 211 : index
    %c0_143 = arith.constant 0 : index
    %131 = vector.load %arg7[%c211, %c0_143] : memref<400x128xf32, #tpu.memory_space<vmem>>, vector<9x128xf32>
    %c220 = arith.constant 220 : index
    %c0_144 = arith.constant 0 : index
    %132 = vector.load %arg7[%c220, %c0_144] : memref<400x128xf32, #tpu.memory_space<vmem>>, vector<9x128xf32>
    %c230 = arith.constant 230 : index
    %c0_145 = arith.constant 0 : index
    %133 = vector.load %arg7[%c230, %c0_145] : memref<400x128xf32, #tpu.memory_space<vmem>>, vector<9x128xf32>
    %c221 = arith.constant 221 : index
    %c0_146 = arith.constant 0 : index
    %134 = vector.load %arg7[%c221, %c0_146] : memref<400x128xf32, #tpu.memory_space<vmem>>, vector<9x128xf32>
    %c231 = arith.constant 231 : index
    %c0_147 = arith.constant 0 : index
    %135 = vector.load %arg7[%c231, %c0_147] : memref<400x128xf32, #tpu.memory_space<vmem>>, vector<9x128xf32>
    %136 = tpu.concatenate %120, %121, %122, %123, %124, %125, %126, %127, %128, %129, %130, %131, %132, %133, %134, %135 in 1 : vector<9x128xf32>, vector<9x128xf32>, vector<9x128xf32>, vector<9x128xf32>, vector<9x128xf32>, vector<9x128xf32>, vector<9x128xf32>, vector<9x128xf32>, vector<9x128xf32>, vector<9x128xf32>, vector<9x128xf32>, vector<9x128xf32>, vector<9x128xf32>, vector<9x128xf32>, vector<9x128xf32>, vector<9x128xf32> -> vector<9x2048xf32>
    %137 = arith.truncf %136 : vector<9x2048xf32> to vector<9x2048xbf16>
    %cst_148 = arith.constant dense<0.000000e+00> : vector<9x128xf32>
    %138 = tpu.matmul %137, %10, %cst_148 {dimension_numbers = #tpu.dot_dimension_numbers<[1], [0], [0], [1], [0, 0, 1, 1], [], []>} : vector<9x2048xbf16>, vector<2048x128xbf16>, vector<9x128xf32> -> vector<9x128xf32>
    %139 = vector.broadcast %11 : vector<1x128xf32> to vector<9x128xf32>
    %140 = arith.addf %138, %139 : vector<9x128xf32>
    %cst_149 = arith.constant 0.000000e+00 : f32
    %141 = vector.broadcast %cst_149 : f32 to vector<9x128xf32>
    %142 = arith.maximumf %140, %141 : vector<9x128xf32>
    %143 = arith.truncf %142 : vector<9x128xf32> to vector<9x128xbf16>
    %c0_150 = arith.constant 0 : index
    %c4 = arith.constant 4 : index
    %c0_151 = arith.constant 0 : index
    %c0_152 = arith.constant 0 : index
    %144 = vector.load %arg6[%c0_150, %c4, %c0_151, %c0_152] : memref<1x9x9x128xbf16, #tpu.memory_space<vmem>>, vector<1x1x9x128xbf16>
    %145 = vector.shape_cast %144 : vector<1x1x9x128xbf16> to vector<9x128xbf16>
    %146 = vector.shape_cast %143 : vector<9x128xbf16> to vector<1x1x9x128xbf16>
    tpu.vector_store %arg6[%c0_150, %c4, %c0_151, %c0_152], %146 {strides = array<i32>} : memref<1x9x9x128xbf16, #tpu.memory_space<vmem>>, vector<1x1x9x128xbf16>,
    %c200_153 = arith.constant 200 : index
    %c0_154 = arith.constant 0 : index
    %147 = vector.load %arg7[%c200_153, %c0_154] : memref<400x128xf32, #tpu.memory_space<vmem>>, vector<9x128xf32>
    %c210_155 = arith.constant 210 : index
    %c0_156 = arith.constant 0 : index
    %148 = vector.load %arg7[%c210_155, %c0_156] : memref<400x128xf32, #tpu.memory_space<vmem>>, vector<9x128xf32>
    %c201_157 = arith.constant 201 : index
    %c0_158 = arith.constant 0 : index
    %149 = vector.load %arg7[%c201_157, %c0_158] : memref<400x128xf32, #tpu.memory_space<vmem>>, vector<9x128xf32>
    %c211_159 = arith.constant 211 : index
    %c0_160 = arith.constant 0 : index
    %150 = vector.load %arg7[%c211_159, %c0_160] : memref<400x128xf32, #tpu.memory_space<vmem>>, vector<9x128xf32>
    %c220_161 = arith.constant 220 : index
    %c0_162 = arith.constant 0 : index
    %151 = vector.load %arg7[%c220_161, %c0_162] : memref<400x128xf32, #tpu.memory_space<vmem>>, vector<9x128xf32>
    %c230_163 = arith.constant 230 : index
    %c0_164 = arith.constant 0 : index
    %152 = vector.load %arg7[%c230_163, %c0_164] : memref<400x128xf32, #tpu.memory_space<vmem>>, vector<9x128xf32>
    %c221_165 = arith.constant 221 : index
    %c0_166 = arith.constant 0 : index
    %153 = vector.load %arg7[%c221_165, %c0_166] : memref<400x128xf32, #tpu.memory_space<vmem>>, vector<9x128xf32>
    %c231_167 = arith.constant 231 : index
    %c0_168 = arith.constant 0 : index
    %154 = vector.load %arg7[%c231_167, %c0_168] : memref<400x128xf32, #tpu.memory_space<vmem>>, vector<9x128xf32>
    %c240 = arith.constant 240 : index
    %c0_169 = arith.constant 0 : index
    %155 = vector.load %arg7[%c240, %c0_169] : memref<400x128xf32, #tpu.memory_space<vmem>>, vector<9x128xf32>
    %c250 = arith.constant 250 : index
    %c0_170 = arith.constant 0 : index
    %156 = vector.load %arg7[%c250, %c0_170] : memref<400x128xf32, #tpu.memory_space<vmem>>, vector<9x128xf32>
    %c241 = arith.constant 241 : index
    %c0_171 = arith.constant 0 : index
    %157 = vector.load %arg7[%c241, %c0_171] : memref<400x128xf32, #tpu.memory_space<vmem>>, vector<9x128xf32>
    %c251 = arith.constant 251 : index
    %c0_172 = arith.constant 0 : index
    %158 = vector.load %arg7[%c251, %c0_172] : memref<400x128xf32, #tpu.memory_space<vmem>>, vector<9x128xf32>
    %c260 = arith.constant 260 : index
    %c0_173 = arith.constant 0 : index
    %159 = vector.load %arg7[%c260, %c0_173] : memref<400x128xf32, #tpu.memory_space<vmem>>, vector<9x128xf32>
    %c270 = arith.constant 270 : index
    %c0_174 = arith.constant 0 : index
    %160 = vector.load %arg7[%c270, %c0_174] : memref<400x128xf32, #tpu.memory_space<vmem>>, vector<9x128xf32>
    %c261 = arith.constant 261 : index
    %c0_175 = arith.constant 0 : index
    %161 = vector.load %arg7[%c261, %c0_175] : memref<400x128xf32, #tpu.memory_space<vmem>>, vector<9x128xf32>
    %c271 = arith.constant 271 : index
    %c0_176 = arith.constant 0 : index
    %162 = vector.load %arg7[%c271, %c0_176] : memref<400x128xf32, #tpu.memory_space<vmem>>, vector<9x128xf32>
    %163 = tpu.concatenate %147, %148, %149, %150, %151, %152, %153, %154, %155, %156, %157, %158, %159, %160, %161, %162 in 1 : vector<9x128xf32>, vector<9x128xf32>, vector<9x128xf32>, vector<9x128xf32>, vector<9x128xf32>, vector<9x128xf32>, vector<9x128xf32>, vector<9x128xf32>, vector<9x128xf32>, vector<9x128xf32>, vector<9x128xf32>, vector<9x128xf32>, vector<9x128xf32>, vector<9x128xf32>, vector<9x128xf32>, vector<9x128xf32> -> vector<9x2048xf32>
    %164 = arith.truncf %163 : vector<9x2048xf32> to vector<9x2048xbf16>
    %cst_177 = arith.constant dense<0.000000e+00> : vector<9x128xf32>
    %165 = tpu.matmul %164, %10, %cst_177 {dimension_numbers = #tpu.dot_dimension_numbers<[1], [0], [0], [1], [0, 0, 1, 1], [], []>} : vector<9x2048xbf16>, vector<2048x128xbf16>, vector<9x128xf32> -> vector<9x128xf32>
    %166 = vector.broadcast %11 : vector<1x128xf32> to vector<9x128xf32>
    %167 = arith.addf %165, %166 : vector<9x128xf32>
    %cst_178 = arith.constant 0.000000e+00 : f32
    %168 = vector.broadcast %cst_178 : f32 to vector<9x128xf32>
    %169 = arith.maximumf %167, %168 : vector<9x128xf32>
    %170 = arith.truncf %169 : vector<9x128xf32> to vector<9x128xbf16>
    %c0_179 = arith.constant 0 : index
    %c5 = arith.constant 5 : index
    %c0_180 = arith.constant 0 : index
    %c0_181 = arith.constant 0 : index
    %171 = vector.load %arg6[%c0_179, %c5, %c0_180, %c0_181] : memref<1x9x9x128xbf16, #tpu.memory_space<vmem>>, vector<1x1x9x128xbf16>
    %172 = vector.shape_cast %171 : vector<1x1x9x128xbf16> to vector<9x128xbf16>
    %173 = vector.shape_cast %170 : vector<9x128xbf16> to vector<1x1x9x128xbf16>
    tpu.vector_store %arg6[%c0_179, %c5, %c0_180, %c0_181], %173 {strides = array<i32>} : memref<1x9x9x128xbf16, #tpu.memory_space<vmem>>, vector<1x1x9x128xbf16>,
    %c240_182 = arith.constant 240 : index
    %c0_183 = arith.constant 0 : index
    %174 = vector.load %arg7[%c240_182, %c0_183] : memref<400x128xf32, #tpu.memory_space<vmem>>, vector<9x128xf32>
    %c250_184 = arith.constant 250 : index
    %c0_185 = arith.constant 0 : index
    %175 = vector.load %arg7[%c250_184, %c0_185] : memref<400x128xf32, #tpu.memory_space<vmem>>, vector<9x128xf32>
    %c241_186 = arith.constant 241 : index
    %c0_187 = arith.constant 0 : index
    %176 = vector.load %arg7[%c241_186, %c0_187] : memref<400x128xf32, #tpu.memory_space<vmem>>, vector<9x128xf32>
    %c251_188 = arith.constant 251 : index
    %c0_189 = arith.constant 0 : index
    %177 = vector.load %arg7[%c251_188, %c0_189] : memref<400x128xf32, #tpu.memory_space<vmem>>, vector<9x128xf32>
    %c260_190 = arith.constant 260 : index
    %c0_191 = arith.constant 0 : index
    %178 = vector.load %arg7[%c260_190, %c0_191] : memref<400x128xf32, #tpu.memory_space<vmem>>, vector<9x128xf32>
    %c270_192 = arith.constant 270 : index
    %c0_193 = arith.constant 0 : index
    %179 = vector.load %arg7[%c270_192, %c0_193] : memref<400x128xf32, #tpu.memory_space<vmem>>, vector<9x128xf32>
    %c261_194 = arith.constant 261 : index
    %c0_195 = arith.constant 0 : index
    %180 = vector.load %arg7[%c261_194, %c0_195] : memref<400x128xf32, #tpu.memory_space<vmem>>, vector<9x128xf32>
    %c271_196 = arith.constant 271 : index
    %c0_197 = arith.constant 0 : index
    %181 = vector.load %arg7[%c271_196, %c0_197] : memref<400x128xf32, #tpu.memory_space<vmem>>, vector<9x128xf32>
    %c280 = arith.constant 280 : index
    %c0_198 = arith.constant 0 : index
    %182 = vector.load %arg7[%c280, %c0_198] : memref<400x128xf32, #tpu.memory_space<vmem>>, vector<9x128xf32>
    %c290 = arith.constant 290 : index
    %c0_199 = arith.constant 0 : index
    %183 = vector.load %arg7[%c290, %c0_199] : memref<400x128xf32, #tpu.memory_space<vmem>>, vector<9x128xf32>
    %c281 = arith.constant 281 : index
    %c0_200 = arith.constant 0 : index
    %184 = vector.load %arg7[%c281, %c0_200] : memref<400x128xf32, #tpu.memory_space<vmem>>, vector<9x128xf32>
    %c291 = arith.constant 291 : index
    %c0_201 = arith.constant 0 : index
    %185 = vector.load %arg7[%c291, %c0_201] : memref<400x128xf32, #tpu.memory_space<vmem>>, vector<9x128xf32>
    %c300 = arith.constant 300 : index
    %c0_202 = arith.constant 0 : index
    %186 = vector.load %arg7[%c300, %c0_202] : memref<400x128xf32, #tpu.memory_space<vmem>>, vector<9x128xf32>
    %c310 = arith.constant 310 : index
    %c0_203 = arith.constant 0 : index
    %187 = vector.load %arg7[%c310, %c0_203] : memref<400x128xf32, #tpu.memory_space<vmem>>, vector<9x128xf32>
    %c301 = arith.constant 301 : index
    %c0_204 = arith.constant 0 : index
    %188 = vector.load %arg7[%c301, %c0_204] : memref<400x128xf32, #tpu.memory_space<vmem>>, vector<9x128xf32>
    %c311 = arith.constant 311 : index
    %c0_205 = arith.constant 0 : index
    %189 = vector.load %arg7[%c311, %c0_205] : memref<400x128xf32, #tpu.memory_space<vmem>>, vector<9x128xf32>
    %190 = tpu.concatenate %174, %175, %176, %177, %178, %179, %180, %181, %182, %183, %184, %185, %186, %187, %188, %189 in 1 : vector<9x128xf32>, vector<9x128xf32>, vector<9x128xf32>, vector<9x128xf32>, vector<9x128xf32>, vector<9x128xf32>, vector<9x128xf32>, vector<9x128xf32>, vector<9x128xf32>, vector<9x128xf32>, vector<9x128xf32>, vector<9x128xf32>, vector<9x128xf32>, vector<9x128xf32>, vector<9x128xf32>, vector<9x128xf32> -> vector<9x2048xf32>
    %191 = arith.truncf %190 : vector<9x2048xf32> to vector<9x2048xbf16>
    %cst_206 = arith.constant dense<0.000000e+00> : vector<9x128xf32>
    %192 = tpu.matmul %191, %10, %cst_206 {dimension_numbers = #tpu.dot_dimension_numbers<[1], [0], [0], [1], [0, 0, 1, 1], [], []>} : vector<9x2048xbf16>, vector<2048x128xbf16>, vector<9x128xf32> -> vector<9x128xf32>
    %193 = vector.broadcast %11 : vector<1x128xf32> to vector<9x128xf32>
    %194 = arith.addf %192, %193 : vector<9x128xf32>
    %cst_207 = arith.constant 0.000000e+00 : f32
    %195 = vector.broadcast %cst_207 : f32 to vector<9x128xf32>
    %196 = arith.maximumf %194, %195 : vector<9x128xf32>
    %197 = arith.truncf %196 : vector<9x128xf32> to vector<9x128xbf16>
    %c0_208 = arith.constant 0 : index
    %c6 = arith.constant 6 : index
    %c0_209 = arith.constant 0 : index
    %c0_210 = arith.constant 0 : index
    %198 = vector.load %arg6[%c0_208, %c6, %c0_209, %c0_210] : memref<1x9x9x128xbf16, #tpu.memory_space<vmem>>, vector<1x1x9x128xbf16>
    %199 = vector.shape_cast %198 : vector<1x1x9x128xbf16> to vector<9x128xbf16>
    %200 = vector.shape_cast %197 : vector<9x128xbf16> to vector<1x1x9x128xbf16>
    tpu.vector_store %arg6[%c0_208, %c6, %c0_209, %c0_210], %200 {strides = array<i32>} : memref<1x9x9x128xbf16, #tpu.memory_space<vmem>>, vector<1x1x9x128xbf16>,
    %c280_211 = arith.constant 280 : index
    %c0_212 = arith.constant 0 : index
    %201 = vector.load %arg7[%c280_211, %c0_212] : memref<400x128xf32, #tpu.memory_space<vmem>>, vector<9x128xf32>
    %c290_213 = arith.constant 290 : index
    %c0_214 = arith.constant 0 : index
    %202 = vector.load %arg7[%c290_213, %c0_214] : memref<400x128xf32, #tpu.memory_space<vmem>>, vector<9x128xf32>
    %c281_215 = arith.constant 281 : index
    %c0_216 = arith.constant 0 : index
    %203 = vector.load %arg7[%c281_215, %c0_216] : memref<400x128xf32, #tpu.memory_space<vmem>>, vector<9x128xf32>
    %c291_217 = arith.constant 291 : index
    %c0_218 = arith.constant 0 : index
    %204 = vector.load %arg7[%c291_217, %c0_218] : memref<400x128xf32, #tpu.memory_space<vmem>>, vector<9x128xf32>
    %c300_219 = arith.constant 300 : index
    %c0_220 = arith.constant 0 : index
    %205 = vector.load %arg7[%c300_219, %c0_220] : memref<400x128xf32, #tpu.memory_space<vmem>>, vector<9x128xf32>
    %c310_221 = arith.constant 310 : index
    %c0_222 = arith.constant 0 : index
    %206 = vector.load %arg7[%c310_221, %c0_222] : memref<400x128xf32, #tpu.memory_space<vmem>>, vector<9x128xf32>
    %c301_223 = arith.constant 301 : index
    %c0_224 = arith.constant 0 : index
    %207 = vector.load %arg7[%c301_223, %c0_224] : memref<400x128xf32, #tpu.memory_space<vmem>>, vector<9x128xf32>
    %c311_225 = arith.constant 311 : index
    %c0_226 = arith.constant 0 : index
    %208 = vector.load %arg7[%c311_225, %c0_226] : memref<400x128xf32, #tpu.memory_space<vmem>>, vector<9x128xf32>
    %c320 = arith.constant 320 : index
    %c0_227 = arith.constant 0 : index
    %209 = vector.load %arg7[%c320, %c0_227] : memref<400x128xf32, #tpu.memory_space<vmem>>, vector<9x128xf32>
    %c330 = arith.constant 330 : index
    %c0_228 = arith.constant 0 : index
    %210 = vector.load %arg7[%c330, %c0_228] : memref<400x128xf32, #tpu.memory_space<vmem>>, vector<9x128xf32>
    %c321 = arith.constant 321 : index
    %c0_229 = arith.constant 0 : index
    %211 = vector.load %arg7[%c321, %c0_229] : memref<400x128xf32, #tpu.memory_space<vmem>>, vector<9x128xf32>
    %c331 = arith.constant 331 : index
    %c0_230 = arith.constant 0 : index
    %212 = vector.load %arg7[%c331, %c0_230] : memref<400x128xf32, #tpu.memory_space<vmem>>, vector<9x128xf32>
    %c340 = arith.constant 340 : index
    %c0_231 = arith.constant 0 : index
    %213 = vector.load %arg7[%c340, %c0_231] : memref<400x128xf32, #tpu.memory_space<vmem>>, vector<9x128xf32>
    %c350 = arith.constant 350 : index
    %c0_232 = arith.constant 0 : index
    %214 = vector.load %arg7[%c350, %c0_232] : memref<400x128xf32, #tpu.memory_space<vmem>>, vector<9x128xf32>
    %c341 = arith.constant 341 : index
    %c0_233 = arith.constant 0 : index
    %215 = vector.load %arg7[%c341, %c0_233] : memref<400x128xf32, #tpu.memory_space<vmem>>, vector<9x128xf32>
    %c351 = arith.constant 351 : index
    %c0_234 = arith.constant 0 : index
    %216 = vector.load %arg7[%c351, %c0_234] : memref<400x128xf32, #tpu.memory_space<vmem>>, vector<9x128xf32>
    %217 = tpu.concatenate %201, %202, %203, %204, %205, %206, %207, %208, %209, %210, %211, %212, %213, %214, %215, %216 in 1 : vector<9x128xf32>, vector<9x128xf32>, vector<9x128xf32>, vector<9x128xf32>, vector<9x128xf32>, vector<9x128xf32>, vector<9x128xf32>, vector<9x128xf32>, vector<9x128xf32>, vector<9x128xf32>, vector<9x128xf32>, vector<9x128xf32>, vector<9x128xf32>, vector<9x128xf32>, vector<9x128xf32>, vector<9x128xf32> -> vector<9x2048xf32>
    %218 = arith.truncf %217 : vector<9x2048xf32> to vector<9x2048xbf16>
    %cst_235 = arith.constant dense<0.000000e+00> : vector<9x128xf32>
    %219 = tpu.matmul %218, %10, %cst_235 {dimension_numbers = #tpu.dot_dimension_numbers<[1], [0], [0], [1], [0, 0, 1, 1], [], []>} : vector<9x2048xbf16>, vector<2048x128xbf16>, vector<9x128xf32> -> vector<9x128xf32>
    %220 = vector.broadcast %11 : vector<1x128xf32> to vector<9x128xf32>
    %221 = arith.addf %219, %220 : vector<9x128xf32>
    %cst_236 = arith.constant 0.000000e+00 : f32
    %222 = vector.broadcast %cst_236 : f32 to vector<9x128xf32>
    %223 = arith.maximumf %221, %222 : vector<9x128xf32>
    %224 = arith.truncf %223 : vector<9x128xf32> to vector<9x128xbf16>
    %c0_237 = arith.constant 0 : index
    %c7 = arith.constant 7 : index
    %c0_238 = arith.constant 0 : index
    %c0_239 = arith.constant 0 : index
    %225 = vector.load %arg6[%c0_237, %c7, %c0_238, %c0_239] : memref<1x9x9x128xbf16, #tpu.memory_space<vmem>>, vector<1x1x9x128xbf16>
    %226 = vector.shape_cast %225 : vector<1x1x9x128xbf16> to vector<9x128xbf16>
    %227 = vector.shape_cast %224 : vector<9x128xbf16> to vector<1x1x9x128xbf16>
    tpu.vector_store %arg6[%c0_237, %c7, %c0_238, %c0_239], %227 {strides = array<i32>} : memref<1x9x9x128xbf16, #tpu.memory_space<vmem>>, vector<1x1x9x128xbf16>,
    %c320_240 = arith.constant 320 : index
    %c0_241 = arith.constant 0 : index
    %228 = vector.load %arg7[%c320_240, %c0_241] : memref<400x128xf32, #tpu.memory_space<vmem>>, vector<9x128xf32>
    %c330_242 = arith.constant 330 : index
    %c0_243 = arith.constant 0 : index
    %229 = vector.load %arg7[%c330_242, %c0_243] : memref<400x128xf32, #tpu.memory_space<vmem>>, vector<9x128xf32>
    %c321_244 = arith.constant 321 : index
    %c0_245 = arith.constant 0 : index
    %230 = vector.load %arg7[%c321_244, %c0_245] : memref<400x128xf32, #tpu.memory_space<vmem>>, vector<9x128xf32>
    %c331_246 = arith.constant 331 : index
    %c0_247 = arith.constant 0 : index
    %231 = vector.load %arg7[%c331_246, %c0_247] : memref<400x128xf32, #tpu.memory_space<vmem>>, vector<9x128xf32>
    %c340_248 = arith.constant 340 : index
    %c0_249 = arith.constant 0 : index
    %232 = vector.load %arg7[%c340_248, %c0_249] : memref<400x128xf32, #tpu.memory_space<vmem>>, vector<9x128xf32>
    %c350_250 = arith.constant 350 : index
    %c0_251 = arith.constant 0 : index
    %233 = vector.load %arg7[%c350_250, %c0_251] : memref<400x128xf32, #tpu.memory_space<vmem>>, vector<9x128xf32>
    %c341_252 = arith.constant 341 : index
    %c0_253 = arith.constant 0 : index
    %234 = vector.load %arg7[%c341_252, %c0_253] : memref<400x128xf32, #tpu.memory_space<vmem>>, vector<9x128xf32>
    %c351_254 = arith.constant 351 : index
    %c0_255 = arith.constant 0 : index
    %235 = vector.load %arg7[%c351_254, %c0_255] : memref<400x128xf32, #tpu.memory_space<vmem>>, vector<9x128xf32>
    %c360 = arith.constant 360 : index
    %c0_256 = arith.constant 0 : index
    %236 = vector.load %arg7[%c360, %c0_256] : memref<400x128xf32, #tpu.memory_space<vmem>>, vector<9x128xf32>
    %c370 = arith.constant 370 : index
    %c0_257 = arith.constant 0 : index
    %237 = vector.load %arg7[%c370, %c0_257] : memref<400x128xf32, #tpu.memory_space<vmem>>, vector<9x128xf32>
    %c361 = arith.constant 361 : index
    %c0_258 = arith.constant 0 : index
    %238 = vector.load %arg7[%c361, %c0_258] : memref<400x128xf32, #tpu.memory_space<vmem>>, vector<9x128xf32>
    %c371 = arith.constant 371 : index
    %c0_259 = arith.constant 0 : index
    %239 = vector.load %arg7[%c371, %c0_259] : memref<400x128xf32, #tpu.memory_space<vmem>>, vector<9x128xf32>
    %c380 = arith.constant 380 : index
    %c0_260 = arith.constant 0 : index
    %240 = vector.load %arg7[%c380, %c0_260] : memref<400x128xf32, #tpu.memory_space<vmem>>, vector<9x128xf32>
    %c390 = arith.constant 390 : index
    %c0_261 = arith.constant 0 : index
    %241 = vector.load %arg7[%c390, %c0_261] : memref<400x128xf32, #tpu.memory_space<vmem>>, vector<9x128xf32>
    %c381 = arith.constant 381 : index
    %c0_262 = arith.constant 0 : index
    %242 = vector.load %arg7[%c381, %c0_262] : memref<400x128xf32, #tpu.memory_space<vmem>>, vector<9x128xf32>
    %c391 = arith.constant 391 : index
    %c0_263 = arith.constant 0 : index
    %243 = vector.load %arg7[%c391, %c0_263] : memref<400x128xf32, #tpu.memory_space<vmem>>, vector<9x128xf32>
    %244 = tpu.concatenate %228, %229, %230, %231, %232, %233, %234, %235, %236, %237, %238, %239, %240, %241, %242, %243 in 1 : vector<9x128xf32>, vector<9x128xf32>, vector<9x128xf32>, vector<9x128xf32>, vector<9x128xf32>, vector<9x128xf32>, vector<9x128xf32>, vector<9x128xf32>, vector<9x128xf32>, vector<9x128xf32>, vector<9x128xf32>, vector<9x128xf32>, vector<9x128xf32>, vector<9x128xf32>, vector<9x128xf32>, vector<9x128xf32> -> vector<9x2048xf32>
    %245 = arith.truncf %244 : vector<9x2048xf32> to vector<9x2048xbf16>
    %cst_264 = arith.constant dense<0.000000e+00> : vector<9x128xf32>
    %246 = tpu.matmul %245, %10, %cst_264 {dimension_numbers = #tpu.dot_dimension_numbers<[1], [0], [0], [1], [0, 0, 1, 1], [], []>} : vector<9x2048xbf16>, vector<2048x128xbf16>, vector<9x128xf32> -> vector<9x128xf32>
    %247 = vector.broadcast %11 : vector<1x128xf32> to vector<9x128xf32>
    %248 = arith.addf %246, %247 : vector<9x128xf32>
    %cst_265 = arith.constant 0.000000e+00 : f32
    %249 = vector.broadcast %cst_265 : f32 to vector<9x128xf32>
    %250 = arith.maximumf %248, %249 : vector<9x128xf32>
    %251 = arith.truncf %250 : vector<9x128xf32> to vector<9x128xbf16>
    %c0_266 = arith.constant 0 : index
    %c8 = arith.constant 8 : index
    %c0_267 = arith.constant 0 : index
    %c0_268 = arith.constant 0 : index
    %252 = vector.load %arg6[%c0_266, %c8, %c0_267, %c0_268] : memref<1x9x9x128xbf16, #tpu.memory_space<vmem>>, vector<1x1x9x128xbf16>
    %253 = vector.shape_cast %252 : vector<1x1x9x128xbf16> to vector<9x128xbf16>
    %254 = vector.shape_cast %251 : vector<9x128xbf16> to vector<1x1x9x128xbf16>
    tpu.vector_store %arg6[%c0_266, %c8, %c0_267, %c0_268], %254 {strides = array<i32>} : memref<1x9x9x128xbf16, #tpu.memory_space<vmem>>, vector<1x1x9x128xbf16>,
    return
  }
  func.func @transform_0(%arg0: i32) -> (i32, i32, i32) {
    %c0_i32 = arith.constant 0 : i32
    %c0_i32_0 = arith.constant 0 : i32
    %c0_i32_1 = arith.constant 0 : i32
    return %arg0, %c0_i32, %c0_i32_0 : i32, i32, i32
  }
  func.func @transform_1(%arg0: i32) -> (i32, i32) {
    %c0_i32 = arith.constant 0 : i32
    %c0_i32_0 = arith.constant 0 : i32
    %c0_i32_1 = arith.constant 0 : i32
    return %c0_i32, %c0_i32_0 : i32, i32
  }
  func.func @transform_2(%arg0: i32) -> (i32, i32) {
    %c0_i32 = arith.constant 0 : i32
    %c0_i32_0 = arith.constant 0 : i32
    %c0_i32_1 = arith.constant 0 : i32
    return %c0_i32, %c0_i32_0 : i32, i32
  }
  func.func @transform_3(%arg0: i32) -> (i32, i32) {
    %c0_i32 = arith.constant 0 : i32
    %c0_i32_0 = arith.constant 0 : i32
    %c0_i32_1 = arith.constant 0 : i32
    return %c0_i32, %c0_i32_0 : i32, i32
  }
  func.func @transform_4(%arg0: i32) -> (i32, i32) {
    %c0_i32 = arith.constant 0 : i32
    %c0_i32_0 = arith.constant 0 : i32
    %c0_i32_1 = arith.constant 0 : i32
    return %c0_i32, %c0_i32_0 : i32, i32
  }
  func.func @transform_5(%arg0: i32) -> (i32, i32, i32, i32) {
    %c0_i32 = arith.constant 0 : i32
    %c0_i32_0 = arith.constant 0 : i32
    %c0_i32_1 = arith.constant 0 : i32
    %c0_i32_2 = arith.constant 0 : i32
    return %arg0, %c0_i32, %c0_i32_0, %c0_i32_1 : i32, i32, i32, i32
  }
}

module attributes {stable_mosaic.version = 11 : i64} {
  func.func @_mlp_head_kernel(%arg0: i32, %arg1: memref<2x2592xbf16, #tpu.memory_space<vmem>>, %arg2: memref<2592x256xbf16, #tpu.memory_space<vmem>>, %arg3: memref<1x256xf32, #tpu.memory_space<vmem>>, %arg4: memref<256x128xbf16, #tpu.memory_space<vmem>>, %arg5: memref<1x128xf32, #tpu.memory_space<vmem>>, %arg6: memref<2x128xf32, #tpu.memory_space<vmem>>) attributes {dimension_semantics = [#tpu.dimension_semantics<arbitrary>], iteration_bounds = array<i64: 1>, scalar_prefetch = 0 : i64, scratch_operands = 0 : i64, tpu.core_type = #tpu.core_type<tc>, window_params = [{pipeline_mode = #tpu.pipeline_mode<synchronous>, transform_indices = @transform_0, window_bounds = array<i64: 2, 2592>}, {pipeline_mode = #tpu.pipeline_mode<synchronous>, transform_indices = @transform_1, window_bounds = array<i64: 2592, 256>}, {pipeline_mode = #tpu.pipeline_mode<synchronous>, transform_indices = @transform_2, window_bounds = array<i64: 1, 256>}, {pipeline_mode = #tpu.pipeline_mode<synchronous>, transform_indices = @transform_3, window_bounds = array<i64: 256, 128>}, {pipeline_mode = #tpu.pipeline_mode<synchronous>, transform_indices = @transform_4, window_bounds = array<i64: 1, 128>}, {pipeline_mode = #tpu.pipeline_mode<synchronous>, transform_indices = @transform_5, window_bounds = array<i64: 2, 128>}]} {
    %c0 = arith.constant 0 : index
    %c0_0 = arith.constant 0 : index
    %0 = vector.load %arg1[%c0, %c0_0] : memref<2x2592xbf16, #tpu.memory_space<vmem>>, vector<2x2592xbf16>
    %c0_1 = arith.constant 0 : index
    %c0_2 = arith.constant 0 : index
    %1 = vector.load %arg2[%c0_1, %c0_2] : memref<2592x256xbf16, #tpu.memory_space<vmem>>, vector<2592x256xbf16>
    %cst = arith.constant dense<0.000000e+00> : vector<2x256xf32>
    %2 = tpu.matmul %0, %1, %cst {dimension_numbers = #tpu.dot_dimension_numbers<[1], [0], [0], [1], [0, 0, 1, 1], [], []>} : vector<2x2592xbf16>, vector<2592x256xbf16>, vector<2x256xf32> -> vector<2x256xf32>
    %c0_3 = arith.constant 0 : index
    %c0_4 = arith.constant 0 : index
    %3 = vector.load %arg3[%c0_3, %c0_4] : memref<1x256xf32, #tpu.memory_space<vmem>>, vector<1x256xf32>
    %4 = vector.broadcast %3 : vector<1x256xf32> to vector<2x256xf32>
    %5 = arith.addf %2, %4 : vector<2x256xf32>
    %6 = math.tanh %5 : vector<2x256xf32>
    %7 = arith.truncf %6 : vector<2x256xf32> to vector<2x256xbf16>
    %c0_5 = arith.constant 0 : index
    %c0_6 = arith.constant 0 : index
    %8 = vector.load %arg4[%c0_5, %c0_6] : memref<256x128xbf16, #tpu.memory_space<vmem>>, vector<256x128xbf16>
    %cst_7 = arith.constant dense<0.000000e+00> : vector<2x128xf32>
    %9 = tpu.matmul %7, %8, %cst_7 {dimension_numbers = #tpu.dot_dimension_numbers<[1], [0], [0], [1], [0, 0, 1, 1], [], []>} : vector<2x256xbf16>, vector<256x128xbf16>, vector<2x128xf32> -> vector<2x128xf32>
    %c0_8 = arith.constant 0 : index
    %c0_9 = arith.constant 0 : index
    %10 = vector.load %arg5[%c0_8, %c0_9] : memref<1x128xf32, #tpu.memory_space<vmem>>, vector<1x128xf32>
    %11 = vector.broadcast %10 : vector<1x128xf32> to vector<2x128xf32>
    %12 = arith.addf %9, %11 : vector<2x128xf32>
    %cst_10 = arith.constant dense<0xFF800000> : vector<2xf32>
    %13 = vector.multi_reduction <maximumf>, %12, %cst_10 [1] : vector<2x128xf32> to vector<2xf32>
    %14 = vector.shape_cast %13 : vector<2xf32> to vector<2x1xf32>
    %15 = vector.broadcast %14 : vector<2x1xf32> to vector<2x128xf32>
    %16 = arith.subf %12, %15 : vector<2x128xf32>
    %17 = math.exp %16 : vector<2x128xf32>
    %cst_11 = arith.constant dense<0.000000e+00> : vector<2xf32>
    %18 = vector.multi_reduction <add>, %17, %cst_11 [1] : vector<2x128xf32> to vector<2xf32>
    %19 = vector.shape_cast %18 : vector<2xf32> to vector<2x1xf32>
    %20 = vector.broadcast %19 : vector<2x1xf32> to vector<2x128xf32>
    %21 = arith.divf %17, %20 : vector<2x128xf32>
    %c0_12 = arith.constant 0 : index
    %c0_13 = arith.constant 0 : index
    %22 = vector.load %arg6[%c0_12, %c0_13] : memref<2x128xf32, #tpu.memory_space<vmem>>, vector<2x128xf32>
    tpu.vector_store %arg6[%c0_12, %c0_13], %21 {strides = array<i32>} : memref<2x128xf32, #tpu.memory_space<vmem>>, vector<2x128xf32>,
    return
  }
  func.func @transform_0(%arg0: i32) -> (i32, i32) {
    %c0_i32 = arith.constant 0 : i32
    %c0_i32_0 = arith.constant 0 : i32
    %c0_i32_1 = arith.constant 0 : i32
    return %c0_i32, %c0_i32_0 : i32, i32
  }
  func.func @transform_1(%arg0: i32) -> (i32, i32) {
    %c0_i32 = arith.constant 0 : i32
    %c0_i32_0 = arith.constant 0 : i32
    %c0_i32_1 = arith.constant 0 : i32
    return %c0_i32, %c0_i32_0 : i32, i32
  }
  func.func @transform_2(%arg0: i32) -> (i32, i32) {
    %c0_i32 = arith.constant 0 : i32
    %c0_i32_0 = arith.constant 0 : i32
    %c0_i32_1 = arith.constant 0 : i32
    return %c0_i32, %c0_i32_0 : i32, i32
  }
  func.func @transform_3(%arg0: i32) -> (i32, i32) {
    %c0_i32 = arith.constant 0 : i32
    %c0_i32_0 = arith.constant 0 : i32
    %c0_i32_1 = arith.constant 0 : i32
    return %c0_i32, %c0_i32_0 : i32, i32
  }
  func.func @transform_4(%arg0: i32) -> (i32, i32) {
    %c0_i32 = arith.constant 0 : i32
    %c0_i32_0 = arith.constant 0 : i32
    %c0_i32_1 = arith.constant 0 : i32
    return %c0_i32, %c0_i32_0 : i32, i32
  }
  func.func @transform_5(%arg0: i32) -> (i32, i32) {
    %c0_i32 = arith.constant 0 : i32
    %c0_i32_0 = arith.constant 0 : i32
    %c0_i32_1 = arith.constant 0 : i32
    return %c0_i32, %c0_i32_0 : i32, i32
  }
}

</mosaic_0001>

<bundles_post_ra>
// kernel: forward.3
= control target key start
LH: loop header
LB: loop body
LE: loop exit
PB: predicated region body
PF: predicated region fallthrough
CT: control target
= control target key end

     0   :  { %v351_v38 = vlaneseq  ;;  %v3746_v39 = vmov 1966171168   ;;  %s4925_s0 = inlined_call_operand.vmem [shape: bf16[2,2592], index: 0, kind: input, shape index: {}]   ;;  %s4926_s1 = inlined_call_operand.vmem [shape: bf16[2592,256], index: 1, kind: input, shape index: {}]   ;;  %s4927_s2 = inlined_call_operand.vmem [shape: f32[1,256], index: 2, kind: input, shape index: {}]   ;;  %s4928_s3 = inlined_call_operand.vmem [shape: bf16[256,128], index: 3, kind: input, shape index: {}]   ;;  %s4929_s4 = inlined_call_operand.vmem [shape: f32[1,128], index: 4, kind: input, shape index: {}]   ;;  %s4930_s5 = inlined_call_operand.hbm [shape: f32[2,128], index: 5, kind: output, shape index: {}]  }
   0x1   :  { %v3209_v0 = vld [vmem:[%s4926_s1 + $0x4] ss:$8 sps:$4 sm:$0xff]   ;;  %v3213_v2 = vld [vmem:[%s4926_s1] ss:$8 sps:$4 sm:$0xff]   ;;  %v3215_v4 = vld [vmem:[%s4926_s1 + $0x14] ss:$8 sps:$4 sm:$0xff]   ;;  %v366_v40 = vunpack.c.l.s4 %v3746_v39 }
   0x2   :  { %v3211_v1 = vld [vmem:[%s4926_s1 + $0x504] ss:$8 sps:$4 sm:$0xff]   ;;  %2145 = vmatprep.subr.bf16.mxu1 %v3209_v0  ;;  %v3214_v3 = vld [vmem:[%s4926_s1 + $0x500] ss:$8 sps:$4 sm:$0xff]   ;;  %v3217_v5 = vld [vmem:[%s4926_s1 + $0x514] ss:$8 sps:$4 sm:$0xff]  }
   0x3   :  { %2350 = vmatprep.subr.bf16.mxu0 %v3211_v1  ;;  %2146 = vmatpush1.bf16.msra.mxu1 %v3213_v2  ;;  %v3219_v6 = vld [vmem:[%s4926_s1 + $0x10] ss:$8 sps:$4 sm:$0xff]   ;;  %v3221_v8 = vld [vmem:[%s4926_s1 + $0x24] ss:$8 sps:$4 sm:$0xff]   ;;  %v3225_v10 = vld [vmem:[%s4926_s1 + $0x20] ss:$8 sps:$4 sm:$0xff]   ;;  %v367_v46 = vunpack.c.0.s8 %v366_v40 }
   0x4   :  { %2351 = vmatpush1.bf16.msra.mxu0 %v3214_v3  ;;  %2147 = vmatprep.subr.bf16.mxu1 %v3215_v4  ;;  %v3220_v7 = vld [vmem:[%s4926_s1 + $0x510] ss:$8 sps:$4 sm:$0xff]   ;;  %v3223_v9 = vld [vmem:[%s4926_s1 + $0x524] ss:$8 sps:$4 sm:$0xff]   ;;  %v3226_v11 = vld [vmem:[%s4926_s1 + $0x520] ss:$8 sps:$4 sm:$0xff]  }
   0x5   :  { %2352 = vmatprep.subr.bf16.mxu0 %v3217_v5  ;;  %v3227_v12 = vld [vmem:[%s4926_s1 + $0x34] ss:$8 sps:$4 sm:$0xff]   ;;  %v3231_v14 = vld [vmem:[%s4926_s1 + $0x30] ss:$8 sps:$4 sm:$0xff]   ;;  %v3233_v16 = vld [vmem:[%s4926_s1 + $0x44] ss:$8 sps:$4 sm:$0xff]  }
   0x6   :  { %v3229_v13 = vld [vmem:[%s4926_s1 + $0x534] ss:$8 sps:$4 sm:$0xff]   ;;  %v3232_v15 = vld [vmem:[%s4926_s1 + $0x530] ss:$8 sps:$4 sm:$0xff]   ;;  %v3235_v17 = vld [vmem:[%s4926_s1 + $0x544] ss:$8 sps:$4 sm:$0xff]  }
   0x7   :  { %2148 = vmatpush1.bf16.msra.mxu1 %v3219_v6  ;;  %v3237_v18 = vld [vmem:[%s4926_s1 + $0x40] ss:$8 sps:$4 sm:$0xff]   ;;  %v3239_v20 = vld [vmem:[%s4926_s1 + $0x54] ss:$8 sps:$4 sm:$0xff]   ;;  %v3243_v22 = vld [vmem:[%s4926_s1 + $0x50] ss:$8 sps:$4 sm:$0xff]  }
   0x8   :  { %2353 = vmatpush1.bf16.msra.mxu0 %v3220_v7  ;;  %2149 = vmatprep.subr.bf16.mxu1 %v3221_v8  ;;  %v3238_v19 = vld [vmem:[%s4926_s1 + $0x540] ss:$8 sps:$4 sm:$0xff]   ;;  %v3241_v21 = vld [vmem:[%s4926_s1 + $0x554] ss:$8 sps:$4 sm:$0xff]   ;;  %v3244_v23 = vld [vmem:[%s4926_s1 + $0x550] ss:$8 sps:$4 sm:$0xff]  }
   0x9   :  { %2354 = vmatprep.subr.bf16.mxu0 %v3223_v9  ;;  %v3245_v24 = vld [vmem:[%s4926_s1 + $0x64] ss:$8 sps:$4 sm:$0xff]   ;;  %v3249_v26 = vld [vmem:[%s4926_s1 + $0x60] ss:$8 sps:$4 sm:$0xff]   ;;  %v3251_v28 = vld [vmem:[%s4926_s1 + $0x74] ss:$8 sps:$4 sm:$0xff]  }
   0xa   :  { %v3247_v25 = vld [vmem:[%s4926_s1 + $0x564] ss:$8 sps:$4 sm:$0xff]   ;;  %v3250_v27 = vld [vmem:[%s4926_s1 + $0x560] ss:$8 sps:$4 sm:$0xff]   ;;  %v3253_v29 = vld [vmem:[%s4926_s1 + $0x574] ss:$8 sps:$4 sm:$0xff]  }
   0xb   :  { %2150 = vmatpush1.bf16.msra.mxu1 %v3225_v10  ;;  %v3255_v30 = vld [vmem:[%s4926_s1 + $0x70] ss:$8 sps:$4 sm:$0xff]   ;;  %v3257_v32 = vld [vmem:[%s4926_s1 + $0x84] ss:$8 sps:$4 sm:$0xff]   ;;  %v3261_v34 = vld [vmem:[%s4926_s1 + $0x80] ss:$8 sps:$4 sm:$0xff]  }
   0xc   :  { %2355 = vmatpush1.bf16.msra.mxu0 %v3226_v11  ;;  %2151 = vmatprep.subr.bf16.mxu1 %v3227_v12  ;;  %v3256_v31 = vld [vmem:[%s4926_s1 + $0x570] ss:$8 sps:$4 sm:$0xff]   ;;  %v3259_v33 = vld [vmem:[%s4926_s1 + $0x584] ss:$8 sps:$4 sm:$0xff]   ;;  %v3262_v35 = vld [vmem:[%s4926_s1 + $0x580] ss:$8 sps:$4 sm:$0xff]  }
   0xd   :  { %2356 = vmatprep.subr.bf16.mxu0 %v3229_v13  ;;  %v3263_v36 = vld [vmem:[%s4926_s1 + $0x94] ss:$8 sps:$4 sm:$0xff]   ;;  %v3267_v41 = vld [vmem:[%s4926_s1 + $0x90] ss:$8 sps:$4 sm:$0xff]   ;;  %v3269_v43 = vld [vmem:[%s4926_s1 + $0xa4] ss:$8 sps:$4 sm:$0xff]  }
   0xe   :  { %v3265_v37 = vld [vmem:[%s4926_s1 + $0x594] ss:$8 sps:$4 sm:$0xff]   ;;  %v3268_v42 = vld [vmem:[%s4926_s1 + $0x590] ss:$8 sps:$4 sm:$0xff]   ;;  %v3271_v44 = vld [vmem:[%s4926_s1 + $0x5a4] ss:$8 sps:$4 sm:$0xff]  }
   0xf   :  { %2152 = vmatpush1.bf16.msra.mxu1 %v3231_v14  ;;  %v3905_v45 = vshrl.u32 %v351_v38, 7  ;;  %v3273_v47 = vld [vmem:[%s4926_s1 + $0xa0] ss:$8 sps:$4 sm:$0xff]   ;;  %v3275_v49 = vld [vmem:[%s4926_s1 + $0xb4] ss:$8 sps:$4 sm:$0xff]  }
  0x10   :  { %2357 = vmatpush1.bf16.msra.mxu0 %v3232_v15  ;;  %2153 = vmatprep.subr.bf16.mxu1 %v3233_v16  ;;  %v3274_v48 = vld [vmem:[%s4926_s1 + $0x5a0] ss:$8 sps:$4 sm:$0xff]   ;;  %v3277_v50 = vld [vmem:[%s4926_s1 + $0x5b4] ss:$8 sps:$4 sm:$0xff]   ;;  %v3279_v53 = vld [vmem:[%s4926_s1 + $0xb0] ss:$8 sps:$4 sm:$0xff]  }
  0x11   :  { %2358 = vmatprep.subr.bf16.mxu0 %v3235_v17  ;;  %v3920_v51 = vsub.s32 %v367_v46, %v3905_v45  ;;  %v3925_v52 = vld [vmem:[%s4925_s0] sm:$0xff]  ;;  %v3280_v55 = vld [vmem:[%s4926_s1 + $0x5b0] ss:$8 sps:$4 sm:$0xff]   ;;  %v23_v56 = vld [vmem:[%s4925_s0 + $0x8] sm:$0xff] }
  0x12   :  { %v3281_v57 = vld [vmem:[%s4926_s1 + $0xc4] ss:$8 sps:$4 sm:$0xff]   ;;  %v3285_v63 = vld [vmem:[%s4926_s1 + $0xc0] ss:$8 sps:$4 sm:$0xff]   ;;  %v3287_v1 = vld [vmem:[%s4926_s1 + $0xd4] ss:$8 sps:$4 sm:$0xff]   ;;  %v413_v9 = vcombine.high %v23_v56, %v23_v56 }
  0x13   :  { %2154 = vmatpush1.bf16.msra.mxu1 %v3237_v18  ;;  %v371_v54 = vrot.slane %v3925_v52, %v3920_v51  ;;  %v3283_v58 = vld [vmem:[%s4926_s1 + $0x5c4] ss:$8 sps:$4 sm:$0xff]   ;;  %v420_v60 = vrot.slane %v23_v56, %v3920_v51  ;;  %v3286_v0 = vld [vmem:[%s4926_s1 + $0x5c0] ss:$8 sps:$4 sm:$0xff]   ;;  %v3289_v2 = vld [vmem:[%s4926_s1 + $0x5d4] ss:$8 sps:$4 sm:$0xff]  }
  0x14   :  { %2359 = vmatpush1.bf16.msra.mxu0 %v3238_v19  ;;  %2155 = vmatprep.subr.bf16.mxu1 %v3239_v20  ;;  %v3291_v5 = vld [vmem:[%s4926_s1 + $0xd0] ss:$8 sps:$4 sm:$0xff]   ;;  %v3293_v7 = vld [vmem:[%s4926_s1 + $0xe4] ss:$8 sps:$4 sm:$0xff]   ;;  %v3297_v10 = vld [vmem:[%s4926_s1 + $0xe0] ss:$8 sps:$4 sm:$0xff]   ;;  %v3991_v14 = vrot.slane %v413_v9, %v3920_v51 }
  0x15   :  { %2360 = vmatprep.subr.bf16.mxu0 %v3241_v21  ;;  %v379_v59 = vcombine.high %v371_v54, %v371_v54  ;;  %v428_v62 = vcombine.high %v420_v60, %v420_v60  ;;  %v3292_v6 = vld [vmem:[%s4926_s1 + $0x5d0] ss:$8 sps:$4 sm:$0xff]   ;;  %v3295_v8 = vld [vmem:[%s4926_s1 + $0x5e4] ss:$8 sps:$4 sm:$0xff]   ;;  %v3298_v11 = vld [vmem:[%s4926_s1 + $0x5e0] ss:$8 sps:$4 sm:$0xff]   ;;  %v3994_v15 = vrot.slane %v420_v60, %v3920_v51  ;;  %v4011_v21 = vrot.slane %v371_v54, %v3920_v51 }
  0x16   :  { %v3299_v12 = vld [vmem:[%s4926_s1 + $0xf4] ss:$8 sps:$4 sm:$0xff]   ;;  %v3303_v16 = vld [vmem:[%s4926_s1 + $0xf0] ss:$8 sps:$4 sm:$0xff]   ;;  %v3308_v18 = vld [vmem:[%s4926_s1 + $0x104] ss:$8 sps:$4 sm:$0xff]   ;;  %v429_v20 = vcombine.high %v3991_v14, %v3991_v14 }
  0x17   :  { %2156 = vmatpush1.bf16.msra.mxu1 %v3243_v22  ;;  %v3946_v61 = vrot.slane %v379_v59, %v3920_v51  ;;  %v3961_v3 = vrot.slane %v428_v62, %v3920_v51  ;;  %v3301_v13 = vld [vmem:[%s4926_s1 + $0x5f4] ss:$8 sps:$4 sm:$0xff]   ;;  %v3304_v17 = vld [vmem:[%s4926_s1 + $0x5f0] ss:$8 sps:$4 sm:$0xff]   ;;  %v3312_v19 = vld [vmem:[%s4926_s1 + $0x604] ss:$8 sps:$4 sm:$0xff]   ;;  %v458_v22 = vcombine.high %v3994_v15, %v3994_v15 }
  0x18   :  { %2361 = vmatpush1.bf16.msra.mxu0 %v3244_v23  ;;  %2157 = vmatprep.subr.bf16.mxu1 %v3245_v24  ;;  %v3306_v23 = vld [vmem:[%s4926_s1 + $0x100] ss:$8 sps:$4 sm:$0xff]   ;;  %v3328_v38 = vld [vmem:[%s4926_s1 + $0x630] ss:$8 sps:$4 sm:$0xff]   ;;  %v3333_v39 = vld [vmem:[%s4926_s1 + $0x144] ss:$8 sps:$4 sm:$0xff]  }
  0x19   :  { %2362 = vmatprep.subr.bf16.mxu0 %v3247_v25  ;;  %2177 = vmatprep.mubr.bf16.mxu1 %v3946_v61  ;;  %v460_v4 = vcombine.high %v3961_v3, %v3961_v3  ;;  %v3310_v24 = vld [vmem:[%s4926_s1 + $0x600] ss:$8 sps:$4 sm:$0xff]   ;;  %v3315_v25 = vld [vmem:[%s4926_s1 + $0x114] ss:$8 sps:$4 sm:$0xff]   ;;  %v3336_v40 = vld [vmem:[%s4926_s1 + $0x644] ss:$8 sps:$4 sm:$0xff]  }
  0x1a   :  { %v3337_v46 = vld [vmem:[%s4926_s1 + $0x150] ss:$8 sps:$4 sm:$0xff]   ;;  %v3351_v54 = vld [vmem:[%s4926_s1 + $0x174] ss:$8 sps:$4 sm:$0xff]   ;;  %v3360_v59 = vld [vmem:[%s4926_s1 + $0x684] ss:$8 sps:$4 sm:$0xff]  }
  0x1b   :  { %2158 = vmatpush1.bf16.msra.mxu1 %v3249_v26  ;;  %2382 = vmatprep.mubr.bf16.mxu0 %v460_v4  ;;  %v3318_v26 = vld [vmem:[%s4926_s1 + $0x614] ss:$8 sps:$4 sm:$0xff]   ;;  %v3349_v56 = vld [vmem:[%s4926_s1 + $0x170] ss:$8 sps:$4 sm:$0xff]   ;;  %v3355_v60 = vld [vmem:[%s4926_s1 + $0x180] ss:$8 sps:$4 sm:$0xff]  }
  0x1c   :  { %2363 = vmatpush1.bf16.msra.mxu0 %v3250_v27  ;;  %2159 = vmatprep.subr.bf16.mxu1 %v3251_v28  ;;  %v411_v27 = vcombine.high %v3946_v61, %v3946_v61  ;;  %v4030_v28 = vrot.slane %v429_v20, %v3920_v51  ;;  %v3358_v61 = vld [vmem:[%s4926_s1 + $0x680] ss:$8 sps:$4 sm:$0xff]   ;;  %v3363_v62 = vld [vmem:[%s4926_s1 + $0x194] ss:$8 sps:$4 sm:$0xff]   ;;  %v3372_v4 = vld [vmem:[%s4926_s1 + $0x6a4] ss:$8 sps:$4 sm:$0xff]  }
  0x1d   :  { %2364 = vmatprep.subr.bf16.mxu0 %v3253_v29  ;;  %v3313_v29 = vld [vmem:[%s4926_s1 + $0x110] ss:$8 sps:$4 sm:$0xff]  }
  0x1e   :  { %v3373_v9 = vld [vmem:[%s4926_s1 + $0x1b0] ss:$8 sps:$4 sm:$0xff]  }
  0x1f   :  { %2160 = vmatpush1.bf16.msra.mxu1 %v3255_v30  ;;  %v3316_v30 = vld [vmem:[%s4926_s1 + $0x610] ss:$8 sps:$4 sm:$0xff]  }
  0x20   :  { %2365 = vmatpush1.bf16.msra.mxu0 %v3256_v31  ;;  %2161 = vmatprep.subr.bf16.mxu1 %v3257_v32  ;;  %v3321_v31 = vld [vmem:[%s4926_s1 + $0x124] ss:$8 sps:$4 sm:$0xff]   ;;  %v3388_v20 = vld [vmem:[%s4926_s1 + $0x6d0] ss:$8 sps:$4 sm:$0xff]  }
  0x21   :  { %2366 = vmatprep.subr.bf16.mxu0 %v3259_v33  ;;  %v3324_v32 = vld [vmem:[%s4926_s1 + $0x624] ss:$8 sps:$4 sm:$0xff]   ;;  %v3319_v33 = vld [vmem:[%s4926_s1 + $0x120] ss:$8 sps:$4 sm:$0xff]  }
  0x23   :  { %2162 = vmatpush1.bf16.msra.mxu1 %v3261_v34  ;;  %v3322_v34 = vld [vmem:[%s4926_s1 + $0x620] ss:$8 sps:$4 sm:$0xff]  }
  0x24   :  { %2367 = vmatpush1.bf16.msra.mxu0 %v3262_v35  ;;  %2163 = vmatprep.subr.bf16.mxu1 %v3263_v36  ;;  %v3327_v35 = vld [vmem:[%s4926_s1 + $0x134] ss:$8 sps:$4 sm:$0xff]  }
  0x25   :  { %2368 = vmatprep.subr.bf16.mxu0 %v3265_v37  ;;  %v3330_v36 = vld [vmem:[%s4926_s1 + $0x634] ss:$8 sps:$4 sm:$0xff]   ;;  %v3325_v37 = vld [vmem:[%s4926_s1 + $0x130] ss:$8 sps:$4 sm:$0xff]  }
  0x27   :  { %2164 = vmatpush1.bf16.msra.mxu1 %v3267_v41  ;;  %v3331_v41 = vld [vmem:[%s4926_s1 + $0x140] ss:$8 sps:$4 sm:$0xff]  }
  0x28   :  { %2369 = vmatpush1.bf16.msra.mxu0 %v3268_v42  ;;  %2165 = vmatprep.subr.bf16.mxu1 %v3269_v43  ;;  %v3334_v42 = vld [vmem:[%s4926_s1 + $0x640] ss:$8 sps:$4 sm:$0xff]   ;;  %v3339_v43 = vld [vmem:[%s4926_s1 + $0x154] ss:$8 sps:$4 sm:$0xff]  }
  0x29   :  { %2370 = vmatprep.subr.bf16.mxu0 %v3271_v44  ;;  %v3342_v44 = vld [vmem:[%s4926_s1 + $0x654] ss:$8 sps:$4 sm:$0xff]  }
  0x2b   :  { %2166 = vmatpush1.bf16.msra.mxu1 %v3273_v47  ;;  %v3340_v47 = vld [vmem:[%s4926_s1 + $0x650] ss:$8 sps:$4 sm:$0xff]  }
  0x2c   :  { %2371 = vmatpush1.bf16.msra.mxu0 %v3274_v48  ;;  %2167 = vmatprep.subr.bf16.mxu1 %v3275_v49  ;;  %v3345_v48 = vld [vmem:[%s4926_s1 + $0x164] ss:$8 sps:$4 sm:$0xff]  }
  0x2d   :  { %2372 = vmatprep.subr.bf16.mxu0 %v3277_v50  ;;  %v3348_v49 = vld [vmem:[%s4926_s1 + $0x664] ss:$8 sps:$4 sm:$0xff]   ;;  %v3343_v50 = vld [vmem:[%s4926_s1 + $0x160] ss:$8 sps:$4 sm:$0xff]  }
  0x2f   :  { %2168 = vmatpush1.bf16.msra.mxu1 %v3279_v53  ;;  %v3346_v53 = vld [vmem:[%s4926_s1 + $0x660] ss:$8 sps:$4 sm:$0xff]  }
  0x30   :  { %2373 = vmatpush1.bf16.msra.mxu0 %v3280_v55  ;;  %2169 = vmatprep.subr.bf16.mxu1 %v3281_v57  ;;  %v3354_v55 = vld [vmem:[%s4926_s1 + $0x674] ss:$8 sps:$4 sm:$0xff]   ;;  %v3352_v57 = vld [vmem:[%s4926_s1 + $0x670] ss:$8 sps:$4 sm:$0xff]  }
  0x31   :  { %2374 = vmatprep.subr.bf16.mxu0 %v3283_v58  ;;  %v3357_v58 = vld [vmem:[%s4926_s1 + $0x184] ss:$8 sps:$4 sm:$0xff]  }
  0x33   :  { %2170 = vmatpush1.bf16.msra.mxu1 %v3285_v63  ;;  %v3366_v63 = vld [vmem:[%s4926_s1 + $0x694] ss:$8 sps:$4 sm:$0xff]  }
  0x34   :  { %2375 = vmatpush1.bf16.msra.mxu0 %v3286_v0  ;;  %2171 = vmatprep.subr.bf16.mxu1 %v3287_v1  ;;  %v3361_v0 = vld [vmem:[%s4926_s1 + $0x190] ss:$8 sps:$4 sm:$0xff]  }
  0x35   :  { %2376 = vmatprep.subr.bf16.mxu0 %v3289_v2  ;;  %v3364_v1 = vld [vmem:[%s4926_s1 + $0x690] ss:$8 sps:$4 sm:$0xff]   ;;  %v3369_v2 = vld [vmem:[%s4926_s1 + $0x1a4] ss:$8 sps:$4 sm:$0xff]  }
  0x37   :  { %2172 = vmatpush1.bf16.msra.mxu1 %v3291_v5  ;;  %v3367_v5 = vld [vmem:[%s4926_s1 + $0x1a0] ss:$8 sps:$4 sm:$0xff]  }
  0x38   :  { %2377 = vmatpush1.bf16.msra.mxu0 %v3292_v6  ;;  %2173 = vmatprep.subr.bf16.mxu1 %v3293_v7  ;;  %v3370_v6 = vld [vmem:[%s4926_s1 + $0x6a0] ss:$8 sps:$4 sm:$0xff]   ;;  %v3375_v7 = vld [vmem:[%s4926_s1 + $0x1b4] ss:$8 sps:$4 sm:$0xff]  }
  0x39   :  { %2378 = vmatprep.subr.bf16.mxu0 %v3295_v8  ;;  %v3378_v8 = vld [vmem:[%s4926_s1 + $0x6b4] ss:$8 sps:$4 sm:$0xff]  }
  0x3b   :  { %2174 = vmatpush1.bf16.msra.mxu1 %v3297_v10  ;;  %v3376_v10 = vld [vmem:[%s4926_s1 + $0x6b0] ss:$8 sps:$4 sm:$0xff]  }
  0x3c   :  { %2379 = vmatpush1.bf16.msra.mxu0 %v3298_v11  ;;  %2175 = vmatprep.subr.bf16.mxu1 %v3299_v12  ;;  %v3381_v11 = vld [vmem:[%s4926_s1 + $0x1c4] ss:$8 sps:$4 sm:$0xff]  }
  0x3d   :  { %2380 = vmatprep.subr.bf16.mxu0 %v3301_v13  ;;  %v3384_v12 = vld [vmem:[%s4926_s1 + $0x6c4] ss:$8 sps:$4 sm:$0xff]   ;;  %v3379_v13 = vld [vmem:[%s4926_s1 + $0x1c0] ss:$8 sps:$4 sm:$0xff]  }
  0x3f   :  { %2176 = vmatpush1.bf16.msra.mxu1 %v3303_v16  ;;  %v3382_v16 = vld [vmem:[%s4926_s1 + $0x6c0] ss:$8 sps:$4 sm:$0xff]  }
  0x40   :  { %2381 = vmatpush1.bf16.msra.mxu0 %v3304_v17  ;;  %2186 = vmatprep.subr.bf16.mxu1 %v3308_v18  ;;  %v3387_v17 = vld [vmem:[%s4926_s1 + $0x1d4] ss:$8 sps:$4 sm:$0xff]  }
  0x41   :  { %2391 = vmatprep.subr.bf16.mxu0 %v3312_v19  ;;  %v3390_v18 = vld [vmem:[%s4926_s1 + $0x6d4] ss:$8 sps:$4 sm:$0xff]   ;;  %v3385_v19 = vld [vmem:[%s4926_s1 + $0x1d0] ss:$8 sps:$4 sm:$0xff]  }
  0x42   :  { %2178 = vmatmul.mubr.bf16.vlgmr.msra.gmra.mrb[0].mxu1 %v4011_v21 }
  0x43   :  { %2383 = vmatmul.mubr.bf16.vlgmr.msra.gmra.mrb[0].mxu0 %v458_v22  ;;  %2187 = vmatpush1.bf16.msra.mxu1 %v3306_v23  ;;  %v3393_v22 = vld [vmem:[%s4926_s1 + $0x1e4] ss:$8 sps:$4 sm:$0xff]  }
  0x44   :  { %2392 = vmatpush1.bf16.msra.mxu0 %v3310_v24  ;;  %2188 = vmatprep.subr.bf16.mxu1 %v3315_v25  ;;  %v3396_v23 = vld [vmem:[%s4926_s1 + $0x6e4] ss:$8 sps:$4 sm:$0xff]   ;;  %v364_v24 = vcombine.high %v3925_v52, %v3925_v52  ;;  %v3391_v25 = vld [vmem:[%s4926_s1 + $0x1e0] ss:$8 sps:$4 sm:$0xff]   ;;  %v3402_v52 = vld [vmem:[%s4926_s1 + $0x6f4] ss:$8 sps:$4 sm:$0xff]  }
  0x45   :  { %2393 = vmatprep.subr.bf16.mxu0 %v3318_v26  ;;  %2218 = vmatprep.mubr.bf16.mxu1 %v411_v27  ;;  %v3394_v26 = vld [vmem:[%s4926_s1 + $0x6e0] ss:$8 sps:$4 sm:$0xff]   ;;  %v3399_v27 = vld [vmem:[%s4926_s1 + $0x1f4] ss:$8 sps:$4 sm:$0xff]  }
  0x46   :  { %2423 = vmatprep.mubr.bf16.mxu0 %v4030_v28 }
  0x47   :  { %2189 = vmatpush1.bf16.msra.mxu1 %v3313_v29  ;;  %v4205_v29 = vrot.slane %v364_v24, %v3920_v51  ;;  %v3472_v24 = vld [vmem:[%s4926_s1 + $0x7b0] ss:$8 sps:$4 sm:$0xff]  }
  0x48   :  { %2394 = vmatpush1.bf16.msra.mxu0 %v3316_v30  ;;  %2190 = vmatprep.subr.bf16.mxu1 %v3321_v31  ;;  %v3397_v30 = vld [vmem:[%s4926_s1 + $0x1f0] ss:$8 sps:$4 sm:$0xff]  }
  0x49   :  { %2395 = vmatprep.subr.bf16.mxu0 %v3324_v32  ;;  %v3400_v31 = vld [vmem:[%s4926_s1 + $0x6f0] ss:$8 sps:$4 sm:$0xff]   ;;  %v3405_v32 = vld [vmem:[%s4926_s1 + $0x204] ss:$8 sps:$4 sm:$0xff]  }
  0x4b   :  { %2191 = vmatpush1.bf16.msra.mxu1 %v3319_v33  ;;  %v3408_v33 = vld [vmem:[%s4926_s1 + $0x704] ss:$8 sps:$4 sm:$0xff]  }
  0x4c   :  { %2396 = vmatpush1.bf16.msra.mxu0 %v3322_v34  ;;  %2192 = vmatprep.subr.bf16.mxu1 %v3327_v35  ;;  %v380_v34 = vcombine.high %v4205_v29, %v4205_v29  ;;  %v409_v35 = vcombine.high %v4011_v21, %v4011_v21  ;;  %v3411_v21 = vld [vmem:[%s4926_s1 + $0x214] ss:$8 sps:$4 sm:$0xff]  }
  0x4d   :  { %2397 = vmatprep.subr.bf16.mxu0 %v3330_v36  ;;  %v4225_v36 = vrot.slane %v3991_v14, %v3920_v51  ;;  %v3414_v14 = vld [vmem:[%s4926_s1 + $0x714] ss:$8 sps:$4 sm:$0xff]  }
  0x4f   :  { %2193 = vmatpush1.bf16.msra.mxu1 %v3325_v37  ;;  %v3403_v37 = vld [vmem:[%s4926_s1 + $0x200] ss:$8 sps:$4 sm:$0xff]  }
  0x50   :  { %2398 = vmatpush1.bf16.msra.mxu0 %v3328_v38  ;;  %2194 = vmatprep.subr.bf16.mxu1 %v3333_v39  ;;  %v3406_v38 = vld [vmem:[%s4926_s1 + $0x700] ss:$8 sps:$4 sm:$0xff]   ;;  %v4240_v39 = vrot.slane %v380_v34, %v3920_v51  ;;  %v3489_v34 = vld [vmem:[%s4926_s1 + $0x2e4] ss:$8 sps:$4 sm:$0xff]  }
  0x51   :  { %2399 = vmatprep.subr.bf16.mxu0 %v3336_v40  ;;  %v461_v40 = vcombine.high %v4030_v28, %v4030_v28  ;;  %v3420_v28 = vld [vmem:[%s4926_s1 + $0x724] ss:$8 sps:$4 sm:$0xff]  }
  0x53   :  { %2195 = vmatpush1.bf16.msra.mxu1 %v3331_v41  ;;  %v3409_v41 = vld [vmem:[%s4926_s1 + $0x210] ss:$8 sps:$4 sm:$0xff]  }
  0x54   :  { %2400 = vmatpush1.bf16.msra.mxu0 %v3334_v42  ;;  %2196 = vmatprep.subr.bf16.mxu1 %v3339_v43  ;;  %v3412_v42 = vld [vmem:[%s4926_s1 + $0x710] ss:$8 sps:$4 sm:$0xff]   ;;  %v3417_v43 = vld [vmem:[%s4926_s1 + $0x224] ss:$8 sps:$4 sm:$0xff]  }
  0x55   :  { %2401 = vmatprep.subr.bf16.mxu0 %v3342_v44  ;;  %v3415_v44 = vld [vmem:[%s4926_s1 + $0x220] ss:$8 sps:$4 sm:$0xff]  }
  0x57   :  { %2197 = vmatpush1.bf16.msra.mxu1 %v3337_v46  ;;  %v3418_v46 = vld [vmem:[%s4926_s1 + $0x720] ss:$8 sps:$4 sm:$0xff]  }
  0x58   :  { %2402 = vmatpush1.bf16.msra.mxu0 %v3340_v47  ;;  %2198 = vmatprep.subr.bf16.mxu1 %v3345_v48  ;;  %v3423_v47 = vld [vmem:[%s4926_s1 + $0x234] ss:$8 sps:$4 sm:$0xff]  }
  0x59   :  { %2403 = vmatprep.subr.bf16.mxu0 %v3348_v49  ;;  %v3426_v48 = vld [vmem:[%s4926_s1 + $0x734] ss:$8 sps:$4 sm:$0xff]   ;;  %v3421_v49 = vld [vmem:[%s4926_s1 + $0x230] ss:$8 sps:$4 sm:$0xff]  }
  0x5b   :  { %2199 = vmatpush1.bf16.msra.mxu1 %v3343_v50  ;;  %v3424_v50 = vld [vmem:[%s4926_s1 + $0x730] ss:$8 sps:$4 sm:$0xff]  }
  0x5c   :  { %2404 = vmatpush1.bf16.msra.mxu0 %v3346_v53  ;;  %2200 = vmatprep.subr.bf16.mxu1 %v3351_v54  ;;  %v3429_v53 = vld [vmem:[%s4926_s1 + $0x244] ss:$8 sps:$4 sm:$0xff]  }
  0x5d   :  { %2405 = vmatprep.subr.bf16.mxu0 %v3354_v55  ;;  %v3432_v54 = vld [vmem:[%s4926_s1 + $0x744] ss:$8 sps:$4 sm:$0xff]   ;;  %v3427_v55 = vld [vmem:[%s4926_s1 + $0x240] ss:$8 sps:$4 sm:$0xff]  }
  0x5f   :  { %2201 = vmatpush1.bf16.msra.mxu1 %v3349_v56  ;;  %v3430_v56 = vld [vmem:[%s4926_s1 + $0x740] ss:$8 sps:$4 sm:$0xff]  }
  0x60   :  { %2406 = vmatpush1.bf16.msra.mxu0 %v3352_v57  ;;  %2202 = vmatprep.subr.bf16.mxu1 %v3357_v58  ;;  %v3435_v57 = vld [vmem:[%s4926_s1 + $0x254] ss:$8 sps:$4 sm:$0xff]  }
  0x61   :  { %2407 = vmatprep.subr.bf16.mxu0 %v3360_v59  ;;  %v3438_v58 = vld [vmem:[%s4926_s1 + $0x754] ss:$8 sps:$4 sm:$0xff]   ;;  %v3433_v59 = vld [vmem:[%s4926_s1 + $0x250] ss:$8 sps:$4 sm:$0xff]  }
  0x63   :  { %2203 = vmatpush1.bf16.msra.mxu1 %v3355_v60  ;;  %v3436_v60 = vld [vmem:[%s4926_s1 + $0x750] ss:$8 sps:$4 sm:$0xff]  }
  0x64   :  { %2408 = vmatpush1.bf16.msra.mxu0 %v3358_v61  ;;  %2204 = vmatprep.subr.bf16.mxu1 %v3363_v62  ;;  %v3441_v61 = vld [vmem:[%s4926_s1 + $0x264] ss:$8 sps:$4 sm:$0xff]  }
  0x65   :  { %2409 = vmatprep.subr.bf16.mxu0 %v3366_v63  ;;  %v3444_v62 = vld [vmem:[%s4926_s1 + $0x764] ss:$8 sps:$4 sm:$0xff]   ;;  %v3439_v63 = vld [vmem:[%s4926_s1 + $0x260] ss:$8 sps:$4 sm:$0xff]  }
  0x67   :  { %2205 = vmatpush1.bf16.msra.mxu1 %v3361_v0  ;;  %v3442_v0 = vld [vmem:[%s4926_s1 + $0x760] ss:$8 sps:$4 sm:$0xff]  }
  0x68   :  { %2410 = vmatpush1.bf16.msra.mxu0 %v3364_v1  ;;  %2206 = vmatprep.subr.bf16.mxu1 %v3369_v2  ;;  %v3447_v1 = vld [vmem:[%s4926_s1 + $0x274] ss:$8 sps:$4 sm:$0xff]  }
  0x69   :  { %2411 = vmatprep.subr.bf16.mxu0 %v3372_v4  ;;  %v3450_v2 = vld [vmem:[%s4926_s1 + $0x774] ss:$8 sps:$4 sm:$0xff]   ;;  %v3445_v4 = vld [vmem:[%s4926_s1 + $0x270] ss:$8 sps:$4 sm:$0xff]  }
  0x6b   :  { %2207 = vmatpush1.bf16.msra.mxu1 %v3367_v5  ;;  %v3448_v5 = vld [vmem:[%s4926_s1 + $0x770] ss:$8 sps:$4 sm:$0xff]  }
  0x6c   :  { %2412 = vmatpush1.bf16.msra.mxu0 %v3370_v6  ;;  %2208 = vmatprep.subr.bf16.mxu1 %v3375_v7  ;;  %v3453_v6 = vld [vmem:[%s4926_s1 + $0x284] ss:$8 sps:$4 sm:$0xff]  }
  0x6d   :  { %2413 = vmatprep.subr.bf16.mxu0 %v3378_v8  ;;  %v3456_v7 = vld [vmem:[%s4926_s1 + $0x784] ss:$8 sps:$4 sm:$0xff]   ;;  %v3451_v8 = vld [vmem:[%s4926_s1 + $0x280] ss:$8 sps:$4 sm:$0xff]  }
  0x6f   :  { %2209 = vmatpush1.bf16.msra.mxu1 %v3373_v9  ;;  %v3454_v9 = vld [vmem:[%s4926_s1 + $0x780] ss:$8 sps:$4 sm:$0xff]  }
  0x70   :  { %2414 = vmatpush1.bf16.msra.mxu0 %v3376_v10  ;;  %2210 = vmatprep.subr.bf16.mxu1 %v3381_v11  ;;  %v3459_v10 = vld [vmem:[%s4926_s1 + $0x294] ss:$8 sps:$4 sm:$0xff]  }
  0x71   :  { %2415 = vmatprep.subr.bf16.mxu0 %v3384_v12  ;;  %v3462_v11 = vld [vmem:[%s4926_s1 + $0x794] ss:$8 sps:$4 sm:$0xff]   ;;  %v3457_v12 = vld [vmem:[%s4926_s1 + $0x290] ss:$8 sps:$4 sm:$0xff]  }
  0x73   :  { %2211 = vmatpush1.bf16.msra.mxu1 %v3379_v13  ;;  %v3460_v13 = vld [vmem:[%s4926_s1 + $0x790] ss:$8 sps:$4 sm:$0xff]  }
  0x74   :  { %2416 = vmatpush1.bf16.msra.mxu0 %v3382_v16  ;;  %2212 = vmatprep.subr.bf16.mxu1 %v3387_v17  ;;  %v3465_v16 = vld [vmem:[%s4926_s1 + $0x2a4] ss:$8 sps:$4 sm:$0xff]  }
  0x75   :  { %2417 = vmatprep.subr.bf16.mxu0 %v3390_v18  ;;  %v3468_v17 = vld [vmem:[%s4926_s1 + $0x7a4] ss:$8 sps:$4 sm:$0xff]   ;;  %v3463_v18 = vld [vmem:[%s4926_s1 + $0x2a0] ss:$8 sps:$4 sm:$0xff]  }
  0x77   :  { %2213 = vmatpush1.bf16.msra.mxu1 %v3385_v19  ;;  %v3466_v19 = vld [vmem:[%s4926_s1 + $0x7a0] ss:$8 sps:$4 sm:$0xff]  }
  0x78   :  { %2418 = vmatpush1.bf16.msra.mxu0 %v3388_v20  ;;  %2214 = vmatprep.subr.bf16.mxu1 %v3393_v22  ;;  %v3471_v20 = vld [vmem:[%s4926_s1 + $0x2b4] ss:$8 sps:$4 sm:$0xff]  }
  0x79   :  { %2419 = vmatprep.subr.bf16.mxu0 %v3396_v23  ;;  %v3474_v22 = vld [vmem:[%s4926_s1 + $0x7b4] ss:$8 sps:$4 sm:$0xff]   ;;  %v3469_v23 = vld [vmem:[%s4926_s1 + $0x2b0] ss:$8 sps:$4 sm:$0xff]  }
  0x7b   :  { %2215 = vmatpush1.bf16.msra.mxu1 %v3391_v25  ;;  %v3477_v25 = vld [vmem:[%s4926_s1 + $0x2c4] ss:$8 sps:$4 sm:$0xff]  }
  0x7c   :  { %2420 = vmatpush1.bf16.msra.mxu0 %v3394_v26  ;;  %2216 = vmatprep.subr.bf16.mxu1 %v3399_v27  ;;  %v3480_v26 = vld [vmem:[%s4926_s1 + $0x7c4] ss:$8 sps:$4 sm:$0xff]   ;;  %v3475_v27 = vld [vmem:[%s4926_s1 + $0x2c0] ss:$8 sps:$4 sm:$0xff]  }
  0x7d   :  { %2421 = vmatprep.subr.bf16.mxu0 %v3402_v52  ;;  %v3478_v52 = vld [vmem:[%s4926_s1 + $0x7c0] ss:$8 sps:$4 sm:$0xff]  }
  0x7f   :  { %2217 = vmatpush1.bf16.msra.mxu1 %v3397_v30  ;;  %v3483_v30 = vld [vmem:[%s4926_s1 + $0x2d4] ss:$8 sps:$4 sm:$0xff]  }
  0x80   :  { %2422 = vmatpush1.bf16.msra.mxu0 %v3400_v31  ;;  %2227 = vmatprep.subr.bf16.mxu1 %v3405_v32  ;;  %v3486_v31 = vld [vmem:[%s4926_s1 + $0x7d4] ss:$8 sps:$4 sm:$0xff]   ;;  %v3481_v32 = vld [vmem:[%s4926_s1 + $0x2d0] ss:$8 sps:$4 sm:$0xff]  }
  0x81   :  { %2432 = vmatprep.subr.bf16.mxu0 %v3408_v33  ;;  %v3484_v33 = vld [vmem:[%s4926_s1 + $0x7d0] ss:$8 sps:$4 sm:$0xff]  }
  0x82   :  { %2219 = vmatmul.mubr.bf16.vlgmr.msra.gmra.mrb[0].mxu1 %v409_v35  ;;  %v3492_v35 = vld [vmem:[%s4926_s1 + $0x7e4] ss:$8 sps:$4 sm:$0xff]  }
  0x83   :  { %2424 = vmatmul.mubr.bf16.vlgmr.msra.gmra.mrb[0].mxu0 %v4225_v36  ;;  %2228 = vmatpush1.bf16.msra.mxu1 %v3403_v37  ;;  %v3487_v37 = vld [vmem:[%s4926_s1 + $0x2e0] ss:$8 sps:$4 sm:$0xff]  }
  0x84   :  { %2433 = vmatpush1.bf16.msra.mxu0 %v3406_v38  ;;  %2229 = vmatprep.subr.bf16.mxu1 %v3411_v21  ;;  %v4408_v38 = vld [vmem:[%s4925_s0 + $0x10] sm:$0x1f]  ;;  %v3490_v21 = vld [vmem:[%s4926_s1 + $0x7e0] ss:$8 sps:$4 sm:$0xff]  }
  0x85   :  { %2434 = vmatprep.subr.bf16.mxu0 %v3414_v14  ;;  %2259 = vmatprep.mubr.bf16.mxu1 %v4240_v39  ;;  %v3495_v14 = vld [vmem:[%s4926_s1 + $0x2f4] ss:$8 sps:$4 sm:$0xff]  }
  0x86   :  { %2464 = vmatprep.mubr.bf16.mxu0 %v461_v40  ;;  %v3498_v40 = vld [vmem:[%s4926_s1 + $0x7f4] ss:$8 sps:$4 sm:$0xff]  }
  0x87   :  { %2230 = vmatpush1.bf16.msra.mxu1 %v3409_v41  ;;  %v4421_v41 = vrot.slane %v4408_v38, %v3920_v51 }
  0x88   :  { %2435 = vmatpush1.bf16.msra.mxu0 %v3412_v42  ;;  %2231 = vmatprep.subr.bf16.mxu1 %v3417_v43  ;;  %v3493_v42 = vld [vmem:[%s4926_s1 + $0x2f0] ss:$8 sps:$4 sm:$0xff]  }
  0x89   :  { %2436 = vmatprep.subr.bf16.mxu0 %v3420_v28  ;;  %v3496_v43 = vld [vmem:[%s4926_s1 + $0x7f0] ss:$8 sps:$4 sm:$0xff]   ;;  %v3501_v28 = vld [vmem:[%s4926_s1 + $0x304] ss:$8 sps:$4 sm:$0xff]  }
  0x8b   :  { %2232 = vmatpush1.bf16.msra.mxu1 %v3415_v44  ;;  %v3504_v44 = vld [vmem:[%s4926_s1 + $0x804] ss:$8 sps:$4 sm:$0xff]  }
  0x8c   :  { %2437 = vmatpush1.bf16.msra.mxu0 %v3418_v46  ;;  %2233 = vmatprep.subr.bf16.mxu1 %v3423_v47  ;;  %v477_v46 = vcombine.high %v4421_v41, %v4421_v41  ;;  %v3499_v47 = vld [vmem:[%s4926_s1 + $0x300] ss:$8 sps:$4 sm:$0xff]  }
  0x8d   :  { %2438 = vmatprep.subr.bf16.mxu0 %v3426_v48  ;;  %v4442_v48 = vrot.slane %v4205_v29, %v3920_v51  ;;  %v3510_v29 = vld [vmem:[%s4926_s1 + $0x814] ss:$8 sps:$4 sm:$0xff]  }
  0x8f   :  { %2234 = vmatpush1.bf16.msra.mxu1 %v3421_v49  ;;  %v459_v49 = vcombine.high %v4225_v36, %v4225_v36  ;;  %v4458_v36 = vrot.slane %v477_v46, %v3920_v51 }
  0x90   :  { %2439 = vmatpush1.bf16.msra.mxu0 %v3424_v50  ;;  %2235 = vmatprep.subr.bf16.mxu1 %v3429_v53  ;;  %v3502_v50 = vld [vmem:[%s4926_s1 + $0x800] ss:$8 sps:$4 sm:$0xff]   ;;  %v3507_v53 = vld [vmem:[%s4926_s1 + $0x314] ss:$8 sps:$4 sm:$0xff]  }
  0x91   :  { %2440 = vmatprep.subr.bf16.mxu0 %v3432_v54  ;;  %v412_v54 = vcombine.high %v4240_v39, %v4240_v39  ;;  %v3513_v39 = vld [vmem:[%s4926_s1 + $0x324] ss:$8 sps:$4 sm:$0xff]  }
  0x93   :  { %2236 = vmatpush1.bf16.msra.mxu1 %v3427_v55  ;;  %v3505_v55 = vld [vmem:[%s4926_s1 + $0x310] ss:$8 sps:$4 sm:$0xff]  }
  0x94   :  { %2441 = vmatpush1.bf16.msra.mxu0 %v3430_v56  ;;  %2237 = vmatprep.subr.bf16.mxu1 %v3435_v57  ;;  %v3508_v56 = vld [vmem:[%s4926_s1 + $0x810] ss:$8 sps:$4 sm:$0xff]   ;;  %v3516_v57 = vld [vmem:[%s4926_s1 + $0x824] ss:$8 sps:$4 sm:$0xff]  }
  0x95   :  { %2442 = vmatprep.subr.bf16.mxu0 %v3438_v58  ;;  %v3511_v58 = vld [vmem:[%s4926_s1 + $0x320] ss:$8 sps:$4 sm:$0xff]  }
  0x97   :  { %2238 = vmatpush1.bf16.msra.mxu1 %v3433_v59  ;;  %v3514_v59 = vld [vmem:[%s4926_s1 + $0x820] ss:$8 sps:$4 sm:$0xff]  }
  0x98   :  { %2443 = vmatpush1.bf16.msra.mxu0 %v3436_v60  ;;  %2239 = vmatprep.subr.bf16.mxu1 %v3441_v61  ;;  %v3519_v60 = vld [vmem:[%s4926_s1 + $0x334] ss:$8 sps:$4 sm:$0xff]  }
  0x99   :  { %2444 = vmatprep.subr.bf16.mxu0 %v3444_v62  ;;  %v3522_v61 = vld [vmem:[%s4926_s1 + $0x834] ss:$8 sps:$4 sm:$0xff]   ;;  %v3517_v62 = vld [vmem:[%s4926_s1 + $0x330] ss:$8 sps:$4 sm:$0xff]  }
  0x9b   :  { %2240 = vmatpush1.bf16.msra.mxu1 %v3439_v63  ;;  %v3520_v63 = vld [vmem:[%s4926_s1 + $0x830] ss:$8 sps:$4 sm:$0xff]  }
  0x9c   :  { %2445 = vmatpush1.bf16.msra.mxu0 %v3442_v0  ;;  %2241 = vmatprep.subr.bf16.mxu1 %v3447_v1  ;;  %v3525_v0 = vld [vmem:[%s4926_s1 + $0x344] ss:$8 sps:$4 sm:$0xff]  }
  0x9d   :  { %2446 = vmatprep.subr.bf16.mxu0 %v3450_v2  ;;  %v3528_v1 = vld [vmem:[%s4926_s1 + $0x844] ss:$8 sps:$4 sm:$0xff]   ;;  %v3523_v2 = vld [vmem:[%s4926_s1 + $0x340] ss:$8 sps:$4 sm:$0xff]  }
  0x9f   :  { %2242 = vmatpush1.bf16.msra.mxu1 %v3445_v4  ;;  %v3526_v4 = vld [vmem:[%s4926_s1 + $0x840] ss:$8 sps:$4 sm:$0xff]  }
  0xa0   :  { %2447 = vmatpush1.bf16.msra.mxu0 %v3448_v5  ;;  %2243 = vmatprep.subr.bf16.mxu1 %v3453_v6  ;;  %v3531_v5 = vld [vmem:[%s4926_s1 + $0x354] ss:$8 sps:$4 sm:$0xff]  }
  0xa1   :  { %2448 = vmatprep.subr.bf16.mxu0 %v3456_v7  ;;  %v3534_v6 = vld [vmem:[%s4926_s1 + $0x854] ss:$8 sps:$4 sm:$0xff]   ;;  %v3529_v7 = vld [vmem:[%s4926_s1 + $0x350] ss:$8 sps:$4 sm:$0xff]  }
  0xa3   :  { %2244 = vmatpush1.bf16.msra.mxu1 %v3451_v8  ;;  %v3532_v8 = vld [vmem:[%s4926_s1 + $0x850] ss:$8 sps:$4 sm:$0xff]  }
  0xa4   :  { %2449 = vmatpush1.bf16.msra.mxu0 %v3454_v9  ;;  %2245 = vmatprep.subr.bf16.mxu1 %v3459_v10  ;;  %v3537_v9 = vld [vmem:[%s4926_s1 + $0x364] ss:$8 sps:$4 sm:$0xff]  }
  0xa5   :  { %2450 = vmatprep.subr.bf16.mxu0 %v3462_v11  ;;  %v3540_v10 = vld [vmem:[%s4926_s1 + $0x864] ss:$8 sps:$4 sm:$0xff]   ;;  %v3535_v11 = vld [vmem:[%s4926_s1 + $0x360] ss:$8 sps:$4 sm:$0xff]  }
  0xa7   :  { %2246 = vmatpush1.bf16.msra.mxu1 %v3457_v12  ;;  %v3538_v12 = vld [vmem:[%s4926_s1 + $0x860] ss:$8 sps:$4 sm:$0xff]  }
  0xa8   :  { %2451 = vmatpush1.bf16.msra.mxu0 %v3460_v13  ;;  %2247 = vmatprep.subr.bf16.mxu1 %v3465_v16  ;;  %v3543_v13 = vld [vmem:[%s4926_s1 + $0x374] ss:$8 sps:$4 sm:$0xff]  }
  0xa9   :  { %2452 = vmatprep.subr.bf16.mxu0 %v3468_v17  ;;  %v3546_v16 = vld [vmem:[%s4926_s1 + $0x874] ss:$8 sps:$4 sm:$0xff]   ;;  %v3541_v17 = vld [vmem:[%s4926_s1 + $0x370] ss:$8 sps:$4 sm:$0xff]  }
  0xab   :  { %2248 = vmatpush1.bf16.msra.mxu1 %v3463_v18  ;;  %v3544_v18 = vld [vmem:[%s4926_s1 + $0x870] ss:$8 sps:$4 sm:$0xff]  }
  0xac   :  { %2453 = vmatpush1.bf16.msra.mxu0 %v3466_v19  ;;  %2249 = vmatprep.subr.bf16.mxu1 %v3471_v20  ;;  %v3549_v19 = vld [vmem:[%s4926_s1 + $0x384] ss:$8 sps:$4 sm:$0xff]  }
  0xad   :  { %2454 = vmatprep.subr.bf16.mxu0 %v3474_v22  ;;  %v3552_v20 = vld [vmem:[%s4926_s1 + $0x884] ss:$8 sps:$4 sm:$0xff]   ;;  %v3547_v22 = vld [vmem:[%s4926_s1 + $0x380] ss:$8 sps:$4 sm:$0xff]  }
  0xaf   :  { %2250 = vmatpush1.bf16.msra.mxu1 %v3469_v23  ;;  %v3550_v23 = vld [vmem:[%s4926_s1 + $0x880] ss:$8 sps:$4 sm:$0xff]  }
  0xb0   :  { %2455 = vmatpush1.bf16.msra.mxu0 %v3472_v24  ;;  %2251 = vmatprep.subr.bf16.mxu1 %v3477_v25  ;;  %v3555_v24 = vld [vmem:[%s4926_s1 + $0x394] ss:$8 sps:$4 sm:$0xff]  }
  0xb1   :  { %2456 = vmatprep.subr.bf16.mxu0 %v3480_v26  ;;  %v3558_v25 = vld [vmem:[%s4926_s1 + $0x894] ss:$8 sps:$4 sm:$0xff]   ;;  %v3553_v26 = vld [vmem:[%s4926_s1 + $0x390] ss:$8 sps:$4 sm:$0xff]  }
  0xb3   :  { %2252 = vmatpush1.bf16.msra.mxu1 %v3475_v27  ;;  %v3556_v27 = vld [vmem:[%s4926_s1 + $0x890] ss:$8 sps:$4 sm:$0xff]  }
  0xb4   :  { %2457 = vmatpush1.bf16.msra.mxu0 %v3478_v52  ;;  %2253 = vmatprep.subr.bf16.mxu1 %v3483_v30 }
  0xb5   :  { %2458 = vmatprep.subr.bf16.mxu0 %v3486_v31 }
  0xb7   :  { %2254 = vmatpush1.bf16.msra.mxu1 %v3481_v32 }
  0xb8   :  { %2459 = vmatpush1.bf16.msra.mxu0 %v3484_v33  ;;  %2255 = vmatprep.subr.bf16.mxu1 %v3489_v34 }
  0xb9   :  { %2460 = vmatprep.subr.bf16.mxu0 %v3492_v35 }
  0xbb   :  { %2256 = vmatpush1.bf16.msra.mxu1 %v3487_v37 }
  0xbc   :  { %2461 = vmatpush1.bf16.msra.mxu0 %v3490_v21  ;;  %2257 = vmatprep.subr.bf16.mxu1 %v3495_v14 }
  0xbd   :  { %2462 = vmatprep.subr.bf16.mxu0 %v3498_v40 }
  0xbf   :  { %2258 = vmatpush1.bf16.msra.mxu1 %v3493_v42 }
  0xc0   :  { %2463 = vmatpush1.bf16.msra.mxu0 %v3496_v43  ;;  %2268 = vmatprep.subr.bf16.mxu1 %v3501_v28 }
  0xc1   :  { %2473 = vmatprep.subr.bf16.mxu0 %v3504_v44 }
  0xc2   :  { %2260 = vmatmul.mubr.bf16.vlgmr.msra.gmra.mrb[0].mxu1 %v4442_v48 }
  0xc3   :  { %2465 = vmatmul.mubr.bf16.vlgmr.msra.gmra.mrb[0].mxu0 %v459_v49  ;;  %2269 = vmatpush1.bf16.msra.mxu1 %v3499_v47 }
  0xc4   :  { %2474 = vmatpush1.bf16.msra.mxu0 %v3502_v50  ;;  %2270 = vmatprep.subr.bf16.mxu1 %v3507_v53 }
  0xc5   :  { %2475 = vmatprep.subr.bf16.mxu0 %v3510_v29  ;;  %2300 = vmatprep.mubr.bf16.mxu1 %v412_v54 }
  0xc6   :  { %2505 = vmatprep.mubr.bf16.mxu0 %v4458_v36 }
  0xc7   :  { %2271 = vmatpush1.bf16.msra.mxu1 %v3505_v55 }
  0xc8   :  { %2476 = vmatpush1.bf16.msra.mxu0 %v3508_v56  ;;  %2272 = vmatprep.subr.bf16.mxu1 %v3513_v39 }
  0xc9   :  { %2477 = vmatprep.subr.bf16.mxu0 %v3516_v57 }
  0xcb   :  { %2273 = vmatpush1.bf16.msra.mxu1 %v3511_v58 }
  0xcc   :  { %2478 = vmatpush1.bf16.msra.mxu0 %v3514_v59  ;;  %2274 = vmatprep.subr.bf16.mxu1 %v3519_v60 }
  0xcd   :  { %2479 = vmatprep.subr.bf16.mxu0 %v3522_v61 }
  0xcf   :  { %2275 = vmatpush1.bf16.msra.mxu1 %v3517_v62 }
  0xd0   :  { %2480 = vmatpush1.bf16.msra.mxu0 %v3520_v63  ;;  %2276 = vmatprep.subr.bf16.mxu1 %v3525_v0 }
  0xd1   :  { %2481 = vmatprep.subr.bf16.mxu0 %v3528_v1 }
  0xd3   :  { %2277 = vmatpush1.bf16.msra.mxu1 %v3523_v2 }
  0xd4   :  { %2482 = vmatpush1.bf16.msra.mxu0 %v3526_v4  ;;  %2278 = vmatprep.subr.bf16.mxu1 %v3531_v5 }
  0xd5   :  { %2483 = vmatprep.subr.bf16.mxu0 %v3534_v6 }
  0xd7   :  { %2279 = vmatpush1.bf16.msra.mxu1 %v3529_v7 }
  0xd8   :  { %2484 = vmatpush1.bf16.msra.mxu0 %v3532_v8  ;;  %2280 = vmatprep.subr.bf16.mxu1 %v3537_v9 }
  0xd9   :  { %2485 = vmatprep.subr.bf16.mxu0 %v3540_v10 }
  0xdb   :  { %2281 = vmatpush1.bf16.msra.mxu1 %v3535_v11 }
  0xdc   :  { %2486 = vmatpush1.bf16.msra.mxu0 %v3538_v12  ;;  %2282 = vmatprep.subr.bf16.mxu1 %v3543_v13 }
  0xdd   :  { %2487 = vmatprep.subr.bf16.mxu0 %v3546_v16 }
  0xdf   :  { %2283 = vmatpush1.bf16.msra.mxu1 %v3541_v17 }
  0xe0   :  { %2488 = vmatpush1.bf16.msra.mxu0 %v3544_v18  ;;  %2284 = vmatprep.subr.bf16.mxu1 %v3549_v19 }
  0xe1   :  { %2489 = vmatprep.subr.bf16.mxu0 %v3552_v20 }
  0xe3   :  { %2285 = vmatpush1.bf16.msra.mxu1 %v3547_v22 }
  0xe4   :  { %2490 = vmatpush1.bf16.msra.mxu0 %v3550_v23 }
  0xe5   :  { %10 = vsyncpa [#allocation3], 0  ;;  %2286 = vmatprep.subr.bf16.mxu1 %v3555_v24  ;;  %2491 = vmatprep.subr.bf16.mxu0 %v3558_v25  ;;  %v3561_v52 = vld [vmem:[%s4926_s1 + $0x3a4] ss:$8 sps:$4 sm:$0xff]   ;;  %v3559_v31 = vld [vmem:[%s4926_s1 + $0x3a0] ss:$8 sps:$4 sm:$0xff]   ;;  %v410_v58 = vcombine.high %v4442_v48, %v4442_v48  ;;  %v4646_v59 = vrot.slane %v4421_v41, %v3920_v51  ;;  %v500_v62 = vcombine.high %v4458_v36, %v4458_v36 }
  0xe6   :  { %v3564_v30 = vld [vmem:[%s4926_s1 + $0x8a4] ss:$8 sps:$4 sm:$0xff]   ;;  %v3562_v32 = vld [vmem:[%s4926_s1 + $0x8a0] ss:$8 sps:$4 sm:$0xff]   ;;  %v3567_v33 = vld [vmem:[%s4926_s1 + $0x3b4] ss:$8 sps:$4 sm:$0xff]  }
  0xe7   :  { %2287 = vmatpush1.bf16.msra.mxu1 %v3553_v26  ;;  %v3570_v34 = vld [vmem:[%s4926_s1 + $0x8b4] ss:$8 sps:$4 sm:$0xff]   ;;  %v3565_v35 = vld [vmem:[%s4926_s1 + $0x3b0] ss:$8 sps:$4 sm:$0xff]   ;;  %v3573_v21 = vld [vmem:[%s4926_s1 + $0x3c4] ss:$8 sps:$4 sm:$0xff]  }
  0xe8   :  { %2492 = vmatpush1.bf16.msra.mxu0 %v3556_v27  ;;  %2288 = vmatprep.subr.bf16.mxu1 %v3561_v52  ;;  %v3568_v37 = vld [vmem:[%s4926_s1 + $0x8b0] ss:$8 sps:$4 sm:$0xff]   ;;  %v3576_v14 = vld [vmem:[%s4926_s1 + $0x8c4] ss:$8 sps:$4 sm:$0xff]   ;;  %v3571_v40 = vld [vmem:[%s4926_s1 + $0x3c0] ss:$8 sps:$4 sm:$0xff]  }
  0xe9   :  { %2493 = vmatprep.subr.bf16.mxu0 %v3564_v30  ;;  %v3574_v42 = vld [vmem:[%s4926_s1 + $0x8c0] ss:$8 sps:$4 sm:$0xff]   ;;  %v3579_v43 = vld [vmem:[%s4926_s1 + $0x3d4] ss:$8 sps:$4 sm:$0xff]   ;;  %v3577_v44 = vld [vmem:[%s4926_s1 + $0x3d0] ss:$8 sps:$4 sm:$0xff]  }
  0xea   :  { %v3582_v28 = vld [vmem:[%s4926_s1 + $0x8d4] ss:$8 sps:$4 sm:$0xff]   ;;  %v3580_v46 = vld [vmem:[%s4926_s1 + $0x8d0] ss:$8 sps:$4 sm:$0xff]   ;;  %v3585_v47 = vld [vmem:[%s4926_s1 + $0x3e4] ss:$8 sps:$4 sm:$0xff]  }
  0xeb   :  { %2289 = vmatpush1.bf16.msra.mxu1 %v3559_v31  ;;  %v3588_v49 = vld [vmem:[%s4926_s1 + $0x8e4] ss:$8 sps:$4 sm:$0xff]   ;;  %v3583_v50 = vld [vmem:[%s4926_s1 + $0x3e0] ss:$8 sps:$4 sm:$0xff]   ;;  %v3591_v29 = vld [vmem:[%s4926_s1 + $0x3f4] ss:$8 sps:$4 sm:$0xff]  }
  0xec   :  { %2494 = vmatpush1.bf16.msra.mxu0 %v3562_v32  ;;  %2290 = vmatprep.subr.bf16.mxu1 %v3567_v33  ;;  %v3586_v53 = vld [vmem:[%s4926_s1 + $0x8e0] ss:$8 sps:$4 sm:$0xff]   ;;  %v3594_v54 = vld [vmem:[%s4926_s1 + $0x8f4] ss:$8 sps:$4 sm:$0xff]   ;;  %v3589_v55 = vld [vmem:[%s4926_s1 + $0x3f0] ss:$8 sps:$4 sm:$0xff]  }
  0xed   :  { %2495 = vmatprep.subr.bf16.mxu0 %v3570_v34  ;;  %v3592_v56 = vld [vmem:[%s4926_s1 + $0x8f0] ss:$8 sps:$4 sm:$0xff]   ;;  %v3597_v39 = vld [vmem:[%s4926_s1 + $0x404] ss:$8 sps:$4 sm:$0xff]   ;;  %v3595_v60 = vld [vmem:[%s4926_s1 + $0x400] ss:$8 sps:$4 sm:$0xff]  }
  0xee   :  { %v3601_v57 = vld [vmem:[%s4926_s1 + $0x904] ss:$8 sps:$4 sm:$0xff]   ;;  %v3599_v61 = vld [vmem:[%s4926_s1 + $0x900] ss:$8 sps:$4 sm:$0xff]   ;;  %v3604_v48 = vld [vmem:[%s4926_s1 + $0x414] ss:$8 sps:$4 sm:$0xff]  }
  0xef   :  { %2291 = vmatpush1.bf16.msra.mxu1 %v3565_v35  ;;  %v3607_v41 = vld [vmem:[%s4926_s1 + $0x914] ss:$8 sps:$4 sm:$0xff]   ;;  %v3602_v63 = vld [vmem:[%s4926_s1 + $0x410] ss:$8 sps:$4 sm:$0xff]   ;;  %v3610_v1 = vld [vmem:[%s4926_s1 + $0x424] ss:$8 sps:$4 sm:$0xff]  }
  0xf0   :  { %2496 = vmatpush1.bf16.msra.mxu0 %v3568_v37  ;;  %2292 = vmatprep.subr.bf16.mxu1 %v3573_v21  ;;  %v3605_v0 = vld [vmem:[%s4926_s1 + $0x910] ss:$8 sps:$4 sm:$0xff]   ;;  %v3613_v36 = vld [vmem:[%s4926_s1 + $0x924] ss:$8 sps:$4 sm:$0xff]   ;;  %v3608_v2 = vld [vmem:[%s4926_s1 + $0x420] ss:$8 sps:$4 sm:$0xff]  }
  0xf1   :  { %2497 = vmatprep.subr.bf16.mxu0 %v3576_v14  ;;  %v3611_v4 = vld [vmem:[%s4926_s1 + $0x920] ss:$8 sps:$4 sm:$0xff]   ;;  %v3616_v5 = vld [vmem:[%s4926_s1 + $0x434] ss:$8 sps:$4 sm:$0xff]   ;;  %v3614_v6 = vld [vmem:[%s4926_s1 + $0x430] ss:$8 sps:$4 sm:$0xff]  }
  0xf2   :  { %v3617_v7 = vld [vmem:[%s4926_s1 + $0x930] ss:$8 sps:$4 sm:$0xff]   ;;  %v3622_v8 = vld [vmem:[%s4926_s1 + $0x444] ss:$8 sps:$4 sm:$0xff]   ;;  %v3620_v10 = vld [vmem:[%s4926_s1 + $0x440] ss:$8 sps:$4 sm:$0xff]  }
  0xf3   :  { %2293 = vmatpush1.bf16.msra.mxu1 %v3571_v40  ;;  %v3625_v9 = vld [vmem:[%s4926_s1 + $0x944] ss:$8 sps:$4 sm:$0xff]   ;;  %v3623_v11 = vld [vmem:[%s4926_s1 + $0x940] ss:$8 sps:$4 sm:$0xff]   ;;  %v3628_v12 = vld [vmem:[%s4926_s1 + $0x454] ss:$8 sps:$4 sm:$0xff]  }
  0xf4   :  { %2498 = vmatpush1.bf16.msra.mxu0 %v3574_v42  ;;  %2294 = vmatprep.subr.bf16.mxu1 %v3579_v43  ;;  %v3631_v13 = vld [vmem:[%s4926_s1 + $0x954] ss:$8 sps:$4 sm:$0xff]   ;;  %v3626_v16 = vld [vmem:[%s4926_s1 + $0x450] ss:$8 sps:$4 sm:$0xff]   ;;  %v3634_v18 = vld [vmem:[%s4926_s1 + $0x464] ss:$8 sps:$4 sm:$0xff]  }
  0xf5   :  { %2499 = vmatprep.subr.bf16.mxu0 %v3582_v28  ;;  %v3629_v17 = vld [vmem:[%s4926_s1 + $0x950] ss:$8 sps:$4 sm:$0xff]   ;;  %v3637_v19 = vld [vmem:[%s4926_s1 + $0x964] ss:$8 sps:$4 sm:$0xff]   ;;  %v3632_v20 = vld [vmem:[%s4926_s1 + $0x460] ss:$8 sps:$4 sm:$0xff]  }
  0xf6   :  { %v3635_v22 = vld [vmem:[%s4926_s1 + $0x960] ss:$8 sps:$4 sm:$0xff]   ;;  %v3640_v23 = vld [vmem:[%s4926_s1 + $0x474] ss:$8 sps:$4 sm:$0xff]   ;;  %v3638_v25 = vld [vmem:[%s4926_s1 + $0x470] ss:$8 sps:$4 sm:$0xff]  }
  0xf7   :  { %2295 = vmatpush1.bf16.msra.mxu1 %v3577_v44  ;;  %v3643_v24 = vld [vmem:[%s4926_s1 + $0x974] ss:$8 sps:$4 sm:$0xff]   ;;  %v3641_v26 = vld [vmem:[%s4926_s1 + $0x970] ss:$8 sps:$4 sm:$0xff]   ;;  %v3646_v27 = vld [vmem:[%s4926_s1 + $0x484] ss:$8 sps:$4 sm:$0xff]  }
  0xf8   :  { %2500 = vmatpush1.bf16.msra.mxu0 %v3580_v46  ;;  %2296 = vmatprep.subr.bf16.mxu1 %v3585_v47  ;;  %v3649_v52 = vld [vmem:[%s4926_s1 + $0x984] ss:$8 sps:$4 sm:$0xff]   ;;  %v3644_v30 = vld [vmem:[%s4926_s1 + $0x480] ss:$8 sps:$4 sm:$0xff]   ;;  %v3652_v32 = vld [vmem:[%s4926_s1 + $0x494] ss:$8 sps:$4 sm:$0xff]  }
  0xf9   :  { %2501 = vmatprep.subr.bf16.mxu0 %v3588_v49  ;;  %v3647_v31 = vld [vmem:[%s4926_s1 + $0x980] ss:$8 sps:$4 sm:$0xff]   ;;  %v3655_v33 = vld [vmem:[%s4926_s1 + $0x994] ss:$8 sps:$4 sm:$0xff]   ;;  %v3650_v34 = vld [vmem:[%s4926_s1 + $0x490] ss:$8 sps:$4 sm:$0xff]  }
  0xfa   :  { %v3653_v35 = vld [vmem:[%s4926_s1 + $0x990] ss:$8 sps:$4 sm:$0xff]   ;;  %v3658_v37 = vld [vmem:[%s4926_s1 + $0x4a4] ss:$8 sps:$4 sm:$0xff]   ;;  %v3656_v14 = vld [vmem:[%s4926_s1 + $0x4a0] ss:$8 sps:$4 sm:$0xff]  }
  0xfb   :  { %2297 = vmatpush1.bf16.msra.mxu1 %v3583_v50  ;;  %v3661_v21 = vld [vmem:[%s4926_s1 + $0x9a4] ss:$8 sps:$4 sm:$0xff]   ;;  %v3659_v40 = vld [vmem:[%s4926_s1 + $0x9a0] ss:$8 sps:$4 sm:$0xff]   ;;  %v3664_v42 = vld [vmem:[%s4926_s1 + $0x4b4] ss:$8 sps:$4 sm:$0xff]  }
  0xfc   :  { %2502 = vmatpush1.bf16.msra.mxu0 %v3586_v53  ;;  %2298 = vmatprep.subr.bf16.mxu1 %v3591_v29  ;;  %v3667_v43 = vld [vmem:[%s4926_s1 + $0x9b4] ss:$8 sps:$4 sm:$0xff]   ;;  %v3662_v28 = vld [vmem:[%s4926_s1 + $0x4b0] ss:$8 sps:$4 sm:$0xff]   ;;  %v3670_v46 = vld [vmem:[%s4926_s1 + $0x4c4] ss:$8 sps:$4 sm:$0xff]  }
  0xfd   :  { %2503 = vmatprep.subr.bf16.mxu0 %v3594_v54  ;;  %v3665_v44 = vld [vmem:[%s4926_s1 + $0x9b0] ss:$8 sps:$4 sm:$0xff]   ;;  %v3673_v47 = vld [vmem:[%s4926_s1 + $0x9c4] ss:$8 sps:$4 sm:$0xff]   ;;  %v3668_v49 = vld [vmem:[%s4926_s1 + $0x4c0] ss:$8 sps:$4 sm:$0xff]  }
  0xfe   :  { %v3671_v50 = vld [vmem:[%s4926_s1 + $0x9c0] ss:$8 sps:$4 sm:$0xff]   ;;  %v3676_v53 = vld [vmem:[%s4926_s1 + $0x4d4] ss:$8 sps:$4 sm:$0xff]   ;;  %v3674_v54 = vld [vmem:[%s4926_s1 + $0x4d0] ss:$8 sps:$4 sm:$0xff]  }
  0xff   :  { %2299 = vmatpush1.bf16.msra.mxu1 %v3589_v55  ;;  %v3679_v29 = vld [vmem:[%s4926_s1 + $0x9d4] ss:$8 sps:$4 sm:$0xff]   ;;  %v3677_v55 = vld [vmem:[%s4926_s1 + $0x9d0] ss:$8 sps:$4 sm:$0xff]   ;;  %vm2141_vm0 = vcmask 261120   ;;  %vm2775_vm1 = vcmask 1041408  }
 0x100   :  { %2504 = vmatpush1.bf16.msra.mxu0 %v3592_v56  ;;  %2309 = vmatprep.subr.bf16.mxu1 %v3597_v39  ;;  %v3682_v56 = vld [vmem:[%s4926_s1 + $0x4e4] ss:$8 sps:$4 sm:$0xff]   ;;  %s3748_s18 = smov [#allocation2]  }
 0x101   :  { %2514 = vmatprep.subr.bf16.mxu0 %v3601_v57  ;;  %v3685_v39 = vld [vmem:[%s4926_s1 + $0x9e4] ss:$8 sps:$4 sm:$0xff]   ;;  %v3680_v57 = vld [vmem:[%s4926_s1 + $0x4e0] ss:$8 sps:$4 sm:$0xff]  }
 0x102   :  { %2301 = vmatmul.mubr.bf16.vlgmr.msra.gmra.mrb[0].mxu1 %v410_v58  ;;  %v3683_v58 = vld [vmem:[%s4926_s1 + $0x9e0] ss:$8 sps:$4 sm:$0xff]  }
 0x103   :  { %2506 = vmatmul.mubr.bf16.vlgmr.msra.gmra.mrb[0].mxu0 %v4646_v59  ;;  %2310 = vmatpush1.bf16.msra.mxu1 %v3595_v60  ;;  %v3688_v60 = vld [vmem:[%s4926_s1 + $0x4f4] ss:$8 sps:$4 sm:$0xff]  }
 0x104   :  { %2515 = vmatpush1.bf16.msra.mxu0 %v3599_v61  ;;  %2311 = vmatprep.subr.bf16.mxu1 %v3604_v48  ;;  %v3691_v61 = vld [vmem:[%s4926_s1 + $0x9f4] ss:$8 sps:$4 sm:$0xff]   ;;  %v3686_v48 = vld [vmem:[%s4926_s1 + $0x4f0] ss:$8 sps:$4 sm:$0xff]  }
 0x105   :  { %2516 = vmatprep.subr.bf16.mxu0 %v3607_v41  ;;  %2341 = vmatprep.mubr.bf16.mxu1 %v3961_v3  ;;  %v3619_v3 = vld [vmem:[%s4926_s1 + $0x934] ss:$8 sps:$4 sm:$0xff]   ;;  %v3689_v41 = vld [vmem:[%s4926_s1 + $0x9f0] ss:$8 sps:$4 sm:$0xff]  }
 0x106   :  { %2546 = vmatprep.mubr.bf16.mxu0 %v500_v62  ;;  %v3694_v62 = vld [vmem:[%s4926_s1 + $0xa04] ss:$8 sps:$4 sm:$0xff]  }
 0x107   :  { %2312 = vmatpush1.bf16.msra.mxu1 %v3602_v63  ;;  %v3698_v63 = vld [vmem:[%s4928_s3 + $0x40] sm:$0xff]  }
 0x108   :  { %2517 = vmatpush1.bf16.msra.mxu0 %v3605_v0  ;;  %2313 = vmatprep.subr.bf16.mxu1 %v3610_v1  ;;  %v499_v0 = vcombine.high %v4646_v59, %v4646_v59  ;;  %v3692_v1 = vld [vmem:[%s4926_s1 + $0xa00] ss:$8 sps:$4 sm:$0xff]   ;;  %v3695_v59 = vld [vmem:[%s4926_s1 + $0xa10] ss:$8 sps:$4 sm:$0xff]  }
 0x109   :  { %2518 = vmatprep.subr.bf16.mxu0 %v3613_v36  ;;  %v3697_v36 = vld [vmem:[%s4926_s1 + $0xa14] ss:$8 sps:$4 sm:$0xff]   ;;  %s2794_s1 = sshll.u32 %s3748_s18, 4  ;;  %s2795_s1 = int_to_ptr.vmem [resolvable:$true] %s2794_s1 }
 0x10a   :  { %p3727_p1 = scmp.lt.s32.totalorder %s2795_s1, %s2795_s1 }
 0x10b   :  { %2314 = vmatpush1.bf16.msra.mxu1 %v3608_v2  ;;  %v3699_v2 = vld [vmem:[%s4928_s3] sm:$0xff]  }
 0x10c   :  { %2519 = vmatpush1.bf16.msra.mxu0 %v3611_v4  ;;  %2315 = vmatprep.subr.bf16.mxu1 %v3616_v5  ;;  %v462_v4 = vcombine.high %v4408_v38, %v4408_v38  ;;  %v3747_v5 = vmov 0   ;;  %v3701_v38 = vld [vmem:[%s4928_s3 + $0x8] sm:$0xff]  }
 0x10d   :  { %2520 = vmatprep.subr.bf16.mxu0 %v3619_v3 }
 0x10e   :  { %v476_v3 = vrot.slane %v462_v4, %v3920_v51 }
 0x10f   :  { %2316 = vmatpush1.bf16.msra.mxu1 %v3614_v6 }
 0x110   :  { %2521 = vmatpush1.bf16.msra.mxu0 %v3617_v7  ;;  %2317 = vmatprep.subr.bf16.mxu1 %v3622_v8  ;;  %v491_v6 = vrot.slane %v476_v3, %v3920_v51  ;;  %v3702_v7 = vld [vmem:[%s4928_s3 + $0x50] sm:$0xff]   ;;  %v3704_v8 = vld [vmem:[%s4928_s3 + $0x58] sm:$0xff]  }
 0x111   :  { %2522 = vmatprep.subr.bf16.mxu0 %v3625_v9  ;;  %v3703_v51 = vld [vmem:[%s4928_s3 + $0x10] sm:$0xff]   ;;  %v3705_v9 = vld [vmem:[%s4928_s3 + $0x18] sm:$0xff]  }
 0x113   :  { %2318 = vmatpush1.bf16.msra.mxu1 %v3620_v10  ;;  %v3706_v10 = vld [vmem:[%s4928_s3 + $0x60] sm:$0xff]  }
 0x114   :  { %2523 = vmatpush1.bf16.msra.mxu0 %v3623_v11  ;;  %2319 = vmatprep.subr.bf16.mxu1 %v3628_v12  ;;  %v3707_v11 = vld [vmem:[%s4928_s3 + $0x20] sm:$0xff]   ;;  %v3708_v12 = vld [vmem:[%s4928_s3 + $0x68] sm:$0xff]  }
 0x115   :  { %2524 = vmatprep.subr.bf16.mxu0 %v3631_v13  ;;  %v3709_v13 = vld [vmem:[%s4928_s3 + $0x28] sm:$0xff]  }
 0x117   :  { %2320 = vmatpush1.bf16.msra.mxu1 %v3626_v16  ;;  %v3710_v16 = vld [vmem:[%s4928_s3 + $0x70] sm:$0xff]  }
 0x118   :  { %2525 = vmatpush1.bf16.msra.mxu0 %v3629_v17  ;;  %2321 = vmatprep.subr.bf16.mxu1 %v3634_v18  ;;  %v3711_v17 = vld [vmem:[%s4928_s3 + $0x30] sm:$0xff]   ;;  %v3712_v18 = vld [vmem:[%s4928_s3 + $0x78] sm:$0xff]  }
 0x119   :  { %2526 = vmatprep.subr.bf16.mxu0 %v3637_v19  ;;  %v3713_v19 = vld [vmem:[%s4928_s3 + $0x38] sm:$0xff]  }
 0x11b   :  { %2322 = vmatpush1.bf16.msra.mxu1 %v3632_v20 }
 0x11c   :  { %2527 = vmatpush1.bf16.msra.mxu0 %v3635_v22  ;;  %2323 = vmatprep.subr.bf16.mxu1 %v3640_v23 }
 0x11d   :  { %2528 = vmatprep.subr.bf16.mxu0 %v3643_v24  ;;  %v353_v24 = vsub.s32 0, %v3905_v45 }
 0x11f   :  { %2324 = vmatpush1.bf16.msra.mxu1 %v3638_v25 }
 0x120   :  { %2529 = vmatpush1.bf16.msra.mxu0 %v3641_v26  ;;  %2325 = vmatprep.subr.bf16.mxu1 %v3646_v27  ;;  %v349_v26 = vld [vmem:[%s4927_s2] sm:$0x3]  ;;  %v357_v27 = vsub.s32 1, %v3905_v45 }
 0x121   :  { %2530 = vmatprep.subr.bf16.mxu0 %v3649_v52  ;;  %v354_v52 = vrot.slane %v349_v26, %v353_v24 }
 0x123   :  { %2326 = vmatpush1.bf16.msra.mxu1 %v3644_v30  ;;  %v358_v30 = vrot.slane %v349_v26, %v357_v27 }
 0x124   :  { %2531 = vmatpush1.bf16.msra.mxu0 %v3647_v31  ;;  %2327 = vmatprep.subr.bf16.mxu1 %v3652_v32 }
 0x125   :  { %2532 = vmatprep.subr.bf16.mxu0 %v3655_v33 }
 0x127   :  { %2328 = vmatpush1.bf16.msra.mxu1 %v3650_v34 }
 0x128   :  { %2533 = vmatpush1.bf16.msra.mxu0 %v3653_v35  ;;  %2329 = vmatprep.subr.bf16.mxu1 %v3658_v37 }
 0x129   :  { %2534 = vmatprep.subr.bf16.mxu0 %v3661_v21 }
 0x12b   :  { %2330 = vmatpush1.bf16.msra.mxu1 %v3656_v14 }
 0x12c   :  { %2535 = vmatpush1.bf16.msra.mxu0 %v3659_v40  ;;  %2331 = vmatprep.subr.bf16.mxu1 %v3664_v42 }
 0x12d   :  { %2536 = vmatprep.subr.bf16.mxu0 %v3667_v43 }
 0x12f   :  { %2332 = vmatpush1.bf16.msra.mxu1 %v3662_v28 }
 0x130   :  { %2537 = vmatpush1.bf16.msra.mxu0 %v3665_v44  ;;  %2333 = vmatprep.subr.bf16.mxu1 %v3670_v46  ;;  %v3127_v46 = vld [vmem:[%s4929_s4] ss:$0 sm:$0xff]  ;;  %s3722_s4 = scalar_lea.vmem %s2795_s1, 32 }
 0x131   :  { %2538 = vmatprep.subr.bf16.mxu0 %v3673_v47  ;;  %p3723_p0 = scmp.ne.s32.totalorder %s2795_s1, %s3722_s4  ;;  %p3728_p2 = scmp.lt.s32.totalorder %s3722_s4, %s3722_s4 }
 0x133   :  { %2334 = vmatpush1.bf16.msra.mxu1 %v3668_v49  ;;  %p3729_p3 = por %p3728_p2, %p3727_p1 }
 0x134   :  { %2539 = vmatpush1.bf16.msra.mxu0 %v3671_v50  ;;  %2335 = vmatprep.subr.bf16.mxu1 %v3676_v53 }
 0x135   :  { %2540 = vmatprep.subr.bf16.mxu0 %v3679_v29  ;;  %p3730_p4 = pnand %p3729_p3, %p3723_p0 }
 0x137   :  { %2336 = vmatpush1.bf16.msra.mxu1 %v3674_v54 }
 0x138   :  { %2541 = vmatpush1.bf16.msra.mxu0 %v3677_v55  ;;  %2337 = vmatprep.subr.bf16.mxu1 %v3682_v56 }
 0x139   :  { %2542 = vmatprep.subr.bf16.mxu0 %v3685_v39 }
 0x13b   :  { %2338 = vmatpush1.bf16.msra.mxu1 %v3680_v57 }
 0x13c   :  { %2543 = vmatpush1.bf16.msra.mxu0 %v3683_v58  ;;  %2339 = vmatprep.subr.bf16.mxu1 %v3688_v60 }
 0x13d   :  { %2544 = vmatprep.subr.bf16.mxu0 %v3691_v61 }
 0x13f   :  { %2340 = vmatpush1.bf16.msra.mxu1 %v3686_v48 }
 0x140   :  { %2545 = vmatpush1.bf16.msra.mxu0 %v3689_v41  ;;  %3144 = vmatprep.subr.bf16.mxu1 %v3698_v63 }
 0x141   :  { %2555 = vmatprep.subr.bf16.mxu0 %v3694_v62 }
 0x142   :  { %2342 = vmatmul.mubr.bf16.vlgmr.msra.gmra.mrb[0].mxu1 %v3994_v15  ;;  %v3700_v15 = vld [vmem:[%s4928_s3 + $0x48] sm:$0xff]  }
 0x143   :  { %2547 = vmatmul.mubr.bf16.vlgmr.msra.gmra.mrb[0].mxu0 %v499_v0  ;;  %3145 = vmatpush3.bf16.msra.mxu1 %v3699_v2 }
 0x144   :  { %2556 = vmatpush1.bf16.msra.mxu0 %v3692_v1  ;;  %2587 = vmatprep.mubr.bf16.mxu0 %v3747_v5 }
 0x145   :  { %2557 = vmatprep.subr.bf16.mxu0 %v3697_v36  ;;  %3146 = vmatprep.subr.bf16.mxu1 %v3700_v15 }
 0x147   :  { %3147 = vmatpush3.bf16.msra.mxu1 %v3701_v38 }
 0x148   :  { %2558 = vmatpush1.bf16.msra.mxu0 %v3695_v59  ;;  %3148 = vmatprep.subr.bf16.mxu1 %v3702_v7 }
 0x14b   :  { %3149 = vmatpush3.bf16.msra.mxu1 %v3703_v51 }
 0x14c   :  { %3150 = vmatprep.subr.bf16.mxu1 %v3704_v8 }
 0x14f   :  { %3126 = vmatmul.mubr.msk.bf16.vlgmr.msra.gmra.mrb[0].mxu0 %vm2141_vm0, %v491_v6  ;;  %3151 = vmatpush3.bf16.msra.mxu1 %v3705_v9 }
 0x150   :  { %3152 = vmatprep.subr.bf16.mxu1 %v3706_v10 }
 0x153   :  { %3153 = vmatpush3.bf16.msra.mxu1 %v3707_v11 }
 0x154   :  { %3154 = vmatprep.subr.bf16.mxu1 %v3708_v12 }
 0x157   :  { %3155 = vmatpush3.bf16.msra.mxu1 %v3709_v13 }
 0x158   :  { %3156 = vmatprep.subr.bf16.mxu1 %v3710_v16 }
 0x15b   :  { %3157 = vmatpush3.bf16.msra.mxu1 %v3711_v17 }
 0x15c   :  { %3158 = vmatprep.subr.bf16.mxu1 %v3712_v18 }
 0x15f   :  { %3159 = vmatpush3.bf16.msra.mxu1 %v3713_v19 }
 0x215   :  { %v2343_v20 = vpop.f32.mrb[0].mxu1 }
 0x216   :  { %v2345_v22 = vpop.f32.mrb[1].mxu1  ;;  %v3166_v31 = vadd.f32 %v2343_v20, %v354_v52 }
 0x217   :  { %v2347_v23 = vpop.f32.mrb[2].mxu1  ;;  %v3168_v32 = vadd.f32 %v2345_v22, %v358_v30 }
 0x218   :  { %v2348_v25 = vpop.f32.mrb[3].mxu1 }
 0x222   :  { %v2589_v33 = vpop.f32.mrb[0].mxu0 }
 0x223   :  { %v3167_v34 = vadd.f32 %v3166_v31, %v2589_v33  ;;  %v2591_v35 = vpop.f32.mrb[1].mxu0 }
 0x224   :  { %v3169_v37 = vadd.f32 %v3168_v32, %v2591_v35  ;;  %v2593_v21 = vpop.f32.mrb[2].mxu0 }
 0x225   :  { %3714 = vtanh.f32 %v3167_v34  ;;  %v2594_v14 = vpop.f32.mrb[3].mxu0 }
 0x226   :  { %3716 = vtanh.f32 %v3169_v37 }
 0x22f   :  { %v3715_v40 = vpop.eup %3714 }
 0x230   :  { %v3717_v42 = vpop.eup %3716  ;;  %v2598_v28 = vpack.c.bf16 %v3715_v40, %v3715_v40 }
 0x231   :  { %v2599_v43 = vpack.c.bf16 %v3717_v42, %v3717_v42 }
 0x233   :  { %2767 = vmatprep.mubr.bf16.mxu1 %v2599_v43 }
 0x234   :  { %2768 = vmatmul.mubr.bf16.vlgmr.msra.gmra.mrb[4].mxu1 %v2598_v28 }
 0x307   :  { %v3160_v44 = vpop.f32.mrb[4].mxu1 }
 0x308   :  { %v3161_v45 = vpop.f32.mrb[5].mxu1 }
 0x309   :  { %v3162_v47 = vadd.f32 %v3161_v45, %v3160_v44  ;;  %v3163_v49 = vpop.f32.mrb[6].mxu1 }
 0x30a   :  { %v3164_v50 = vpop.f32.mrb[7].mxu1 }
 0x30b   :  { %v2770_v53 = vadd.f32 %v3162_v47, %v3127_v46 }
 0x30d   :  { %v2776_v29 = vsel %vm2775_vm1, %v2770_v53, -inf }
 0x30e   :  { %2777 = vmax.xlane.f32.xlu0 %v2776_v29 }
 0x39b   :  { %v2778_v54 = vpop.xlane.xlu0 %2777 }
 0x39c   :  { %v2779_v55 = vsub.f32 %v2770_v53, %v2778_v54 }
 0x39e   :  { %v2780_v56 = vmul.f32 1.442695, %v2779_v55 }
 0x3a0   :  { %3718 = vpow2.f32 %v2780_v56 }
 0x3aa   :  { %v3719_v39 = vpop.eup %3718 }
 0x3ab   :  { %v2782_v57 = vsel %vm2775_vm1, %v3719_v39, 0.0 }
 0x3ac   :  { %2783 = vadd.xlane.f32.xlu0 %v2782_v57 }
 0x439   :  { %v2784_v58 = vpop.xlane.xlu0 %2783 }
 0x43a   :  { %3720 = vrcp.f32 %v2784_v58 }
 0x444   :  { %v3721_v60 = vpop.eup %3720 }
 0x445   :  { %v2786_v61 = vmul.f32 %v3721_v60, %v3719_v39 }
 0x447   :  { %2787 = vst [vmem:[#allocation2] sm:$0x3] %v2786_v61 }
 0x448   :  { %3733 = shalt.err (!%p3730_p4)
}
 0x449   :  { %s3734_s21 = scalar_lea.hbm %s4930_s5, 32 }
 0x44a   :  { %p3735_p5 = scmp.ne.s32.totalorder %s4930_s5, %s3734_s21  ;;  %p3738_p6 = scmp.lt.u32.totalorder %s3734_s21, %s4930_s5 }
 0x44c   :  { %p3740_p7 = pnand %p3738_p6, %p3735_p5 }
 0x44e   :  { %3743 = shalt.err (!%p3740_p7)
}
 0x44f   :  { %2797 = dma.vmem_to_hbm [thread:$0]  %s2795_s1, 32, %s4930_s5, [#allocation3]  }
 0x450   :  { %3744 = dma.done.wait [#allocation3], 32  }
 0x451   :  { %3745 = vsyncadd [#allocation3], 4294967264 }
 0x452   :  { %2801 = vsyncpa [#allocation3], 1 }

// kernel: forward.2
= control target key start
LH: loop header
LB: loop body
LE: loop exit
PB: predicated region body
PF: predicated region fallthrough
CT: control target
= control target key end

     0   :  { %s8123_s18 = smov 0   ;;  %s12405_s0 = inlined_call_operand.vmem [shape: bf16[2,400,256], index: 0, kind: input, shape index: {}]   ;;  %s12406_s1 = inlined_call_operand.vmem [shape: bf16[256,128], index: 1, kind: input, shape index: {}]   ;;  %s12407_s2 = inlined_call_operand.vmem [shape: f32[1,128], index: 2, kind: input, shape index: {}]   ;;  %s12408_s3 = inlined_call_operand.vmem [shape: bf16[2048,128], index: 3, kind: input, shape index: {}]   ;;  %s12409_s4 = inlined_call_operand.vmem [shape: f32[1,128], index: 4, kind: input, shape index: {}]   ;;  %s12410_s5 = inlined_call_operand.vmem [shape: bf16[2,9,9,128], index: 5, kind: output, shape index: {}]  }
   0x1 LB: > { %s5601_s19 = sadd.s32 4294967295, %s8090_s18   ;;  %p5605_p0 = scmp.ge.s32.totalorder %s8090_s18, 1  ;;  %s8090_s18 = sphi %s8123_s18, %s15_s18  }
   0x2   : > { %p187_p1 = scmp.lt.s32.totalorder %s8090_s18, 3 }
   0x4   : > { %p188_p2 = pnand %p5605_p0, %p187_p1 }
   0x6   : > { %191 = sbr.rel (%p188_p2) target bundleno = 1786 (0x6fa), region = 40 }
   0xd   : > { %v7461_v0 = vld [vmem:[%s12406_s1] sm:$0xff]   ;;  %v8092_v1 = vmov 0   ;;  %v7462_v2 = vld [vmem:[%s12406_s1 + $0x8] sm:$0xff]   ;;  %p215_p3 = scmp.lt.s32.totalorder %s5601_s19, 1  ;;  %v7463_v3 = vld [vmem:[%s12406_s1 + $0x10] sm:$0xff]   ;;  %vm2412_vm0 = vcmask 1040384  }
   0xe   : > { %661 = vmatprep.subr.bf16.mxu0 %v8092_v1  ;;  %v7464_v4 = vld [vmem:[%s12406_s1 + $0x18] sm:$0xff]   ;;  %v7465_v5 = vld [vmem:[%s12406_s1 + $0x20] sm:$0xff]   ;;  %v7466_v7 = vld [vmem:[%s12406_s1 + $0x28] sm:$0xff]   ;;  %vm2413_vm1 = vsmask.f32 256 }
   0xf   : > { %662 = vmatpush1.bf16.msra.mxu0 %v7461_v0  ;;  %s13316_s19 = smov (!%p215_p3, %s5601_s19), 1  ;;  %v7467_v8 = vld [vmem:[%s12406_s1 + $0x30] sm:$0xff]   ;;  %v7468_v9 = vld [vmem:[%s12406_s1 + $0x38] sm:$0xff]   ;;  %v7469_v10 = vld [vmem:[%s12406_s1 + $0x40] sm:$0xff]  }
  0x10   : > { %663 = vmatprep.subr.bf16.mxu0 %v8092_v1  ;;  %s7450_s28 = smul.u32 400, %s13316_s19  ;;  %v7470_v11 = vld [vmem:[%s12406_s1 + $0x48] sm:$0xff]   ;;  %v7471_v12 = vld [vmem:[%s12406_s1 + $0x50] sm:$0xff]   ;;  %v7472_v13 = vld [vmem:[%s12406_s1 + $0x58] sm:$0xff]  }
  0x11   : > { %v7473_v14 = vld [vmem:[%s12406_s1 + $0x60] sm:$0xff]   ;;  %v7474_v15 = vld [vmem:[%s12406_s1 + $0x68] sm:$0xff]   ;;  %v7475_v16 = vld [vmem:[%s12406_s1 + $0x70] sm:$0xff]   ;;  %s7451_s7 = smul.u32 72, %s13316_s19 }
  0x12   : > { %s8152_s8 = scalar_lea.vmem %s12405_s0, %s7450_s28  ;;  %v7476_v17 = vld [vmem:[%s12406_s1 + $0x78] sm:$0xff]   ;;  %v7534_v24 = vld [vmem:[%s12408_s3 + $0x40] sm:$0xff]   ;;  %v7539_v28 = vld [vmem:[%s12408_s3 + $0x48] sm:$0xff]  }
  0x13   : > { %664 = vmatpush1.bf16.msra.mxu0 %v7462_v2  ;;  %v7479_v6 = vld [vmem:[%s8152_s8 + $0x4] ss:$8 sps:$4 sm:$0xff]   ;;  %v7477_v18 = vld [vmem:[%s8152_s8] ss:$8 sps:$4 sm:$0xff]   ;;  %v7480_v19 = vld [vmem:[%s8152_s8 + $0x14] ss:$8 sps:$4 sm:$0xff]   ;;  %5866 = vmatprep.subr.bf16.mxu1 %v7534_v24  ;;  %s10060_s14 = scalar_lea.vmem %s12410_s5, %s7451_s7 }
  0x14   : > { %665 = vmatprep.subr.bf16.mxu0 %v8092_v1  ;;  %693 = vmatprep.mubr.bf16.mxu0 %v7479_v6  ;;  %v7482_v20 = vld [vmem:[%s8152_s8 + $0x10] ss:$8 sps:$4 sm:$0xff]   ;;  %v7483_v21 = vld [vmem:[%s8152_s8 + $0x24] ss:$8 sps:$4 sm:$0xff]   ;;  %v7485_v22 = vld [vmem:[%s8152_s8 + $0x20] ss:$8 sps:$4 sm:$0xff]  }
  0x15   : > { %v7486_v23 = vld [vmem:[%s8152_s8 + $0x34] ss:$8 sps:$4 sm:$0xff]   ;;  %v7535_v25 = vld [vmem:[%s12408_s3] sm:$0xff]   ;;  %v7488_v26 = vld [vmem:[%s8152_s8 + $0x30] ss:$8 sps:$4 sm:$0xff]  }
  0x16   : > { %v7489_v27 = vld [vmem:[%s8152_s8 + $0x44] ss:$8 sps:$4 sm:$0xff]   ;;  %5867 = vmatpush3.bf16.msra.mxu1 %v7535_v25  ;;  %v7541_v30 = vld [vmem:[%s12408_s3 + $0x50] sm:$0xff]   ;;  %v7491_v31 = vld [vmem:[%s8152_s8 + $0x40] ss:$8 sps:$4 sm:$0xff]  }
  0x17   : > { %666 = vmatpush1.bf16.msra.mxu0 %v7463_v3  ;;  %v7540_v29 = vld [vmem:[%s12408_s3 + $0x8] sm:$0xff]   ;;  %5868 = vmatprep.subr.bf16.mxu1 %v7539_v28  ;;  %v7492_v32 = vld [vmem:[%s8152_s8 + $0x54] ss:$8 sps:$4 sm:$0xff]   ;;  %v7494_v33 = vld [vmem:[%s8152_s8 + $0x50] ss:$8 sps:$4 sm:$0xff]  }
  0x18   : > { %667 = vmatprep.subr.bf16.mxu0 %v8092_v1  ;;  %v7495_v34 = vld [vmem:[%s8152_s8 + $0x64] ss:$8 sps:$4 sm:$0xff]   ;;  %v7497_v35 = vld [vmem:[%s8152_s8 + $0x60] ss:$8 sps:$4 sm:$0xff]   ;;  %v7498_v36 = vld [vmem:[%s8152_s8 + $0x74] ss:$8 sps:$4 sm:$0xff]  }
  0x19   : > { %v7500_v37 = vld [vmem:[%s8152_s8 + $0x70] ss:$8 sps:$4 sm:$0xff]   ;;  %v7501_v38 = vld [vmem:[%s8152_s8 + $0x84] ss:$8 sps:$4 sm:$0xff]   ;;  %v7503_v39 = vld [vmem:[%s8152_s8 + $0x80] ss:$8 sps:$4 sm:$0xff]  }
  0x1a   : > { %5869 = vmatpush3.bf16.msra.mxu1 %v7540_v29  ;;  %v7504_v40 = vld [vmem:[%s8152_s8 + $0x94] ss:$8 sps:$4 sm:$0xff]   ;;  %v7506_v41 = vld [vmem:[%s8152_s8 + $0x90] ss:$8 sps:$4 sm:$0xff]   ;;  %v7507_v42 = vld [vmem:[%s8152_s8 + $0xa4] ss:$8 sps:$4 sm:$0xff]  }
  0x1b   : > { %668 = vmatpush1.bf16.msra.mxu0 %v7464_v4  ;;  %5870 = vmatprep.subr.bf16.mxu1 %v7541_v30  ;;  %v7509_v43 = vld [vmem:[%s8152_s8 + $0xa0] ss:$8 sps:$4 sm:$0xff]   ;;  %v7510_v44 = vld [vmem:[%s8152_s8 + $0xb4] ss:$8 sps:$4 sm:$0xff]   ;;  %v7512_v46 = vld [vmem:[%s8152_s8 + $0xb0] ss:$8 sps:$4 sm:$0xff]  }
  0x1c   : > { %669 = vmatprep.subr.bf16.mxu0 %v8092_v1  ;;  %v7542_v45 = vld [vmem:[%s12408_s3 + $0x10] sm:$0xff]   ;;  %v7546_v47 = vld [vmem:[%s12408_s3 + $0x58] sm:$0xff]   ;;  %v7513_v48 = vld [vmem:[%s8152_s8 + $0xc4] ss:$8 sps:$4 sm:$0xff]  }
  0x1d   : > { %v7547_v49 = vld [vmem:[%s12408_s3 + $0x18] sm:$0xff]   ;;  %v7548_v50 = vld [vmem:[%s12408_s3 + $0x60] sm:$0xff]   ;;  %v7553_v53 = vld [vmem:[%s12408_s3 + $0x68] sm:$0xff]  }
  0x1e   : > { %5871 = vmatpush3.bf16.msra.mxu1 %v7542_v45  ;;  %v7549_v51 = vld [vmem:[%s12408_s3 + $0x20] sm:$0xff]   ;;  %v7516_v54 = vld [vmem:[%s8152_s8 + $0xd4] ss:$8 sps:$4 sm:$0xff]   ;;  %v7554_v55 = vld [vmem:[%s12408_s3 + $0x28] sm:$0xff]  }
  0x1f   : > { %670 = vmatpush1.bf16.msra.mxu0 %v7465_v5  ;;  %5872 = vmatprep.subr.bf16.mxu1 %v7546_v47  ;;  %v7515_v52 = vld [vmem:[%s8152_s8 + $0xc0] ss:$8 sps:$4 sm:$0xff]   ;;  %v7555_v56 = vld [vmem:[%s12408_s3 + $0x70] sm:$0xff]   ;;  %v7560_v59 = vld [vmem:[%s12408_s3 + $0x78] sm:$0xff]  }
  0x20   : > { %671 = vmatprep.subr.bf16.mxu0 %v8092_v1  ;;  %v7556_v57 = vld [vmem:[%s12408_s3 + $0x30] sm:$0xff]   ;;  %v7519_v60 = vld [vmem:[%s8152_s8 + $0xe4] ss:$8 sps:$4 sm:$0xff]   ;;  %v7561_v61 = vld [vmem:[%s12408_s3 + $0x38] sm:$0xff]  }
  0x21   : > { %v7518_v58 = vld [vmem:[%s8152_s8 + $0xd0] ss:$8 sps:$4 sm:$0xff]   ;;  %v7562_v62 = vld [vmem:[%s12408_s3 + $0xc0] sm:$0xff]   ;;  %v7522_v0 = vld [vmem:[%s8152_s8 + $0xf4] ss:$8 sps:$4 sm:$0xff]  }
  0x22   : > { %5873 = vmatpush3.bf16.msra.mxu1 %v7547_v49  ;;  %v7521_v63 = vld [vmem:[%s8152_s8 + $0xe0] ss:$8 sps:$4 sm:$0xff]   ;;  %v7525_v2 = vld [vmem:[%s8152_s8 + $0x104] ss:$8 sps:$4 sm:$0xff]   ;;  %v7528_v5 = vld [vmem:[%s8152_s8 + $0x114] ss:$8 sps:$4 sm:$0xff]  }
  0x23   : > { %672 = vmatpush1.bf16.msra.mxu0 %v7466_v7  ;;  %5874 = vmatprep.subr.bf16.mxu1 %v7548_v50  ;;  %v8274_v3 = vld [vmem:[%s12408_s3 + $0x140] sm:$0xff]   ;;  %v7530_v6 = vld [vmem:[%s8152_s8 + $0x110] ss:$8 sps:$4 sm:$0xff]   ;;  %vm10080_vm2 = vmand %vm2412_vm0, %vm2413_vm1 }
  0x24   : > { %673 = vmatprep.subr.bf16.mxu0 %v8092_v1  ;;  %v7527_v4 = vld [vmem:[%s8152_s8 + $0x100] ss:$8 sps:$4 sm:$0xff]   ;;  %v7531_v7 = vld [vmem:[%s8152_s8 + $0x124] ss:$8 sps:$4 sm:$0xff]  }
  0x26   : > { %5875 = vmatpush3.bf16.msra.mxu1 %v7549_v51 }
  0x27   : > { %674 = vmatpush1.bf16.msra.mxu0 %v7467_v8  ;;  %5876 = vmatprep.subr.bf16.mxu1 %v7553_v53  ;;  %v7533_v8 = vld [vmem:[%s8152_s8 + $0x120] ss:$8 sps:$4 sm:$0xff]  }
  0x28   : > { %675 = vmatprep.subr.bf16.mxu0 %v8092_v1 }
  0x2a   : > { %5877 = vmatpush3.bf16.msra.mxu1 %v7554_v55 }
  0x2b   : > { %676 = vmatpush1.bf16.msra.mxu0 %v7468_v9  ;;  %5878 = vmatprep.subr.bf16.mxu1 %v7555_v56  ;;  %v7536_v9 = vld [vmem:[%s8152_s8 + $0x134] ss:$8 sps:$4 sm:$0xff]  }
  0x2c   : > { %677 = vmatprep.subr.bf16.mxu0 %v8092_v1 }
  0x2e   : > { %5879 = vmatpush3.bf16.msra.mxu1 %v7556_v57 }
  0x2f   : > { %678 = vmatpush1.bf16.msra.mxu0 %v7469_v10  ;;  %5880 = vmatprep.subr.bf16.mxu1 %v7560_v59  ;;  %v7538_v10 = vld [vmem:[%s8152_s8 + $0x130] ss:$8 sps:$4 sm:$0xff]  }
  0x30   : > { %679 = vmatprep.subr.bf16.mxu0 %v8092_v1 }
  0x32   : > { %5881 = vmatpush3.bf16.msra.mxu1 %v7561_v61 }
  0x33   : > { %680 = vmatpush1.bf16.msra.mxu0 %v7470_v11  ;;  %5888 = vmatprep.subr.bf16.mxu1 %v7562_v62  ;;  %v7543_v11 = vld [vmem:[%s8152_s8 + $0x144] ss:$8 sps:$4 sm:$0xff]  }
  0x34   : > { %681 = vmatprep.subr.bf16.mxu0 %v8092_v1 }
  0x37   : > { %682 = vmatpush1.bf16.msra.mxu0 %v7471_v12  ;;  %v7545_v12 = vld [vmem:[%s8152_s8 + $0x140] ss:$8 sps:$4 sm:$0xff]  }
  0x38   : > { %683 = vmatprep.subr.bf16.mxu0 %v8092_v1 }
  0x3b   : > { %684 = vmatpush1.bf16.msra.mxu0 %v7472_v13  ;;  %v7550_v13 = vld [vmem:[%s8152_s8 + $0x154] ss:$8 sps:$4 sm:$0xff]  }
  0x3c   : > { %685 = vmatprep.subr.bf16.mxu0 %v8092_v1 }
  0x3f   : > { %686 = vmatpush1.bf16.msra.mxu0 %v7473_v14  ;;  %v7552_v14 = vld [vmem:[%s8152_s8 + $0x150] ss:$8 sps:$4 sm:$0xff]  }
  0x40   : > { %687 = vmatprep.subr.bf16.mxu0 %v8092_v1 }
  0x43   : > { %688 = vmatpush1.bf16.msra.mxu0 %v7474_v15  ;;  %v7557_v15 = vld [vmem:[%s8152_s8 + $0x164] ss:$8 sps:$4 sm:$0xff]  }
  0x44   : > { %689 = vmatprep.subr.bf16.mxu0 %v8092_v1 }
  0x47   : > { %690 = vmatpush1.bf16.msra.mxu0 %v7475_v16  ;;  %v7559_v16 = vld [vmem:[%s8152_s8 + $0x160] ss:$8 sps:$4 sm:$0xff]  }
  0x48   : > { %691 = vmatprep.subr.bf16.mxu0 %v8092_v1  ;;  %v7524_v1 = vld [vmem:[%s8152_s8 + $0xf0] ss:$8 sps:$4 sm:$0xff]  }
  0x4b   : > { %692 = vmatpush1.bf16.msra.mxu0 %v7476_v17  ;;  %v7564_v17 = vld [vmem:[%s8152_s8 + $0x174] ss:$8 sps:$4 sm:$0xff]  }
  0x4c   : > { %6042 = vmatprep.subr.bf16.mxu0 %v7534_v24 }
  0x4e   : > { %694 = vmatmul.mubr.bf16.vlgmr.msra.gmra.mrb[0].mxu0 %v7477_v18  ;;  %v7566_v18 = vld [vmem:[%s8152_s8 + $0x170] ss:$8 sps:$4 sm:$0xff]  }
  0x4f   : > { %701 = vmatprep.mubr.bf16.mxu0 %v7480_v19  ;;  %6043 = vmatpush3.bf16.msra.mxu0 %v7535_v25  ;;  %v7571_v19 = vld [vmem:[%s8152_s8 + $0x184] ss:$8 sps:$4 sm:$0xff]  }
  0x50   : > { %6044 = vmatprep.subr.bf16.mxu0 %v7539_v28 }
  0x53   : > { %6045 = vmatpush3.bf16.msra.mxu0 %v7540_v29 }
  0x54   : > { %6046 = vmatprep.subr.bf16.mxu0 %v7541_v30 }
  0x56   : > { %702 = vmatmul.mubr.bf16.gmra.mrb[4].mxu0 %v7482_v20  ;;  %v7573_v20 = vld [vmem:[%s8152_s8 + $0x180] ss:$8 sps:$4 sm:$0xff]  }
  0x57   : > { %709 = vmatprep.mubr.bf16.mxu0 %v7483_v21  ;;  %6047 = vmatpush3.bf16.msra.mxu0 %v7542_v45  ;;  %v8297_v21 = vld [vmem:[%s12407_s2] ss:$0 sm:$0xff] }
  0x58   : > { %6048 = vmatprep.subr.bf16.mxu0 %v7546_v47 }
  0x5b   : > { %6049 = vmatpush3.bf16.msra.mxu0 %v7547_v49 }
  0x5c   : > { %6050 = vmatprep.subr.bf16.mxu0 %v7548_v50 }
  0x5e   : > { %710 = vmatmul.mubr.bf16.gmra.mrb[8].mxu0 %v7485_v22 }
  0x5f   : > { %717 = vmatprep.mubr.bf16.mxu0 %v7486_v23  ;;  %6051 = vmatpush3.bf16.msra.mxu0 %v7549_v51  ;;  %v7563_v51 = vld [vmem:[%s12408_s3 + $0x80] sm:$0xff]  }
  0x60   : > { %6052 = vmatprep.subr.bf16.mxu0 %v7553_v53 }
  0x63   : > { %6053 = vmatpush3.bf16.msra.mxu0 %v7554_v55 }
  0x64   : > { %6054 = vmatprep.subr.bf16.mxu0 %v7555_v56 }
  0x66   : > { %718 = vmatmul.mubr.bf16.gmra.mrb[12].mxu0 %v7488_v26 }
  0x67   : > { %725 = vmatprep.mubr.bf16.mxu0 %v7489_v27  ;;  %6055 = vmatpush3.bf16.msra.mxu0 %v7556_v57 }
  0x68   : > { %6056 = vmatprep.subr.bf16.mxu0 %v7560_v59  ;;  %v7568_v59 = vld [vmem:[%s12408_s3 + $0x88] sm:$0xff]  }
  0x6b   : > { %6057 = vmatpush3.bf16.msra.mxu0 %v7561_v61  ;;  %v7569_v61 = vld [vmem:[%s12408_s3 + $0xd0] sm:$0xff]  }
  0x6c   : > { %6086 = vmatprep.subr.bf16.mxu0 %v8274_v3 }
  0x6e   : > { %726 = vmatmul.mubr.bf16.gmra.mrb[16].mxu0 %v7491_v31 }
  0x6f   : > { %733 = vmatprep.mubr.bf16.mxu0 %v7492_v32 }
  0x76   : > { %734 = vmatmul.mubr.bf16.gmra.mrb[20].mxu0 %v7494_v33 }
  0x77   : > { %741 = vmatprep.mubr.bf16.mxu0 %v7495_v34 }
  0x7e   : > { %742 = vmatmul.mubr.bf16.gmra.mrb[24].mxu0 %v7497_v35 }
  0x7f   : > { %749 = vmatprep.mubr.bf16.mxu0 %v7498_v36 }
  0x86   : > { %750 = vmatmul.mubr.bf16.gmra.mrb[28].mxu0 %v7500_v37 }
  0x87   : > { %757 = vmatprep.mubr.bf16.mxu0 %v7501_v38 }
  0x8e   : > { %758 = vmatmul.mubr.bf16.gmra.mrb[32].mxu0 %v7503_v39 }
  0x8f   : > { %765 = vmatprep.mubr.bf16.mxu0 %v7504_v40 }
  0x96   : > { %766 = vmatmul.mubr.bf16.gmra.mrb[36].mxu0 %v7506_v41 }
  0x97   : > { %773 = vmatprep.mubr.bf16.mxu0 %v7507_v42 }
  0x9e   : > { %774 = vmatmul.mubr.bf16.gmra.mrb[40].mxu0 %v7509_v43 }
  0x9f   : > { %781 = vmatprep.mubr.bf16.mxu0 %v7510_v44 }
  0xa6   : > { %782 = vmatmul.mubr.bf16.gmra.mrb[44].mxu0 %v7512_v46 }
  0xa7   : > { %789 = vmatprep.mubr.bf16.mxu0 %v7513_v48 }
  0xae   : > { %790 = vmatmul.mubr.bf16.gmra.mrb[48].mxu0 %v7515_v52 }
  0xaf   : > { %797 = vmatprep.mubr.bf16.mxu0 %v7516_v54  ;;  %v7567_v54 = vld [vmem:[%s12408_s3 + $0xc8] sm:$0xff]  }
  0xb6   : > { %798 = vmatmul.mubr.bf16.gmra.mrb[52].mxu0 %v7518_v58 }
  0xb7   : > { %805 = vmatprep.mubr.bf16.mxu0 %v7519_v60 }
  0xbe   : > { %806 = vmatmul.mubr.bf16.gmra.mrb[56].mxu0 %v7521_v63 }
  0xbf   : > { %813 = vmatprep.mubr.bf16.mxu0 %v7522_v0 }
  0xc6   : > { %814 = vmatmul.mubr.bf16.gmra.mrb[60].mxu0 %v7524_v1 }
  0xc7   : > { %821 = vmatprep.mubr.bf16.mxu0 %v7525_v2  ;;  %v7570_v2 = vld [vmem:[%s12408_s3 + $0x90] sm:$0xff]  }
  0xce   : > { %822 = vmatmul.mubr.bf16.gmra.mrb[64].mxu0 %v7527_v4  ;;  %v7574_v4 = vld [vmem:[%s12408_s3 + $0xd8] sm:$0xff]  }
  0xcf   : > { %829 = vmatprep.mubr.bf16.mxu0 %v7528_v5 }
  0xd6   : > { %830 = vmatmul.mubr.bf16.gmra.mrb[68].mxu0 %v7530_v6  ;;  %v7575_v6 = vld [vmem:[%s12408_s3 + $0x98] sm:$0xff]  }
  0xd7   : > { %837 = vmatprep.mubr.bf16.mxu0 %v7531_v7 }
  0xde   : > { %838 = vmatmul.mubr.bf16.gmra.mrb[72].mxu0 %v7533_v8 }
  0xdf   : > { %845 = vmatprep.mubr.bf16.mxu0 %v7536_v9  ;;  %v7576_v9 = vld [vmem:[%s12408_s3 + $0xe0] sm:$0xff]  }
  0xe6   : > { %846 = vmatmul.mubr.bf16.gmra.mrb[76].mxu0 %v7538_v10 }
  0xe7   : > { %853 = vmatprep.mubr.bf16.mxu0 %v7543_v11 }
  0xee   : > { %854 = vmatmul.mubr.bf16.gmra.mrb[80].mxu0 %v7545_v12 }
  0xef   : > { %861 = vmatprep.mubr.bf16.mxu0 %v7550_v13 }
  0xf6   : > { %862 = vmatmul.mubr.bf16.gmra.mrb[84].mxu0 %v7552_v14 }
  0xf7   : > { %869 = vmatprep.mubr.bf16.mxu0 %v7557_v15  ;;  %v7577_v15 = vld [vmem:[%s12408_s3 + $0xa0] sm:$0xff]  }
  0xfe   : > { %870 = vmatmul.mubr.bf16.gmra.mrb[88].mxu0 %v7559_v16 }
  0xff   : > { %877 = vmatprep.mubr.bf16.mxu0 %v7564_v17 }
 0x106   : > { %878 = vmatmul.mubr.bf16.gmra.mrb[92].mxu0 %v7566_v18 }
 0x107   : > { %885 = vmatprep.mubr.bf16.mxu0 %v7571_v19 }
 0x10e   : > { %886 = vmatmul.mubr.bf16.gmra.mrb[96].mxu0 %v7573_v20  ;;  %v7580_v20 = vld [vmem:[%s12408_s3 + $0xe8] sm:$0xff]  }
 0x121   : > { %v695_v22 = vpop.f32.mrb[0].mxu0 }
 0x122   : > { %v696_v23 = vadd.f32 %v8297_v21, %v695_v22  ;;  %v697_v24 = vpop.f32.mrb[1].mxu0 }
 0x123   : > { %v698_v25 = vpop.f32.mrb[2].mxu0  ;;  %v8354_v24 = vld [vmem:[%s12408_s3 + $0x148] sm:$0xff]  }
 0x124   : > { %v894_v26 = vmax.f32 %v696_v23, 0.0  ;;  %v699_v27 = vadd.f32 %v8297_v21, %v698_v25  ;;  %v700_v28 = vpop.f32.mrb[3].mxu0  ;;  %v8349_v23 = vld [vmem:[%s12408_s3 + $0x100] sm:$0xff]  }
 0x126   : > { %944 = vst [vmem:[#allocation2] sm:$0xff] %v894_v26  ;;  %v895_v29 = vmax.f32 %v699_v27, 0.0 }
 0x128   : > { %945 = vst [vmem:[#allocation2 + $0x8] sm:$0xff] %v895_v29  ;;  %v7584_v29 = vld [vmem:[%s12408_s3 + $0xf0] sm:$0xff]  }
 0x129   : > { %v703_v30 = vpop.f32.mrb[4].mxu0 }
 0x12a   : > { %v704_v31 = vadd.f32 %v8297_v21, %v703_v30  ;;  %v705_v32 = vpop.f32.mrb[5].mxu0 }
 0x12b   : > { %v706_v33 = vpop.f32.mrb[6].mxu0 }
 0x12c   : > { %v896_v34 = vmax.f32 %v704_v31, 0.0  ;;  %v707_v35 = vadd.f32 %v8297_v21, %v706_v33  ;;  %v708_v36 = vpop.f32.mrb[7].mxu0  ;;  %v8367_v31 = vld [vmem:[%s12408_s3 + $0x108] sm:$0xff]  }
 0x12d   : > { %v7585_v36 = vld [vmem:[%s12408_s3 + $0xb0] sm:$0xff]  }
 0x12e   : > { %946 = vst [vmem:[#allocation2 + $0x10] sm:$0xff] %v896_v34  ;;  %v897_v37 = vmax.f32 %v707_v35, 0.0  ;;  %v8376_v35 = vld [vmem:[%s12408_s3 + $0x150] sm:$0xff]  }
 0x12f   : > { %v1252_v45 = vld [vmem:[#allocation2 + $0x8] sm:$0x1] }
 0x130   : > { %947 = vst [vmem:[#allocation2 + $0x18] sm:$0xff] %v897_v37  ;;  %v1283_v53 = vpack.c.bf16 %v1252_v45, %v894_v26  ;;  %v7581_v26 = vld [vmem:[%s12408_s3 + $0xa8] sm:$0xff]   ;;  %v7589_v45 = vld [vmem:[%s12408_s3 + $0xb8] sm:$0xff]  }
 0x131   : > { %v711_v38 = vpop.f32.mrb[8].mxu0 }
 0x132   : > { %v712_v39 = vadd.f32 %v8297_v21, %v711_v38  ;;  %v713_v40 = vpop.f32.mrb[9].mxu0  ;;  %v7588_v38 = vld [vmem:[%s12408_s3 + $0xf8] sm:$0xff]  }
 0x133   : > { %v714_v41 = vpop.f32.mrb[10].mxu0 }
 0x134   : > { %v898_v42 = vmax.f32 %v712_v39, 0.0  ;;  %v715_v43 = vadd.f32 %v8297_v21, %v714_v41  ;;  %v716_v44 = vpop.f32.mrb[11].mxu0  ;;  %v8391_v41 = vld [vmem:[%s12408_s3 + $0x110] sm:$0xff]  }
 0x135   : > { %v1253_v46 = vld [vmem:[#allocation2 + $0xa] sm:$0xff]  ;;  %v1254_v47 = vld [vmem:[#allocation2 + $0x12] sm:$0x1]  ;;  %v1258_v52 = vld [vmem:[#allocation2 + $0x13] sm:$0x1] }
 0x136   : > { %v1257_v48 = vld [vmem:[#allocation2 + $0xb] sm:$0xff]  ;;  %948 = vst [vmem:[#allocation2 + $0x20] sm:$0xff] %v898_v42  ;;  %v8305_v49 = vmax.f32 %v715_v43, 0.0  ;;  %v1284_v50 = vpack.c.bf16 %v1254_v47, %v1253_v46  ;;  %v8398_v43 = vld [vmem:[%s12408_s3 + $0x158] sm:$0xff]  }
 0x137   : > { %v1286_v55 = vpack.c.bf16 %v1258_v52, %v1257_v48  ;;  %v1256_v52 = vld [vmem:[#allocation2 + $0x9] sm:$0x1] }
 0x138   : > { %949 = vst [vmem:[#allocation2 + $0x28] sm:$0xff] %v8305_v49  ;;  %2105 = vmatprep.mubr.bf16.mxu1 %v1284_v50  ;;  %v8408_v50 = vld [vmem:[%s12408_s3 + $0x118] sm:$0xff]  }
 0x139   : > { %v719_v56 = vpop.f32.mrb[12].mxu0  ;;  %2106 = vmatmul.mubr.bf16.vlgmr.msra.gmra.mrb[0].mxu1 %v1283_v53 }
 0x13a   : > { %v720_v57 = vadd.f32 %v8297_v21, %v719_v56  ;;  %5889 = vmatpush3.bf16.msra.mxu1 %v7563_v51  ;;  %v721_v58 = vpop.f32.mrb[13].mxu0  ;;  %2146 = vmatprep.mubr.bf16.mxu1 %v1286_v55  ;;  %v1255_v51 = vld [vmem:[#allocation2 + $0x1] sm:$0xff] }
 0x13b   : > { %v722_v60 = vpop.f32.mrb[14].mxu0  ;;  %5890 = vmatprep.subr.bf16.mxu1 %v7567_v54  ;;  %v8415_v58 = vld [vmem:[%s12408_s3 + $0x160] sm:$0xff]  }
 0x13c   : > { %v900_v62 = vmax.f32 %v720_v57, 0.0  ;;  %v723_v63 = vadd.f32 %v8297_v21, %v722_v60  ;;  %v724_v0 = vpop.f32.mrb[15].mxu0  ;;  %v1285_v60 = vpack.c.bf16 %v1256_v52, %v1255_v51  ;;  %v7613_v52 = vld [vmem:[%s12408_s3 + $0x188] sm:$0xff]  }
 0x13d   : > { %v1261_v56 = vld [vmem:[#allocation2 + $0x1e] sm:$0xff]  ;;  %v1262_v57 = vld [vmem:[#allocation2 + $0x26] sm:$0x1] }
 0x13e   : > { %950 = vst [vmem:[#allocation2 + $0x30] sm:$0xff] %v900_v62  ;;  %v901_v1 = vmax.f32 %v723_v63, 0.0  ;;  %5891 = vmatpush3.bf16.msra.mxu1 %v7568_v59  ;;  %v8422_v62 = vld [vmem:[%s12408_s3 + $0x120] sm:$0xff]   ;;  %v8428_v63 = vld [vmem:[%s12408_s3 + $0x168] sm:$0xff]  }
 0x13f   : > { %5892 = vmatprep.subr.bf16.mxu1 %v7569_v61  ;;  %v1288_v61 = vpack.c.bf16 %v1262_v57, %v1261_v56  ;;  %v8574_v57 = vld [vmem:[%s12408_s3 + $0x228] sm:$0xff]  }
 0x140   : > { %951 = vst [vmem:[#allocation2 + $0x38] sm:$0xff] %v901_v1 }
 0x141   : > { %v727_v5 = vpop.f32.mrb[16].mxu0 }
 0x142   : > { %5893 = vmatpush3.bf16.msra.mxu1 %v7570_v2  ;;  %v728_v7 = vadd.f32 %v8297_v21, %v727_v5  ;;  %v729_v8 = vpop.f32.mrb[17].mxu0  ;;  %v8437_v2 = vld [vmem:[%s12408_s3 + $0x128] sm:$0xff]   ;;  %v8443_v5 = vld [vmem:[%s12408_s3 + $0x170] sm:$0xff]  }
 0x143   : > { %5894 = vmatprep.subr.bf16.mxu1 %v7574_v4  ;;  %v730_v10 = vpop.f32.mrb[18].mxu0  ;;  %v8465_v8 = vld [vmem:[%s12408_s3 + $0x138] sm:$0xff]  }
 0x144   : > { %v902_v11 = vmax.f32 %v728_v7, 0.0  ;;  %v731_v12 = vadd.f32 %v8297_v21, %v730_v10  ;;  %v732_v13 = vpop.f32.mrb[19].mxu0  ;;  %v8457_v7 = vld [vmem:[%s12408_s3 + $0x178] sm:$0xff]   ;;  %12711 = vst [vmem:[#allocation3_spill] sm:$0xff] %v8465_v8 }
 0x145   : > { %v2419_v14 = vld [vmem:[#allocation2 + $0x30] sm:$0x1] }
 0x146   : > { %5895 = vmatpush3.bf16.msra.mxu1 %v7575_v6  ;;  %952 = vst [vmem:[#allocation2 + $0x40] sm:$0xff] %v902_v11  ;;  %v903_v16 = vmax.f32 %v731_v12, 0.0  ;;  %v2450_v19 = vpack.c.bf16 %v2419_v14, %v8305_v49  ;;  %v8451_v6 = vld [vmem:[%s12408_s3 + $0x130] sm:$0xff]   ;;  %v8473_v11 = vld [vmem:[%s12408_s3 + $0x240] sm:$0xff]  }
 0x147   : > { %5896 = vmatprep.subr.bf16.mxu1 %v7576_v9  ;;  %v8339_v17 = vld [vmem:[#allocation2 + $0x32] sm:$0xff]  ;;  %v2421_v18 = vld [vmem:[#allocation2 + $0x3a] sm:$0x1] }
 0x148   : > { %v2451_v22 = vpack.c.bf16 %v2421_v18, %v8339_v17  ;;  %953 = vst [vmem:[#allocation2 + $0x48] sm:$0xff] %v903_v16  ;;  %v8491_v18 = vld [vmem:[%s12408_s3 + $0x248] sm:$0xff]  }
 0x149   : > { %v735_v25 = vpop.f32.mrb[20].mxu0 }
 0x14a   : > { %5897 = vmatpush3.bf16.msra.mxu1 %v7577_v15  ;;  %2498 = vmatprep.mubr.bf16.mxu0 %v2451_v22  ;;  %v736_v27 = vadd.f32 %v8297_v21, %v735_v25  ;;  %v737_v28 = vpop.f32.mrb[21].mxu0  ;;  %v8484_v15 = vld [vmem:[%s12408_s3 + $0x200] sm:$0xff]   ;;  %v8513_v22 = vld [vmem:[%s12408_s3 + $0x210] sm:$0xff]   ;;  %v8519_v25 = vld [vmem:[%s12408_s3 + $0x258] sm:$0xff]  }
 0x14b   : > { %2499 = vmatmul.mubr.bf16.vlgmr.msra.gmra.mrb[100].mxu0 %v2450_v19  ;;  %5898 = vmatprep.subr.bf16.mxu1 %v7580_v20  ;;  %v738_v30 = vpop.f32.mrb[22].mxu0  ;;  %v8499_v19 = vld [vmem:[%s12408_s3 + $0x208] sm:$0xff]   ;;  %v8505_v20 = vld [vmem:[%s12408_s3 + $0x250] sm:$0xff]   ;;  %12713 = vst [vmem:[#allocation5_spill] sm:$0xff] %v8519_v25 }
 0x14c   : > { %6087 = vmatpush3.bf16.msra.mxu0 %v8349_v23  ;;  %v8369_v32 = vmax.f32 %v736_v27, 0.0  ;;  %v739_v33 = vadd.f32 %v8297_v21, %v738_v30  ;;  %v740_v34 = vpop.f32.mrb[23].mxu0  ;;  %v8530_v27 = vld [vmem:[%s12408_s3 + $0x218] sm:$0xff]  }
 0x14d   : > { %6088 = vmatprep.subr.bf16.mxu0 %v8354_v24  ;;  %v8467_v9 = vld [vmem:[#allocation2 + $0x3c] sm:$0xff]  ;;  %v2427_v10 = vld [vmem:[#allocation2 + $0x44] sm:$0x1]  ;;  %v1259_v28 = vld [vmem:[#allocation2 + $0x14] sm:$0xff] }
 0x14e   : > { %5899 = vmatpush3.bf16.msra.mxu1 %v7581_v26  ;;  %954 = vst [vmem:[#allocation2 + $0x50] sm:$0xff] %v8369_v32  ;;  %v905_v37 = vmax.f32 %v739_v33, 0.0  ;;  %12712 = vst [vmem:[#allocation4_spill] sm:$0xff] %v8467_v9  ;;  %v2454_v14 = vpack.c.bf16 %v2427_v10, %v8467_v9  ;;  %v7608_v26 = vld [vmem:[%s12408_s3 + $0x1c0] sm:$0xff]   ;;  %v8593_v10 = vld [vmem:[%s12408_s3 + $0x230] sm:$0xff]  }
 0x14f   : > { %5900 = vmatprep.subr.bf16.mxu1 %v7584_v29  ;;  %v8385_v39 = vld [vmem:[#allocation2 + $0x46] sm:$0xff]  ;;  %v2429_v40 = vld [vmem:[#allocation2 + $0x4e] sm:$0x1]  ;;  %v1260_v29 = vld [vmem:[#allocation2 + $0x1c] sm:$0x1] }
 0x150   : > { %6089 = vmatpush3.bf16.msra.mxu0 %v8367_v31  ;;  %v2455_v42 = vpack.c.bf16 %v2429_v40, %v8385_v39  ;;  %955 = vst [vmem:[#allocation2 + $0x58] sm:$0xff] %v905_v37  ;;  %v1265_v30 = vld [vmem:[#allocation2 + $0x1f] sm:$0xff]  ;;  %v1266_v33 = vld [vmem:[#allocation2 + $0x27] sm:$0x1]  ;;  %v7612_v40 = vld [vmem:[%s12408_s3 + $0x1c8] sm:$0xff]  }
 0x151   : > { %6090 = vmatprep.subr.bf16.mxu0 %v8376_v35  ;;  %v743_v44 = vpop.f32.mrb[24].mxu0  ;;  %v8536_v34 = vld [vmem:[%s12408_s3 + $0x260] sm:$0xff]  }
 0x152   : > { %5901 = vmatpush3.bf16.msra.mxu1 %v7585_v36  ;;  %2580 = vmatprep.mubr.bf16.mxu0 %v2455_v42  ;;  %v744_v46 = vadd.f32 %v8297_v21, %v743_v44  ;;  %v745_v47 = vpop.f32.mrb[25].mxu0  ;;  %v7609_v36 = vld [vmem:[%s12408_s3 + $0x180] sm:$0xff]  }
 0x153   : > { %5902 = vmatprep.subr.bf16.mxu1 %v7588_v38  ;;  %v746_v48 = vpop.f32.mrb[26].mxu0  ;;  %v1287_v38 = vpack.c.bf16 %v1260_v29, %v1259_v28  ;;  %v8558_v47 = vld [vmem:[%s12408_s3 + $0x268] sm:$0xff]   ;;  %v7624_v28 = vld [vmem:[%s12408_s3 + $0x1e0] sm:$0xff]  }
 0x154   : > { %6091 = vmatpush3.bf16.msra.mxu0 %v8391_v41  ;;  %v906_v53 = vmax.f32 %v744_v46, 0.0  ;;  %v747_v54 = vadd.f32 %v8297_v21, %v746_v48  ;;  %v748_v55 = vpop.f32.mrb[27].mxu0  ;;  %v8552_v46 = vld [vmem:[%s12408_s3 + $0x220] sm:$0xff]  }
 0x155   : > { %6092 = vmatprep.subr.bf16.mxu0 %v8398_v43  ;;  %v7616_v55 = vld [vmem:[%s12408_s3 + $0x1d0] sm:$0xff]  }
 0x156   : > { %5903 = vmatpush3.bf16.msra.mxu1 %v7589_v45  ;;  %956 = vst [vmem:[#allocation2 + $0x60] sm:$0xff] %v906_v53  ;;  %v907_v59 = vmax.f32 %v747_v54, 0.0  ;;  %v1290_v45 = vpack.c.bf16 %v1266_v33, %v1265_v30  ;;  %v8611_v30 = vld [vmem:[%s12408_s3 + $0x238] sm:$0xff]  }
 0x157   : > { %5910 = vmatprep.subr.bf16.mxu1 %v8274_v3  ;;  %v2435_v33 = vld [vmem:[#allocation2 + $0x58] sm:$0x1] }
 0x158   : > { %6093 = vmatpush3.bf16.msra.mxu0 %v8408_v50  ;;  %957 = vst [vmem:[#allocation2 + $0x68] sm:$0xff] %v907_v59 }
 0x159   : > { %2147 = vmatmul.mubr.bf16.vlgmr.msra.gmra.mrb[4].mxu1 %v1285_v60  ;;  %6094 = vmatprep.subr.bf16.mxu0 %v8415_v58  ;;  %v751_v0 = vpop.f32.mrb[28].mxu0 }
 0x15a   : > { %5911 = vmatpush3.bf16.msra.mxu1 %v8349_v23  ;;  %2187 = vmatprep.mubr.bf16.mxu1 %v1288_v61  ;;  %v752_v3 = vadd.f32 %v8297_v21, %v751_v0  ;;  %v753_v1 = vpop.f32.mrb[29].mxu0  ;;  %v8581_v0 = vld [vmem:[%s12408_s3 + $0x270] sm:$0xff]  }
 0x15b   : > { %5912 = vmatprep.subr.bf16.mxu1 %v8354_v24  ;;  %v754_v37 = vpop.f32.mrb[30].mxu0 }
 0x15c   : > { %6095 = vmatpush3.bf16.msra.mxu0 %v8422_v62  ;;  %v908_v4 = vmax.f32 %v752_v3, 0.0  ;;  %v8546_v42 = vadd.f32 %v8297_v21, %v754_v37  ;;  %v756_v44 = vpop.f32.mrb[31].mxu0  ;;  %v7617_v3 = vld [vmem:[%s12408_s3 + $0x190] sm:$0xff]   ;;  %v8617_v37 = vld [vmem:[%s12408_s3 + $0x340] sm:$0xff]  }
 0x15d   : > { %6096 = vmatprep.subr.bf16.mxu0 %v8428_v63  ;;  %v8475_v12 = vld [vmem:[#allocation2 + $0x5a] sm:$0xff]  ;;  %v2437_v13 = vld [vmem:[#allocation2 + $0x62] sm:$0x1] }
 0x15e   : > { %5913 = vmatpush3.bf16.msra.mxu1 %v8367_v31  ;;  %958 = vst [vmem:[#allocation2 + $0x70] sm:$0xff] %v908_v4  ;;  %v2459_v16 = vpack.c.bf16 %v2437_v13, %v8475_v12  ;;  %12714 = vst [vmem:[#allocation6_spill] sm:$0xff] %v8546_v42  ;;  %v12411_v48 = vmax.f32 %v8546_v42, 0.0  ;;  %v7620_v4 = vld [vmem:[%s12408_s3 + $0x1d8] sm:$0xff]  }
 0x15f   : > { %5914 = vmatprep.subr.bf16.mxu1 %v8376_v35  ;;  %v8599_v13 = vld [vmem:[%s12408_s3 + $0x278] sm:$0xff]  }
 0x160   : > { %6097 = vmatpush3.bf16.msra.mxu0 %v8437_v2  ;;  %959 = vst [vmem:[#allocation2 + $0x78] sm:$0xff] %v12411_v48  ;;  %v1270_v48 = vld [vmem:[#allocation2 + $0x3a] sm:$0x1] }
 0x161   : > { %6098 = vmatprep.subr.bf16.mxu0 %v8443_v5  ;;  %v759_v51 = vpop.f32.mrb[32].mxu0  ;;  %v1292_v9 = vpack.c.bf16 %v1270_v48, %v8339_v17  ;;  %v8728_v48 = vld [vmem:[%s12408_s3 + $0x368] sm:$0xff]  }
 0x162   : > { %5915 = vmatpush3.bf16.msra.mxu1 %v8391_v41  ;;  %v760_v53 = vadd.f32 %v8297_v21, %v759_v51  ;;  %v761_v54 = vpop.f32.mrb[33].mxu0 }
 0x163   : > { %5916 = vmatprep.subr.bf16.mxu1 %v8398_v43  ;;  %v762_v56 = vpop.f32.mrb[34].mxu0 }
 0x164   : > { %6099 = vmatpush3.bf16.msra.mxu0 %v8451_v6  ;;  %v910_v59 = vmax.f32 %v760_v53, 0.0  ;;  %v763_v60 = vadd.f32 %v8297_v21, %v762_v56  ;;  %v764_v61 = vpop.f32.mrb[35].mxu0  ;;  %v7628_v53 = vld [vmem:[%s12408_s3 + $0x1e8] sm:$0xff]  }
 0x165   : > { %6100 = vmatprep.subr.bf16.mxu0 %v8457_v7  ;;  %v8640_v61 = vld [vmem:[%s12408_s3 + $0x348] sm:$0xff]  }
 0x166   : > { %5917 = vmatpush3.bf16.msra.mxu1 %v8408_v50  ;;  %960 = vst [vmem:[#allocation2 + $0x80] sm:$0xff] %v910_v59  ;;  %v911_v1 = vmax.f32 %v763_v60, 0.0 }
 0x167   : > { %5918 = vmatprep.subr.bf16.mxu1 %v8415_v58 }
 0x168   : > { %6101 = vmatpush3.bf16.msra.mxu0 %v8465_v8  ;;  %961 = vst [vmem:[#allocation2 + $0x88] sm:$0xff] %v911_v1  ;;  %v8645_v1 = vld [vmem:[%s12408_s3 + $0x1a8] sm:$0xff]  }
 0x169   : > { %6130 = vmatprep.subr.bf16.mxu0 %v8473_v11  ;;  %12715 = vst [vmem:[#allocation7_spill] sm:$0xff] %v8645_v1 }
 0x16a   : > { %5919 = vmatpush3.bf16.msra.mxu1 %v8422_v62 }
 0x16b   : > { %2581 = vmatmul.mubr.bf16.vlgmr.msra.gmra.mrb[104].mxu0 %v2454_v14  ;;  %5920 = vmatprep.subr.bf16.mxu1 %v8428_v63  ;;  %v767_v14 = vpop.f32.mrb[36].mxu0 }
 0x16c   : > { %6131 = vmatpush3.bf16.msra.mxu0 %v8484_v15  ;;  %2662 = vmatprep.mubr.bf16.mxu0 %v2459_v16  ;;  %v7621_v16 = vld [vmem:[%s12408_s3 + $0x198] sm:$0xff]   ;;  %v768_v59 = vadd.f32 %v8297_v21, %v767_v14  ;;  %v8651_v14 = vld [vmem:[%s12408_s3 + $0x1f0] sm:$0xff]  }
 0x16d   : > { %6132 = vmatprep.subr.bf16.mxu0 %v8491_v18  ;;  %12716 = vst [vmem:[#allocation8_spill] sm:$0xff] %v8651_v14 }
 0x16e   : > { %5921 = vmatpush3.bf16.msra.mxu1 %v8437_v2 }
 0x16f   : > { %5922 = vmatprep.subr.bf16.mxu1 %v8443_v5 }
 0x170   : > { %6133 = vmatpush3.bf16.msra.mxu0 %v8499_v19 }
 0x171   : > { %6134 = vmatprep.subr.bf16.mxu0 %v8505_v20 }
 0x172   : > { %5923 = vmatpush3.bf16.msra.mxu1 %v8451_v6 }
 0x173   : > { %5924 = vmatprep.subr.bf16.mxu1 %v8457_v7 }
 0x174   : > { %6135 = vmatpush3.bf16.msra.mxu0 %v8513_v22 }
 0x175   : > { %6136 = vmatprep.subr.bf16.mxu0 %v8519_v25 }
 0x176   : > { %5925 = vmatpush3.bf16.msra.mxu1 %v8465_v8  ;;  %v8721_v8 = vld [vmem:[%s12408_s3 + $0x320] sm:$0xff]  }
 0x177   : > { %5932 = vmatprep.subr.bf16.mxu1 %v7608_v26  ;;  %v769_v26 = vpop.f32.mrb[37].mxu0 }
 0x178   : > { %6137 = vmatpush3.bf16.msra.mxu0 %v8530_v27  ;;  %v770_v29 = vpop.f32.mrb[38].mxu0 }
 0x179   : > { %2188 = vmatmul.mubr.bf16.vlgmr.msra.gmra.mrb[8].mxu1 %v1287_v38  ;;  %6138 = vmatprep.subr.bf16.mxu0 %v8536_v34  ;;  %v8619_v38 = vld [vmem:[#allocation2 + $0x6e] sm:$0xff] }
 0x17a   : > { %5933 = vmatpush3.bf16.msra.mxu1 %v7609_v36  ;;  %2228 = vmatprep.mubr.bf16.mxu1 %v1290_v45  ;;  %v772_v36 = vpop.f32.mrb[39].mxu0  ;;  %v7625_v45 = vld [vmem:[%s12408_s3 + $0x1a0] sm:$0xff]  }
 0x17b   : > { %5934 = vmatprep.subr.bf16.mxu1 %v7612_v40  ;;  %v2445_v40 = vld [vmem:[#allocation2 + $0x76] sm:$0x1]  ;;  %v775_v44 = vpop.f32.mrb[40].mxu0 }
 0x17c   : > { %6139 = vmatpush3.bf16.msra.mxu0 %v8552_v46  ;;  %v777_v51 = vpop.f32.mrb[41].mxu0  ;;  %v2463_v56 = vpack.c.bf16 %v2445_v40, %v8619_v38 }
 0x17d   : > { %6140 = vmatprep.subr.bf16.mxu0 %v8558_v47  ;;  %v778_v54 = vpop.f32.mrb[42].mxu0 }
 0x17e   : > { %5935 = vmatpush3.bf16.msra.mxu1 %v7613_v52  ;;  %v2458_v52 = vpack.c.bf16 %v2435_v33, %v8369_v32  ;;  %v780_v60 = vpop.f32.mrb[43].mxu0  ;;  %v8657_v33 = vld [vmem:[%s12408_s3 + $0x308] sm:$0xff]  }
 0x17f   : > { %5936 = vmatprep.subr.bf16.mxu1 %v7616_v55  ;;  %v8632_v55 = vld [vmem:[%s12408_s3 + $0x300] sm:$0xff]   ;;  %v8682_v60 = vld [vmem:[%s12408_s3 + $0x310] sm:$0xff]  }
 0x180   : > { %6141 = vmatpush3.bf16.msra.mxu0 %v8574_v57 }
 0x181   : > { %6142 = vmatprep.subr.bf16.mxu0 %v8581_v0 }
 0x182   : > { %5937 = vmatpush3.bf16.msra.mxu1 %v7617_v3  ;;  %v783_v3 = vpop.f32.mrb[44].mxu0 }
 0x183   : > { %5938 = vmatprep.subr.bf16.mxu1 %v7620_v4  ;;  %v912_v4 = vmax.f32 %v768_v59, 0.0  ;;  %v785_v26 = vpop.f32.mrb[45].mxu0 }
 0x184   : > { %6143 = vmatpush3.bf16.msra.mxu0 %v8593_v10  ;;  %v8689_v26 = vld [vmem:[%s12408_s3 + $0x358] sm:$0xff]  }
 0x185   : > { %6144 = vmatprep.subr.bf16.mxu0 %v8599_v13  ;;  %962 = vst [vmem:[#allocation2 + $0x90] sm:$0xff] %v912_v4  ;;  %v779_v4 = vadd.f32 %v8297_v21, %v778_v54 }
 0x186   : > { %5939 = vmatpush3.bf16.msra.mxu1 %v7621_v16  ;;  %v771_v16 = vadd.f32 %v8297_v21, %v770_v29  ;;  %v776_v29 = vadd.f32 %v8297_v21, %v775_v44  ;;  %v8676_v44 = vld [vmem:[%s12408_s3 + $0x1f8] sm:$0xff]  }
 0x187   : > { %5940 = vmatprep.subr.bf16.mxu1 %v7624_v28  ;;  %v786_v28 = vpop.f32.mrb[46].mxu0  ;;  %12718 = vst [vmem:[#allocation10_spill] sm:$0xff] %v8676_v44 }
 0x188   : > { %6145 = vmatpush3.bf16.msra.mxu0 %v8611_v30  ;;  %v913_v36 = vmax.f32 %v771_v16, 0.0  ;;  %v788_v40 = vpop.f32.mrb[47].mxu0  ;;  %v787_v54 = vadd.f32 %v8297_v21, %v786_v28 }
 0x189   : > { %6174 = vmatprep.subr.bf16.mxu0 %v8617_v37  ;;  %v791_v51 = vpop.f32.mrb[48].mxu0  ;;  %v915_v40 = vmax.f32 %v779_v4, 0.0 }
 0x18a   : > { %5941 = vmatpush3.bf16.msra.mxu1 %v7625_v45  ;;  %v8664_v45 = vld [vmem:[%s12408_s3 + $0x350] sm:$0xff]   ;;  %963 = vst [vmem:[#allocation2 + $0x98] sm:$0xff] %v913_v36  ;;  %v917_v42 = vmax.f32 %v787_v54, 0.0 }
 0x18b   : > { %2663 = vmatmul.mubr.bf16.vlgmr.msra.gmra.mrb[108].mxu0 %v2458_v52  ;;  %5942 = vmatprep.subr.bf16.mxu1 %v7628_v53  ;;  %v8670_v52 = vld [vmem:[%s12408_s3 + $0x1b0] sm:$0xff]   ;;  %v914_v53 = vmax.f32 %v776_v29, 0.0  ;;  %v8695_v29 = vld [vmem:[%s12408_s3 + $0x1b8] sm:$0xff]   ;;  %965 = vst [vmem:[#allocation2 + $0xa8] sm:$0xff] %v915_v40 }
 0x18c   : > { %6175 = vmatpush3.bf16.msra.mxu0 %v8632_v55  ;;  %2744 = vmatprep.mubr.bf16.mxu0 %v2463_v56  ;;  %12717 = vst [vmem:[#allocation9_spill] sm:$0xff] %v8670_v52  ;;  %v793_v56 = vpop.f32.mrb[49].mxu0  ;;  %12719 = vst [vmem:[#allocation11_spill] sm:$0xff] %v8695_v29 }
 0x18d   : > { %6176 = vmatprep.subr.bf16.mxu0 %v8640_v61  ;;  %v794_v59 = vpop.f32.mrb[50].mxu0  ;;  %964 = vst [vmem:[#allocation2 + $0xa0] sm:$0xff] %v914_v53  ;;  %v784_v53 = vadd.f32 %v8297_v21, %v783_v3  ;;  %v792_v3 = vadd.f32 %v8297_v21, %v791_v51  ;;  %967 = vst [vmem:[#allocation2 + $0xb8] sm:$0xff] %v917_v42 }
 0x18e   : > { %5943 = vmatpush3.bf16.msra.mxu1 %v8645_v1  ;;  %v796_v16 = vpop.f32.mrb[51].mxu0  ;;  %v1264_v1 = vld [vmem:[#allocation2 + $0x1d] sm:$0x1] }
 0x18f   : > { %5944 = vmatprep.subr.bf16.mxu1 %v8651_v14  ;;  %v799_v36 = vpop.f32.mrb[52].mxu0  ;;  %v8703_v16 = vld [vmem:[%s12408_s3 + $0x318] sm:$0xff]   ;;  %v916_v4 = vmax.f32 %v784_v53, 0.0  ;;  %v918_v40 = vmax.f32 %v792_v3, 0.0  ;;  %v795_v53 = vadd.f32 %v8297_v21, %v794_v59  ;;  %v8737_v3 = vld [vmem:[%s12408_s3 + $0x328] sm:$0xff]  }
 0x190   : > { %6177 = vmatpush3.bf16.msra.mxu0 %v8657_v33  ;;  %v801_v56 = vpop.f32.mrb[53].mxu0  ;;  %v1263_v14 = vld [vmem:[#allocation2 + $0x15] sm:$0xff]  ;;  %v800_v17 = vadd.f32 %v8297_v21, %v799_v36 }
 0x191   : > { %6178 = vmatprep.subr.bf16.mxu0 %v8664_v45  ;;  %v8711_v56 = vld [vmem:[%s12408_s3 + $0x360] sm:$0xff]   ;;  %966 = vst [vmem:[#allocation2 + $0xb0] sm:$0xff] %v916_v4  ;;  %v1289_v51 = vpack.c.bf16 %v1264_v1, %v1263_v14  ;;  %968 = vst [vmem:[#allocation2 + $0xc0] sm:$0xff] %v918_v40 }
 0x192   : > { %5945 = vmatpush3.bf16.msra.mxu1 %v8670_v52  ;;  %v802_v52 = vpop.f32.mrb[54].mxu0  ;;  %v920_v14 = vmax.f32 %v800_v17, 0.0 }
 0x193   : > { %5946 = vmatprep.subr.bf16.mxu1 %v8676_v44  ;;  %v804_v28 = vpop.f32.mrb[55].mxu0  ;;  %v803_v59 = vadd.f32 %v8297_v21, %v802_v52  ;;  %v8744_v52 = vld [vmem:[%s12408_s3 + $0x370] sm:$0xff]  }
 0x194   : > { %6179 = vmatpush3.bf16.msra.mxu0 %v8682_v60  ;;  %v807_v44 = vpop.f32.mrb[56].mxu0  ;;  %970 = vst [vmem:[#allocation2 + $0xd0] sm:$0xff] %v920_v14 }
 0x195   : > { %6180 = vmatprep.subr.bf16.mxu0 %v8689_v26  ;;  %v809_v54 = vpop.f32.mrb[57].mxu0  ;;  %v921_v40 = vmax.f32 %v803_v59, 0.0 }
 0x196   : > { %5947 = vmatpush3.bf16.msra.mxu1 %v8695_v29  ;;  %v810_v28 = vpop.f32.mrb[58].mxu0  ;;  %v919_v29 = vmax.f32 %v795_v53, 0.0  ;;  %v808_v53 = vadd.f32 %v8297_v21, %v807_v44  ;;  %v8753_v44 = vld [vmem:[%s12408_s3 + $0x330] sm:$0xff]  }
 0x197   : > { %5954 = vmatprep.subr.bf16.mxu1 %v8473_v11  ;;  %v812_v42 = vpop.f32.mrb[59].mxu0  ;;  %971 = vst [vmem:[#allocation2 + $0xd8] sm:$0xff] %v921_v40  ;;  %v811_v54 = vadd.f32 %v8297_v21, %v810_v28 }
 0x198   : > { %6181 = vmatpush3.bf16.msra.mxu0 %v8703_v16  ;;  %969 = vst [vmem:[#allocation2 + $0xc8] sm:$0xff] %v919_v29  ;;  %v922_v29 = vmax.f32 %v808_v53, 0.0  ;;  %v8760_v42 = vld [vmem:[%s12408_s3 + $0x378] sm:$0xff]   ;;  %v8771_v53 = vld [vmem:[#allocation2 + $0x64] sm:$0xff] }
 0x199   : > { %2229 = vmatmul.mubr.bf16.vlgmr.msra.gmra.mrb[12].mxu1 %v1289_v51  ;;  %6182 = vmatprep.subr.bf16.mxu0 %v8711_v56  ;;  %v815_v1 = vpop.f32.mrb[60].mxu0  ;;  %v923_v51 = vmax.f32 %v811_v54, 0.0 }
 0x19a   : > { %5955 = vmatpush3.bf16.msra.mxu1 %v8484_v15  ;;  %2269 = vmatprep.mubr.bf16.mxu1 %v1292_v9  ;;  %v817_v4 = vpop.f32.mrb[61].mxu0  ;;  %972 = vst [vmem:[#allocation2 + $0xe0] sm:$0xff] %v922_v29  ;;  %v816_v17 = vadd.f32 %v8297_v21, %v815_v1  ;;  %v8769_v1 = vld [vmem:[%s12408_s3 + $0x338] sm:$0xff]  }
 0x19b   : > { %5956 = vmatprep.subr.bf16.mxu1 %v8491_v18  ;;  %v818_v36 = vpop.f32.mrb[62].mxu0  ;;  %973 = vst [vmem:[#allocation2 + $0xe8] sm:$0xff] %v923_v51 }
 0x19c   : > { %6183 = vmatpush3.bf16.msra.mxu0 %v8721_v8  ;;  %v820_v9 = vpop.f32.mrb[63].mxu0  ;;  %v924_v14 = vmax.f32 %v816_v17, 0.0  ;;  %v819_v59 = vadd.f32 %v8297_v21, %v818_v36  ;;  %v2812_v36 = vld [vmem:[#allocation2 + $0x62] sm:$0x1] }
 0x19d   : > { %6184 = vmatprep.subr.bf16.mxu0 %v8728_v48  ;;  %v2443_v9 = vld [vmem:[#allocation2 + $0x6c] sm:$0x1] }
 0x19e   : > { %5957 = vmatpush3.bf16.msra.mxu1 %v8499_v19  ;;  %974 = vst [vmem:[#allocation2 + $0xf0] sm:$0xff] %v924_v14  ;;  %v925_v29 = vmax.f32 %v819_v59, 0.0  ;;  %v2842_v14 = vpack.c.bf16 %v2812_v36, %v8475_v12  ;;  %v8784_v59 = vld [vmem:[%s12408_s3 + $0x40] sm:$0xff]  }
 0x19f   : > { %5958 = vmatprep.subr.bf16.mxu1 %v8505_v20 }
 0x1a0   : > { %6185 = vmatpush3.bf16.msra.mxu0 %v8737_v3  ;;  %975 = vst [vmem:[#allocation2 + $0xf8] sm:$0xff] %v925_v29 }
 0x1a1   : > { %6186 = vmatprep.subr.bf16.mxu0 %v8744_v52  ;;  %v823_v28 = vpop.f32.mrb[64].mxu0 }
 0x1a2   : > { %5959 = vmatpush3.bf16.msra.mxu1 %v8513_v22  ;;  %v825_v4 = vpop.f32.mrb[65].mxu0  ;;  %v824_v54 = vadd.f32 %v8297_v21, %v823_v28 }
 0x1a3   : > { %5960 = vmatprep.subr.bf16.mxu1 %v8519_v25  ;;  %v826_v40 = vpop.f32.mrb[66].mxu0  ;;  %v2462_v25 = vpack.c.bf16 %v2443_v9, %v8771_v53 }
 0x1a4   : > { %6187 = vmatpush3.bf16.msra.mxu0 %v8753_v44  ;;  %v828_v51 = vpop.f32.mrb[67].mxu0  ;;  %v926_v17 = vmax.f32 %v824_v54, 0.0  ;;  %v827_v4 = vadd.f32 %v8297_v21, %v826_v40  ;;  %v8793_v54 = vld [vmem:[%s12408_s3] sm:$0xff]  }
 0x1a5   : > { %6188 = vmatprep.subr.bf16.mxu0 %v8760_v42  ;;  %12720 = vst [vmem:[#allocation12_spill] sm:$0xff] %v8793_v54 }
 0x1a6   : > { %5961 = vmatpush3.bf16.msra.mxu1 %v8530_v27  ;;  %976 = vst [vmem:[#allocation2 + $0x100] sm:$0xff] %v926_v17  ;;  %v927_v28 = vmax.f32 %v827_v4, 0.0  ;;  %v8800_v4 = vld [vmem:[%s12408_s3 + $0x48] sm:$0xff]  }
 0x1a7   : > { %5962 = vmatprep.subr.bf16.mxu1 %v8536_v34  ;;  %12721 = vst [vmem:[#allocation13_spill] sm:$0xff] %v8800_v4 }
 0x1a8   : > { %6189 = vmatpush3.bf16.msra.mxu0 %v8769_v1  ;;  %977 = vst [vmem:[#allocation2 + $0x108] sm:$0xff] %v927_v28  ;;  %v8814_v28 = vld [vmem:[%s12408_s3 + $0x50] sm:$0xff]  }
 0x1a9   : > { %6218 = vmatprep.subr.bf16.mxu0 %v8784_v59  ;;  %v831_v29 = vpop.f32.mrb[68].mxu0  ;;  %12723 = vst [vmem:[#allocation15_spill] sm:$0xff] %v8814_v28 }
 0x1aa   : > { %5963 = vmatpush3.bf16.msra.mxu1 %v8552_v46  ;;  %v832_v40 = vadd.f32 %v8297_v21, %v831_v29  ;;  %v833_v9 = vpop.f32.mrb[69].mxu0 }
 0x1ab   : > { %2745 = vmatmul.mubr.bf16.vlgmr.msra.gmra.mrb[112].mxu0 %v2462_v25  ;;  %5964 = vmatprep.subr.bf16.mxu1 %v8558_v47  ;;  %v834_v12 = vpop.f32.mrb[70].mxu0 }
 0x1ac   : > { %6219 = vmatpush3.bf16.msra.mxu0 %v8793_v54  ;;  %2889 = vmatprep.mubr.bf16.mxu0 %v2842_v14  ;;  %v928_v51 = vmax.f32 %v832_v40, 0.0  ;;  %v835_v36 = vadd.f32 %v8297_v21, %v834_v12  ;;  %v836_v17 = vpop.f32.mrb[71].mxu0  ;;  %v8808_v14 = vld [vmem:[%s12408_s3 + $0x8] sm:$0xff]   ;;  %v8823_v12 = vld [vmem:[%s12408_s3 + $0x2c0] sm:$0xff]  }
 0x1ad   : > { %6220 = vmatprep.subr.bf16.mxu0 %v8800_v4  ;;  %12722 = vst [vmem:[#allocation14_spill] sm:$0xff] %v8808_v14  ;;  %12724 = vst [vmem:[#allocation16_spill] sm:$0xff] %v8823_v12  ;;  %v1268_v17 = vld [vmem:[#allocation2 + $0x30] sm:$0x1]  ;;  %v1274_v4 = vld [vmem:[#allocation2 + $0x3b] sm:$0x1] }
 0x1ae   : > { %5965 = vmatpush3.bf16.msra.mxu1 %v8574_v57  ;;  %978 = vst [vmem:[#allocation2 + $0x110] sm:$0xff] %v928_v51  ;;  %v929_v25 = vmax.f32 %v835_v36, 0.0  ;;  %v8828_v36 = vld [vmem:[%s12408_s3 + $0x10] sm:$0xff]  }
 0x1af   : > { %5966 = vmatprep.subr.bf16.mxu1 %v8581_v0  ;;  %12725 = vst [vmem:[#allocation17_spill] sm:$0xff] %v8828_v36 }
 0x1b0   : > { %6221 = vmatpush3.bf16.msra.mxu0 %v8808_v14  ;;  %979 = vst [vmem:[#allocation2 + $0x118] sm:$0xff] %v929_v25  ;;  %v8838_v14 = vld [vmem:[#allocation2 + $0x33] sm:$0xff] }
 0x1b1   : > { %6222 = vmatprep.subr.bf16.mxu0 %v8814_v28  ;;  %v839_v29 = vpop.f32.mrb[72].mxu0  ;;  %v8835_v28 = vld [vmem:[%s12408_s3 + $0x58] sm:$0xff]   ;;  %v1294_v54 = vpack.c.bf16 %v1274_v4, %v8838_v14 }
 0x1b2   : > { %5967 = vmatpush3.bf16.msra.mxu1 %v8593_v10  ;;  %v840_v40 = vadd.f32 %v8297_v21, %v839_v29  ;;  %v841_v9 = vpop.f32.mrb[73].mxu0  ;;  %12726 = vst [vmem:[#allocation18_spill] sm:$0xff] %v8835_v28 }
 0x1b3   : > { %5968 = vmatprep.subr.bf16.mxu1 %v8599_v13  ;;  %v842_v51 = vpop.f32.mrb[74].mxu0 }
 0x1b4   : > { %6223 = vmatpush3.bf16.msra.mxu0 %v8828_v36  ;;  %v930_v25 = vmax.f32 %v840_v40, 0.0  ;;  %v843_v29 = vadd.f32 %v8297_v21, %v842_v51  ;;  %v844_v9 = vpop.f32.mrb[75].mxu0  ;;  %v8844_v36 = vld [vmem:[%s12408_s3 + $0x280] sm:$0xff]   ;;  %v1291_v51 = vpack.c.bf16 %v1268_v17, %v8305_v49 }
 0x1b5   : > { %6224 = vmatprep.subr.bf16.mxu0 %v8835_v28  ;;  %12727 = vst [vmem:[#allocation19_spill] sm:$0xff] %v8844_v36  ;;  %v8851_v9 = vld [vmem:[%s12408_s3 + $0x2c8] sm:$0xff]   ;;  %v8856_v28 = vld [vmem:[%s12408_s3 + $0x18] sm:$0xff]   ;;  %v8863_v49 = vld [vmem:[%s12408_s3 + $0x60] sm:$0xff]  }
 0x1b6   : > { %5969 = vmatpush3.bf16.msra.mxu1 %v8611_v30  ;;  %980 = vst [vmem:[#allocation2 + $0x120] sm:$0xff] %v930_v25  ;;  %v931_v40 = vmax.f32 %v843_v29, 0.0  ;;  %12728 = vst [vmem:[#allocation20_spill] sm:$0xff] %v8851_v9  ;;  %v8870_v25 = vld [vmem:[%s12408_s3 + $0x288] sm:$0xff]  }
 0x1b7   : > { %5976 = vmatprep.subr.bf16.mxu1 %v8823_v12  ;;  %12729 = vst [vmem:[#allocation21_spill] sm:$0xff] %v8856_v28  ;;  %12730 = vst [vmem:[#allocation22_spill] sm:$0xff] %v8863_v49 }
 0x1b8   : > { %6225 = vmatpush3.bf16.msra.mxu0 %v8856_v28  ;;  %981 = vst [vmem:[#allocation2 + $0x128] sm:$0xff] %v931_v40  ;;  %12731 = vst [vmem:[#allocation23_spill] sm:$0xff] %v8870_v25  ;;  %v8877_v40 = vld [vmem:[%s12408_s3 + $0x2d0] sm:$0xff]   ;;  %v8946_v28 = vld [vmem:[%s12408_s3 + $0x2a0] sm:$0xff]  }
 0x1b9   : > { %2270 = vmatmul.mubr.bf16.vlgmr.msra.gmra.mrb[16].mxu1 %v1291_v51  ;;  %6226 = vmatprep.subr.bf16.mxu0 %v8863_v49  ;;  %v847_v17 = vpop.f32.mrb[76].mxu0  ;;  %12732 = vst [vmem:[#allocation24_spill] sm:$0xff] %v8877_v40  ;;  %v2820_v49 = vld [vmem:[#allocation2 + $0x76] sm:$0x1]  ;;  %12741 = vst [vmem:[#allocation33_spill] sm:$0xff] %v8946_v28 }
 0x1ba   : > { %5977 = vmatpush3.bf16.msra.mxu1 %v8844_v36  ;;  %2310 = vmatprep.mubr.bf16.mxu1 %v1294_v54  ;;  %v848_v4 = vadd.f32 %v8297_v21, %v847_v17  ;;  %v849_v29 = vpop.f32.mrb[77].mxu0  ;;  %v8882_v54 = vld [vmem:[%s12408_s3 + $0x20] sm:$0xff]  }
 0x1bb   : > { %5978 = vmatprep.subr.bf16.mxu1 %v8851_v9  ;;  %v850_v51 = vpop.f32.mrb[78].mxu0  ;;  %12733 = vst [vmem:[#allocation25_spill] sm:$0xff] %v8882_v54  ;;  %v8889_v29 = vld [vmem:[%s12408_s3 + $0x68] sm:$0xff]   ;;  %v8896_v9 = vld [vmem:[%s12408_s3 + $0x290] sm:$0xff]  }
 0x1bc   : > { %6227 = vmatpush3.bf16.msra.mxu0 %v8882_v54  ;;  %v932_v36 = vmax.f32 %v848_v4, 0.0  ;;  %v851_v12 = vadd.f32 %v8297_v21, %v850_v51  ;;  %v852_v17 = vpop.f32.mrb[79].mxu0  ;;  %12734 = vst [vmem:[#allocation26_spill] sm:$0xff] %v8889_v29  ;;  %12735 = vst [vmem:[#allocation27_spill] sm:$0xff] %v8896_v9  ;;  %v8902_v4 = vld [vmem:[%s12408_s3 + $0x2d8] sm:$0xff]   ;;  %v8907_v51 = vld [vmem:[%s12408_s3 + $0x28] sm:$0xff]  }
 0x1bd   : > { %6228 = vmatprep.subr.bf16.mxu0 %v8889_v29  ;;  %12736 = vst [vmem:[#allocation28_spill] sm:$0xff] %v8902_v4  ;;  %12737 = vst [vmem:[#allocation29_spill] sm:$0xff] %v8907_v51  ;;  %v8920_v17 = vld [vmem:[%s12408_s3 + $0x298] sm:$0xff]  }
 0x1be   : > { %5979 = vmatpush3.bf16.msra.mxu1 %v8870_v25  ;;  %982 = vst [vmem:[#allocation2 + $0x130] sm:$0xff] %v932_v36  ;;  %v933_v54 = vmax.f32 %v851_v12, 0.0  ;;  %v8913_v36 = vld [vmem:[%s12408_s3 + $0x70] sm:$0xff]   ;;  %12739 = vst [vmem:[#allocation31_spill] sm:$0xff] %v8920_v17 }
 0x1bf   : > { %5980 = vmatprep.subr.bf16.mxu1 %v8877_v40  ;;  %12738 = vst [vmem:[#allocation30_spill] sm:$0xff] %v8913_v36 }
 0x1c0   : > { %6229 = vmatpush3.bf16.msra.mxu0 %v8907_v51  ;;  %983 = vst [vmem:[#allocation2 + $0x138] sm:$0xff] %v933_v54  ;;  %v8927_v54 = vld [vmem:[%s12408_s3 + $0x2e0] sm:$0xff]  }
 0x1c1   : > { %6230 = vmatprep.subr.bf16.mxu0 %v8913_v36  ;;  %v855_v12 = vpop.f32.mrb[80].mxu0  ;;  %12740 = vst [vmem:[#allocation32_spill] sm:$0xff] %v8927_v54  ;;  %v2810_v36 = vld [vmem:[#allocation2 + $0x58] sm:$0x1] }
 0x1c2   : > { %5981 = vmatpush3.bf16.msra.mxu1 %v8896_v9  ;;  %v856_v40 = vadd.f32 %v8297_v21, %v855_v12  ;;  %v857_v25 = vpop.f32.mrb[81].mxu0  ;;  %v8932_v9 = vld [vmem:[%s12408_s3 + $0x30] sm:$0xff]  }
 0x1c3   : > { %5982 = vmatprep.subr.bf16.mxu1 %v8902_v4  ;;  %v858_v51 = vpop.f32.mrb[82].mxu0  ;;  %v8939_v4 = vld [vmem:[%s12408_s3 + $0x78] sm:$0xff]  }
 0x1c4   : > { %6231 = vmatpush3.bf16.msra.mxu0 %v8932_v9  ;;  %v934_v29 = vmax.f32 %v856_v40, 0.0  ;;  %v859_v12 = vadd.f32 %v8297_v21, %v858_v51  ;;  %v860_v25 = vpop.f32.mrb[83].mxu0  ;;  %v2841_v21 = vpack.c.bf16 %v2810_v36, %v8369_v32  ;;  %v8953_v51 = vld [vmem:[%s12408_s3 + $0x2e8] sm:$0xff]  }
 0x1c5   : > { %6232 = vmatprep.subr.bf16.mxu0 %v8939_v4  ;;  %v8958_v25 = vld [vmem:[%s12408_s3 + $0x38] sm:$0xff]   ;;  %v8972_v36 = vld [vmem:[%s12408_s3 + $0x2a8] sm:$0xff]  }
 0x1c6   : > { %5983 = vmatpush3.bf16.msra.mxu1 %v8920_v17  ;;  %984 = vst [vmem:[#allocation2 + $0x140] sm:$0xff] %v934_v29  ;;  %v935_v40 = vmax.f32 %v859_v12, 0.0  ;;  %12742 = vst [vmem:[#allocation34_spill] sm:$0xff] %v8958_v25  ;;  %v2846_v17 = vpack.c.bf16 %v2820_v49, %v8619_v38  ;;  %v8965_v29 = vld [vmem:[%s12408_s3 + $0x140] sm:$0xff]  }
 0x1c7   : > { %5984 = vmatprep.subr.bf16.mxu1 %v8927_v54  ;;  %12743 = vst [vmem:[#allocation35_spill] sm:$0xff] %v8965_v29  ;;  %v8977_v38 = vld [vmem:[%s12407_s2] ss:$0 sm:$0xff] }
 0x1c8   : > { %6233 = vmatpush3.bf16.msra.mxu0 %v8958_v25  ;;  %985 = vst [vmem:[#allocation2 + $0x148] sm:$0xff] %v935_v40  ;;  %v8984_v40 = vld [vmem:[%s12408_s3 + $0x2f0] sm:$0xff]  }
 0x1c9   : > { %6262 = vmatprep.subr.bf16.mxu0 %v8965_v29  ;;  %v863_v32 = vpop.f32.mrb[84].mxu0 }
 0x1ca   : > { %5985 = vmatpush3.bf16.msra.mxu1 %v8946_v28  ;;  %v864_v49 = vadd.f32 %v8977_v38, %v863_v32  ;;  %v865_v12 = vpop.f32.mrb[85].mxu0 }
 0x1cb   : > { %2890 = vmatmul.mubr.bf16.vlgmr.msra.gmra.mrb[116].mxu0 %v2841_v21  ;;  %5986 = vmatprep.subr.bf16.mxu1 %v8953_v51  ;;  %v866_v28 = vpop.f32.mrb[86].mxu0  ;;  %v8993_v21 = vld [vmem:[%s12408_s3 + $0x2b0] sm:$0xff]  }
 0x1cc   : > { %6263 = vmatpush3.bf16.msra.mxu0 %v8349_v23  ;;  %2971 = vmatprep.mubr.bf16.mxu0 %v2846_v17  ;;  %v936_v54 = vmax.f32 %v864_v49, 0.0  ;;  %v867_v29 = vadd.f32 %v8977_v38, %v866_v28  ;;  %v868_v25 = vpop.f32.mrb[87].mxu0  ;;  %v8999_v23 = vld [vmem:[%s12408_s3 + $0x2f8] sm:$0xff]  }
 0x1cd   : > { %6264 = vmatprep.subr.bf16.mxu0 %v8354_v24  ;;  %12744 = vst [vmem:[#allocation36_spill] sm:$0xff] %v8999_v23  ;;  %v9007_v28 = vld [vmem:[%s12408_s3 + $0x2b8] sm:$0xff]   ;;  %v1278_v25 = vld [vmem:[#allocation2 + $0x4e] sm:$0x1] }
 0x1ce   : > { %5987 = vmatpush3.bf16.msra.mxu1 %v8972_v36  ;;  %986 = vst [vmem:[#allocation2 + $0x150] sm:$0xff] %v936_v54  ;;  %v937_v32 = vmax.f32 %v867_v29, 0.0 }
 0x1cf   : > { %5988 = vmatprep.subr.bf16.mxu1 %v8984_v40 }
 0x1d0   : > { %6265 = vmatpush3.bf16.msra.mxu0 %v8367_v31  ;;  %987 = vst [vmem:[#allocation2 + $0x158] sm:$0xff] %v937_v32  ;;  %v9012_v31 = vld [vmem:[#allocation2 + $0x29] sm:$0xff] }
 0x1d1   : > { %6266 = vmatprep.subr.bf16.mxu0 %v8376_v35  ;;  %v871_v24 = vpop.f32.mrb[88].mxu0  ;;  %v1272_v35 = vld [vmem:[#allocation2 + $0x31] sm:$0x1] }
 0x1d2   : > { %5989 = vmatpush3.bf16.msra.mxu1 %v8993_v21  ;;  %v872_v17 = vadd.f32 %v8977_v38, %v871_v24  ;;  %v873_v54 = vpop.f32.mrb[89].mxu0  ;;  %v1296_v24 = vpack.c.bf16 %v1278_v25, %v8385_v39 }
 0x1d3   : > { %5990 = vmatprep.subr.bf16.mxu1 %v8999_v23  ;;  %v874_v29 = vpop.f32.mrb[90].mxu0  ;;  %v1293_v23 = vpack.c.bf16 %v1272_v35, %v9012_v31 }
 0x1d4   : > { %6267 = vmatpush3.bf16.msra.mxu0 %v8391_v41  ;;  %v938_v49 = vmax.f32 %v872_v17, 0.0  ;;  %v875_v12 = vadd.f32 %v8977_v38, %v874_v29  ;;  %v876_v32 = vpop.f32.mrb[91].mxu0 }
 0x1d5   : > { %6268 = vmatprep.subr.bf16.mxu0 %v8398_v43 }
 0x1d6   : > { %5991 = vmatpush3.bf16.msra.mxu1 %v9007_v28  ;;  %988 = vst [vmem:[#allocation2 + $0x160] sm:$0xff] %v938_v49  ;;  %v939_v54 = vmax.f32 %v875_v12, 0.0  ;;  %v2818_v49 = vld [vmem:[#allocation2 + $0x6c] sm:$0x1] }
 0x1d7   : > { %5998 = vmatprep.subr.bf16.mxu1 %v8617_v37 }
 0x1d8   : > { %6269 = vmatpush3.bf16.msra.mxu0 %v8408_v50  ;;  %989 = vst [vmem:[#allocation2 + $0x168] sm:$0xff] %v939_v54 }
 0x1d9   : > { %2311 = vmatmul.mubr.bf16.vlgmr.msra.gmra.mrb[20].mxu1 %v1293_v23  ;;  %6270 = vmatprep.subr.bf16.mxu0 %v8415_v58  ;;  %v879_v41 = vpop.f32.mrb[92].mxu0 }
 0x1da   : > { %5999 = vmatpush3.bf16.msra.mxu1 %v8632_v55  ;;  %2351 = vmatprep.mubr.bf16.mxu1 %v1296_v24  ;;  %v880_v43 = vadd.f32 %v8977_v38, %v879_v41  ;;  %v881_v17 = vpop.f32.mrb[93].mxu0  ;;  %v2845_v41 = vpack.c.bf16 %v2818_v49, %v8771_v53  ;;  %v1282_v53 = vld [vmem:[#allocation2 + $0x4f] sm:$0x1] }
 0x1db   : > { %6000 = vmatprep.subr.bf16.mxu1 %v8640_v61  ;;  %v882_v39 = vpop.f32.mrb[94].mxu0 }
 0x1dc   : > { %6271 = vmatpush3.bf16.msra.mxu0 %v8422_v62  ;;  %v940_v25 = vmax.f32 %v880_v43, 0.0  ;;  %v883_v29 = vadd.f32 %v8977_v38, %v882_v39  ;;  %v884_v50 = vpop.f32.mrb[95].mxu0  ;;  %v12745_v43 = vld [vmem:[#allocation3_spill] sm:$0xff]  ;;  %v9085_v39 = vld [vmem:[%s12408_s3 + $0x388] sm:$0xff]  }
 0x1dd   : > { %6272 = vmatprep.subr.bf16.mxu0 %v8428_v63  ;;  %12748 = vst [vmem:[#allocation3_spill] sm:$0xff] %v9085_v39  ;;  %v9129_v50 = vld [vmem:[%s12408_s3 + $0x3a0] sm:$0xff]  }
 0x1de   : > { %6001 = vmatpush3.bf16.msra.mxu1 %v8657_v33  ;;  %990 = vst [vmem:[#allocation2 + $0x170] sm:$0xff] %v940_v25  ;;  %v941_v58 = vmax.f32 %v883_v29, 0.0  ;;  %v9091_v25 = vld [vmem:[%s12408_s3 + $0x3d0] sm:$0xff]   ;;  %v2826_v29 = vld [vmem:[#allocation2 + $0x80] sm:$0x1]  ;;  %12753 = vst [vmem:[#allocation39_spill] sm:$0xff] %v9129_v50 }
 0x1df   : > { %6002 = vmatprep.subr.bf16.mxu1 %v8664_v45 }
 0x1e0   : > { %6273 = vmatpush3.bf16.msra.mxu0 %v8437_v2  ;;  %991 = vst [vmem:[#allocation2 + $0x178] sm:$0xff] %v941_v58  ;;  %v9038_v2 = vld [vmem:[#allocation2 + $0x82] sm:$0xff] }
 0x1e1   : > { %6274 = vmatprep.subr.bf16.mxu0 %v8443_v5  ;;  %v887_v23 = vpop.f32.mrb[96].mxu0  ;;  %v2828_v5 = vld [vmem:[#allocation2 + $0x8a] sm:$0x1] }
 0x1e2   : > { %6003 = vmatpush3.bf16.msra.mxu1 %v8682_v60  ;;  %v888_v62 = vadd.f32 %v8977_v38, %v887_v23  ;;  %v889_v35 = vpop.f32.mrb[97].mxu0  ;;  %v12754_v58 = vld [vmem:[#allocation6_spill] sm:$0xff] }
 0x1e3   : > { %6004 = vmatprep.subr.bf16.mxu1 %v8689_v26  ;;  %v890_v63 = vpop.f32.mrb[98].mxu0  ;;  %v12755_v23 = vmax.f32 %v12754_v58, 0.0  ;;  %v9146_v35 = vld [vmem:[%s12408_s3 + $0x3a8] sm:$0xff]   ;;  %v9263_v58 = vld [vmem:[%s12408_s3 + $0xa0] sm:$0xff]  }
 0x1e4   : > { %6275 = vmatpush3.bf16.msra.mxu0 %v8451_v6  ;;  %v942_v12 = vmax.f32 %v888_v62, 0.0  ;;  %v891_v32 = vadd.f32 %v8977_v38, %v890_v63  ;;  %v892_v24 = vpop.f32.mrb[99].mxu0  ;;  %v2850_v6 = vpack.c.bf16 %v2828_v5, %v9038_v2  ;;  %v9152_v63 = vld [vmem:[%s12408_s3 + $0x3f0] sm:$0xff]   ;;  %12766 = vst [vmem:[#allocation49_spill] sm:$0xff] %v9263_v58 }
 0x1e5   : > { %6276 = vmatprep.subr.bf16.mxu0 %v8457_v7  ;;  %v9059_v7 = vld [vmem:[%s12408_s3 + $0x3c0] sm:$0xff]   ;;  %v2849_v62 = vpack.c.bf16 %v2826_v29, %v12755_v23  ;;  %v9247_v29 = vld [vmem:[%s12408_s3 + $0x98] sm:$0xff]  }
 0x1e6   : > { %6005 = vmatpush3.bf16.msra.mxu1 %v8703_v16  ;;  %992 = vst [vmem:[#allocation2 + $0x180] sm:$0xff] %v942_v12  ;;  %v943_v54 = vmax.f32 %v891_v32, 0.0  ;;  %v9162_v32 = vld [vmem:[%s12408_s3 + $0x3b0] sm:$0xff]   ;;  %12764 = vst [vmem:[#allocation47_spill] sm:$0xff] %v9247_v29  ;;  %v9269_v23 = vld [vmem:[%s12409_s4] ss:$0 sm:$0xff] }
 0x1e7   : > { %6006 = vmatprep.subr.bf16.mxu1 %v8711_v56  ;;  %12767 = vst [vmem:[#allocation50_spill] sm:$0xff] %v9269_v23 }
 0x1e8   : > { %6277 = vmatpush3.bf16.msra.mxu0 %v12745_v43  ;;  %993 = vst [vmem:[#allocation2 + $0x188] sm:$0xff] %v943_v54  ;;  %v9182_v54 = vld [vmem:[#allocation2 + $0x3d] sm:$0xff]  ;;  %v2425_v43 = vld [vmem:[#allocation2 + $0x3b] sm:$0x1] }
 0x1e9   : > { %6306 = vmatprep.subr.bf16.mxu0 %v8473_v11  ;;  %v1276_v11 = vld [vmem:[#allocation2 + $0x44] sm:$0x1] }
 0x1ea   : > { %6007 = vmatpush3.bf16.msra.mxu1 %v8721_v8 }
 0x1eb   : > { %2972 = vmatmul.mubr.bf16.vlgmr.msra.gmra.mrb[120].mxu0 %v2845_v41  ;;  %6008 = vmatprep.subr.bf16.mxu1 %v8728_v48  ;;  %v1280_v41 = vld [vmem:[#allocation2 + $0x45] sm:$0x1] }
 0x1ec   : > { %6307 = vmatpush3.bf16.msra.mxu0 %v8484_v15  ;;  %3053 = vmatprep.mubr.bf16.mxu0 %v2850_v6  ;;  %v12746_v15 = vld [vmem:[#allocation5_spill] sm:$0xff]  ;;  %v9205_v6 = vld [vmem:[%s12408_s3 + $0xc8] sm:$0xff]  }
 0x1ed   : > { %6308 = vmatprep.subr.bf16.mxu0 %v8491_v18  ;;  %v9063_v18 = vld [vmem:[#allocation2 + $0x47] sm:$0xff]  ;;  %12749 = vst [vmem:[#allocation5_spill] sm:$0xff] %v9091_v25 }
 0x1ee   : > { %6009 = vmatpush3.bf16.msra.mxu1 %v8737_v3  ;;  %v1298_v17 = vpack.c.bf16 %v1282_v53, %v9063_v18  ;;  %v9229_v53 = vld [vmem:[%s12408_s3 + $0x90] sm:$0xff]  }
 0x1ef   : > { %6010 = vmatprep.subr.bf16.mxu1 %v8744_v52  ;;  %12761 = vst [vmem:[#allocation44_spill] sm:$0xff] %v9229_v53 }
 0x1f0   : > { %6309 = vmatpush3.bf16.msra.mxu0 %v8499_v19  ;;  %v9069_v19 = vld [vmem:[%s12408_s3 + $0x380] sm:$0xff]  }
 0x1f1   : > { %6310 = vmatprep.subr.bf16.mxu0 %v8505_v20  ;;  %v12747_v20 = vld [vmem:[#allocation4_spill] sm:$0xff] }
 0x1f2   : > { %6011 = vmatpush3.bf16.msra.mxu1 %v8753_v44  ;;  %v1295_v38 = vpack.c.bf16 %v1276_v11, %v12747_v20 }
 0x1f3   : > { %6012 = vmatprep.subr.bf16.mxu1 %v8760_v42 }
 0x1f4   : > { %6311 = vmatpush3.bf16.msra.mxu0 %v8513_v22  ;;  %v9076_v22 = vld [vmem:[%s12408_s3 + $0x3c8] sm:$0xff]  }
 0x1f5   : > { %6312 = vmatprep.subr.bf16.mxu0 %v12746_v15 }
 0x1f6   : > { %6013 = vmatpush3.bf16.msra.mxu1 %v8769_v1 }
 0x1f7   : > { %6020 = vmatprep.subr.bf16.mxu1 %v9059_v7 }
 0x1f8   : > { %6313 = vmatpush3.bf16.msra.mxu0 %v8530_v27  ;;  %v9099_v27 = vld [vmem:[%s12408_s3 + $0x390] sm:$0xff]  }
 0x1f9   : > { %2352 = vmatmul.mubr.bf16.vlgmr.msra.gmra.mrb[24].mxu1 %v1295_v38  ;;  %6314 = vmatprep.subr.bf16.mxu0 %v8536_v34  ;;  %12750 = vst [vmem:[#allocation4_spill] sm:$0xff] %v9099_v27  ;;  %v9105_v34 = vld [vmem:[%s12408_s3 + $0x3d8] sm:$0xff]  }
 0x1fa   : > { %6021 = vmatpush3.bf16.msra.mxu1 %v9069_v19  ;;  %2392 = vmatprep.mubr.bf16.mxu1 %v1298_v17  ;;  %12751 = vst [vmem:[#allocation37_spill] sm:$0xff] %v9105_v34  ;;  %v9237_v38 = vld [vmem:[%s12408_s3 + $0xd8] sm:$0xff]   ;;  %v3203_v17 = vld [vmem:[#allocation2 + $0x8a] sm:$0x1] }
 0x1fb   : > { %6022 = vmatprep.subr.bf16.mxu1 %v9076_v22  ;;  %12763 = vst [vmem:[#allocation46_spill] sm:$0xff] %v9237_v38 }
 0x1fc   : > { %6315 = vmatpush3.bf16.msra.mxu0 %v8552_v46  ;;  %v9113_v46 = vld [vmem:[%s12408_s3 + $0x398] sm:$0xff]  }
 0x1fd   : > { %6316 = vmatprep.subr.bf16.mxu0 %v8558_v47  ;;  %v9119_v47 = vld [vmem:[%s12408_s3 + $0x3e0] sm:$0xff]  }
 0x1fe   : > { %6023 = vmatpush3.bf16.msra.mxu1 %v9085_v39  ;;  %12752 = vst [vmem:[#allocation38_spill] sm:$0xff] %v9119_v47 }
 0x1ff   : > { %6024 = vmatprep.subr.bf16.mxu1 %v9091_v25 }
 0x200   : > { %6317 = vmatpush3.bf16.msra.mxu0 %v8574_v57  ;;  %v9123_v57 = vld [vmem:[#allocation2 + $0x96] sm:$0xff] }
 0x201   : > { %6318 = vmatprep.subr.bf16.mxu0 %v8581_v0  ;;  %v2836_v0 = vld [vmem:[#allocation2 + $0x9e] sm:$0x1] }
 0x202   : > { %6025 = vmatpush3.bf16.msra.mxu1 %v9099_v27 }
 0x203   : > { %6026 = vmatprep.subr.bf16.mxu1 %v9105_v34 }
 0x204   : > { %6319 = vmatpush3.bf16.msra.mxu0 %v8593_v10  ;;  %v9137_v10 = vld [vmem:[%s12408_s3 + $0x3e8] sm:$0xff]  }
 0x205   : > { %6320 = vmatprep.subr.bf16.mxu0 %v8599_v13  ;;  %12756 = vst [vmem:[#allocation6_spill] sm:$0xff] %v9137_v10  ;;  %v2854_v13 = vpack.c.bf16 %v2836_v0, %v9123_v57  ;;  %v9253_v0 = vld [vmem:[%s12408_s3 + $0xe0] sm:$0xff]  }
 0x206   : > { %6027 = vmatpush3.bf16.msra.mxu1 %v9113_v46  ;;  %12765 = vst [vmem:[#allocation48_spill] sm:$0xff] %v9253_v0 }
 0x207   : > { %6028 = vmatprep.subr.bf16.mxu1 %v9119_v47 }
 0x208   : > { %6321 = vmatpush3.bf16.msra.mxu0 %v8611_v30 }
 0x209   : > { %6350 = vmatprep.subr.bf16.mxu0 %v8617_v37 }
 0x20a   : > { %6029 = vmatpush3.bf16.msra.mxu1 %v9129_v50 }
 0x20b   : > { %3054 = vmatmul.mubr.bf16.vlgmr.msra.gmra.mrb[124].mxu0 %v2849_v62  ;;  %6030 = vmatprep.subr.bf16.mxu1 %v9137_v10 }
 0x20c   : > { %6351 = vmatpush3.bf16.msra.mxu0 %v8632_v55  ;;  %v5882_v30 = vpop.f32.mrb[0].mxu1  ;;  %3135 = vmatprep.mubr.bf16.mxu0 %v2854_v13  ;;  %v9168_v55 = vld [vmem:[%s12408_s3 + $0x3f8] sm:$0xff]   ;;  %v12770_v13 = vld [vmem:[#allocation13_spill] sm:$0xff] }
 0x20d   : > { %v5883_v37 = vpop.f32.mrb[1].mxu1  ;;  %6352 = vmatprep.subr.bf16.mxu0 %v8640_v61  ;;  %12757 = vst [vmem:[#allocation40_spill] sm:$0xff] %v9168_v55  ;;  %v9178_v61 = vld [vmem:[%s12408_s3 + $0x3b8] sm:$0xff]  }
 0x20e   : > { %v9156_v49 = vadd.f32 %v5883_v37, %v5882_v30  ;;  %6031 = vmatpush3.bf16.msra.mxu1 %v9146_v35  ;;  %v5885_v12 = vpop.f32.mrb[2].mxu1 }
 0x20f   : > { %v5886_v24 = vpop.f32.mrb[3].mxu1  ;;  %6032 = vmatprep.subr.bf16.mxu1 %v9152_v63 }
 0x210   : > { %v9170_v5 = vadd.f32 %v5886_v24, %v5885_v12  ;;  %6353 = vmatpush3.bf16.msra.mxu0 %v8657_v33  ;;  %v1297_v33 = vpack.c.bf16 %v1280_v41, %v9182_v54  ;;  %v2108_v30 = vadd.f32 %v9156_v49, %v9269_v23  ;;  %v9284_v24 = vld [vmem:[%s12408_s3 + $0xa8] sm:$0xff]  }
 0x211   : > { %6354 = vmatprep.subr.bf16.mxu0 %v8664_v45  ;;  %v9190_v45 = vld [vmem:[%s12408_s3 + $0xc0] sm:$0xff]  }
 0x212   : > { %6033 = vmatpush3.bf16.msra.mxu1 %v9162_v32  ;;  %v2111_v49 = vadd.f32 %v9170_v5, %v9269_v23  ;;  %v9310_v5 = vld [vmem:[%s12408_s3 + $0xf8] sm:$0xff]  }
 0x213   : > { %6034 = vmatprep.subr.bf16.mxu1 %v9168_v55 }
 0x214   : > { %6355 = vmatpush3.bf16.msra.mxu0 %v8682_v60  ;;  %v2453_v60 = vpack.c.bf16 %v2425_v43, %v8838_v14  ;;  %v9219_v14 = vld [vmem:[%s12408_s3 + $0xd0] sm:$0xff]  }
 0x215   : > { %6356 = vmatprep.subr.bf16.mxu0 %v8689_v26  ;;  %v9199_v26 = vld [vmem:[%s12408_s3 + $0x80] sm:$0xff]   ;;  %12759 = vst [vmem:[#allocation42_spill] sm:$0xff] %v9219_v14  ;;  %v9290_v43 = vld [vmem:[%s12408_s3 + $0xf0] sm:$0xff]  }
 0x216   : > { %6035 = vmatpush3.bf16.msra.mxu1 %v9178_v61 }
 0x217   : > { %6064 = vmatprep.subr.bf16.mxu1 %v9190_v45 }
 0x218   : > { %6357 = vmatpush3.bf16.msra.mxu0 %v8703_v16  ;;  %v9213_v16 = vld [vmem:[%s12408_s3 + $0x88] sm:$0xff]  }
 0x219   : > { %2393 = vmatmul.mubr.bf16.vlgmr.msra.gmra.mrb[28].mxu1 %v1297_v33  ;;  %6358 = vmatprep.subr.bf16.mxu0 %v8711_v56  ;;  %12758 = vst [vmem:[#allocation41_spill] sm:$0xff] %v9213_v16 }
 0x21a   : > { %6065 = vmatpush3.bf16.msra.mxu1 %v9199_v26  ;;  %2539 = vmatprep.mubr.bf16.mxu1 %v2453_v60 }
 0x21b   : > { %6066 = vmatprep.subr.bf16.mxu1 %v9205_v6 }
 0x21c   : > { %6359 = vmatpush3.bf16.msra.mxu0 %v8721_v8 }
 0x21d   : > { %6360 = vmatprep.subr.bf16.mxu0 %v8728_v48 }
 0x21e   : > { %6067 = vmatpush3.bf16.msra.mxu1 %v9213_v16  ;;  %v6058_v56 = vpop.f32.mrb[100].mxu0 }
 0x21f   : > { %6068 = vmatprep.subr.bf16.mxu1 %v9219_v14  ;;  %v6059_v11 = vpop.f32.mrb[101].mxu0 }
 0x220   : > { %6361 = vmatpush3.bf16.msra.mxu0 %v8737_v3  ;;  %v9223_v8 = vadd.f32 %v6059_v11, %v6058_v56  ;;  %v6061_v48 = vpop.f32.mrb[102].mxu0  ;;  %v9241_v3 = vld [vmem:[#allocation2 + $0x8c] sm:$0xff] }
 0x221   : > { %6362 = vmatprep.subr.bf16.mxu0 %v8744_v52  ;;  %v6062_v15 = vpop.f32.mrb[103].mxu0  ;;  %v2834_v52 = vld [vmem:[#allocation2 + $0x94] sm:$0x1]  ;;  %v12772_v56 = vld [vmem:[#allocation14_spill] sm:$0xff] }
 0x222   : > { %12760 = vst [vmem:[#allocation43_spill] sm:$0xff] %v9223_v8  ;;  %6069 = vmatpush3.bf16.msra.mxu1 %v9229_v53  ;;  %v9232_v20 = vadd.f32 %v6062_v15, %v6061_v48  ;;  %v12773_v11 = vld [vmem:[#allocation15_spill] sm:$0xff]  ;;  %12775 = vst [vmem:[#allocation14_spill] sm:$0xff] %v9310_v5 }
 0x223   : > { %6070 = vmatprep.subr.bf16.mxu1 %v9237_v38  ;;  %v9304_v15 = vld [vmem:[%s12408_s3 + $0xb0] sm:$0xff]  }
 0x224   : > { %12762 = vst [vmem:[#allocation45_spill] sm:$0xff] %v9232_v20  ;;  %6363 = vmatpush3.bf16.msra.mxu0 %v8753_v44  ;;  %v2853_v44 = vpack.c.bf16 %v2834_v52, %v9241_v3  ;;  %12774 = vst [vmem:[#allocation13_spill] sm:$0xff] %v9304_v15  ;;  %v12776_v52 = vld [vmem:[#allocation17_spill] sm:$0xff]  ;;  %v12796_v8 = vld [vmem:[#allocation7_spill] sm:$0xff] }
 0x225   : > { %6364 = vmatprep.subr.bf16.mxu0 %v8760_v42  ;;  %v3233_v42 = vpack.c.bf16 %v3203_v17, %v9038_v2  ;;  %v12769_v2 = vld [vmem:[#allocation12_spill] sm:$0xff]  ;;  %v2423_v17 = vld [vmem:[#allocation2 + $0x31] sm:$0x1] }
 0x226   : > { %6071 = vmatpush3.bf16.msra.mxu1 %v9247_v29  ;;  %12771 = vst [vmem:[#allocation12_spill] sm:$0xff] %v9284_v24 }
 0x227   : > { %6072 = vmatprep.subr.bf16.mxu1 %v9253_v0 }
 0x228   : > { %6365 = vmatpush3.bf16.msra.mxu0 %v8769_v1  ;;  %v9274_v1 = vld [vmem:[%s12408_s3 + $0xe8] sm:$0xff]  }
 0x229   : > { %6394 = vmatprep.subr.bf16.mxu0 %v8784_v59  ;;  %12768 = vst [vmem:[#allocation51_spill] sm:$0xff] %v9274_v1 }
 0x22a   : > { %6073 = vmatpush3.bf16.msra.mxu1 %v9263_v58 }
 0x22b   : > { %3136 = vmatmul.mubr.bf16.vlgmr.msra.gmra.mrb[128].mxu0 %v2853_v44  ;;  %6074 = vmatprep.subr.bf16.mxu1 %v9274_v1  ;;  %v12777_v44 = vld [vmem:[#allocation18_spill] sm:$0xff] }
 0x22c   : > { %v5904_v59 = vpop.f32.mrb[4].mxu1  ;;  %6395 = vmatpush3.bf16.msra.mxu0 %v12769_v2  ;;  %3280 = vmatprep.mubr.bf16.mxu0 %v3233_v42  ;;  %v2433_v42 = vld [vmem:[#allocation2 + $0x4f] sm:$0x1]  ;;  %v2452_v2 = vpack.c.bf16 %v2423_v17, %v9012_v31 }
 0x22d   : > { %v5905_v62 = vpop.f32.mrb[5].mxu1  ;;  %6396 = vmatprep.subr.bf16.mxu0 %v12770_v13  ;;  %v12780_v13 = vld [vmem:[#allocation21_spill] sm:$0xff]  ;;  %v9340_v31 = vld [vmem:[%s12408_s3 + $0x1c8] sm:$0xff]  }
 0x22e   : > { %v5906_v37 = vadd.f32 %v5905_v62, %v5904_v59  ;;  %v5907_v12 = vpop.f32.mrb[6].mxu1  ;;  %6075 = vmatpush3.bf16.msra.mxu1 %v9284_v24  ;;  %v9318_v59 = vld [vmem:[%s12408_s3 + $0xb8] sm:$0xff]   ;;  %v9325_v62 = vld [vmem:[%s12408_s3 + $0x1c0] sm:$0xff]  }
 0x22f   : > { %v5908_v41 = vpop.f32.mrb[7].mxu1  ;;  %6076 = vmatprep.subr.bf16.mxu1 %v9290_v43  ;;  %12778 = vst [vmem:[#allocation15_spill] sm:$0xff] %v9318_v59  ;;  %12779 = vst [vmem:[#allocation17_spill] sm:$0xff] %v9325_v62 }
 0x230   : > { %v9295_v33 = vadd.f32 %v5906_v37, %v2108_v30  ;;  %v5909_v60 = vadd.f32 %v5908_v41, %v5907_v12  ;;  %6397 = vmatpush3.bf16.msra.mxu0 %v12772_v56  ;;  %v2457_v30 = vpack.c.bf16 %v2433_v42, %v9063_v18  ;;  %v12781_v37 = vld [vmem:[#allocation22_spill] sm:$0xff]  ;;  %v9334_v12 = vld [vmem:[%s12408_s3 + $0x180] sm:$0xff]   ;;  %v9354_v56 = vld [vmem:[%s12408_s3 + $0x1d0] sm:$0xff]  }
 0x231   : > { %6398 = vmatprep.subr.bf16.mxu0 %v12773_v11  ;;  %v12782_v41 = vld [vmem:[#allocation25_spill] sm:$0xff]  ;;  %v12783_v18 = vld [vmem:[#allocation26_spill] sm:$0xff] }
 0x232   : > { %v9299_v48 = vadd.f32 %v5909_v60, %v2111_v49  ;;  %6077 = vmatpush3.bf16.msra.mxu1 %v9304_v15  ;;  %v9348_v49 = vld [vmem:[%s12408_s3 + $0x188] sm:$0xff]  }
 0x233   : > { %6078 = vmatprep.subr.bf16.mxu1 %v9310_v5  ;;  %v12786_v42 = vld [vmem:[#allocation30_spill] sm:$0xff] }
 0x234   : > { %6399 = vmatpush3.bf16.msra.mxu0 %v12776_v52  ;;  %v12784_v52 = vld [vmem:[#allocation29_spill] sm:$0xff] }
 0x235   : > { %6400 = vmatprep.subr.bf16.mxu0 %v12777_v44 }
 0x236   : > { %6079 = vmatpush3.bf16.msra.mxu1 %v9318_v59 }
 0x237   : > { %6108 = vmatprep.subr.bf16.mxu1 %v9325_v62 }
 0x238   : > { %6401 = vmatpush3.bf16.msra.mxu0 %v12780_v13  ;;  %v9364_v13 = vld [vmem:[%s12408_s3 + $0x190] sm:$0xff]  }
 0x239   : > { %2540 = vmatmul.mubr.bf16.vlgmr.msra.gmra.mrb[32].mxu1 %v2452_v2  ;;  %6402 = vmatprep.subr.bf16.mxu0 %v12781_v37  ;;  %v9372_v37 = vld [vmem:[%s12408_s3 + $0x1d8] sm:$0xff]  }
 0x23a   : > { %6109 = vmatpush3.bf16.msra.mxu1 %v9334_v12  ;;  %2621 = vmatprep.mubr.bf16.mxu1 %v2457_v30  ;;  %12788 = vst [vmem:[#allocation22_spill] sm:$0xff] %v9372_v37 }
 0x23b   : > { %6110 = vmatprep.subr.bf16.mxu1 %v9340_v31 }
 0x23c   : > { %6403 = vmatpush3.bf16.msra.mxu0 %v12782_v41  ;;  %v3201_v41 = vld [vmem:[#allocation2 + $0x80] sm:$0x1] }
 0x23d   : > { %6404 = vmatprep.subr.bf16.mxu0 %v12783_v18  ;;  %v3211_v18 = vld [vmem:[#allocation2 + $0x9e] sm:$0x1] }
 0x23e   : > { %6111 = vmatpush3.bf16.msra.mxu1 %v9348_v49  ;;  %v6102_v60 = vpop.f32.mrb[104].mxu0 }
 0x23f   : > { %6112 = vmatprep.subr.bf16.mxu1 %v9354_v56  ;;  %v6103_v11 = vpop.f32.mrb[105].mxu0 }
 0x240   : > { %6405 = vmatpush3.bf16.msra.mxu0 %v12784_v52  ;;  %v9358_v17 = vadd.f32 %v6103_v11, %v6102_v60  ;;  %v6105_v44 = vpop.f32.mrb[106].mxu0  ;;  %v9380_v60 = vld [vmem:[%s12408_s3 + $0x198] sm:$0xff]   ;;  %v9386_v11 = vld [vmem:[%s12408_s3 + $0x1e0] sm:$0xff]  }
 0x241   : > { %6406 = vmatprep.subr.bf16.mxu0 %v12786_v42  ;;  %v6106_v2 = vpop.f32.mrb[107].mxu0  ;;  %12789 = vst [vmem:[#allocation25_spill] sm:$0xff] %v9380_v60  ;;  %12790 = vst [vmem:[#allocation26_spill] sm:$0xff] %v9386_v11  ;;  %v7723_v52 = vld [vmem:[#allocation2 + $0x78] sm:$0xff]  ;;  %v3237_v42 = vpack.c.bf16 %v3211_v18, %v9123_v57  ;;  %v9407_v57 = vld [vmem:[%s12408_s3 + $0x100] sm:$0xff]  }
 0x242   : > { %12785 = vst [vmem:[#allocation18_spill] sm:$0xff] %v9358_v17  ;;  %6113 = vmatpush3.bf16.msra.mxu1 %v9364_v13  ;;  %v9367_v30 = vadd.f32 %v6106_v2, %v6105_v44  ;;  %v12791_v44 = vld [vmem:[#allocation34_spill] sm:$0xff]  ;;  %v12792_v2 = vld [vmem:[#allocation35_spill] sm:$0xff] }
 0x243   : > { %6114 = vmatprep.subr.bf16.mxu1 %v9372_v37  ;;  %v9401_v17 = vld [vmem:[%s12408_s3 + $0x1e8] sm:$0xff]   ;;  %12795 = vst [vmem:[#allocation34_spill] sm:$0xff] %v9407_v57 }
 0x244   : > { %12787 = vst [vmem:[#allocation21_spill] sm:$0xff] %v9367_v30  ;;  %6407 = vmatpush3.bf16.msra.mxu0 %v8932_v9  ;;  %v3232_v9 = vpack.c.bf16 %v3201_v41, %v7723_v52  ;;  %v9395_v30 = vld [vmem:[%s12408_s3 + $0x1a0] sm:$0xff]   ;;  %12794 = vst [vmem:[#allocation30_spill] sm:$0xff] %v9401_v17  ;;  %v9413_v52 = vld [vmem:[%s12408_s3 + $0x148] sm:$0xff]  }
 0x245   : > { %6408 = vmatprep.subr.bf16.mxu0 %v8939_v4  ;;  %12793 = vst [vmem:[#allocation29_spill] sm:$0xff] %v9395_v30 }
 0x246   : > { %6115 = vmatpush3.bf16.msra.mxu1 %v9380_v60 }
 0x247   : > { %6116 = vmatprep.subr.bf16.mxu1 %v9386_v11 }
 0x248   : > { %6409 = vmatpush3.bf16.msra.mxu0 %v12791_v44 }
 0x249   : > { %6438 = vmatprep.subr.bf16.mxu0 %v12792_v2 }
 0x24a   : > { %6117 = vmatpush3.bf16.msra.mxu1 %v9395_v30 }
 0x24b   : > { %3281 = vmatmul.mubr.bf16.vlgmr.msra.gmra.mrb[132].mxu0 %v3232_v9  ;;  %6118 = vmatprep.subr.bf16.mxu1 %v9401_v17  ;;  %v12797_v17 = vld [vmem:[#allocation8_spill] sm:$0xff] }
 0x24c   : > { %v5926_v41 = vpop.f32.mrb[8].mxu1  ;;  %6439 = vmatpush3.bf16.msra.mxu0 %v9407_v57  ;;  %3362 = vmatprep.mubr.bf16.mxu0 %v3237_v42  ;;  %v9424_v42 = vld [vmem:[%s12408_s3 + $0x108] sm:$0xff]  }
 0x24d   : > { %v5927_v18 = vpop.f32.mrb[9].mxu1  ;;  %6440 = vmatprep.subr.bf16.mxu0 %v9413_v52 }
 0x24e   : > { %v5928_v9 = vadd.f32 %v5927_v18, %v5926_v41  ;;  %v5929_v20 = vpop.f32.mrb[10].mxu1  ;;  %6119 = vmatpush3.bf16.msra.mxu1 %v12796_v8  ;;  %v9430_v41 = vld [vmem:[%s12408_s3 + $0x150] sm:$0xff]  }
 0x24f   : > { %v5930_v23 = vpop.f32.mrb[11].mxu1  ;;  %6120 = vmatprep.subr.bf16.mxu1 %v12797_v17  ;;  %12798 = vst [vmem:[#allocation35_spill] sm:$0xff] %v9430_v41  ;;  %v2441_v17 = vld [vmem:[#allocation2 + $0x63] sm:$0x1]  ;;  %v9443_v18 = vld [vmem:[%s12408_s3 + $0x110] sm:$0xff]  }
 0x250   : > { %v9419_v30 = vadd.f32 %v5928_v9, %v9295_v33  ;;  %v5931_v57 = vadd.f32 %v5930_v23, %v5929_v20  ;;  %6441 = vmatpush3.bf16.msra.mxu0 %v9424_v42  ;;  %v12799_v33 = vld [vmem:[#allocation9_spill] sm:$0xff]  ;;  %v12800_v20 = vld [vmem:[#allocation10_spill] sm:$0xff]  ;;  %12801 = vst [vmem:[#allocation7_spill] sm:$0xff] %v9443_v18 }
 0x251   : > { %6442 = vmatprep.subr.bf16.mxu0 %v9430_v41  ;;  %v9438_v23 = vld [vmem:[#allocation2 + $0x5b] sm:$0xff]  ;;  %v2431_v9 = vld [vmem:[#allocation2 + $0x45] sm:$0x1] }
 0x252   : > { %v9434_v8 = vadd.f32 %v5931_v57, %v9299_v48  ;;  %6121 = vmatpush3.bf16.msra.mxu1 %v12799_v33  ;;  %v9449_v48 = vld [vmem:[%s12408_s3 + $0x158] sm:$0xff]   ;;  %v12803_v57 = vld [vmem:[#allocation11_spill] sm:$0xff]  ;;  %v2461_v33 = vpack.c.bf16 %v2441_v17, %v9438_v23 }
 0x253   : > { %6122 = vmatprep.subr.bf16.mxu1 %v12800_v20  ;;  %12802 = vst [vmem:[#allocation8_spill] sm:$0xff] %v9449_v48  ;;  %v2456_v20 = vpack.c.bf16 %v2431_v9, %v9182_v54  ;;  %v12804_v41 = vld [vmem:[#allocation16_spill] sm:$0xff]  ;;  %v12807_v17 = vld [vmem:[#allocation19_spill] sm:$0xff]  ;;  %v9479_v9 = vld [vmem:[%s12408_s3 + $0x168] sm:$0xff]  }
 0x254   : > { %6443 = vmatpush3.bf16.msra.mxu0 %v9443_v18  ;;  %v9459_v18 = vld [vmem:[%s12408_s3 + $0x118] sm:$0xff]   ;;  %12810 = vst [vmem:[#allocation16_spill] sm:$0xff] %v9479_v9 }
 0x255   : > { %6444 = vmatprep.subr.bf16.mxu0 %v9449_v48  ;;  %12805 = vst [vmem:[#allocation9_spill] sm:$0xff] %v9459_v18  ;;  %v9465_v48 = vld [vmem:[%s12408_s3 + $0x160] sm:$0xff]   ;;  %v12808_v54 = vld [vmem:[#allocation20_spill] sm:$0xff] }
 0x256   : > { %6123 = vmatpush3.bf16.msra.mxu1 %v12803_v57  ;;  %12806 = vst [vmem:[#allocation10_spill] sm:$0xff] %v9465_v48  ;;  %v12811_v57 = vld [vmem:[#allocation23_spill] sm:$0xff] }
 0x257   : > { %6152 = vmatprep.subr.bf16.mxu1 %v12804_v41  ;;  %v9473_v41 = vld [vmem:[%s12408_s3 + $0x120] sm:$0xff]  }
 0x258   : > { %6445 = vmatpush3.bf16.msra.mxu0 %v9459_v18  ;;  %12809 = vst [vmem:[#allocation11_spill] sm:$0xff] %v9473_v41 }
 0x259   : > { %2622 = vmatmul.mubr.bf16.vlgmr.msra.gmra.mrb[36].mxu1 %v2456_v20  ;;  %6446 = vmatprep.subr.bf16.mxu0 %v9465_v48  ;;  %v12812_v20 = vld [vmem:[#allocation24_spill] sm:$0xff] }
 0x25a   : > { %6153 = vmatpush3.bf16.msra.mxu1 %v12807_v17  ;;  %2703 = vmatprep.mubr.bf16.mxu1 %v2461_v33  ;;  %v9487_v33 = vld [vmem:[%s12408_s3 + $0x128] sm:$0xff]   ;;  %v9493_v17 = vld [vmem:[%s12408_s3 + $0x170] sm:$0xff]  }
 0x25b   : > { %6154 = vmatprep.subr.bf16.mxu1 %v12808_v54  ;;  %12813 = vst [vmem:[#allocation19_spill] sm:$0xff] %v9487_v33  ;;  %12814 = vst [vmem:[#allocation20_spill] sm:$0xff] %v9493_v17  ;;  %v12815_v54 = vld [vmem:[#allocation27_spill] sm:$0xff] }
 0x25c   : > { %6447 = vmatpush3.bf16.msra.mxu0 %v9473_v41  ;;  %v12819_v41 = vld [vmem:[#allocation31_spill] sm:$0xff] }
 0x25d   : > { %6448 = vmatprep.subr.bf16.mxu0 %v9479_v9  ;;  %v12816_v9 = vld [vmem:[#allocation28_spill] sm:$0xff] }
 0x25e   : > { %6155 = vmatpush3.bf16.msra.mxu1 %v12811_v57  ;;  %v9501_v57 = vld [vmem:[%s12408_s3 + $0x130] sm:$0xff]  }
 0x25f   : > { %6156 = vmatprep.subr.bf16.mxu1 %v12812_v20  ;;  %12817 = vst [vmem:[#allocation23_spill] sm:$0xff] %v9501_v57  ;;  %v3209_v20 = vld [vmem:[#allocation2 + $0x94] sm:$0x1] }
 0x260   : > { %6449 = vmatpush3.bf16.msra.mxu0 %v9487_v33  ;;  %v9507_v33 = vld [vmem:[%s12408_s3 + $0x178] sm:$0xff]   ;;  %v3236_v48 = vpack.c.bf16 %v3209_v20, %v9241_v3  ;;  %v9533_v20 = vld [vmem:[%s12408_s3 + $0x200] sm:$0xff]  }
 0x261   : > { %6450 = vmatprep.subr.bf16.mxu0 %v9493_v17  ;;  %12818 = vst [vmem:[#allocation24_spill] sm:$0xff] %v9507_v33  ;;  %v9510_v17 = vld [vmem:[#allocation2 + $0xaa] sm:$0xff]  ;;  %12824 = vst [vmem:[#allocation31_spill] sm:$0xff] %v9533_v20 }
 0x262   : > { %6157 = vmatpush3.bf16.msra.mxu1 %v12815_v54  ;;  %v3219_v54 = vld [vmem:[#allocation2 + $0xb2] sm:$0x1] }
 0x263   : > { %6158 = vmatprep.subr.bf16.mxu1 %v12816_v9  ;;  %v12820_v9 = vld [vmem:[#allocation32_spill] sm:$0xff]  ;;  %v3241_v18 = vpack.c.bf16 %v3219_v54, %v9510_v17 }
 0x264   : > { %6451 = vmatpush3.bf16.msra.mxu0 %v9501_v57  ;;  %v9518_v57 = vld [vmem:[%s12408_s3 + $0x138] sm:$0xff]  }
 0x265   : > { %6452 = vmatprep.subr.bf16.mxu0 %v9507_v33  ;;  %12821 = vst [vmem:[#allocation27_spill] sm:$0xff] %v9518_v57  ;;  %v9525_v33 = vld [vmem:[%s12408_s3 + $0x240] sm:$0xff]  }
 0x266   : > { %6159 = vmatpush3.bf16.msra.mxu1 %v12819_v41  ;;  %12822 = vst [vmem:[#allocation28_spill] sm:$0xff] %v9525_v33  ;;  %v12823_v41 = vld [vmem:[#allocation33_spill] sm:$0xff] }
 0x267   : > { %6160 = vmatprep.subr.bf16.mxu1 %v12820_v9  ;;  %v9539_v9 = vld [vmem:[%s12408_s3 + $0x248] sm:$0xff]  }
 0x268   : > { %6453 = vmatpush3.bf16.msra.mxu0 %v9518_v57  ;;  %12825 = vst [vmem:[#allocation32_spill] sm:$0xff] %v9539_v9 }
 0x269   : > { %6482 = vmatprep.subr.bf16.mxu0 %v9525_v33 }
 0x26a   : > { %6161 = vmatpush3.bf16.msra.mxu1 %v12823_v41 }
 0x26b   : > { %3363 = vmatmul.mubr.bf16.vlgmr.msra.gmra.mrb[136].mxu0 %v3236_v48  ;;  %6162 = vmatprep.subr.bf16.mxu1 %v8953_v51 }
 0x26c   : > { %v5948_v3 = vpop.f32.mrb[12].mxu1  ;;  %6483 = vmatpush3.bf16.msra.mxu0 %v9533_v20  ;;  %3444 = vmatprep.mubr.bf16.mxu0 %v3241_v18  ;;  %v9550_v18 = vld [vmem:[%s12408_s3 + $0x208] sm:$0xff]  }
 0x26d   : > { %v5949_v54 = vpop.f32.mrb[13].mxu1  ;;  %6484 = vmatprep.subr.bf16.mxu0 %v9539_v9  ;;  %12826 = vst [vmem:[#allocation33_spill] sm:$0xff] %v9550_v18 }
 0x26e   : > { %v5950_v48 = vadd.f32 %v5949_v54, %v5948_v3  ;;  %v5951_v41 = vpop.f32.mrb[14].mxu1  ;;  %6163 = vmatpush3.bf16.msra.mxu1 %v8972_v36  ;;  %v9556_v3 = vld [vmem:[%s12408_s3 + $0x250] sm:$0xff]  }
 0x26f   : > { %v5952_v51 = vpop.f32.mrb[15].mxu1  ;;  %6164 = vmatprep.subr.bf16.mxu1 %v8984_v40  ;;  %12827 = vst [vmem:[#allocation52_spill] sm:$0xff] %v9556_v3  ;;  %v12828_v40 = vld [vmem:[#allocation36_spill] sm:$0xff] }
 0x270   : > { %v9545_v33 = vadd.f32 %v5950_v48, %v9419_v30  ;;  %v5953_v20 = vadd.f32 %v5952_v51, %v5951_v41  ;;  %6485 = vmatpush3.bf16.msra.mxu0 %v9550_v18  ;;  %v9567_v30 = vld [vmem:[%s12408_s3 + $0x210] sm:$0xff]   ;;  %v2439_v48 = vld [vmem:[#allocation2 + $0x59] sm:$0x1] }
 0x271   : > { %6486 = vmatprep.subr.bf16.mxu0 %v9556_v3  ;;  %12829 = vst [vmem:[#allocation36_spill] sm:$0xff] %v9567_v30  ;;  %v9570_v54 = vld [vmem:[#allocation2 + $0x51] sm:$0xff] }
 0x272   : > { %v9560_v36 = vadd.f32 %v5953_v20, %v9434_v8  ;;  %6165 = vmatpush3.bf16.msra.mxu1 %v8993_v21  ;;  %v9575_v41 = vld [vmem:[%s12408_s3 + $0x258] sm:$0xff]   ;;  %v9578_v21 = vld [vmem:[#allocation2 + $0x6f] sm:$0xff]  ;;  %v2449_v8 = vld [vmem:[#allocation2 + $0x77] sm:$0x1]  ;;  %v2460_v20 = vpack.c.bf16 %v2439_v48, %v9570_v54 }
 0x273   : > { %6166 = vmatprep.subr.bf16.mxu1 %v12828_v40  ;;  %12830 = vst [vmem:[#allocation53_spill] sm:$0xff] %v9575_v41  ;;  %v9586_v51 = vld [vmem:[%s12408_s3 + $0x218] sm:$0xff]   ;;  %v2465_v40 = vpack.c.bf16 %v2449_v8, %v9578_v21  ;;  %v9607_v48 = vld [vmem:[%s12408_s3 + $0x268] sm:$0xff]  }
 0x274   : > { %6487 = vmatpush3.bf16.msra.mxu0 %v9567_v30  ;;  %12831 = vst [vmem:[#allocation54_spill] sm:$0xff] %v9607_v48  ;;  %v9615_v8 = vld [vmem:[%s12408_s3 + $0x228] sm:$0xff]  }
 0x275   : > { %6488 = vmatprep.subr.bf16.mxu0 %v9575_v41  ;;  %v9593_v41 = vld [vmem:[%s12408_s3 + $0x260] sm:$0xff]   ;;  %12832 = vst [vmem:[#allocation55_spill] sm:$0xff] %v9615_v8 }
 0x276   : > { %6167 = vmatpush3.bf16.msra.mxu1 %v9007_v28  ;;  %v9601_v28 = vld [vmem:[%s12408_s3 + $0x220] sm:$0xff]  }
 0x277   : > { %6196 = vmatprep.subr.bf16.mxu1 %v9059_v7 }
 0x278   : > { %6489 = vmatpush3.bf16.msra.mxu0 %v9586_v51 }
 0x279   : > { %2704 = vmatmul.mubr.bf16.vlgmr.msra.gmra.mrb[40].mxu1 %v2460_v20  ;;  %6490 = vmatprep.subr.bf16.mxu0 %v9593_v41  ;;  %v9621_v20 = vld [vmem:[%s12408_s3 + $0x270] sm:$0xff]  }
 0x27a   : > { %6197 = vmatpush3.bf16.msra.mxu1 %v9069_v19  ;;  %2785 = vmatprep.mubr.bf16.mxu1 %v2465_v40  ;;  %12833 = vst [vmem:[#allocation56_spill] sm:$0xff] %v9621_v20  ;;  %v9629_v40 = vld [vmem:[%s12408_s3 + $0x230] sm:$0xff]  }
 0x27b   : > { %6198 = vmatprep.subr.bf16.mxu1 %v9076_v22  ;;  %12834 = vst [vmem:[#allocation57_spill] sm:$0xff] %v9629_v40 }
 0x27c   : > { %6491 = vmatpush3.bf16.msra.mxu0 %v9601_v28 }
 0x27d   : > { %6492 = vmatprep.subr.bf16.mxu0 %v9607_v48  ;;  %v9655_v48 = vld [vmem:[%s12408_s3 + $0x340] sm:$0xff]  }
 0x27e   : > { %6199 = vmatpush3.bf16.msra.mxu1 %v9085_v39  ;;  %12837 = vst [vmem:[#allocation60_spill] sm:$0xff] %v9655_v48 }
 0x27f   : > { %6200 = vmatprep.subr.bf16.mxu1 %v9091_v25  ;;  %v3217_v25 = vld [vmem:[#allocation2 + $0xa8] sm:$0x1] }
 0x280   : > { %6493 = vmatpush3.bf16.msra.mxu0 %v9615_v8  ;;  %v9635_v8 = vld [vmem:[%s12408_s3 + $0x278] sm:$0xff]  }
 0x281   : > { %6494 = vmatprep.subr.bf16.mxu0 %v9621_v20  ;;  %12835 = vst [vmem:[#allocation58_spill] sm:$0xff] %v9635_v8  ;;  %v9638_v20 = vld [vmem:[#allocation2 + $0xbe] sm:$0xff] }
 0x282   : > { %6201 = vmatpush3.bf16.msra.mxu1 %v9099_v27  ;;  %v3227_v27 = vld [vmem:[#allocation2 + $0xc6] sm:$0x1] }
 0x283   : > { %6202 = vmatprep.subr.bf16.mxu1 %v9105_v34  ;;  %v9642_v34 = vld [vmem:[#allocation2 + $0xa0] sm:$0xff] }
 0x284   : > { %6495 = vmatpush3.bf16.msra.mxu0 %v9629_v40  ;;  %v3240_v39 = vpack.c.bf16 %v3217_v25, %v9642_v34  ;;  %v9648_v40 = vld [vmem:[%s12408_s3 + $0x238] sm:$0xff]  }
 0x285   : > { %6496 = vmatprep.subr.bf16.mxu0 %v9635_v8  ;;  %12836 = vst [vmem:[#allocation59_spill] sm:$0xff] %v9648_v40  ;;  %v3245_v8 = vpack.c.bf16 %v3227_v27, %v9638_v20 }
 0x286   : > { %6203 = vmatpush3.bf16.msra.mxu1 %v9113_v46 }
 0x287   : > { %6204 = vmatprep.subr.bf16.mxu1 %v9119_v47  ;;  %v9663_v47 = vld [vmem:[%s12408_s3 + $0x300] sm:$0xff]  }
 0x288   : > { %6497 = vmatpush3.bf16.msra.mxu0 %v9648_v40  ;;  %12838 = vst [vmem:[#allocation61_spill] sm:$0xff] %v9663_v47  ;;  %v9669_v40 = vld [vmem:[%s12408_s3 + $0x348] sm:$0xff]  }
 0x289   : > { %6526 = vmatprep.subr.bf16.mxu0 %v9655_v48 }
 0x28a   : > { %6205 = vmatpush3.bf16.msra.mxu1 %v9129_v50 }
 0x28b   : > { %3445 = vmatmul.mubr.bf16.vlgmr.msra.gmra.mrb[140].mxu0 %v3240_v39  ;;  %6206 = vmatprep.subr.bf16.mxu1 %v9137_v10 }
 0x28c   : > { %v5970_v25 = vpop.f32.mrb[16].mxu1  ;;  %6527 = vmatpush3.bf16.msra.mxu0 %v9663_v47  ;;  %3526 = vmatprep.mubr.bf16.mxu0 %v3245_v8  ;;  %v9680_v8 = vld [vmem:[%s12408_s3 + $0x308] sm:$0xff]  }
 0x28d   : > { %v5971_v27 = vpop.f32.mrb[17].mxu1  ;;  %6528 = vmatprep.subr.bf16.mxu0 %v9669_v40 }
 0x28e   : > { %v5972_v39 = vadd.f32 %v5971_v27, %v5970_v25  ;;  %v5973_v50 = vpop.f32.mrb[18].mxu1  ;;  %6207 = vmatpush3.bf16.msra.mxu1 %v9146_v35  ;;  %v9686_v25 = vld [vmem:[%s12408_s3 + $0x350] sm:$0xff]  }
 0x28f   : > { %v5974_v10 = vpop.f32.mrb[19].mxu1  ;;  %6208 = vmatprep.subr.bf16.mxu1 %v9152_v63 }
 0x290   : > { %v9675_v48 = vadd.f32 %v5972_v39, %v9545_v33  ;;  %v5975_v47 = vadd.f32 %v5974_v10, %v5973_v50  ;;  %6529 = vmatpush3.bf16.msra.mxu0 %v9680_v8  ;;  %v9697_v50 = vld [vmem:[%s12408_s3 + $0x310] sm:$0xff]   ;;  %v9700_v10 = vld [vmem:[#allocation2 + $0x65] sm:$0xff]  ;;  %v2447_v33 = vld [vmem:[#allocation2 + $0x6d] sm:$0x1] }
 0x291   : > { %6530 = vmatprep.subr.bf16.mxu0 %v9686_v25  ;;  %12839 = vst [vmem:[#allocation62_spill] sm:$0xff] %v9697_v50  ;;  %v9705_v39 = vld [vmem:[%s12408_s3 + $0x358] sm:$0xff]  }
 0x292   : > { %v9690_v27 = vadd.f32 %v5975_v47, %v9560_v36  ;;  %6209 = vmatpush3.bf16.msra.mxu1 %v9162_v32  ;;  %12840 = vst [vmem:[#allocation63_spill] sm:$0xff] %v9705_v39  ;;  %v2816_v47 = vld [vmem:[#allocation2 + $0x63] sm:$0x1]  ;;  %v2464_v36 = vpack.c.bf16 %v2447_v33, %v9700_v10 }
 0x293   : > { %6210 = vmatprep.subr.bf16.mxu1 %v9168_v55  ;;  %v2844_v55 = vpack.c.bf16 %v2816_v47, %v9438_v23  ;;  %v9729_v33 = vld [vmem:[%s12408_s3 + $0x320] sm:$0xff]   ;;  %v9735_v23 = vld [vmem:[%s12408_s3 + $0x368] sm:$0xff]   ;;  %v9749_v47 = vld [vmem:[%s12408_s3 + $0x370] sm:$0xff]  }
 0x294   : > { %6531 = vmatpush3.bf16.msra.mxu0 %v9697_v50  ;;  %v9714_v50 = vld [vmem:[%s12408_s3 + $0x318] sm:$0xff]   ;;  %12842 = vst [vmem:[#allocation65_spill] sm:$0xff] %v9749_v47 }
 0x295   : > { %6532 = vmatprep.subr.bf16.mxu0 %v9705_v39  ;;  %v9721_v39 = vld [vmem:[%s12408_s3 + $0x360] sm:$0xff]  }
 0x296   : > { %6211 = vmatpush3.bf16.msra.mxu1 %v9178_v61 }
 0x297   : > { %6240 = vmatprep.subr.bf16.mxu1 %v9190_v45 }
 0x298   : > { %6533 = vmatpush3.bf16.msra.mxu0 %v9714_v50 }
 0x299   : > { %2786 = vmatmul.mubr.bf16.vlgmr.msra.gmra.mrb[44].mxu1 %v2464_v36  ;;  %6534 = vmatprep.subr.bf16.mxu0 %v9721_v39  ;;  %v9757_v36 = vld [vmem:[%s12408_s3 + $0x330] sm:$0xff]  }
 0x29a   : > { %6241 = vmatpush3.bf16.msra.mxu1 %v9199_v26  ;;  %2930 = vmatprep.mubr.bf16.mxu1 %v2844_v55  ;;  %v9743_v55 = vld [vmem:[%s12408_s3 + $0x328] sm:$0xff]   ;;  %12843 = vst [vmem:[#allocation66_spill] sm:$0xff] %v9757_v36 }
 0x29b   : > { %6242 = vmatprep.subr.bf16.mxu1 %v9205_v6  ;;  %12841 = vst [vmem:[#allocation64_spill] sm:$0xff] %v9743_v55 }
 0x29c   : > { %6535 = vmatpush3.bf16.msra.mxu0 %v9729_v33 }
 0x29d   : > { %6536 = vmatprep.subr.bf16.mxu0 %v9735_v23 }
 0x29e   : > { %6243 = vmatpush3.bf16.msra.mxu1 %v9213_v16  ;;  %v9765_v16 = vld [vmem:[%s12408_s3 + $0x378] sm:$0xff]  }
 0x29f   : > { %6244 = vmatprep.subr.bf16.mxu1 %v9219_v14  ;;  %v9760_v14 = vld [vmem:[#allocation2 + $0xb4] sm:$0xff]  ;;  %12844 = vst [vmem:[#allocation67_spill] sm:$0xff] %v9765_v16 }
 0x2a0   : > { %6537 = vmatpush3.bf16.msra.mxu0 %v9743_v55  ;;  %v3225_v55 = vld [vmem:[#allocation2 + $0xbc] sm:$0x1] }
 0x2a1   : > { %6538 = vmatprep.subr.bf16.mxu0 %v9749_v47  ;;  %v9780_v47 = vld [vmem:[%s12408_s3 + $0x40] sm:$0xff]  }
 0x2a2   : > { %6245 = vmatpush3.bf16.msra.mxu1 %v9229_v53  ;;  %v3594_v53 = vld [vmem:[#allocation2 + $0xb2] sm:$0x1]  ;;  %12846 = vst [vmem:[#allocation69_spill] sm:$0xff] %v9780_v47 }
 0x2a3   : > { %6246 = vmatprep.subr.bf16.mxu1 %v9237_v38  ;;  %v3244_v38 = vpack.c.bf16 %v3225_v55, %v9760_v14 }
 0x2a4   : > { %6539 = vmatpush3.bf16.msra.mxu0 %v9757_v36  ;;  %v9774_v36 = vld [vmem:[%s12408_s3 + $0x338] sm:$0xff]  }
 0x2a5   : > { %6540 = vmatprep.subr.bf16.mxu0 %v9765_v16  ;;  %12845 = vst [vmem:[#allocation68_spill] sm:$0xff] %v9774_v36  ;;  %v9806_v16 = vld [vmem:[%s12408_s3 + $0x8] sm:$0xff]  }
 0x2a6   : > { %6247 = vmatpush3.bf16.msra.mxu1 %v9247_v29  ;;  %v9789_v29 = vld [vmem:[%s12408_s3] sm:$0xff]  }
 0x2a7   : > { %6248 = vmatprep.subr.bf16.mxu1 %v9253_v0  ;;  %v3624_v0 = vpack.c.bf16 %v3594_v53, %v9510_v17  ;;  %12847 = vst [vmem:[#allocation70_spill] sm:$0xff] %v9789_v29  ;;  %v6146_v17 = vpop.f32.mrb[108].mxu0 }
 0x2a8   : > { %6541 = vmatpush3.bf16.msra.mxu0 %v9774_v36 }
 0x2a9   : > { %6570 = vmatprep.subr.bf16.mxu0 %v9780_v47  ;;  %v9795_v47 = vld [vmem:[%s12408_s3 + $0x48] sm:$0xff]  }
 0x2aa   : > { %6249 = vmatpush3.bf16.msra.mxu1 %v9263_v58  ;;  %v6147_v58 = vpop.f32.mrb[109].mxu0 }
 0x2ab   : > { %3527 = vmatmul.mubr.bf16.vlgmr.msra.gmra.mrb[144].mxu0 %v3244_v38  ;;  %6250 = vmatprep.subr.bf16.mxu1 %v9274_v1 }
 0x2ac   : > { %v5992_v55 = vpop.f32.mrb[20].mxu1  ;;  %6571 = vmatpush3.bf16.msra.mxu0 %v9789_v29  ;;  %3671 = vmatprep.mubr.bf16.mxu0 %v3624_v0 }
 0x2ad   : > { %v5993_v36 = vpop.f32.mrb[21].mxu1  ;;  %6572 = vmatprep.subr.bf16.mxu0 %v9795_v47 }
 0x2ae   : > { %v5994_v53 = vadd.f32 %v5993_v36, %v5992_v55  ;;  %v5995_v38 = vpop.f32.mrb[22].mxu1  ;;  %6251 = vmatpush3.bf16.msra.mxu1 %v9284_v24  ;;  %v9809_v36 = vadd.f32 %v6147_v58, %v6146_v17  ;;  %v6149_v55 = vpop.f32.mrb[110].mxu0  ;;  %v9814_v24 = vld [vmem:[%s12408_s3 + $0x50] sm:$0xff]   ;;  %v2814_v17 = vld [vmem:[#allocation2 + $0x59] sm:$0x1] }
 0x2af   : > { %v5996_v1 = vpop.f32.mrb[23].mxu1  ;;  %6252 = vmatprep.subr.bf16.mxu1 %v9290_v43 }
 0x2b0   : > { %v9801_v29 = vadd.f32 %v5994_v53, %v9675_v48  ;;  %v5997_v0 = vadd.f32 %v5996_v1, %v5995_v38  ;;  %6573 = vmatpush3.bf16.msra.mxu0 %v9806_v16  ;;  %12848 = vst [vmem:[#allocation71_spill] sm:$0xff] %v9809_v36  ;;  %v6150_v48 = vpop.f32.mrb[111].mxu0  ;;  %v9827_v38 = vld [vmem:[%s12408_s3 + $0x10] sm:$0xff]  }
 0x2b1   : > { %6574 = vmatprep.subr.bf16.mxu0 %v9814_v24  ;;  %v9821_v53 = vadd.f32 %v6150_v48, %v6149_v55  ;;  %v6190_v58 = vpop.f32.mrb[112].mxu0  ;;  %12850 = vst [vmem:[#allocation73_spill] sm:$0xff] %v9827_v38 }
 0x2b2   : > { %v9818_v1 = vadd.f32 %v5997_v0, %v9690_v27  ;;  %6253 = vmatpush3.bf16.msra.mxu1 %v9304_v15  ;;  %v6191_v36 = vpop.f32.mrb[113].mxu0  ;;  %v9833_v27 = vld [vmem:[%s12408_s3 + $0x58] sm:$0xff]   ;;  %v2824_v0 = vld [vmem:[#allocation2 + $0x77] sm:$0x1] }
 0x2b3   : > { %12849 = vst [vmem:[#allocation72_spill] sm:$0xff] %v9821_v53  ;;  %6254 = vmatprep.subr.bf16.mxu1 %v9310_v5  ;;  %12851 = vst [vmem:[#allocation74_spill] sm:$0xff] %v9833_v27  ;;  %v6193_v55 = vpop.f32.mrb[114].mxu0  ;;  %v2843_v53 = vpack.c.bf16 %v2814_v17, %v9570_v54  ;;  %v2848_v15 = vpack.c.bf16 %v2824_v0, %v9578_v21  ;;  %v9853_v17 = vadd.f32 %v6191_v36, %v6190_v58  ;;  %v9893_v36 = vld [vmem:[%s12408_s3 + $0x30] sm:$0xff]   ;;  %v3592_v58 = vld [vmem:[#allocation2 + $0xa8] sm:$0x1] }
 0x2b4   : > { %6575 = vmatpush3.bf16.msra.mxu0 %v9827_v38  ;;  %v6194_v48 = vpop.f32.mrb[115].mxu0  ;;  %v9842_v38 = vld [vmem:[%s12408_s3 + $0x18] sm:$0xff]   ;;  %12857 = vst [vmem:[#allocation80_spill] sm:$0xff] %v9893_v36 }
 0x2b5   : > { %6576 = vmatprep.subr.bf16.mxu0 %v9833_v27  ;;  %v6234_v5 = vpop.f32.mrb[116].mxu0  ;;  %12852 = vst [vmem:[#allocation75_spill] sm:$0xff] %v9842_v38  ;;  %12853 = vst [vmem:[#allocation76_spill] sm:$0xff] %v9853_v17  ;;  %v9866_v0 = vadd.f32 %v6194_v48, %v6193_v55  ;;  %v3602_v55 = vld [vmem:[#allocation2 + $0xc6] sm:$0x1] }
 0x2b6   : > { %6255 = vmatpush3.bf16.msra.mxu1 %v9318_v59  ;;  %v6235_v27 = vpop.f32.mrb[117].mxu0  ;;  %v9849_v59 = vld [vmem:[%s12408_s3 + $0x60] sm:$0xff]  }
 0x2b7   : > { %6284 = vmatprep.subr.bf16.mxu1 %v9325_v62  ;;  %v6237_v54 = vpop.f32.mrb[118].mxu0  ;;  %12856 = vst [vmem:[#allocation79_spill] sm:$0xff] %v9866_v0  ;;  %v12859_v17 = vld [vmem:[#allocation29_spill] sm:$0xff] }
 0x2b8   : > { %6577 = vmatpush3.bf16.msra.mxu0 %v9842_v38  ;;  %v6238_v62 = vpop.f32.mrb[119].mxu0  ;;  %v9856_v38 = vadd.f32 %v6235_v27, %v6234_v5  ;;  %v9879_v5 = vld [vmem:[%s12408_s3 + $0x28] sm:$0xff]  }
 0x2b9   : > { %2931 = vmatmul.mubr.bf16.vlgmr.msra.gmra.mrb[48].mxu1 %v2843_v53  ;;  %6578 = vmatprep.subr.bf16.mxu0 %v9849_v59  ;;  %v9858_v21 = vadd.f32 %v6238_v62, %v6237_v54  ;;  %v9863_v53 = vld [vmem:[%s12408_s3 + $0x20] sm:$0xff]   ;;  %v9885_v62 = vld [vmem:[%s12408_s3 + $0x70] sm:$0xff]  }
 0x2ba   : > { %6285 = vmatpush3.bf16.msra.mxu1 %v9334_v12  ;;  %3012 = vmatprep.mubr.bf16.mxu1 %v2848_v15  ;;  %12854 = vst [vmem:[#allocation77_spill] sm:$0xff] %v9856_v38  ;;  %v9871_v15 = vld [vmem:[%s12408_s3 + $0x68] sm:$0xff]   ;;  %v3623_v38 = vpack.c.bf16 %v3592_v58, %v9642_v34 }
 0x2bb   : > { %6286 = vmatprep.subr.bf16.mxu1 %v9340_v31  ;;  %12855 = vst [vmem:[#allocation78_spill] sm:$0xff] %v9858_v21 }
 0x2bc   : > { %6579 = vmatpush3.bf16.msra.mxu0 %v9863_v53 }
 0x2bd   : > { %6580 = vmatprep.subr.bf16.mxu0 %v9871_v15 }
 0x2be   : > { %6287 = vmatpush3.bf16.msra.mxu1 %v9348_v49  ;;  %v6278_v27 = vpop.f32.mrb[120].mxu0 }
 0x2bf   : > { %6288 = vmatprep.subr.bf16.mxu1 %v9354_v56  ;;  %v6279_v48 = vpop.f32.mrb[121].mxu0 }
 0x2c0   : > { %6581 = vmatpush3.bf16.msra.mxu0 %v9879_v5  ;;  %v9900_v54 = vadd.f32 %v6279_v48, %v6278_v27  ;;  %v6281_v21 = vpop.f32.mrb[122].mxu0  ;;  %v12864_v48 = vld [vmem:[#allocation7_spill] sm:$0xff] }
 0x2c1   : > { %6582 = vmatprep.subr.bf16.mxu0 %v9885_v62  ;;  %v6282_v0 = vpop.f32.mrb[123].mxu0 }
 0x2c2   : > { %6289 = vmatpush3.bf16.msra.mxu1 %v9364_v13  ;;  %12858 = vst [vmem:[#allocation81_spill] sm:$0xff] %v9900_v54 }
 0x2c3   : > { %6290 = vmatprep.subr.bf16.mxu1 %v9372_v37  ;;  %v12862_v37 = vld [vmem:[#allocation34_spill] sm:$0xff] }
 0x2c4   : > { %6583 = vmatpush3.bf16.msra.mxu0 %v9893_v36 }
 0x2c5   : > { %6584 = vmatprep.subr.bf16.mxu0 %v8939_v4  ;;  %v3628_v4 = vpack.c.bf16 %v3602_v55, %v9638_v20  ;;  %v9934_v55 = vld [vmem:[%s12408_s3 + $0x1b0] sm:$0xff]  }
 0x2c6   : > { %6291 = vmatpush3.bf16.msra.mxu1 %v9380_v60  ;;  %v9906_v60 = vadd.f32 %v6282_v0, %v6281_v21 }
 0x2c7   : > { %6292 = vmatprep.subr.bf16.mxu1 %v9386_v11  ;;  %v12861_v11 = vld [vmem:[#allocation30_spill] sm:$0xff] }
 0x2c8   : > { %6585 = vmatpush3.bf16.msra.mxu0 %v12791_v44  ;;  %12860 = vst [vmem:[#allocation29_spill] sm:$0xff] %v9906_v60  ;;  %v12868_v60 = vld [vmem:[#allocation9_spill] sm:$0xff] }
 0x2c9   : > { %6614 = vmatprep.subr.bf16.mxu0 %v12792_v2  ;;  %v9914_v2 = vld [vmem:[%s12408_s3 + $0x1a8] sm:$0xff]  }
 0x2ca   : > { %6293 = vmatpush3.bf16.msra.mxu1 %v12859_v17 }
 0x2cb   : > { %3672 = vmatmul.mubr.bf16.vlgmr.msra.gmra.mrb[148].mxu0 %v3623_v38  ;;  %6294 = vmatprep.subr.bf16.mxu1 %v12861_v11  ;;  %v9920_v38 = vld [vmem:[%s12408_s3 + $0x1f0] sm:$0xff]  }
 0x2cc   : > { %v6014_v36 = vpop.f32.mrb[24].mxu1  ;;  %6615 = vmatpush3.bf16.msra.mxu0 %v12862_v37  ;;  %3753 = vmatprep.mubr.bf16.mxu0 %v3628_v4  ;;  %v2822_v4 = vld [vmem:[#allocation2 + $0x6d] sm:$0x1] }
 0x2cd   : > { %v6015_v44 = vpop.f32.mrb[25].mxu1  ;;  %6616 = vmatprep.subr.bf16.mxu0 %v9413_v52 }
 0x2ce   : > { %v6016_v34 = vadd.f32 %v6015_v44, %v6014_v36  ;;  %v6017_v58 = vpop.f32.mrb[26].mxu1  ;;  %6295 = vmatpush3.bf16.msra.mxu1 %v9914_v2  ;;  %v12863_v36 = vld [vmem:[#allocation35_spill] sm:$0xff]  ;;  %v12865_v44 = vld [vmem:[#allocation8_spill] sm:$0xff] }
 0x2cf   : > { %v6018_v20 = vpop.f32.mrb[27].mxu1  ;;  %6296 = vmatprep.subr.bf16.mxu1 %v9920_v38 }
 0x2d0   : > { %v9924_v21 = vadd.f32 %v6016_v34, %v9801_v29  ;;  %v6019_v0 = vadd.f32 %v6018_v20, %v6017_v58  ;;  %6617 = vmatpush3.bf16.msra.mxu0 %v9424_v42  ;;  %v9940_v29 = vld [vmem:[%s12408_s3 + $0x1f8] sm:$0xff]   ;;  %v2832_v34 = vld [vmem:[#allocation2 + $0x8b] sm:$0x1]  ;;  %v2847_v20 = vpack.c.bf16 %v2822_v4, %v9700_v10  ;;  %v12872_v4 = vld [vmem:[#allocation11_spill] sm:$0xff] }
 0x2d1   : > { %6618 = vmatprep.subr.bf16.mxu0 %v12863_v36  ;;  %v9950_v58 = vld [vmem:[%s12408_s3 + $0x1b8] sm:$0xff]   ;;  %v9972_v10 = vld [vmem:[%s12408_s3 + $0x2c8] sm:$0xff]  }
 0x2d2   : > { %v9929_v27 = vadd.f32 %v6019_v0, %v9818_v1  ;;  %6297 = vmatpush3.bf16.msra.mxu1 %v9934_v55  ;;  %v9945_v1 = vld [vmem:[#allocation2 + $0x83] sm:$0xff]  ;;  %12866 = vst [vmem:[#allocation30_spill] sm:$0xff] %v9950_v58  ;;  %12871 = vst [vmem:[#allocation82_spill] sm:$0xff] %v9972_v10 }
 0x2d3   : > { %6298 = vmatprep.subr.bf16.mxu1 %v9940_v29  ;;  %v9957_v0 = vld [vmem:[%s12408_s3 + $0x2c0] sm:$0xff]   ;;  %v2852_v54 = vpack.c.bf16 %v2832_v34, %v9945_v1  ;;  %v12873_v34 = vld [vmem:[#allocation16_spill] sm:$0xff] }
 0x2d4   : > { %6619 = vmatpush3.bf16.msra.mxu0 %v12864_v48  ;;  %12867 = vst [vmem:[#allocation34_spill] sm:$0xff] %v9957_v0 }
 0x2d5   : > { %6620 = vmatprep.subr.bf16.mxu0 %v12865_v44  ;;  %v12869_v44 = vld [vmem:[#allocation10_spill] sm:$0xff] }
 0x2d6   : > { %6299 = vmatpush3.bf16.msra.mxu1 %v9950_v58  ;;  %v9966_v58 = vld [vmem:[%s12408_s3 + $0x280] sm:$0xff]  }
 0x2d7   : > { %6328 = vmatprep.subr.bf16.mxu1 %v9957_v0  ;;  %12870 = vst [vmem:[#allocation35_spill] sm:$0xff] %v9966_v58 }
 0x2d8   : > { %6621 = vmatpush3.bf16.msra.mxu0 %v12868_v60  ;;  %v12878_v60 = vld [vmem:[#allocation20_spill] sm:$0xff] }
 0x2d9   : > { %3013 = vmatmul.mubr.bf16.vlgmr.msra.gmra.mrb[52].mxu1 %v2847_v20  ;;  %6622 = vmatprep.subr.bf16.mxu0 %v12869_v44  ;;  %v9980_v20 = vld [vmem:[%s12408_s3 + $0x288] sm:$0xff]   ;;  %v12876_v44 = vld [vmem:[#allocation19_spill] sm:$0xff] }
 0x2da   : > { %6329 = vmatpush3.bf16.msra.mxu1 %v9966_v58  ;;  %3094 = vmatprep.mubr.bf16.mxu1 %v2852_v54  ;;  %12874 = vst [vmem:[#allocation83_spill] sm:$0xff] %v9980_v20  ;;  %v9986_v54 = vld [vmem:[%s12408_s3 + $0x2d0] sm:$0xff]  }
 0x2db   : > { %6330 = vmatprep.subr.bf16.mxu1 %v9972_v10  ;;  %12875 = vst [vmem:[#allocation84_spill] sm:$0xff] %v9986_v54 }
 0x2dc   : > { %6623 = vmatpush3.bf16.msra.mxu0 %v12872_v4 }
 0x2dd   : > { %6624 = vmatprep.subr.bf16.mxu0 %v12873_v34 }
 0x2de   : > { %6331 = vmatpush3.bf16.msra.mxu1 %v9980_v20  ;;  %v6322_v58 = vpop.f32.mrb[124].mxu0  ;;  %v9996_v20 = vld [vmem:[%s12408_s3 + $0x290] sm:$0xff]  }
 0x2df   : > { %6332 = vmatprep.subr.bf16.mxu1 %v9986_v54  ;;  %v6323_v10 = vpop.f32.mrb[125].mxu0  ;;  %12879 = vst [vmem:[#allocation20_spill] sm:$0xff] %v9996_v20  ;;  %v10004_v54 = vld [vmem:[%s12408_s3 + $0x2d8] sm:$0xff]  }
 0x2e0   : > { %6625 = vmatpush3.bf16.msra.mxu0 %v12876_v44  ;;  %v9990_v4 = vadd.f32 %v6323_v10, %v6322_v58  ;;  %v6325_v34 = vpop.f32.mrb[126].mxu0  ;;  %12881 = vst [vmem:[#allocation86_spill] sm:$0xff] %v10004_v54  ;;  %v12882_v58 = vld [vmem:[#allocation23_spill] sm:$0xff]  ;;  %v12883_v10 = vld [vmem:[#allocation24_spill] sm:$0xff] }
 0x2e1   : > { %6626 = vmatprep.subr.bf16.mxu0 %v12878_v60  ;;  %v6326_v0 = vpop.f32.mrb[127].mxu0 }
 0x2e2   : > { %12877 = vst [vmem:[#allocation19_spill] sm:$0xff] %v9990_v4  ;;  %6333 = vmatpush3.bf16.msra.mxu1 %v9996_v20  ;;  %v9999_v48 = vadd.f32 %v6326_v0, %v6325_v34  ;;  %v10012_v4 = vld [vmem:[%s12408_s3 + $0x298] sm:$0xff]   ;;  %v10018_v34 = vld [vmem:[%s12408_s3 + $0x2e0] sm:$0xff]  }
 0x2e3   : > { %6334 = vmatprep.subr.bf16.mxu1 %v10004_v54  ;;  %12884 = vst [vmem:[#allocation87_spill] sm:$0xff] %v10012_v4  ;;  %v3600_v0 = vld [vmem:[#allocation2 + $0xbc] sm:$0x1]  ;;  %12885 = vst [vmem:[#allocation88_spill] sm:$0xff] %v10018_v34 }
 0x2e4   : > { %12880 = vst [vmem:[#allocation85_spill] sm:$0xff] %v9999_v48  ;;  %6627 = vmatpush3.bf16.msra.mxu0 %v12882_v58  ;;  %v10021_v48 = vld [vmem:[#allocation2 + $0xd2] sm:$0xff]  ;;  %v3610_v58 = vld [vmem:[#allocation2 + $0xda] sm:$0x1] }
 0x2e5   : > { %6628 = vmatprep.subr.bf16.mxu0 %v12883_v10  ;;  %v3627_v10 = vpack.c.bf16 %v3600_v0, %v9760_v14  ;;  %v12886_v54 = vld [vmem:[#allocation28_spill] sm:$0xff]  ;;  %v3632_v20 = vpack.c.bf16 %v3610_v58, %v10021_v48  ;;  %v12889_v0 = vld [vmem:[#allocation31_spill] sm:$0xff]  ;;  %v10045_v58 = vld [vmem:[%s12408_s3 + $0x2a8] sm:$0xff]  }
 0x2e6   : > { %6335 = vmatpush3.bf16.msra.mxu1 %v10012_v4  ;;  %v10029_v4 = vld [vmem:[%s12408_s3 + $0x2a0] sm:$0xff]  }
 0x2e7   : > { %6336 = vmatprep.subr.bf16.mxu1 %v10018_v34  ;;  %12887 = vst [vmem:[#allocation89_spill] sm:$0xff] %v10029_v4  ;;  %v10036_v34 = vld [vmem:[%s12408_s3 + $0x2e8] sm:$0xff]  }
 0x2e8   : > { %6629 = vmatpush3.bf16.msra.mxu0 %v9518_v57  ;;  %12888 = vst [vmem:[#allocation90_spill] sm:$0xff] %v10036_v34 }
 0x2e9   : > { %6658 = vmatprep.subr.bf16.mxu0 %v12886_v54 }
 0x2ea   : > { %6337 = vmatpush3.bf16.msra.mxu1 %v10029_v4 }
 0x2eb   : > { %3754 = vmatmul.mubr.bf16.vlgmr.msra.gmra.mrb[152].mxu0 %v3627_v10  ;;  %6338 = vmatprep.subr.bf16.mxu1 %v10036_v34  ;;  %v10051_v34 = vld [vmem:[%s12408_s3 + $0x2f0] sm:$0xff]  }
 0x2ec   : > { %v6036_v14 = vpop.f32.mrb[28].mxu1  ;;  %6659 = vmatpush3.bf16.msra.mxu0 %v12889_v0  ;;  %3835 = vmatprep.mubr.bf16.mxu0 %v3632_v20  ;;  %12890 = vst [vmem:[#allocation31_spill] sm:$0xff] %v10051_v34 }
 0x2ed   : > { %v6037_v54 = vpop.f32.mrb[29].mxu1  ;;  %6660 = vmatprep.subr.bf16.mxu0 %v9539_v9 }
 0x2ee   : > { %v6038_v57 = vadd.f32 %v6037_v54, %v6036_v14  ;;  %v6039_v4 = vpop.f32.mrb[30].mxu1  ;;  %6339 = vmatpush3.bf16.msra.mxu1 %v10045_v58 }
 0x2ef   : > { %v6040_v10 = vpop.f32.mrb[31].mxu1  ;;  %6340 = vmatprep.subr.bf16.mxu1 %v10051_v34  ;;  %v2840_v34 = vld [vmem:[#allocation2 + $0x9f] sm:$0x1] }
 0x2f0   : > { %v2395_v20 = vadd.f32 %v6038_v57, %v9924_v21  ;;  %v6041_v9 = vadd.f32 %v6040_v10, %v6039_v4  ;;  %6661 = vmatpush3.bf16.msra.mxu0 %v9550_v18  ;;  %v10066_v57 = vld [vmem:[%s12408_s3 + $0x2b0] sm:$0xff]   ;;  %v10072_v21 = vld [vmem:[%s12408_s3 + $0x2f8] sm:$0xff]   ;;  %v12895_v18 = vld [vmem:[#allocation53_spill] sm:$0xff] }
 0x2f1   : > { %6662 = vmatprep.subr.bf16.mxu0 %v9556_v3  ;;  %12891 = vst [vmem:[#allocation91_spill] sm:$0xff] %v10066_v57  ;;  %12892 = vst [vmem:[#allocation92_spill] sm:$0xff] %v10072_v21 }
 0x2f2   : > { %v2401_v54 = vmax.f32 %v2395_v20, 0.0  ;;  %v2398_v14 = vadd.f32 %v6041_v9, %v9929_v27  ;;  %6341 = vmatpush3.bf16.msra.mxu1 %v10066_v57  ;;  %v10076_v9 = vld [vmem:[#allocation2 + $0x79] sm:$0xff]  ;;  %v2830_v27 = vld [vmem:[#allocation2 + $0x81] sm:$0x1]  ;;  %v2415_v57 = vld [vmem:[%s10060_s14 + $0x4] sm:$0x1] }
 0x2f3   : > { %6342 = vmatprep.subr.bf16.mxu1 %v10072_v21  ;;  %v10078_v20 = vld [vmem:[#allocation2 + $0x97] sm:$0xff] }
 0x2f4   : > { %v5848_v4 = vpack.c.bf16 %v2401_v54, %v2401_v54  ;;  %v2402_v10 = vmax.f32 %v2398_v14, 0.0  ;;  %6663 = vmatpush3.bf16.msra.mxu0 %v9567_v30  ;;  %v10090_v54 = vld [vmem:[%s12408_s3 + $0x2b8] sm:$0xff]   ;;  %v2851_v14 = vpack.c.bf16 %v2830_v27, %v10076_v9  ;;  %v12905_v27 = vld [vmem:[#allocation57_spill] sm:$0xff] }
 0x2f5   : > { %6664 = vmatprep.subr.bf16.mxu0 %v12895_v18  ;;  %v2856_v18 = vpack.c.bf16 %v2840_v34, %v10078_v20  ;;  %v12899_v34 = vld [vmem:[#allocation55_spill] sm:$0xff] }
 0x2f6   : > { %2411 = vst [vmem:[%s10060_s14] sm:$0xf] %v5848_v4  ;;  %v5849_v21 = vpack.c.bf16 %v2402_v10, %v2402_v10  ;;  %6343 = vmatpush3.bf16.msra.mxu1 %v10090_v54  ;;  %v12896_v4 = vld [vmem:[#allocation54_spill] sm:$0xff]  ;;  %v12901_v10 = vld [vmem:[#allocation56_spill] sm:$0xff] }
 0x2f7   : > { %6372 = vmatprep.subr.bf16.mxu1 %v9059_v7  ;;  %v12897_v7 = vld [vmem:[#allocation3_spill] sm:$0xff] }
 0x2f8   : > { %v2416_v30 = vsel %vm10080_vm2, %v5849_v21, %v2415_v57  ;;  %6665 = vmatpush3.bf16.msra.mxu0 %v9586_v51  ;;  %v12898_v21 = vld [vmem:[#allocation5_spill] sm:$0xff] }
 0x2f9   : > { %2417 = vst [vmem:[%s10060_s14 + $0x4] sm:$0x1] %v2416_v30  ;;  %3095 = vmatmul.mubr.bf16.vlgmr.msra.gmra.mrb[56].mxu1 %v2851_v14  ;;  %6666 = vmatprep.subr.bf16.mxu0 %v9593_v41  ;;  %v12906_v14 = vld [vmem:[#allocation58_spill] sm:$0xff] }
 0x2fa   : > { %6373 = vmatpush3.bf16.msra.mxu1 %v9069_v19  ;;  %3176 = vmatprep.mubr.bf16.mxu1 %v2856_v18  ;;  %v12902_v18 = vld [vmem:[#allocation4_spill] sm:$0xff] }
 0x2fb   : > { %6374 = vmatprep.subr.bf16.mxu1 %v9076_v22 }
 0x2fc   : > { %6667 = vmatpush3.bf16.msra.mxu0 %v9601_v28  ;;  %v12904_v28 = vld [vmem:[#allocation37_spill] sm:$0xff] }
 0x2fd   : > { %6668 = vmatprep.subr.bf16.mxu0 %v12896_v4  ;;  %v10118_v4 = vld [vmem:[#allocation2 + $0xc8] sm:$0xff] }
 0x2fe   : > { %6375 = vmatpush3.bf16.msra.mxu1 %v12897_v7  ;;  %v6366_v57 = vpop.f32.mrb[128].mxu0  ;;  %v3608_v7 = vld [vmem:[#allocation2 + $0xd0] sm:$0x1] }
 0x2ff   : > { %6376 = vmatprep.subr.bf16.mxu1 %v12898_v21  ;;  %v6367_v51 = vpop.f32.mrb[129].mxu0  ;;  %v10121_v21 = vld [vmem:[#allocation2 + $0xe6] sm:$0xff] }
 0x300   : > { %6669 = vmatpush3.bf16.msra.mxu0 %v12899_v34  ;;  %v10108_v30 = vadd.f32 %v6367_v51, %v6366_v57  ;;  %v6369_v41 = vpop.f32.mrb[130].mxu0  ;;  %v12907_v57 = vld [vmem:[#allocation38_spill] sm:$0xff]  ;;  %v12908_v34 = vld [vmem:[#allocation59_spill] sm:$0xff] }
 0x301   : > { %6670 = vmatprep.subr.bf16.mxu0 %v12901_v10  ;;  %v6370_v19 = vpop.f32.mrb[131].mxu0  ;;  %v3618_v51 = vld [vmem:[#allocation2 + $0xee] sm:$0x1]  ;;  %v12909_v10 = vld [vmem:[#allocation60_spill] sm:$0xff] }
 0x302   : > { %12900 = vst [vmem:[#allocation54_spill] sm:$0xff] %v10108_v30  ;;  %6377 = vmatpush3.bf16.msra.mxu1 %v12902_v18  ;;  %v10112_v22 = vadd.f32 %v6370_v19, %v6369_v41  ;;  %v3631_v41 = vpack.c.bf16 %v3608_v7, %v10118_v4  ;;  %v12910_v19 = vld [vmem:[#allocation39_spill] sm:$0xff]  ;;  %v3636_v18 = vpack.c.bf16 %v3618_v51, %v10121_v21  ;;  %v12915_v51 = vld [vmem:[#allocation45_spill] sm:$0xff] }
 0x303   : > { %6378 = vmatprep.subr.bf16.mxu1 %v12904_v28 }
 0x304   : > { %12903 = vst [vmem:[#allocation3_spill] sm:$0xff] %v10112_v22  ;;  %6671 = vmatpush3.bf16.msra.mxu0 %v12905_v27  ;;  %v12912_v27 = vld [vmem:[#allocation61_spill] sm:$0xff] }
 0x305   : > { %6672 = vmatprep.subr.bf16.mxu0 %v12906_v14 }
 0x306   : > { %6379 = vmatpush3.bf16.msra.mxu1 %v9113_v46  ;;  %v12911_v46 = vld [vmem:[#allocation6_spill] sm:$0xff] }
 0x307   : > { %6380 = vmatprep.subr.bf16.mxu1 %v12907_v57  ;;  %v12913_v57 = vld [vmem:[#allocation50_spill] sm:$0xff] }
 0x308   : > { %6673 = vmatpush3.bf16.msra.mxu0 %v12908_v34  ;;  %v12914_v34 = vld [vmem:[#allocation43_spill] sm:$0xff] }
 0x309   : > { %6702 = vmatprep.subr.bf16.mxu0 %v12909_v10  ;;  %v2501_v22 = vadd.f32 %v12914_v34, %v12913_v57  ;;  %v12919_v34 = vld [vmem:[#allocation21_spill] sm:$0xff] }
 0x30a   : > { %6381 = vmatpush3.bf16.msra.mxu1 %v12910_v19 }
 0x30b   : > { %3836 = vmatmul.mubr.bf16.vlgmr.msra.gmra.mrb[156].mxu0 %v3631_v41  ;;  %6382 = vmatprep.subr.bf16.mxu1 %v12911_v46  ;;  %v2504_v41 = vadd.f32 %v12915_v51, %v12913_v57  ;;  %v12925_v51 = vld [vmem:[#allocation44_spill] sm:$0xff] }
 0x30c   : > { %v6080_v28 = vpop.f32.mrb[32].mxu1  ;;  %6703 = vmatpush3.bf16.msra.mxu0 %v12912_v27  ;;  %3917 = vmatprep.mubr.bf16.mxu0 %v3636_v18  ;;  %v12916_v18 = vld [vmem:[#allocation18_spill] sm:$0xff]  ;;  %v12917_v27 = vld [vmem:[#allocation40_spill] sm:$0xff] }
 0x30d   : > { %v6081_v14 = vpop.f32.mrb[33].mxu1  ;;  %6704 = vmatprep.subr.bf16.mxu0 %v9669_v40 }
 0x30e   : > { %v6082_v7 = vadd.f32 %v6081_v14, %v6080_v28  ;;  %v6083_v30 = vpop.f32.mrb[34].mxu1  ;;  %6383 = vmatpush3.bf16.msra.mxu1 %v9146_v35  ;;  %v12918_v35 = vld [vmem:[#allocation62_spill] sm:$0xff] }
 0x30f   : > { %v6084_v10 = vpop.f32.mrb[35].mxu1  ;;  %6384 = vmatprep.subr.bf16.mxu1 %v9152_v63  ;;  %v10143_v14 = vld [vmem:[#allocation2 + $0x8d] sm:$0xff]  ;;  %v2838_v63 = vld [vmem:[#allocation2 + $0x95] sm:$0x1] }
 0x310   : > { %v2542_v19 = vadd.f32 %v6082_v7, %v2501_v22  ;;  %v6085_v46 = vadd.f32 %v6084_v10, %v6083_v30  ;;  %6705 = vmatpush3.bf16.msra.mxu0 %v9680_v8  ;;  %v12920_v22 = vld [vmem:[#allocation63_spill] sm:$0xff]  ;;  %v3207_v30 = vld [vmem:[#allocation2 + $0x8b] sm:$0x1]  ;;  %v2855_v8 = vpack.c.bf16 %v2838_v63, %v10143_v14  ;;  %v12923_v7 = vld [vmem:[#allocation64_spill] sm:$0xff] }
 0x311   : > { %6706 = vmatprep.subr.bf16.mxu0 %v9686_v25  ;;  %v12924_v10 = vld [vmem:[#allocation65_spill] sm:$0xff] }
 0x312   : > { %v2545_v40 = vadd.f32 %v6085_v46, %v2504_v41  ;;  %6385 = vmatpush3.bf16.msra.mxu1 %v9162_v32  ;;  %v2583_v28 = vadd.f32 %v12916_v18, %v2542_v19  ;;  %v3235_v32 = vpack.c.bf16 %v3207_v30, %v9945_v1  ;;  %v12928_v41 = vld [vmem:[#allocation67_spill] sm:$0xff]  ;;  %v10170_v46 = vld [vmem:[#allocation2 + $0xdc] sm:$0xff] }
 0x313   : > { %6386 = vmatprep.subr.bf16.mxu1 %v12917_v27  ;;  %v12929_v19 = vld [vmem:[#allocation47_spill] sm:$0xff]  ;;  %v12930_v18 = vld [vmem:[#allocation48_spill] sm:$0xff] }
 0x314   : > { %6707 = vmatpush3.bf16.msra.mxu0 %v12918_v35  ;;  %v2586_v57 = vadd.f32 %v12919_v34, %v2545_v40  ;;  %v3616_v40 = vld [vmem:[#allocation2 + $0xe4] sm:$0x1]  ;;  %v3985_v27 = vld [vmem:[#allocation2 + $0xda] sm:$0x1] }
 0x315   : > { %6708 = vmatprep.subr.bf16.mxu0 %v12920_v22  ;;  %v12931_v35 = vld [vmem:[#allocation68_spill] sm:$0xff]  ;;  %v3635_v63 = vpack.c.bf16 %v3616_v40, %v10170_v46  ;;  %v12932_v34 = vld [vmem:[#allocation69_spill] sm:$0xff]  ;;  %v4015_v30 = vpack.c.bf16 %v3985_v27, %v10021_v48  ;;  %v12942_v27 = vld [vmem:[#allocation74_spill] sm:$0xff] }
 0x316   : > { %6387 = vmatpush3.bf16.msra.mxu1 %v9178_v61  ;;  %v12921_v61 = vld [vmem:[#allocation41_spill] sm:$0xff] }
 0x317   : > { %6416 = vmatprep.subr.bf16.mxu1 %v9190_v45  ;;  %v12922_v45 = vld [vmem:[#allocation42_spill] sm:$0xff]  ;;  %v12933_v22 = vld [vmem:[#allocation49_spill] sm:$0xff] }
 0x318   : > { %6709 = vmatpush3.bf16.msra.mxu0 %v9714_v50  ;;  %v12941_v40 = vld [vmem:[#allocation73_spill] sm:$0xff] }
 0x319   : > { %3177 = vmatmul.mubr.bf16.vlgmr.msra.gmra.mrb[60].mxu1 %v2855_v8  ;;  %6710 = vmatprep.subr.bf16.mxu0 %v9721_v39  ;;  %v12934_v8 = vld [vmem:[#allocation51_spill] sm:$0xff] }
 0x31a   : > { %6417 = vmatpush3.bf16.msra.mxu1 %v9199_v26  ;;  %3321 = vmatprep.mubr.bf16.mxu1 %v3235_v32 }
 0x31b   : > { %6418 = vmatprep.subr.bf16.mxu1 %v9205_v6 }
 0x31c   : > { %6711 = vmatpush3.bf16.msra.mxu0 %v9729_v33  ;;  %v12926_v33 = vld [vmem:[#allocation46_spill] sm:$0xff] }
 0x31d   : > { %6712 = vmatprep.subr.bf16.mxu0 %v9735_v23  ;;  %v12927_v23 = vld [vmem:[#allocation66_spill] sm:$0xff] }
 0x31e   : > { %6419 = vmatpush3.bf16.msra.mxu1 %v12921_v61  ;;  %v6410_v25 = vpop.f32.mrb[132].mxu0  ;;  %v12935_v61 = vld [vmem:[#allocation70_spill] sm:$0xff] }
 0x31f   : > { %6420 = vmatprep.subr.bf16.mxu1 %v12922_v45  ;;  %v6411_v50 = vpop.f32.mrb[133].mxu0 }
 0x320   : > { %6713 = vmatpush3.bf16.msra.mxu0 %v12923_v7  ;;  %v10160_v1 = vadd.f32 %v6411_v50, %v6410_v25  ;;  %v6413_v39 = vpop.f32.mrb[134].mxu0  ;;  %v12936_v7 = vld [vmem:[#allocation12_spill] sm:$0xff] }
 0x321   : > { %6714 = vmatprep.subr.bf16.mxu0 %v12924_v10  ;;  %v6414_v26 = vpop.f32.mrb[135].mxu0 }
 0x322   : > { %6421 = vmatpush3.bf16.msra.mxu1 %v12925_v51  ;;  %v10164_v6 = vadd.f32 %v6414_v26, %v6413_v39  ;;  %v12937_v51 = vld [vmem:[#allocation71_spill] sm:$0xff] }
 0x323   : > { %6422 = vmatprep.subr.bf16.mxu1 %v12926_v33 }
 0x324   : > { %6715 = vmatpush3.bf16.msra.mxu0 %v12927_v23  ;;  %v12938_v23 = vld [vmem:[#allocation13_spill] sm:$0xff] }
 0x325   : > { %6716 = vmatprep.subr.bf16.mxu0 %v12928_v41  ;;  %v12939_v41 = vld [vmem:[#allocation14_spill] sm:$0xff] }
 0x326   : > { %6423 = vmatpush3.bf16.msra.mxu1 %v12929_v19 }
 0x327   : > { %6424 = vmatprep.subr.bf16.mxu1 %v12930_v18  ;;  %v3205_v18 = vld [vmem:[#allocation2 + $0x81] sm:$0x1] }
 0x328   : > { %6717 = vmatpush3.bf16.msra.mxu0 %v12931_v35 }
 0x329   : > { %6746 = vmatprep.subr.bf16.mxu0 %v12932_v34  ;;  %v3993_v34 = vld [vmem:[#allocation2 + $0xee] sm:$0x1] }
 0x32a   : > { %6425 = vmatpush3.bf16.msra.mxu1 %v12933_v22 }
 0x32b   : > { %3918 = vmatmul.mubr.bf16.vlgmr.msra.gmra.mrb[160].mxu0 %v3635_v63  ;;  %6426 = vmatprep.subr.bf16.mxu1 %v12934_v8  ;;  %v4019_v8 = vpack.c.bf16 %v3993_v34, %v10121_v21  ;;  %v12975_v34 = vld [vmem:[#allocation90_spill] sm:$0xff] }
 0x32c   : > { %v6124_v32 = vpop.f32.mrb[36].mxu1  ;;  %6747 = vmatpush3.bf16.msra.mxu0 %v12935_v61  ;;  %4062 = vmatprep.mubr.bf16.mxu0 %v4015_v30  ;;  %v10230_v30 = vld [vmem:[%s12408_s3 + $0x140] sm:$0xff]  }
 0x32d   : > { %v6125_v25 = vpop.f32.mrb[37].mxu1  ;;  %6748 = vmatprep.subr.bf16.mxu0 %v9795_v47  ;;  %v12940_v47 = vld [vmem:[#allocation72_spill] sm:$0xff] }
 0x32e   : > { %v6126_v45 = vadd.f32 %v6125_v25, %v6124_v32  ;;  %v6127_v50 = vpop.f32.mrb[38].mxu1  ;;  %6427 = vmatpush3.bf16.msra.mxu1 %v12936_v7  ;;  %v3213_v7 = vld [vmem:[#allocation2 + $0x95] sm:$0x1] }
 0x32f   : > { %v6128_v39 = vpop.f32.mrb[39].mxu1  ;;  %6428 = vmatprep.subr.bf16.mxu1 %v9290_v43  ;;  %v3215_v43 = vld [vmem:[#allocation2 + $0x9f] sm:$0x1] }
 0x330   : > { %v2624_v10 = vadd.f32 %v6126_v45, %v2583_v28  ;;  %v6129_v26 = vadd.f32 %v6128_v39, %v6127_v50  ;;  %6749 = vmatpush3.bf16.msra.mxu0 %v9806_v16  ;;  %v12943_v28 = vld [vmem:[#allocation15_spill] sm:$0xff]  ;;  %v3234_v16 = vpack.c.bf16 %v3205_v18, %v10076_v9  ;;  %v3239_v35 = vpack.c.bf16 %v3215_v43, %v10078_v20 }
 0x331   : > { %6750 = vmatprep.subr.bf16.mxu0 %v9814_v24  ;;  %v12944_v24 = vld [vmem:[#allocation17_spill] sm:$0xff] }
 0x332   : > { %v2627_v48 = vadd.f32 %v6129_v26, %v2586_v57  ;;  %v2665_v33 = vadd.f32 %v12937_v51, %v2624_v10  ;;  %6429 = vmatpush3.bf16.msra.mxu1 %v12938_v23  ;;  %v12945_v57 = vld [vmem:[#allocation75_spill] sm:$0xff]  ;;  %v12953_v10 = vld [vmem:[#allocation8_spill] sm:$0xff]  ;;  %v12957_v51 = vld [vmem:[#allocation10_spill] sm:$0xff] }
 0x333   : > { %6430 = vmatprep.subr.bf16.mxu1 %v12939_v41  ;;  %v3223_v26 = vld [vmem:[#allocation2 + $0xb3] sm:$0x1]  ;;  %v12959_v23 = vld [vmem:[#allocation82_spill] sm:$0xff] }
 0x334   : > { %v2668_v19 = vadd.f32 %v12940_v47, %v2627_v48  ;;  %6751 = vmatpush3.bf16.msra.mxu0 %v12941_v40  ;;  %v12955_v48 = vld [vmem:[#allocation34_spill] sm:$0xff]  ;;  %v12960_v41 = vld [vmem:[#allocation11_spill] sm:$0xff]  ;;  %v12961_v47 = vld [vmem:[#allocation16_spill] sm:$0xff] }
 0x335   : > { %6752 = vmatprep.subr.bf16.mxu0 %v12942_v27  ;;  %v12963_v40 = vld [vmem:[#allocation84_spill] sm:$0xff] }
 0x336   : > { %6431 = vmatpush3.bf16.msra.mxu1 %v12943_v28 }
 0x337   : > { %6460 = vmatprep.subr.bf16.mxu1 %v12944_v24 }
 0x338   : > { %6753 = vmatpush3.bf16.msra.mxu0 %v12945_v57  ;;  %v12967_v57 = vld [vmem:[#allocation86_spill] sm:$0xff] }
 0x339   : > { %3322 = vmatmul.mubr.bf16.vlgmr.msra.gmra.mrb[64].mxu1 %v3234_v16  ;;  %6754 = vmatprep.subr.bf16.mxu0 %v9849_v59  ;;  %v12965_v16 = vld [vmem:[#allocation20_spill] sm:$0xff] }
 0x33a   : > { %6461 = vmatpush3.bf16.msra.mxu1 %v9334_v12  ;;  %3403 = vmatprep.mubr.bf16.mxu1 %v3239_v35  ;;  %v12968_v35 = vld [vmem:[#allocation23_spill] sm:$0xff] }
 0x33b   : > { %6462 = vmatprep.subr.bf16.mxu1 %v9340_v31 }
 0x33c   : > { %6755 = vmatpush3.bf16.msra.mxu0 %v9863_v53  ;;  %v12946_v53 = vld [vmem:[#allocation22_spill] sm:$0xff] }
 0x33d   : > { %6756 = vmatprep.subr.bf16.mxu0 %v9871_v15  ;;  %v12947_v15 = vld [vmem:[#allocation80_spill] sm:$0xff] }
 0x33e   : > { %6463 = vmatpush3.bf16.msra.mxu1 %v9348_v49  ;;  %v6454_v9 = vpop.f32.mrb[136].mxu0  ;;  %v10215_v49 = vld [vmem:[%s12408_s3 + $0x78] sm:$0xff]  }
 0x33f   : > { %6464 = vmatprep.subr.bf16.mxu1 %v9354_v56  ;;  %v6455_v63 = vpop.f32.mrb[137].mxu0  ;;  %v12948_v56 = vld [vmem:[#allocation25_spill] sm:$0xff] }
 0x340   : > { %6757 = vmatpush3.bf16.msra.mxu0 %v9879_v5  ;;  %v10204_v20 = vadd.f32 %v6455_v63, %v6454_v9  ;;  %v6457_v59 = vpop.f32.mrb[138].mxu0  ;;  %v3983_v5 = vld [vmem:[#allocation2 + $0xd0] sm:$0x1]  ;;  %v12969_v9 = vld [vmem:[#allocation24_spill] sm:$0xff] }
 0x341   : > { %6758 = vmatprep.subr.bf16.mxu0 %v9885_v62  ;;  %v6458_v12 = vpop.f32.mrb[139].mxu0  ;;  %v12949_v62 = vld [vmem:[#allocation26_spill] sm:$0xff]  ;;  %v4014_v22 = vpack.c.bf16 %v3983_v5, %v10118_v4  ;;  %v12970_v63 = vld [vmem:[#allocation87_spill] sm:$0xff]  ;;  %v12974_v5 = vld [vmem:[#allocation89_spill] sm:$0xff] }
 0x342   : > { %6465 = vmatpush3.bf16.msra.mxu1 %v9364_v13  ;;  %v10208_v31 = vadd.f32 %v6458_v12, %v6457_v59  ;;  %v10223_v13 = vld [vmem:[%s12408_s3 + $0x38] sm:$0xff]   ;;  %v3991_v59 = vld [vmem:[#allocation2 + $0xe4] sm:$0x1] }
 0x343   : > { %6466 = vmatprep.subr.bf16.mxu1 %v12946_v53  ;;  %v10274_v12 = vld [vmem:[#allocation2 + $0xfa] sm:$0xff]  ;;  %v4001_v53 = vld [vmem:[#allocation2 + $0x102] sm:$0x1] }
 0x344   : > { %6759 = vmatpush3.bf16.msra.mxu0 %v12947_v15  ;;  %v4018_v15 = vpack.c.bf16 %v3991_v59, %v10170_v46  ;;  %v10369_v59 = vld [vmem:[%s12408_s3 + $0x270] sm:$0xff]  }
 0x345   : > { %6760 = vmatprep.subr.bf16.mxu0 %v10215_v49 }
 0x346   : > { %6467 = vmatpush3.bf16.msra.mxu1 %v12948_v56  ;;  %v12973_v56 = vld [vmem:[#allocation28_spill] sm:$0xff] }
 0x347   : > { %6468 = vmatprep.subr.bf16.mxu1 %v12949_v62  ;;  %v4023_v62 = vpack.c.bf16 %v4001_v53, %v10274_v12  ;;  %v10377_v53 = vld [vmem:[%s12408_s3 + $0x390] sm:$0xff]  }
 0x348   : > { %6761 = vmatpush3.bf16.msra.mxu0 %v10223_v13 }
 0x349   : > { %6790 = vmatprep.subr.bf16.mxu0 %v10230_v30 }
 0x34a   : > { %6469 = vmatpush3.bf16.msra.mxu1 %v12859_v17 }
 0x34b   : > { %4063 = vmatmul.mubr.bf16.vlgmr.msra.gmra.mrb[164].mxu0 %v4014_v22  ;;  %6470 = vmatprep.subr.bf16.mxu1 %v12861_v11 }
 0x34c   : > { %v6168_v32 = vpop.f32.mrb[40].mxu1  ;;  %6791 = vmatpush3.bf16.msra.mxu0 %v12862_v37  ;;  %4144 = vmatprep.mubr.bf16.mxu0 %v4019_v8  ;;  %v12950_v37 = vld [vmem:[#allocation76_spill] sm:$0xff] }
 0x34d   : > { %v6169_v61 = vpop.f32.mrb[41].mxu1  ;;  %6792 = vmatprep.subr.bf16.mxu0 %v9413_v52  ;;  %v12951_v52 = vld [vmem:[#allocation7_spill] sm:$0xff] }
 0x34e   : > { %v6170_v4 = vadd.f32 %v6169_v61, %v6168_v32  ;;  %v6171_v25 = vpop.f32.mrb[42].mxu1  ;;  %6471 = vmatpush3.bf16.msra.mxu1 %v9914_v2  ;;  %v12952_v2 = vld [vmem:[#allocation79_spill] sm:$0xff]  ;;  %v12976_v32 = vld [vmem:[#allocation32_spill] sm:$0xff] }
 0x34f   : > { %v6172_v45 = vpop.f32.mrb[43].mxu1  ;;  %6472 = vmatprep.subr.bf16.mxu1 %v9920_v38  ;;  %v10248_v38 = vld [vmem:[#allocation2 + $0xab] sm:$0xff] }
 0x350   : > { %v2706_v17 = vadd.f32 %v6170_v4, %v2665_v33  ;;  %v6173_v50 = vadd.f32 %v6172_v45, %v6171_v25  ;;  %6793 = vmatpush3.bf16.msra.mxu0 %v9424_v42  ;;  %v12954_v42 = vld [vmem:[#allocation30_spill] sm:$0xff]  ;;  %v12958_v33 = vld [vmem:[#allocation35_spill] sm:$0xff] }
 0x351   : > { %6794 = vmatprep.subr.bf16.mxu0 %v12863_v36  ;;  %v3238_v36 = vpack.c.bf16 %v3213_v7, %v10143_v14  ;;  %v12977_v25 = vld [vmem:[#allocation31_spill] sm:$0xff]  ;;  %v12981_v7 = vld [vmem:[#allocation92_spill] sm:$0xff] }
 0x352   : > { %v2709_v11 = vadd.f32 %v6173_v50, %v2668_v19  ;;  %6473 = vmatpush3.bf16.msra.mxu1 %v9934_v55  ;;  %v2747_v21 = vadd.f32 %v12950_v37, %v2706_v17  ;;  %v12956_v55 = vld [vmem:[#allocation9_spill] sm:$0xff]  ;;  %v12962_v19 = vld [vmem:[#allocation83_spill] sm:$0xff] }
 0x353   : > { %6474 = vmatprep.subr.bf16.mxu1 %v9940_v29  ;;  %v3243_v29 = vpack.c.bf16 %v3223_v26, %v10248_v38  ;;  %v12978_v50 = vld [vmem:[#allocation33_spill] sm:$0xff] }
 0x354   : > { %6795 = vmatpush3.bf16.msra.mxu0 %v12951_v52  ;;  %v2750_v39 = vadd.f32 %v12952_v2, %v2709_v11  ;;  %v12979_v11 = vld [vmem:[#allocation52_spill] sm:$0xff]  ;;  %v12980_v52 = vld [vmem:[#allocation91_spill] sm:$0xff]  ;;  %v10291_v26 = vld [vmem:[#allocation2 + $0xa1] sm:$0xff] }
 0x355   : > { %6796 = vmatprep.subr.bf16.mxu0 %v12953_v10 }
 0x356   : > { %6475 = vmatpush3.bf16.msra.mxu1 %v12954_v42  ;;  %v5809_v42 = vld [vmem:[%s10060_s14 + $0xc] sm:$0x1] }
 0x357   : > { %6504 = vmatprep.subr.bf16.mxu1 %v12955_v48  ;;  %v10295_v48 = vld [vmem:[#allocation2 + $0xbf] sm:$0xff] }
 0x358   : > { %6797 = vmatpush3.bf16.msra.mxu0 %v12956_v55  ;;  %v3231_v55 = vld [vmem:[#allocation2 + $0xc7] sm:$0x1] }
 0x359   : > { %3404 = vmatmul.mubr.bf16.vlgmr.msra.gmra.mrb[68].mxu1 %v3238_v36  ;;  %6798 = vmatprep.subr.bf16.mxu0 %v12957_v51  ;;  %v12983_v36 = vld [vmem:[#allocation53_spill] sm:$0xff] }
 0x35a   : > { %6505 = vmatpush3.bf16.msra.mxu1 %v12958_v33  ;;  %3485 = vmatprep.mubr.bf16.mxu1 %v3243_v29  ;;  %v10303_v51 = vld [vmem:[%s12408_s3 + $0x3c0] sm:$0xff]  }
 0x35b   : > { %6506 = vmatprep.subr.bf16.mxu1 %v12959_v23  ;;  %v10311_v23 = vld [vmem:[%s12408_s3 + $0x218] sm:$0xff]  }
 0x35c   : > { %6799 = vmatpush3.bf16.msra.mxu0 %v12960_v41  ;;  %v10319_v41 = vld [vmem:[%s12408_s3 + $0x260] sm:$0xff]  }
 0x35d   : > { %6800 = vmatprep.subr.bf16.mxu0 %v12961_v47  ;;  %v10325_v47 = vld [vmem:[%s12408_s3 + $0x380] sm:$0xff]  }
 0x35e   : > { %6507 = vmatpush3.bf16.msra.mxu1 %v12962_v19  ;;  %v6498_v14 = vpop.f32.mrb[140].mxu0  ;;  %v10331_v19 = vld [vmem:[%s12408_s3 + $0x3c8] sm:$0xff]  }
 0x35f   : > { %6508 = vmatprep.subr.bf16.mxu1 %v12963_v40  ;;  %v6499_v18 = vpop.f32.mrb[141].mxu0  ;;  %v10343_v40 = vld [vmem:[%s12408_s3 + $0x268] sm:$0xff]  }
 0x360   : > { %6801 = vmatpush3.bf16.msra.mxu0 %v12876_v44  ;;  %v10263_v27 = vadd.f32 %v6499_v18, %v6498_v14  ;;  %v6501_v43 = vpop.f32.mrb[142].mxu0  ;;  %v12971_v44 = vld [vmem:[#allocation88_spill] sm:$0xff]  ;;  %v10337_v14 = vld [vmem:[%s12408_s3 + $0x220] sm:$0xff]  }
 0x361   : > { %6802 = vmatprep.subr.bf16.mxu0 %v12878_v60  ;;  %v6502_v28 = vpop.f32.mrb[143].mxu0  ;;  %v12972_v60 = vld [vmem:[#allocation27_spill] sm:$0xff] }
 0x362   : > { %12964 = vst [vmem:[#allocation5_spill] sm:$0xff] %v10263_v27  ;;  %6509 = vmatpush3.bf16.msra.mxu1 %v12965_v16  ;;  %v10267_v24 = vadd.f32 %v6502_v28, %v6501_v43  ;;  %v10349_v43 = vld [vmem:[%s12408_s3 + $0x388] sm:$0xff]   ;;  %v10355_v16 = vld [vmem:[%s12408_s3 + $0x3d0] sm:$0xff]  }
 0x363   : > { %6510 = vmatprep.subr.bf16.mxu1 %v12967_v57 }
 0x364   : > { %12966 = vst [vmem:[#allocation55_spill] sm:$0xff] %v10267_v24  ;;  %6803 = vmatpush3.bf16.msra.mxu0 %v12968_v35  ;;  %v10584_v24 = vld [vmem:[%s12408_s3 + $0x328] sm:$0xff]  }
 0x365   : > { %6804 = vmatprep.subr.bf16.mxu0 %v12969_v9  ;;  %v10363_v9 = vld [vmem:[%s12408_s3 + $0x228] sm:$0xff]   ;;  %12994 = vst [vmem:[#allocation59_spill] sm:$0xff] %v10584_v24 }
 0x366   : > { %6511 = vmatpush3.bf16.msra.mxu1 %v12970_v63 }
 0x367   : > { %6512 = vmatprep.subr.bf16.mxu1 %v12971_v44 }
 0x368   : > { %6805 = vmatpush3.bf16.msra.mxu0 %v12972_v60  ;;  %v10383_v60 = vld [vmem:[%s12408_s3 + $0x3d8] sm:$0xff]  }
 0x369   : > { %6834 = vmatprep.subr.bf16.mxu0 %v12973_v56  ;;  %v10395_v56 = vld [vmem:[%s12408_s3 + $0x278] sm:$0xff]  }
 0x36a   : > { %6513 = vmatpush3.bf16.msra.mxu1 %v12974_v5  ;;  %v10401_v5 = vld [vmem:[%s12408_s3 + $0x398] sm:$0xff]  }
 0x36b   : > { %4145 = vmatmul.mubr.bf16.vlgmr.msra.gmra.mrb[168].mxu0 %v4018_v15  ;;  %6514 = vmatprep.subr.bf16.mxu1 %v12975_v34  ;;  %v10389_v15 = vld [vmem:[%s12408_s3 + $0x230] sm:$0xff]   ;;  %v3999_v34 = vld [vmem:[#allocation2 + $0xf8] sm:$0x1] }
 0x36c   : > { %v6212_v22 = vpop.f32.mrb[44].mxu1  ;;  %6835 = vmatpush3.bf16.msra.mxu0 %v12889_v0  ;;  %4226 = vmatprep.mubr.bf16.mxu0 %v4023_v62  ;;  %v10404_v62 = vld [vmem:[#allocation2 + $0xf0] sm:$0xff] }
 0x36d   : > { %v6213_v8 = vpop.f32.mrb[45].mxu1  ;;  %6836 = vmatprep.subr.bf16.mxu0 %v12976_v32  ;;  %v4009_v32 = vld [vmem:[#allocation2 + $0x116] sm:$0x1] }
 0x36e   : > { %v6214_v61 = vadd.f32 %v6213_v8, %v6212_v22  ;;  %v6215_v4 = vpop.f32.mrb[46].mxu1  ;;  %6515 = vmatpush3.bf16.msra.mxu1 %v10045_v58  ;;  %v12982_v58 = vld [vmem:[#allocation36_spill] sm:$0xff]  ;;  %v10409_v22 = vld [vmem:[%s12408_s3 + $0x3e0] sm:$0xff]   ;;  %v10412_v8 = vld [vmem:[#allocation2 + $0x10e] sm:$0xff] }
 0x36f   : > { %v6216_v46 = vpop.f32.mrb[47].mxu1  ;;  %6516 = vmatprep.subr.bf16.mxu1 %v12977_v25  ;;  %v10430_v25 = vld [vmem:[%s12408_s3 + $0x3a0] sm:$0xff]  }
 0x370   : > { %v2788_v45 = vadd.f32 %v6214_v61, %v2747_v21  ;;  %v6217_v17 = vadd.f32 %v6216_v46, %v6215_v4  ;;  %6837 = vmatpush3.bf16.msra.mxu0 %v12978_v50  ;;  %v3221_v21 = vld [vmem:[#allocation2 + $0xa9] sm:$0x1]  ;;  %v10417_v61 = vld [vmem:[%s12408_s3 + $0x238] sm:$0xff]   ;;  %v4022_v4 = vpack.c.bf16 %v3999_v34, %v10404_v62  ;;  %v10424_v46 = vld [vmem:[%s12408_s3 + $0x340] sm:$0xff]  }
 0x371   : > { %6838 = vmatprep.subr.bf16.mxu0 %v12979_v11  ;;  %v3242_v29 = vpack.c.bf16 %v3221_v21, %v10291_v26  ;;  %v10443_v11 = vld [vmem:[%s12408_s3 + $0x300] sm:$0xff]   ;;  %v10462_v21 = vld [vmem:[%s12408_s3 + $0x3a8] sm:$0xff]  }
 0x372   : > { %v2794_v0 = vmax.f32 %v2788_v45, 0.0  ;;  %v2791_v37 = vadd.f32 %v6217_v17, %v2750_v39  ;;  %6517 = vmatpush3.bf16.msra.mxu1 %v12980_v52  ;;  %v4027_v45 = vpack.c.bf16 %v4009_v32, %v10412_v8  ;;  %v10437_v17 = vld [vmem:[%s12408_s3 + $0x3e8] sm:$0xff]   ;;  %v10455_v52 = vld [vmem:[%s12409_s4] ss:$0 sm:$0xff]  ;;  %v10497_v32 = vld [vmem:[%s12408_s3 + $0x3f8] sm:$0xff]  }
 0x373   : > { %6518 = vmatprep.subr.bf16.mxu1 %v12981_v7  ;;  %v12986_v7 = vld [vmem:[#allocation77_spill] sm:$0xff] }
 0x374   : > { %v5850_v2 = vpack.c.bf16 %v2794_v0, %v2794_v0  ;;  %v2795_v10 = vmax.f32 %v2791_v37, 0.0  ;;  %6839 = vmatpush3.bf16.msra.mxu0 %v12982_v58  ;;  %v10449_v37 = vld [vmem:[%s12408_s3 + $0x348] sm:$0xff]  }
 0x375   : > { %6840 = vmatprep.subr.bf16.mxu0 %v12983_v36  ;;  %v10468_v36 = vld [vmem:[%s12408_s3 + $0x3f0] sm:$0xff]  }
 0x376   : > { %5808 = vst [vmem:[%s10060_s14 + $0x8] sm:$0xf] %v5850_v2  ;;  %v5851_v39 = vpack.c.bf16 %v2795_v10, %v2795_v10  ;;  %6519 = vmatpush3.bf16.msra.mxu1 %v10090_v54  ;;  %v3247_v54 = vpack.c.bf16 %v3231_v55, %v10295_v48  ;;  %v2892_v2 = vadd.f32 %v10455_v52, %v12986_v7  ;;  %v12987_v55 = vld [vmem:[#allocation78_spill] sm:$0xff] }
 0x377   : > { %6548 = vmatprep.subr.bf16.mxu1 %v10303_v51 }
 0x378   : > { %v2807_v33 = vsel %vm10080_vm2, %v5851_v39, %v5809_v42  ;;  %6841 = vmatpush3.bf16.msra.mxu0 %v10311_v23  ;;  %v2895_v39 = vadd.f32 %v10455_v52, %v12987_v55  ;;  %v10527_v55 = vld [vmem:[%s12408_s3 + $0xc0] sm:$0xff]  }
 0x379   : > { %5810 = vst [vmem:[%s10060_s14 + $0xc] sm:$0x1] %v2807_v33  ;;  %3486 = vmatmul.mubr.bf16.vlgmr.msra.gmra.mrb[72].mxu1 %v3242_v29  ;;  %6842 = vmatprep.subr.bf16.mxu0 %v10319_v41 }
 0x37a   : > { %6549 = vmatpush3.bf16.msra.mxu1 %v10325_v47  ;;  %3567 = vmatprep.mubr.bf16.mxu1 %v3247_v54  ;;  %v10476_v54 = vld [vmem:[%s12408_s3 + $0x308] sm:$0xff]  }
 0x37b   : > { %6550 = vmatprep.subr.bf16.mxu1 %v10331_v19 }
 0x37c   : > { %6843 = vmatpush3.bf16.msra.mxu0 %v10337_v14 }
 0x37d   : > { %6844 = vmatprep.subr.bf16.mxu0 %v10343_v40 }
 0x37e   : > { %v6542_v18 = vpop.f32.mrb[144].mxu0  ;;  %6551 = vmatpush3.bf16.msra.mxu1 %v10349_v43 }
 0x37f   : > { %v6543_v28 = vpop.f32.mrb[145].mxu0  ;;  %6552 = vmatprep.subr.bf16.mxu1 %v10355_v16 }
 0x380   : > { %v10358_v57 = vadd.f32 %v6543_v28, %v6542_v18  ;;  %v6545_v35 = vpop.f32.mrb[146].mxu0  ;;  %6845 = vmatpush3.bf16.msra.mxu0 %v10363_v9  ;;  %v10482_v18 = vld [vmem:[%s12408_s3 + $0x350] sm:$0xff]  }
 0x381   : > { %v6546_v63 = vpop.f32.mrb[147].mxu0  ;;  %6846 = vmatprep.subr.bf16.mxu0 %v10369_v59 }
 0x382   : > { %12984 = vst [vmem:[#allocation56_spill] sm:$0xff] %v10358_v57  ;;  %v10372_v44 = vadd.f32 %v6546_v63, %v6545_v35  ;;  %6553 = vmatpush3.bf16.msra.mxu1 %v10377_v53  ;;  %v10488_v35 = vld [vmem:[%s12408_s3 + $0x3b0] sm:$0xff]   ;;  %v12988_v63 = vld [vmem:[#allocation81_spill] sm:$0xff] }
 0x383   : > { %6554 = vmatprep.subr.bf16.mxu1 %v10383_v60 }
 0x384   : > { %12985 = vst [vmem:[#allocation4_spill] sm:$0xff] %v10372_v44  ;;  %6847 = vmatpush3.bf16.msra.mxu0 %v10389_v15 }
 0x385   : > { %6848 = vmatprep.subr.bf16.mxu0 %v10395_v56 }
 0x386   : > { %6555 = vmatpush3.bf16.msra.mxu1 %v10401_v5 }
 0x387   : > { %6556 = vmatprep.subr.bf16.mxu1 %v10409_v22 }
 0x388   : > { %6849 = vmatpush3.bf16.msra.mxu0 %v10417_v61 }
 0x389   : > { %6878 = vmatprep.subr.bf16.mxu0 %v10424_v46 }
 0x38a   : > { %6557 = vmatpush3.bf16.msra.mxu1 %v10430_v25 }
 0x38b   : > { %4227 = vmatmul.mubr.bf16.vlgmr.msra.gmra.mrb[172].mxu0 %v4022_v4  ;;  %6558 = vmatprep.subr.bf16.mxu1 %v10437_v17  ;;  %v10503_v4 = vld [vmem:[%s12408_s3 + $0x310] sm:$0xff]  }
 0x38c   : > { %v6256_v50 = vpop.f32.mrb[48].mxu1  ;;  %6879 = vmatpush3.bf16.msra.mxu0 %v10443_v11  ;;  %4308 = vmatprep.mubr.bf16.mxu0 %v4027_v45  ;;  %v10506_v45 = vld [vmem:[#allocation2 + $0xb5] sm:$0xff] }
 0x38d   : > { %v6257_v0 = vpop.f32.mrb[49].mxu1  ;;  %6880 = vmatprep.subr.bf16.mxu0 %v10449_v37 }
 0x38e   : > { %v6258_v10 = vadd.f32 %v6257_v0, %v6256_v50  ;;  %v6259_v58 = vpop.f32.mrb[50].mxu1  ;;  %6559 = vmatpush3.bf16.msra.mxu1 %v10462_v21  ;;  %v3229_v50 = vld [vmem:[#allocation2 + $0xbd] sm:$0x1]  ;;  %v12989_v0 = vld [vmem:[#allocation29_spill] sm:$0xff] }
 0x38f   : > { %v6260_v42 = vpop.f32.mrb[51].mxu1  ;;  %6560 = vmatprep.subr.bf16.mxu1 %v10468_v36 }
 0x390   : > { %v2933_v29 = vadd.f32 %v6258_v10, %v2892_v2  ;;  %v6261_v33 = vadd.f32 %v6260_v42, %v6259_v58  ;;  %6881 = vmatpush3.bf16.msra.mxu0 %v10476_v54  ;;  %v10514_v2 = vld [vmem:[%s12408_s3 + $0x358] sm:$0xff]   ;;  %v3598_v10 = vld [vmem:[#allocation2 + $0xb3] sm:$0x1]  ;;  %v3246_v42 = vpack.c.bf16 %v3229_v50, %v10506_v45  ;;  %v10564_v50 = vld [vmem:[%s12408_s3 + $0x368] sm:$0xff]  }
 0x391   : > { %6882 = vmatprep.subr.bf16.mxu0 %v10482_v18  ;;  %v10520_v58 = vld [vmem:[%s12408_s3 + $0x3b8] sm:$0xff]   ;;  %12990 = vst [vmem:[#allocation37_spill] sm:$0xff] %v10564_v50 }
 0x392   : > { %v2936_v28 = vadd.f32 %v6261_v33, %v2895_v39  ;;  %6561 = vmatpush3.bf16.msra.mxu1 %v10488_v35  ;;  %v10492_v34 = vadd.f32 %v12988_v63, %v2933_v29  ;;  %v10533_v39 = vld [vmem:[%s12408_s3 + $0x318] sm:$0xff]   ;;  %v3626_v29 = vpack.c.bf16 %v3598_v10, %v10248_v38  ;;  %v10540_v33 = vld [vmem:[%s12408_s3 + $0x360] sm:$0xff]   ;;  %v10552_v38 = vld [vmem:[%s12408_s3 + $0xc8] sm:$0xff]  }
 0x393   : > { %6562 = vmatprep.subr.bf16.mxu1 %v10497_v32  ;;  %v10558_v63 = vld [vmem:[%s12408_s3 + $0x320] sm:$0xff]   ;;  %v10570_v10 = vld [vmem:[%s12408_s3 + $0x88] sm:$0xff]  }
 0x394   : > { %6883 = vmatpush3.bf16.msra.mxu0 %v10503_v4  ;;  %v10509_v7 = vadd.f32 %v12989_v0, %v2936_v28  ;;  %v10546_v28 = vld [vmem:[%s12408_s3 + $0x80] sm:$0xff]   ;;  %12991 = vst [vmem:[#allocation57_spill] sm:$0xff] %v10570_v10 }
 0x395   : > { %6884 = vmatprep.subr.bf16.mxu0 %v10514_v2 }
 0x396   : > { %6563 = vmatpush3.bf16.msra.mxu1 %v10520_v58 }
 0x397   : > { %6592 = vmatprep.subr.bf16.mxu1 %v10527_v55 }
 0x398   : > { %6885 = vmatpush3.bf16.msra.mxu0 %v10533_v39 }
 0x399   : > { %3568 = vmatmul.mubr.bf16.vlgmr.msra.gmra.mrb[76].mxu1 %v3246_v42  ;;  %6886 = vmatprep.subr.bf16.mxu0 %v10540_v33 }
 0x39a   : > { %6593 = vmatpush3.bf16.msra.mxu1 %v10546_v28  ;;  %3712 = vmatprep.mubr.bf16.mxu1 %v3626_v29  ;;  %v10576_v29 = vld [vmem:[%s12408_s3 + $0xd0] sm:$0xff]  }
 0x39b   : > { %6594 = vmatprep.subr.bf16.mxu1 %v10552_v38  ;;  %12992 = vst [vmem:[#allocation58_spill] sm:$0xff] %v10576_v29 }
 0x39c   : > { %6887 = vmatpush3.bf16.msra.mxu0 %v10558_v63 }
 0x39d   : > { %6888 = vmatprep.subr.bf16.mxu0 %v10564_v50 }
 0x39e   : > { %v6586_v0 = vpop.f32.mrb[148].mxu0  ;;  %6595 = vmatpush3.bf16.msra.mxu1 %v10570_v10  ;;  %v10590_v10 = vld [vmem:[%s12408_s3 + $0x370] sm:$0xff]  }
 0x39f   : > { %v6587_v42 = vpop.f32.mrb[149].mxu0  ;;  %6596 = vmatprep.subr.bf16.mxu1 %v10576_v29  ;;  %12995 = vst [vmem:[#allocation60_spill] sm:$0xff] %v10590_v10 }
 0x3a0   : > { %v10579_v44 = vadd.f32 %v6587_v42, %v6586_v0  ;;  %v6589_v57 = vpop.f32.mrb[150].mxu0  ;;  %6889 = vmatpush3.bf16.msra.mxu0 %v10584_v24  ;;  %v10598_v0 = vld [vmem:[%s12408_s3 + $0x90] sm:$0xff]   ;;  %v10604_v42 = vld [vmem:[%s12408_s3 + $0xd8] sm:$0xff]  }
 0x3a1   : > { %v6590_v27 = vpop.f32.mrb[151].mxu0  ;;  %6890 = vmatprep.subr.bf16.mxu0 %v10590_v10  ;;  %12997 = vst [vmem:[#allocation6_spill] sm:$0xff] %v10598_v0  ;;  %12998 = vst [vmem:[#allocation61_spill] sm:$0xff] %v10604_v42  ;;  %v10643_v10 = vld [vmem:[%s12408_s3 + $0x40] sm:$0xff]  }
 0x3a2   : > { %12993 = vst [vmem:[#allocation38_spill] sm:$0xff] %v10579_v44  ;;  %v10593_v50 = vadd.f32 %v6590_v27, %v6589_v57  ;;  %6597 = vmatpush3.bf16.msra.mxu1 %v10598_v0  ;;  %v10610_v44 = vld [vmem:[%s12408_s3 + $0x330] sm:$0xff]   ;;  %v10616_v27 = vld [vmem:[%s12408_s3 + $0x378] sm:$0xff]   ;;  %v4376_v0 = vld [vmem:[#allocation2 + $0x102] sm:$0x1] }
 0x3a3   : > { %6598 = vmatprep.subr.bf16.mxu1 %v10604_v42  ;;  %12999 = vst [vmem:[#allocation50_spill] sm:$0xff] %v10610_v44  ;;  %13000 = vst [vmem:[#allocation43_spill] sm:$0xff] %v10616_v27  ;;  %v10622_v57 = vld [vmem:[%s12408_s3 + $0x98] sm:$0xff]   ;;  %v4007_v42 = vld [vmem:[#allocation2 + $0x10c] sm:$0x1]  ;;  %v4406_v24 = vpack.c.bf16 %v4376_v0, %v10274_v12 }
 0x3a4   : > { %12996 = vst [vmem:[#allocation39_spill] sm:$0xff] %v10593_v50  ;;  %6891 = vmatpush3.bf16.msra.mxu0 %v10610_v44  ;;  %13001 = vst [vmem:[#allocation45_spill] sm:$0xff] %v10622_v57  ;;  %v10625_v50 = vld [vmem:[#allocation2 + $0x104] sm:$0xff] }
 0x3a5   : > { %6892 = vmatprep.subr.bf16.mxu0 %v10616_v27  ;;  %v10630_v44 = vld [vmem:[%s12408_s3 + $0xe0] sm:$0xff]   ;;  %v10636_v27 = vld [vmem:[%s12408_s3 + $0x338] sm:$0xff]   ;;  %13004 = vst [vmem:[#allocation62_spill] sm:$0xff] %v10643_v10  ;;  %v10668_v12 = vld [vmem:[%s12408_s3 + $0x48] sm:$0xff]  }
 0x3a6   : > { %6599 = vmatpush3.bf16.msra.mxu1 %v10622_v57  ;;  %13002 = vst [vmem:[#allocation18_spill] sm:$0xff] %v10630_v44  ;;  %13003 = vst [vmem:[#allocation40_spill] sm:$0xff] %v10636_v27  ;;  %v4026_v57 = vpack.c.bf16 %v4007_v42, %v10625_v50  ;;  %v10656_v42 = vld [vmem:[%s12408_s3 + $0xe8] sm:$0xff]  }
 0x3a7   : > { %6600 = vmatprep.subr.bf16.mxu1 %v10630_v44  ;;  %v10649_v44 = vld [vmem:[%s12408_s3 + $0xa0] sm:$0xff]   ;;  %13006 = vst [vmem:[#allocation63_spill] sm:$0xff] %v10656_v42  ;;  %13008 = vst [vmem:[#allocation42_spill] sm:$0xff] %v10668_v12 }
 0x3a8   : > { %6893 = vmatpush3.bf16.msra.mxu0 %v10636_v27  ;;  %13005 = vst [vmem:[#allocation21_spill] sm:$0xff] %v10649_v44 }
 0x3a9   : > { %6922 = vmatprep.subr.bf16.mxu0 %v10643_v10  ;;  %v10662_v10 = vld [vmem:[%s12408_s3] sm:$0xff]  }
 0x3aa   : > { %6601 = vmatpush3.bf16.msra.mxu1 %v10649_v44  ;;  %13007 = vst [vmem:[#allocation41_spill] sm:$0xff] %v10662_v10 }
 0x3ab   : > { %4309 = vmatmul.mubr.bf16.vlgmr.msra.gmra.mrb[176].mxu0 %v4026_v57  ;;  %6602 = vmatprep.subr.bf16.mxu1 %v10656_v42  ;;  %v10674_v42 = vld [vmem:[%s12408_s3 + $0xa8] sm:$0xff]  }
 0x3ac   : > { %v6300_v27 = vpop.f32.mrb[52].mxu1  ;;  %6923 = vmatpush3.bf16.msra.mxu0 %v10662_v10  ;;  %4453 = vmatprep.mubr.bf16.mxu0 %v4406_v24  ;;  %13009 = vst [vmem:[#allocation64_spill] sm:$0xff] %v10674_v42  ;;  %v10680_v24 = vld [vmem:[%s12408_s3 + $0xf0] sm:$0xff]  }
 0x3ad   : > { %v6301_v44 = vpop.f32.mrb[53].mxu1  ;;  %6924 = vmatprep.subr.bf16.mxu0 %v10668_v12 }
 0x3ae   : > { %v6302_v0 = vadd.f32 %v6301_v44, %v6300_v27  ;;  %v6303_v57 = vpop.f32.mrb[54].mxu1  ;;  %6603 = vmatpush3.bf16.msra.mxu1 %v10674_v42  ;;  %v10687_v44 = vld [vmem:[%s12408_s3 + $0x8] sm:$0xff]   ;;  %v10693_v27 = vld [vmem:[%s12408_s3 + $0x50] sm:$0xff]  }
 0x3af   : > { %v6304_v29 = vpop.f32.mrb[55].mxu1  ;;  %6604 = vmatprep.subr.bf16.mxu1 %v10680_v24  ;;  %13010 = vst [vmem:[#allocation65_spill] sm:$0xff] %v10693_v27 }
 0x3b0   : > { %v3015_v10 = vadd.f32 %v6302_v0, %v10492_v34  ;;  %v6305_v12 = vadd.f32 %v6304_v29, %v6303_v57  ;;  %6925 = vmatpush3.bf16.msra.mxu0 %v10687_v44  ;;  %v10700_v34 = vld [vmem:[%s12408_s3 + $0xb0] sm:$0xff]   ;;  %v10709_v57 = vld [vmem:[%s12408_s3 + $0xf8] sm:$0xff]  }
 0x3b1   : > { %6926 = vmatprep.subr.bf16.mxu0 %v10693_v27  ;;  %13011 = vst [vmem:[#allocation44_spill] sm:$0xff] %v10700_v34  ;;  %v13012_v29 = vld [vmem:[#allocation19_spill] sm:$0xff]  ;;  %13013 = vst [vmem:[#allocation46_spill] sm:$0xff] %v10709_v57  ;;  %v13015_v27 = vld [vmem:[#allocation85_spill] sm:$0xff] }
 0x3b2   : > { %v3018_v42 = vadd.f32 %v6305_v12, %v10509_v7  ;;  %6605 = vmatpush3.bf16.msra.mxu1 %v10700_v34  ;;  %v10704_v0 = vadd.f32 %v13012_v29, %v3015_v10  ;;  %v10715_v7 = vld [vmem:[%s12408_s3 + $0x10] sm:$0xff]   ;;  %v3596_v12 = vld [vmem:[#allocation2 + $0xa9] sm:$0x1]  ;;  %v10724_v10 = vld [vmem:[%s12408_s3 + $0x58] sm:$0xff]  }
 0x3b3   : > { %6606 = vmatprep.subr.bf16.mxu1 %v10709_v57  ;;  %13014 = vst [vmem:[#allocation66_spill] sm:$0xff] %v10715_v7  ;;  %13016 = vst [vmem:[#allocation67_spill] sm:$0xff] %v10724_v10  ;;  %v3606_v29 = vld [vmem:[#allocation2 + $0xc7] sm:$0x1]  ;;  %v10730_v57 = vld [vmem:[%s12408_s3 + $0xb8] sm:$0xff]  }
 0x3b4   : > { %6927 = vmatpush3.bf16.msra.mxu0 %v10715_v7  ;;  %v10719_v34 = vadd.f32 %v13015_v27, %v3018_v42  ;;  %13017 = vst [vmem:[#allocation47_spill] sm:$0xff] %v10730_v57  ;;  %v3625_v7 = vpack.c.bf16 %v3596_v12, %v10291_v26  ;;  %v10737_v42 = vld [vmem:[%s12408_s3 + $0x1c0] sm:$0xff]   ;;  %v10743_v27 = vld [vmem:[%s12408_s3 + $0x18] sm:$0xff]  }
 0x3b5   : > { %6928 = vmatprep.subr.bf16.mxu0 %v10724_v10  ;;  %13018 = vst [vmem:[#allocation48_spill] sm:$0xff] %v10737_v42  ;;  %13019 = vst [vmem:[#allocation68_spill] sm:$0xff] %v10743_v27  ;;  %v3630_v10 = vpack.c.bf16 %v3606_v29, %v10295_v48  ;;  %v10750_v26 = vld [vmem:[%s12408_s3 + $0x60] sm:$0xff]   ;;  %v10762_v48 = vld [vmem:[%s12408_s3 + $0x1c8] sm:$0xff]  }
 0x3b6   : > { %6607 = vmatpush3.bf16.msra.mxu1 %v10730_v57  ;;  %13020 = vst [vmem:[#allocation69_spill] sm:$0xff] %v10750_v26  ;;  %v10756_v12 = vld [vmem:[%s12408_s3 + $0x180] sm:$0xff]   ;;  %13022 = vst [vmem:[#allocation51_spill] sm:$0xff] %v10762_v48  ;;  %v10774_v29 = vld [vmem:[%s12408_s3 + $0x68] sm:$0xff]  }
 0x3b7   : > { %6636 = vmatprep.subr.bf16.mxu1 %v10737_v42  ;;  %13021 = vst [vmem:[#allocation49_spill] sm:$0xff] %v10756_v12  ;;  %13024 = vst [vmem:[#allocation12_spill] sm:$0xff] %v10774_v29 }
 0x3b8   : > { %6929 = vmatpush3.bf16.msra.mxu0 %v10743_v27 }
 0x3b9   : > { %3713 = vmatmul.mubr.bf16.vlgmr.msra.gmra.mrb[80].mxu1 %v3625_v7  ;;  %6930 = vmatprep.subr.bf16.mxu0 %v10750_v26  ;;  %v10768_v7 = vld [vmem:[%s12408_s3 + $0x20] sm:$0xff]  }
 0x3ba   : > { %6637 = vmatpush3.bf16.msra.mxu1 %v10756_v12  ;;  %3794 = vmatprep.mubr.bf16.mxu1 %v3630_v10  ;;  %13023 = vst [vmem:[#allocation70_spill] sm:$0xff] %v10768_v7  ;;  %v10780_v12 = vld [vmem:[%s12408_s3 + $0x188] sm:$0xff]  }
 0x3bb   : > { %6638 = vmatprep.subr.bf16.mxu1 %v10762_v48  ;;  %13025 = vst [vmem:[#allocation71_spill] sm:$0xff] %v10780_v12 }
 0x3bc   : > { %6931 = vmatpush3.bf16.msra.mxu0 %v10768_v7  ;;  %v10786_v7 = vld [vmem:[%s12408_s3 + $0x1d0] sm:$0xff]  }
 0x3bd   : > { %6932 = vmatprep.subr.bf16.mxu0 %v10774_v29  ;;  %v10794_v29 = vld [vmem:[%s12408_s3 + $0x28] sm:$0xff]  }
 0x3be   : > { %v6630_v10 = vpop.f32.mrb[152].mxu0  ;;  %6639 = vmatpush3.bf16.msra.mxu1 %v10780_v12  ;;  %v10800_v12 = vld [vmem:[%s12408_s3 + $0x70] sm:$0xff]  }
 0x3bf   : > { %v6631_v48 = vpop.f32.mrb[153].mxu0  ;;  %6640 = vmatprep.subr.bf16.mxu1 %v10786_v7 }
 0x3c0   : > { %v10789_v26 = vadd.f32 %v6631_v48, %v6630_v10  ;;  %v6633_v27 = vpop.f32.mrb[154].mxu0  ;;  %6933 = vmatpush3.bf16.msra.mxu0 %v10794_v29  ;;  %v10808_v48 = vld [vmem:[%s12408_s3 + $0x190] sm:$0xff]   ;;  %v10814_v10 = vld [vmem:[%s12408_s3 + $0x1d8] sm:$0xff]  }
 0x3c1   : > { %v6634_v42 = vpop.f32.mrb[155].mxu0  ;;  %6934 = vmatprep.subr.bf16.mxu0 %v10800_v12  ;;  %13028 = vst [vmem:[#allocation72_spill] sm:$0xff] %v10814_v10 }
 0x3c2   : > { %13026 = vst [vmem:[#allocation13_spill] sm:$0xff] %v10789_v26  ;;  %v10803_v57 = vadd.f32 %v6634_v42, %v6633_v27  ;;  %6641 = vmatpush3.bf16.msra.mxu1 %v10808_v48  ;;  %v10820_v26 = vld [vmem:[%s12408_s3 + $0x30] sm:$0xff]   ;;  %v10827_v42 = vld [vmem:[%s12408_s3 + $0x198] sm:$0xff]  }
 0x3c3   : > { %6642 = vmatprep.subr.bf16.mxu1 %v10814_v10  ;;  %13029 = vst [vmem:[#allocation73_spill] sm:$0xff] %v10820_v26  ;;  %13030 = vst [vmem:[#allocation74_spill] sm:$0xff] %v10827_v42  ;;  %v4374_v27 = vld [vmem:[#allocation2 + $0xf8] sm:$0x1]  ;;  %v4384_v10 = vld [vmem:[#allocation2 + $0x116] sm:$0x1] }
 0x3c4   : > { %13027 = vst [vmem:[#allocation14_spill] sm:$0xff] %v10803_v57  ;;  %6935 = vmatpush3.bf16.msra.mxu0 %v10820_v26  ;;  %v10833_v57 = vld [vmem:[%s12408_s3 + $0x1e0] sm:$0xff]  }
 0x3c5   : > { %6936 = vmatprep.subr.bf16.mxu0 %v10215_v49  ;;  %13031 = vst [vmem:[#allocation15_spill] sm:$0xff] %v10833_v57  ;;  %v4405_v49 = vpack.c.bf16 %v4374_v27, %v10404_v62  ;;  %v10842_v26 = vld [vmem:[%s12408_s3 + $0x1a0] sm:$0xff]  }
 0x3c6   : > { %6643 = vmatpush3.bf16.msra.mxu1 %v10827_v42  ;;  %13032 = vst [vmem:[#allocation17_spill] sm:$0xff] %v10842_v26  ;;  %v4410_v42 = vpack.c.bf16 %v4384_v10, %v10412_v8  ;;  %v10861_v8 = vld [vmem:[%s12408_s3 + $0x148] sm:$0xff]  }
 0x3c7   : > { %6644 = vmatprep.subr.bf16.mxu1 %v10833_v57  ;;  %v10849_v57 = vld [vmem:[%s12408_s3 + $0x1e8] sm:$0xff]   ;;  %13035 = vst [vmem:[#allocation80_spill] sm:$0xff] %v10861_v8 }
 0x3c8   : > { %6937 = vmatpush3.bf16.msra.mxu0 %v10223_v13  ;;  %13033 = vst [vmem:[#allocation75_spill] sm:$0xff] %v10849_v57 }
 0x3c9   : > { %6966 = vmatprep.subr.bf16.mxu0 %v10230_v30  ;;  %v10855_v30 = vld [vmem:[%s12408_s3 + $0x100] sm:$0xff]  }
 0x3ca   : > { %6645 = vmatpush3.bf16.msra.mxu1 %v10842_v26  ;;  %13034 = vst [vmem:[#allocation22_spill] sm:$0xff] %v10855_v30 }
 0x3cb   : > { %4454 = vmatmul.mubr.bf16.vlgmr.msra.gmra.mrb[180].mxu0 %v4405_v49  ;;  %6646 = vmatprep.subr.bf16.mxu1 %v10849_v57  ;;  %v10867_v49 = vld [vmem:[%s12408_s3 + $0x1a8] sm:$0xff]  }
 0x3cc   : > { %v6344_v13 = vpop.f32.mrb[56].mxu1  ;;  %6967 = vmatpush3.bf16.msra.mxu0 %v10855_v30  ;;  %4535 = vmatprep.mubr.bf16.mxu0 %v4410_v42  ;;  %13036 = vst [vmem:[#allocation25_spill] sm:$0xff] %v10867_v49  ;;  %v10873_v42 = vld [vmem:[%s12408_s3 + $0x1f0] sm:$0xff]  }
 0x3cd   : > { %v6345_v62 = vpop.f32.mrb[57].mxu1  ;;  %6968 = vmatprep.subr.bf16.mxu0 %v10861_v8  ;;  %13037 = vst [vmem:[#allocation26_spill] sm:$0xff] %v10873_v42 }
 0x3ce   : > { %v6346_v10 = vadd.f32 %v6345_v62, %v6344_v13  ;;  %v6347_v27 = vpop.f32.mrb[58].mxu1  ;;  %6647 = vmatpush3.bf16.msra.mxu1 %v10867_v49  ;;  %v10880_v13 = vld [vmem:[%s12408_s3 + $0x108] sm:$0xff]   ;;  %v10886_v62 = vld [vmem:[%s12408_s3 + $0x150] sm:$0xff]  }
 0x3cf   : > { %v6348_v57 = vpop.f32.mrb[59].mxu1  ;;  %6648 = vmatprep.subr.bf16.mxu1 %v10873_v42  ;;  %13038 = vst [vmem:[#allocation76_spill] sm:$0xff] %v10880_v13  ;;  %13039 = vst [vmem:[#allocation7_spill] sm:$0xff] %v10886_v62 }
 0x3d0   : > { %v3097_v30 = vadd.f32 %v6346_v10, %v10704_v0  ;;  %v6349_v8 = vadd.f32 %v6348_v57, %v6347_v27  ;;  %6969 = vmatpush3.bf16.msra.mxu0 %v10880_v13  ;;  %v10893_v0 = vld [vmem:[%s12408_s3 + $0x1b0] sm:$0xff]   ;;  %v13041_v57 = vld [vmem:[#allocation54_spill] sm:$0xff]  ;;  %v10902_v27 = vld [vmem:[%s12408_s3 + $0x1f8] sm:$0xff]  }
 0x3d1   : > { %6970 = vmatprep.subr.bf16.mxu0 %v10886_v62  ;;  %13040 = vst [vmem:[#allocation79_spill] sm:$0xff] %v10893_v0  ;;  %13042 = vst [vmem:[#allocation8_spill] sm:$0xff] %v10902_v27  ;;  %v13044_v62 = vld [vmem:[#allocation3_spill] sm:$0xff]  ;;  %v10925_v13 = vld [vmem:[%s12408_s3 + $0x1b8] sm:$0xff]  }
 0x3d2   : > { %v3100_v49 = vadd.f32 %v6349_v8, %v10719_v34  ;;  %6649 = vmatpush3.bf16.msra.mxu1 %v10893_v0  ;;  %v10897_v10 = vadd.f32 %v13041_v57, %v3097_v30  ;;  %v10908_v34 = vld [vmem:[%s12408_s3 + $0x110] sm:$0xff]   ;;  %v3604_v8 = vld [vmem:[#allocation2 + $0xbd] sm:$0x1]  ;;  %13046 = vst [vmem:[#allocation9_spill] sm:$0xff] %v10925_v13 }
 0x3d3   : > { %6650 = vmatprep.subr.bf16.mxu1 %v10902_v27  ;;  %13043 = vst [vmem:[#allocation30_spill] sm:$0xff] %v10908_v34  ;;  %v10917_v30 = vld [vmem:[%s12408_s3 + $0x158] sm:$0xff]  }
 0x3d4   : > { %6971 = vmatpush3.bf16.msra.mxu0 %v10908_v34  ;;  %v10912_v0 = vadd.f32 %v13044_v62, %v3100_v49  ;;  %13045 = vst [vmem:[#allocation34_spill] sm:$0xff] %v10917_v30  ;;  %v10920_v57 = vld [vmem:[#allocation2 + $0xd3] sm:$0xff]  ;;  %v3614_v27 = vld [vmem:[#allocation2 + $0xdb] sm:$0x1]  ;;  %v3629_v49 = vpack.c.bf16 %v3604_v8, %v10506_v45  ;;  %v10932_v62 = vld [vmem:[%s12408_s3 + $0x2c0] sm:$0xff]  }
 0x3d5   : > { %6972 = vmatprep.subr.bf16.mxu0 %v10917_v30  ;;  %13047 = vst [vmem:[#allocation10_spill] sm:$0xff] %v10932_v62  ;;  %v10938_v30 = vld [vmem:[%s12408_s3 + $0x118] sm:$0xff]   ;;  %v3634_v34 = vpack.c.bf16 %v3614_v27, %v10920_v57  ;;  %v10945_v45 = vld [vmem:[%s12408_s3 + $0x160] sm:$0xff]   ;;  %v10957_v27 = vld [vmem:[%s12408_s3 + $0x2c8] sm:$0xff]  }
 0x3d6   : > { %6651 = vmatpush3.bf16.msra.mxu1 %v10925_v13  ;;  %13048 = vst [vmem:[#allocation35_spill] sm:$0xff] %v10938_v30  ;;  %13049 = vst [vmem:[#allocation82_spill] sm:$0xff] %v10945_v45  ;;  %v10951_v8 = vld [vmem:[%s12408_s3 + $0x280] sm:$0xff]  }
 0x3d7   : > { %6680 = vmatprep.subr.bf16.mxu1 %v10932_v62  ;;  %13050 = vst [vmem:[#allocation11_spill] sm:$0xff] %v10951_v8  ;;  %13051 = vst [vmem:[#allocation16_spill] sm:$0xff] %v10957_v27 }
 0x3d8   : > { %6973 = vmatpush3.bf16.msra.mxu0 %v10938_v30 }
 0x3d9   : > { %3795 = vmatmul.mubr.bf16.vlgmr.msra.gmra.mrb[84].mxu1 %v3629_v49  ;;  %6974 = vmatprep.subr.bf16.mxu0 %v10945_v45  ;;  %v10963_v49 = vld [vmem:[%s12408_s3 + $0x120] sm:$0xff]   ;;  %v10969_v45 = vld [vmem:[%s12408_s3 + $0x168] sm:$0xff]  }
 0x3da   : > { %6681 = vmatpush3.bf16.msra.mxu1 %v10951_v8  ;;  %3876 = vmatprep.mubr.bf16.mxu1 %v3634_v34  ;;  %13052 = vst [vmem:[#allocation83_spill] sm:$0xff] %v10963_v49  ;;  %13053 = vst [vmem:[#allocation84_spill] sm:$0xff] %v10969_v45  ;;  %v10975_v8 = vld [vmem:[%s12408_s3 + $0x288] sm:$0xff]  }
 0x3db   : > { %6682 = vmatprep.subr.bf16.mxu1 %v10957_v27  ;;  %13054 = vst [vmem:[#allocation20_spill] sm:$0xff] %v10975_v8 }
 0x3dc   : > { %6975 = vmatpush3.bf16.msra.mxu0 %v10963_v49  ;;  %v10981_v49 = vld [vmem:[%s12408_s3 + $0x2d0] sm:$0xff]  }
 0x3dd   : > { %6976 = vmatprep.subr.bf16.mxu0 %v10969_v45  ;;  %13055 = vst [vmem:[#allocation86_spill] sm:$0xff] %v10981_v49  ;;  %v10989_v45 = vld [vmem:[%s12408_s3 + $0x128] sm:$0xff]  }
 0x3de   : > { %v6674_v34 = vpop.f32.mrb[156].mxu0  ;;  %6683 = vmatpush3.bf16.msra.mxu1 %v10975_v8  ;;  %13057 = vst [vmem:[#allocation24_spill] sm:$0xff] %v10989_v45  ;;  %v10995_v8 = vld [vmem:[%s12408_s3 + $0x170] sm:$0xff]  }
 0x3df   : > { %v6675_v27 = vpop.f32.mrb[157].mxu0  ;;  %6684 = vmatprep.subr.bf16.mxu1 %v10981_v49  ;;  %13058 = vst [vmem:[#allocation87_spill] sm:$0xff] %v10995_v8 }
 0x3e0   : > { %v10984_v30 = vadd.f32 %v6675_v27, %v6674_v34  ;;  %v6677_v62 = vpop.f32.mrb[158].mxu0  ;;  %6977 = vmatpush3.bf16.msra.mxu0 %v10989_v45  ;;  %v11003_v27 = vld [vmem:[%s12408_s3 + $0x290] sm:$0xff]   ;;  %v11009_v34 = vld [vmem:[%s12408_s3 + $0x2d8] sm:$0xff]  }
 0x3e1   : > { %v6678_v13 = vpop.f32.mrb[159].mxu0  ;;  %6978 = vmatprep.subr.bf16.mxu0 %v10995_v8  ;;  %13060 = vst [vmem:[#allocation27_spill] sm:$0xff] %v11003_v27  ;;  %13061 = vst [vmem:[#allocation28_spill] sm:$0xff] %v11009_v34  ;;  %v11048_v8 = vld [vmem:[%s12408_s3 + $0x240] sm:$0xff]  }
 0x3e2   : > { %13056 = vst [vmem:[#allocation23_spill] sm:$0xff] %v10984_v30  ;;  %v10998_v42 = vadd.f32 %v6678_v13, %v6677_v62  ;;  %6685 = vmatpush3.bf16.msra.mxu1 %v11003_v27  ;;  %v11015_v30 = vld [vmem:[%s12408_s3 + $0x130] sm:$0xff]   ;;  %v11021_v13 = vld [vmem:[%s12408_s3 + $0x178] sm:$0xff]   ;;  %v4392_v27 = vld [vmem:[#allocation2 + $0x12a] sm:$0x1] }
 0x3e3   : > { %6686 = vmatprep.subr.bf16.mxu1 %v11009_v34  ;;  %13062 = vst [vmem:[#allocation89_spill] sm:$0xff] %v11015_v30  ;;  %13063 = vst [vmem:[#allocation90_spill] sm:$0xff] %v11021_v13  ;;  %v11027_v62 = vld [vmem:[%s12408_s3 + $0x298] sm:$0xff]   ;;  %v11033_v34 = vld [vmem:[%s12408_s3 + $0x2e0] sm:$0xff]  }
 0x3e4   : > { %13059 = vst [vmem:[#allocation88_spill] sm:$0xff] %v10998_v42  ;;  %6979 = vmatpush3.bf16.msra.mxu0 %v11015_v30  ;;  %13064 = vst [vmem:[#allocation32_spill] sm:$0xff] %v11027_v62  ;;  %v4382_v42 = vld [vmem:[#allocation2 + $0x10c] sm:$0x1]  ;;  %v11036_v30 = vld [vmem:[#allocation2 + $0x122] sm:$0xff] }
 0x3e5   : > { %6980 = vmatprep.subr.bf16.mxu0 %v11021_v13  ;;  %13065 = vst [vmem:[#allocation31_spill] sm:$0xff] %v11033_v34  ;;  %v11041_v13 = vld [vmem:[%s12408_s3 + $0x138] sm:$0xff]   ;;  %13067 = vst [vmem:[#allocation52_spill] sm:$0xff] %v11048_v8  ;;  %v4414_v45 = vpack.c.bf16 %v4392_v27, %v11036_v30  ;;  %v11073_v27 = vld [vmem:[%s12408_s3 + $0x248] sm:$0xff]  }
 0x3e6   : > { %6687 = vmatpush3.bf16.msra.mxu1 %v11027_v62  ;;  %13066 = vst [vmem:[#allocation33_spill] sm:$0xff] %v11041_v13  ;;  %v4409_v62 = vpack.c.bf16 %v4382_v42, %v10625_v50  ;;  %v11061_v50 = vld [vmem:[%s12408_s3 + $0x2e8] sm:$0xff]   ;;  %13071 = vst [vmem:[#allocation53_spill] sm:$0xff] %v11073_v27 }
 0x3e7   : > { %6688 = vmatprep.subr.bf16.mxu1 %v11033_v34  ;;  %v11054_v34 = vld [vmem:[%s12408_s3 + $0x2a0] sm:$0xff]   ;;  %13069 = vst [vmem:[#allocation92_spill] sm:$0xff] %v11061_v50 }
 0x3e8   : > { %6981 = vmatpush3.bf16.msra.mxu0 %v11041_v13  ;;  %13068 = vst [vmem:[#allocation91_spill] sm:$0xff] %v11054_v34 }
 0x3e9   : > { %7010 = vmatprep.subr.bf16.mxu0 %v11048_v8  ;;  %v11067_v8 = vld [vmem:[%s12408_s3 + $0x200] sm:$0xff]  }
 0x3ea   : > { %6689 = vmatpush3.bf16.msra.mxu1 %v11054_v34  ;;  %13070 = vst [vmem:[#allocation36_spill] sm:$0xff] %v11067_v8 }
 0x3eb   : > { %4536 = vmatmul.mubr.bf16.vlgmr.msra.gmra.mrb[184].mxu0 %v4409_v62  ;;  %6690 = vmatprep.subr.bf16.mxu1 %v11061_v50  ;;  %v11079_v50 = vld [vmem:[%s12408_s3 + $0x2a8] sm:$0xff]  }
 0x3ec   : > { %v6388_v42 = vpop.f32.mrb[60].mxu1  ;;  %7011 = vmatpush3.bf16.msra.mxu0 %v11067_v8  ;;  %4617 = vmatprep.mubr.bf16.mxu0 %v4414_v45  ;;  %13072 = vst [vmem:[#allocation77_spill] sm:$0xff] %v11079_v50  ;;  %v11085_v45 = vld [vmem:[%s12408_s3 + $0x2f0] sm:$0xff]  }
 0x3ed   : > { %v6389_v34 = vpop.f32.mrb[61].mxu1  ;;  %7012 = vmatprep.subr.bf16.mxu0 %v11073_v27  ;;  %13073 = vst [vmem:[#allocation78_spill] sm:$0xff] %v11085_v45 }
 0x3ee   : > { %v6390_v62 = vadd.f32 %v6389_v34, %v6388_v42  ;;  %v6391_v13 = vpop.f32.mrb[62].mxu1  ;;  %6691 = vmatpush3.bf16.msra.mxu1 %v11079_v50  ;;  %v11092_v34 = vld [vmem:[%s12408_s3 + $0x208] sm:$0xff]   ;;  %v11098_v42 = vld [vmem:[%s12408_s3 + $0x250] sm:$0xff]  }
 0x3ef   : > { %v6392_v49 = vpop.f32.mrb[63].mxu1  ;;  %6692 = vmatprep.subr.bf16.mxu1 %v11085_v45  ;;  %13074 = vst [vmem:[#allocation81_spill] sm:$0xff] %v11092_v34  ;;  %13075 = vst [vmem:[#allocation29_spill] sm:$0xff] %v11098_v42 }
 0x3f0   : > { %v3179_v8 = vadd.f32 %v6390_v62, %v10897_v10  ;;  %v6393_v27 = vadd.f32 %v6392_v49, %v6391_v13  ;;  %7013 = vmatpush3.bf16.msra.mxu0 %v11092_v34  ;;  %v11105_v10 = vld [vmem:[%s12408_s3 + $0x2b0] sm:$0xff]   ;;  %v11111_v49 = vld [vmem:[%s12408_s3 + $0x2f8] sm:$0xff]  }
 0x3f1   : > { %7014 = vmatprep.subr.bf16.mxu0 %v11098_v42  ;;  %13076 = vst [vmem:[#allocation19_spill] sm:$0xff] %v11105_v10  ;;  %13077 = vst [vmem:[#allocation85_spill] sm:$0xff] %v11111_v49  ;;  %v11126_v42 = vld [vmem:[%s12408_s3 + $0x258] sm:$0xff]  }
 0x3f2   : > { %v3185_v50 = vmax.f32 %v3179_v8, 0.0  ;;  %v3182_v45 = vadd.f32 %v6393_v27, %v10912_v0  ;;  %6693 = vmatpush3.bf16.msra.mxu1 %v11105_v10  ;;  %v11117_v0 = vld [vmem:[%s12408_s3 + $0x210] sm:$0xff]   ;;  %13079 = vst [vmem:[#allocation3_spill] sm:$0xff] %v11126_v42 }
 0x3f3   : > { %6694 = vmatprep.subr.bf16.mxu1 %v11111_v49  ;;  %13078 = vst [vmem:[#allocation54_spill] sm:$0xff] %v11117_v0  ;;  %v11120_v8 = vld [vmem:[#allocation2 + $0xc9] sm:$0xff]  ;;  %v3612_v27 = vld [vmem:[#allocation2 + $0xd1] sm:$0x1]  ;;  %v5814_v10 = vld [vmem:[%s10060_s14 + $0x14] sm:$0x1] }
 0x3f4   : > { %v5852_v13 = vpack.c.bf16 %v3185_v50, %v3185_v50  ;;  %v3186_v62 = vmax.f32 %v3182_v45, 0.0  ;;  %7015 = vmatpush3.bf16.msra.mxu0 %v11117_v0  ;;  %v11129_v50 = vld [vmem:[#allocation2 + $0xe7] sm:$0xff]  ;;  %v3622_v45 = vld [vmem:[#allocation2 + $0xef] sm:$0x1]  ;;  %v11135_v0 = vld [vmem:[%s12408_s3 + $0x2b8] sm:$0xff]   ;;  %v3633_v34 = vpack.c.bf16 %v3612_v27, %v11120_v8 }
 0x3f5   : > { %7016 = vmatprep.subr.bf16.mxu0 %v11126_v42  ;;  %v3638_v42 = vpack.c.bf16 %v3622_v45, %v11129_v50  ;;  %v13092_v27 = vld [vmem:[#allocation62_spill] sm:$0xff]  ;;  %v13093_v45 = vld [vmem:[#allocation21_spill] sm:$0xff] }
 0x3f6   : > { %5813 = vst [vmem:[%s10060_s14 + $0x10] sm:$0xf] %v5852_v13  ;;  %v5853_v49 = vpack.c.bf16 %v3186_v62, %v3186_v62  ;;  %6695 = vmatpush3.bf16.msra.mxu1 %v11135_v0  ;;  %v13091_v13 = vld [vmem:[#allocation40_spill] sm:$0xff] }
 0x3f7   : > { %6724 = vmatprep.subr.bf16.mxu1 %v10303_v51 }
 0x3f8   : > { %v3198_v26 = vsel %vm10080_vm2, %v5853_v49, %v5814_v10  ;;  %7017 = vmatpush3.bf16.msra.mxu0 %v10311_v23  ;;  %v4767_v49 = vld [vmem:[#allocation2 + $0x12a] sm:$0x1] }
 0x3f9   : > { %5815 = vst [vmem:[%s10060_s14 + $0x14] sm:$0x1] %v3198_v26  ;;  %3877 = vmatmul.mubr.bf16.vlgmr.msra.gmra.mrb[88].mxu1 %v3633_v34  ;;  %7018 = vmatprep.subr.bf16.mxu0 %v10319_v41  ;;  %v4398_v34 = vld [vmem:[#allocation2 + $0x134] sm:$0x1] }
 0x3fa   : > { %6725 = vmatpush3.bf16.msra.mxu1 %v10325_v47  ;;  %3958 = vmatprep.mubr.bf16.mxu1 %v3638_v42  ;;  %v13090_v42 = vld [vmem:[#allocation18_spill] sm:$0xff] }
 0x3fb   : > { %6726 = vmatprep.subr.bf16.mxu1 %v10331_v19  ;;  %v11163_v19 = vld [vmem:[#allocation2 + $0x118] sm:$0xff] }
 0x3fc   : > { %7019 = vmatpush3.bf16.msra.mxu0 %v10337_v14  ;;  %v4390_v14 = vld [vmem:[#allocation2 + $0x120] sm:$0x1] }
 0x3fd   : > { %7020 = vmatprep.subr.bf16.mxu0 %v10343_v40  ;;  %v11166_v40 = vld [vmem:[#allocation2 + $0x136] sm:$0xff] }
 0x3fe   : > { %v6718_v51 = vpop.f32.mrb[160].mxu0  ;;  %6727 = vmatpush3.bf16.msra.mxu1 %v10349_v43  ;;  %v4400_v43 = vld [vmem:[#allocation2 + $0x13e] sm:$0x1] }
 0x3ff   : > { %v6719_v10 = vpop.f32.mrb[161].mxu0  ;;  %6728 = vmatprep.subr.bf16.mxu1 %v10355_v16  ;;  %v4413_v16 = vpack.c.bf16 %v4390_v14, %v11163_v19 }
 0x400   : > { %v11152_v23 = vadd.f32 %v6719_v10, %v6718_v51  ;;  %v6721_v26 = vpop.f32.mrb[162].mxu0  ;;  %7021 = vmatpush3.bf16.msra.mxu0 %v10363_v9  ;;  %v4418_v9 = vpack.c.bf16 %v4400_v43, %v11166_v40  ;;  %v4797_v51 = vpack.c.bf16 %v4767_v49, %v11036_v30  ;;  %v13094_v10 = vld [vmem:[#allocation63_spill] sm:$0xff]  ;;  %v13096_v43 = vld [vmem:[#allocation42_spill] sm:$0xff]  ;;  %v13098_v30 = vld [vmem:[#allocation65_spill] sm:$0xff] }
 0x401   : > { %v6722_v41 = vpop.f32.mrb[163].mxu0  ;;  %7022 = vmatprep.subr.bf16.mxu0 %v10369_v59 }
 0x402   : > { %v11156_v47 = vadd.f32 %v6722_v41, %v6721_v26  ;;  %6729 = vmatpush3.bf16.msra.mxu1 %v10377_v53  ;;  %v13095_v41 = vld [vmem:[#allocation41_spill] sm:$0xff] }
 0x403   : > { %6730 = vmatprep.subr.bf16.mxu1 %v10383_v60  ;;  %v3283_v60 = vadd.f32 %v10455_v52, %v10160_v1 }
 0x404   : > { %7023 = vmatpush3.bf16.msra.mxu0 %v10389_v15 }
 0x405   : > { %7024 = vmatprep.subr.bf16.mxu0 %v10395_v56 }
 0x406   : > { %6731 = vmatpush3.bf16.msra.mxu1 %v10401_v5 }
 0x407   : > { %6732 = vmatprep.subr.bf16.mxu1 %v10409_v22  ;;  %v3286_v22 = vadd.f32 %v10455_v52, %v10164_v6 }
 0x408   : > { %7025 = vmatpush3.bf16.msra.mxu0 %v10417_v61 }
 0x409   : > { %7054 = vmatprep.subr.bf16.mxu0 %v10424_v46 }
 0x40a   : > { %6733 = vmatpush3.bf16.msra.mxu1 %v10430_v25 }
 0x40b   : > { %4618 = vmatmul.mubr.bf16.vlgmr.msra.gmra.mrb[188].mxu0 %v4413_v16  ;;  %6734 = vmatprep.subr.bf16.mxu1 %v10437_v17  ;;  %v11188_v17 = vld [vmem:[#allocation2 + $0xdd] sm:$0xff] }
 0x40c   : > { %v6432_v59 = vpop.f32.mrb[64].mxu1  ;;  %7055 = vmatpush3.bf16.msra.mxu0 %v10443_v11  ;;  %4699 = vmatprep.mubr.bf16.mxu0 %v4418_v9  ;;  %v3620_v11 = vld [vmem:[#allocation2 + $0xe5] sm:$0x1] }
 0x40d   : > { %v6433_v53 = vpop.f32.mrb[65].mxu1  ;;  %7056 = vmatprep.subr.bf16.mxu0 %v10449_v37  ;;  %v3989_v37 = vld [vmem:[#allocation2 + $0xdb] sm:$0x1]  ;;  %v3637_v52 = vpack.c.bf16 %v3620_v11, %v11188_v17  ;;  %v3987_v11 = vld [vmem:[#allocation2 + $0xd1] sm:$0x1] }
 0x40e   : > { %v6434_v15 = vadd.f32 %v6433_v53, %v6432_v59  ;;  %v6435_v56 = vpop.f32.mrb[66].mxu1  ;;  %6735 = vmatpush3.bf16.msra.mxu1 %v10462_v21  ;;  %v13097_v59 = vld [vmem:[#allocation64_spill] sm:$0xff] }
 0x40f   : > { %v6436_v5 = vpop.f32.mrb[67].mxu1  ;;  %6736 = vmatprep.subr.bf16.mxu1 %v10468_v36  ;;  %v13081_v36 = vld [vmem:[#allocation57_spill] sm:$0xff] }
 0x410   : > { %v3324_v61 = vadd.f32 %v6434_v15, %v3283_v60  ;;  %v6437_v46 = vadd.f32 %v6436_v5, %v6435_v56  ;;  %7057 = vmatpush3.bf16.msra.mxu0 %v10476_v54  ;;  %v13099_v5 = vld [vmem:[#allocation44_spill] sm:$0xff] }
 0x411   : > { %7058 = vmatprep.subr.bf16.mxu0 %v10482_v18  ;;  %v13082_v18 = vld [vmem:[#allocation58_spill] sm:$0xff] }
 0x412   : > { %v3327_v25 = vadd.f32 %v6437_v46, %v3286_v22  ;;  %6737 = vmatpush3.bf16.msra.mxu1 %v10488_v35  ;;  %v3365_v1 = vadd.f32 %v10204_v20, %v3324_v61  ;;  %v4017_v20 = vpack.c.bf16 %v3989_v37, %v10920_v57  ;;  %v11215_v57 = vld [vmem:[#allocation2 + $0x12c] sm:$0xff]  ;;  %v13100_v22 = vld [vmem:[#allocation5_spill] sm:$0xff] }
 0x413   : > { %6738 = vmatprep.subr.bf16.mxu1 %v10497_v32  ;;  %v4417_v62 = vpack.c.bf16 %v4398_v34, %v11215_v57  ;;  %v13101_v46 = vld [vmem:[#allocation46_spill] sm:$0xff]  ;;  %v13103_v37 = vld [vmem:[#allocation55_spill] sm:$0xff] }
 0x414   : > { %7059 = vmatpush3.bf16.msra.mxu0 %v10503_v4  ;;  %v3368_v6 = vadd.f32 %v10208_v31, %v3327_v25  ;;  %v13080_v31 = vld [vmem:[#allocation37_spill] sm:$0xff]  ;;  %v13083_v4 = vld [vmem:[#allocation59_spill] sm:$0xff]  ;;  %v13102_v25 = vld [vmem:[#allocation66_spill] sm:$0xff] }
 0x415   : > { %7060 = vmatprep.subr.bf16.mxu0 %v10514_v2  ;;  %v13116_v34 = vld [vmem:[#allocation74_spill] sm:$0xff] }
 0x416   : > { %6739 = vmatpush3.bf16.msra.mxu1 %v10520_v58  ;;  %v13084_v58 = vld [vmem:[#allocation60_spill] sm:$0xff] }
 0x417   : > { %6768 = vmatprep.subr.bf16.mxu1 %v10527_v55 }
 0x418   : > { %7061 = vmatpush3.bf16.msra.mxu0 %v10533_v39  ;;  %v13085_v39 = vld [vmem:[#allocation6_spill] sm:$0xff] }
 0x419   : > { %3959 = vmatmul.mubr.bf16.vlgmr.msra.gmra.mrb[92].mxu1 %v3637_v52  ;;  %7062 = vmatprep.subr.bf16.mxu0 %v10540_v33  ;;  %v13086_v33 = vld [vmem:[#allocation61_spill] sm:$0xff] }
 0x41a   : > { %6769 = vmatpush3.bf16.msra.mxu1 %v10546_v28  ;;  %4103 = vmatprep.mubr.bf16.mxu1 %v4017_v20  ;;  %v13087_v28 = vld [vmem:[#allocation50_spill] sm:$0xff]  ;;  %v13104_v20 = vld [vmem:[#allocation67_spill] sm:$0xff] }
 0x41b   : > { %6770 = vmatprep.subr.bf16.mxu1 %v10552_v38  ;;  %v13088_v38 = vld [vmem:[#allocation43_spill] sm:$0xff] }
 0x41c   : > { %7063 = vmatpush3.bf16.msra.mxu0 %v10558_v63  ;;  %v13089_v63 = vld [vmem:[#allocation45_spill] sm:$0xff] }
 0x41d   : > { %7064 = vmatprep.subr.bf16.mxu0 %v13080_v31  ;;  %v13106_v31 = vld [vmem:[#allocation48_spill] sm:$0xff] }
 0x41e   : > { %v6762_v21 = vpop.f32.mrb[164].mxu0  ;;  %6771 = vmatpush3.bf16.msra.mxu1 %v13081_v36  ;;  %v13108_v36 = vld [vmem:[#allocation69_spill] sm:$0xff] }
 0x41f   : > { %v6763_v54 = vpop.f32.mrb[165].mxu0  ;;  %6772 = vmatprep.subr.bf16.mxu1 %v13082_v18  ;;  %v13110_v18 = vld [vmem:[#allocation51_spill] sm:$0xff] }
 0x420   : > { %v11204_v35 = vadd.f32 %v6763_v54, %v6762_v21  ;;  %v6765_v32 = vpop.f32.mrb[166].mxu0  ;;  %7065 = vmatpush3.bf16.msra.mxu0 %v13083_v4  ;;  %v13109_v54 = vld [vmem:[#allocation49_spill] sm:$0xff]  ;;  %v13112_v4 = vld [vmem:[#allocation12_spill] sm:$0xff] }
 0x421   : > { %v6766_v2 = vpop.f32.mrb[167].mxu0  ;;  %7066 = vmatprep.subr.bf16.mxu0 %v13084_v58 }
 0x422   : > { %v11208_v55 = vadd.f32 %v6766_v2, %v6765_v32  ;;  %6773 = vmatpush3.bf16.msra.mxu1 %v13085_v39  ;;  %v13111_v32 = vld [vmem:[#allocation70_spill] sm:$0xff] }
 0x423   : > { %6774 = vmatprep.subr.bf16.mxu1 %v13086_v33 }
 0x424   : > { %7067 = vmatpush3.bf16.msra.mxu0 %v13087_v28 }
 0x425   : > { %7068 = vmatprep.subr.bf16.mxu0 %v13088_v38  ;;  %v13114_v38 = vld [vmem:[#allocation72_spill] sm:$0xff] }
 0x426   : > { %6775 = vmatpush3.bf16.msra.mxu1 %v13089_v63  ;;  %v13115_v63 = vld [vmem:[#allocation73_spill] sm:$0xff] }
 0x427   : > { %6776 = vmatprep.subr.bf16.mxu1 %v13090_v42  ;;  %v13117_v42 = vld [vmem:[#allocation15_spill] sm:$0xff] }
 0x428   : > { %7069 = vmatpush3.bf16.msra.mxu0 %v13091_v13  ;;  %v11275_v13 = vld [vmem:[%s12408_s3 + $0x140] sm:$0xff]  }
 0x429   : > { %7098 = vmatprep.subr.bf16.mxu0 %v13092_v27 }
 0x42a   : > { %6777 = vmatpush3.bf16.msra.mxu1 %v13093_v45  ;;  %v13119_v45 = vld [vmem:[#allocation75_spill] sm:$0xff] }
 0x42b   : > { %4700 = vmatmul.mubr.bf16.vlgmr.msra.gmra.mrb[192].mxu0 %v4417_v62  ;;  %6778 = vmatprep.subr.bf16.mxu1 %v13094_v10  ;;  %v13118_v62 = vld [vmem:[#allocation17_spill] sm:$0xff]  ;;  %v13120_v10 = vld [vmem:[#allocation22_spill] sm:$0xff] }
 0x42c   : > { %v6476_v26 = vpop.f32.mrb[68].mxu1  ;;  %7099 = vmatpush3.bf16.msra.mxu0 %v13095_v41  ;;  %4844 = vmatprep.mubr.bf16.mxu0 %v4797_v51 }
 0x42d   : > { %v6477_v14 = vpop.f32.mrb[69].mxu1  ;;  %7100 = vmatprep.subr.bf16.mxu0 %v13096_v43  ;;  %v13122_v43 = vld [vmem:[#allocation25_spill] sm:$0xff] }
 0x42e   : > { %v6478_v16 = vadd.f32 %v6477_v14, %v6476_v26  ;;  %v6479_v9 = vpop.f32.mrb[70].mxu1  ;;  %6779 = vmatpush3.bf16.msra.mxu1 %v13097_v59 }
 0x42f   : > { %v6480_v53 = vpop.f32.mrb[71].mxu1  ;;  %6780 = vmatprep.subr.bf16.mxu1 %v10680_v24  ;;  %v3997_v24 = vld [vmem:[#allocation2 + $0xef] sm:$0x1] }
 0x430   : > { %v3406_v60 = vadd.f32 %v6478_v16, %v3365_v1  ;;  %v6481_v15 = vadd.f32 %v6480_v53, %v6479_v9  ;;  %7101 = vmatpush3.bf16.msra.mxu0 %v10687_v44  ;;  %v13105_v1 = vld [vmem:[#allocation47_spill] sm:$0xff]  ;;  %v4016_v44 = vpack.c.bf16 %v3987_v11, %v11120_v8  ;;  %v4021_v21 = vpack.c.bf16 %v3997_v24, %v11129_v50  ;;  %v13123_v9 = vld [vmem:[#allocation26_spill] sm:$0xff]  ;;  %v13130_v11 = vld [vmem:[#allocation4_spill] sm:$0xff] }
 0x431   : > { %7102 = vmatprep.subr.bf16.mxu0 %v13098_v30  ;;  %v13113_v8 = vld [vmem:[#allocation71_spill] sm:$0xff]  ;;  %v4005_v24 = vld [vmem:[#allocation2 + $0x103] sm:$0x1] }
 0x432   : > { %v3409_v56 = vadd.f32 %v6481_v15, %v3368_v6  ;;  %6781 = vmatpush3.bf16.msra.mxu1 %v13099_v5  ;;  %v3447_v61 = vadd.f32 %v13100_v22, %v3406_v60  ;;  %v13107_v6 = vld [vmem:[#allocation68_spill] sm:$0xff]  ;;  %v13125_v60 = vld [vmem:[#allocation7_spill] sm:$0xff] }
 0x433   : > { %6782 = vmatprep.subr.bf16.mxu1 %v13101_v46  ;;  %v13126_v30 = vld [vmem:[#allocation79_spill] sm:$0xff]  ;;  %v13128_v22 = vld [vmem:[#allocation8_spill] sm:$0xff]  ;;  %v13129_v46 = vld [vmem:[#allocation30_spill] sm:$0xff] }
 0x434   : > { %7103 = vmatpush3.bf16.msra.mxu0 %v13102_v25  ;;  %v3450_v52 = vadd.f32 %v13103_v37, %v3409_v56  ;;  %v13127_v56 = vld [vmem:[#allocation56_spill] sm:$0xff]  ;;  %v3995_v25 = vld [vmem:[#allocation2 + $0xe5] sm:$0x1] }
 0x435   : > { %7104 = vmatprep.subr.bf16.mxu0 %v13104_v20  ;;  %v13131_v20 = vld [vmem:[#allocation34_spill] sm:$0xff] }
 0x436   : > { %6783 = vmatpush3.bf16.msra.mxu1 %v13105_v1  ;;  %v13132_v1 = vld [vmem:[#allocation9_spill] sm:$0xff] }
 0x437   : > { %6812 = vmatprep.subr.bf16.mxu1 %v13106_v31  ;;  %v13134_v31 = vld [vmem:[#allocation35_spill] sm:$0xff] }
 0x438   : > { %7105 = vmatpush3.bf16.msra.mxu0 %v13107_v6 }
 0x439   : > { %4104 = vmatmul.mubr.bf16.vlgmr.msra.gmra.mrb[96].mxu1 %v4016_v44  ;;  %7106 = vmatprep.subr.bf16.mxu0 %v13108_v36  ;;  %v13133_v44 = vld [vmem:[#allocation10_spill] sm:$0xff]  ;;  %v13136_v36 = vld [vmem:[#allocation11_spill] sm:$0xff] }
 0x43a   : > { %6813 = vmatpush3.bf16.msra.mxu1 %v13109_v54  ;;  %4185 = vmatprep.mubr.bf16.mxu1 %v4021_v21  ;;  %v13135_v21 = vld [vmem:[#allocation82_spill] sm:$0xff]  ;;  %v13137_v54 = vld [vmem:[#allocation16_spill] sm:$0xff] }
 0x43b   : > { %6814 = vmatprep.subr.bf16.mxu1 %v13110_v18  ;;  %v13138_v18 = vld [vmem:[#allocation83_spill] sm:$0xff] }
 0x43c   : > { %7107 = vmatpush3.bf16.msra.mxu0 %v13111_v32  ;;  %v13139_v32 = vld [vmem:[#allocation84_spill] sm:$0xff] }
 0x43d   : > { %7108 = vmatprep.subr.bf16.mxu0 %v13112_v4 }
 0x43e   : > { %v6806_v2 = vpop.f32.mrb[168].mxu0  ;;  %6815 = vmatpush3.bf16.msra.mxu1 %v13113_v8  ;;  %v13141_v8 = vld [vmem:[#allocation86_spill] sm:$0xff] }
 0x43f   : > { %v6807_v58 = vpop.f32.mrb[169].mxu0  ;;  %6816 = vmatprep.subr.bf16.mxu1 %v10786_v7  ;;  %v11260_v7 = vld [vmem:[%s12408_s3 + $0x78] sm:$0xff]  }
 0x440   : > { %v11248_v39 = vadd.f32 %v6807_v58, %v6806_v2  ;;  %v6809_v50 = vpop.f32.mrb[170].mxu0  ;;  %7109 = vmatpush3.bf16.msra.mxu0 %v10794_v29  ;;  %v4765_v29 = vld [vmem:[#allocation2 + $0x120] sm:$0x1] }
 0x441   : > { %v6810_v33 = vpop.f32.mrb[171].mxu0  ;;  %7110 = vmatprep.subr.bf16.mxu0 %v10800_v12  ;;  %v4775_v12 = vld [vmem:[#allocation2 + $0x13e] sm:$0x1]  ;;  %v4796_v49 = vpack.c.bf16 %v4765_v29, %v11163_v19  ;;  %v13146_v29 = vld [vmem:[#allocation27_spill] sm:$0xff] }
 0x442   : > { %v11252_v28 = vadd.f32 %v6810_v33, %v6809_v50  ;;  %6817 = vmatpush3.bf16.msra.mxu1 %v10808_v48  ;;  %v11268_v48 = vld [vmem:[%s12408_s3 + $0x38] sm:$0xff]   ;;  %v4801_v27 = vpack.c.bf16 %v4775_v12, %v11166_v40  ;;  %v13148_v12 = vld [vmem:[#allocation89_spill] sm:$0xff] }
 0x443   : > { %6818 = vmatprep.subr.bf16.mxu1 %v13114_v38  ;;  %v13121_v19 = vld [vmem:[#allocation80_spill] sm:$0xff] }
 0x444   : > { %7111 = vmatpush3.bf16.msra.mxu0 %v13115_v63  ;;  %v13124_v40 = vld [vmem:[#allocation76_spill] sm:$0xff]  ;;  %v13144_v63 = vld [vmem:[#allocation87_spill] sm:$0xff] }
 0x445   : > { %7112 = vmatprep.subr.bf16.mxu0 %v11260_v7  ;;  %v13143_v33 = vld [vmem:[#allocation24_spill] sm:$0xff] }
 0x446   : > { %6819 = vmatpush3.bf16.msra.mxu1 %v13116_v34 }
 0x447   : > { %6820 = vmatprep.subr.bf16.mxu1 %v13117_v42  ;;  %v13147_v42 = vld [vmem:[#allocation28_spill] sm:$0xff] }
 0x448   : > { %7113 = vmatpush3.bf16.msra.mxu0 %v11268_v48 }
 0x449   : > { %7142 = vmatprep.subr.bf16.mxu0 %v11275_v13 }
 0x44a   : > { %6821 = vmatpush3.bf16.msra.mxu1 %v13118_v62  ;;  %v13150_v62 = vld [vmem:[#allocation32_spill] sm:$0xff] }
 0x44b   : > { %4845 = vmatmul.mubr.bf16.vlgmr.msra.gmra.mrb[196].mxu0 %v4796_v49  ;;  %6822 = vmatprep.subr.bf16.mxu1 %v13119_v45  ;;  %v13149_v49 = vld [vmem:[#allocation90_spill] sm:$0xff]  ;;  %v13151_v45 = vld [vmem:[#allocation31_spill] sm:$0xff] }
 0x44c   : > { %v6520_v51 = vpop.f32.mrb[72].mxu1  ;;  %7143 = vmatpush3.bf16.msra.mxu0 %v13120_v10  ;;  %4926 = vmatprep.mubr.bf16.mxu0 %v4801_v27  ;;  %v4773_v27 = vld [vmem:[#allocation2 + $0x134] sm:$0x1]  ;;  %v4783_v10 = vld [vmem:[#allocation2 + $0x152] sm:$0x1] }
 0x44d   : > { %v6521_v26 = vpop.f32.mrb[73].mxu1  ;;  %7144 = vmatprep.subr.bf16.mxu0 %v13121_v19  ;;  %v4800_v19 = vpack.c.bf16 %v4773_v27, %v11215_v57 }
 0x44e   : > { %v6522_v41 = vadd.f32 %v6521_v26, %v6520_v51  ;;  %v6523_v14 = vpop.f32.mrb[74].mxu1  ;;  %6823 = vmatpush3.bf16.msra.mxu1 %v13122_v43  ;;  %v11319_v51 = vld [vmem:[#allocation2 + $0x14a] sm:$0xff]  ;;  %v13152_v26 = vld [vmem:[#allocation33_spill] sm:$0xff] }
 0x44f   : > { %v6524_v16 = vpop.f32.mrb[75].mxu1  ;;  %6824 = vmatprep.subr.bf16.mxu1 %v13123_v9  ;;  %v4805_v43 = vpack.c.bf16 %v4783_v10, %v11319_v51  ;;  %v11408_v10 = vld [vmem:[%s12408_s3 + $0x228] sm:$0xff]  }
 0x450   : > { %v3488_v59 = vadd.f32 %v6522_v41, %v3447_v61  ;;  %v6525_v53 = vadd.f32 %v6524_v16, %v6523_v14  ;;  %7145 = vmatpush3.bf16.msra.mxu0 %v13124_v40  ;;  %v11293_v61 = vld [vmem:[#allocation2 + $0xfb] sm:$0xff]  ;;  %v13154_v14 = vld [vmem:[#allocation91_spill] sm:$0xff] }
 0x451   : > { %7146 = vmatprep.subr.bf16.mxu0 %v13125_v60  ;;  %v4025_v6 = vpack.c.bf16 %v4005_v24, %v11293_v61  ;;  %v13153_v41 = vld [vmem:[#allocation52_spill] sm:$0xff]  ;;  %v13157_v40 = vld [vmem:[#allocation53_spill] sm:$0xff] }
 0x452   : > { %v3491_v15 = vadd.f32 %v6525_v53, %v3450_v52  ;;  %6825 = vmatpush3.bf16.msra.mxu1 %v13126_v30  ;;  %v3529_v5 = vadd.f32 %v13127_v56, %v3488_v59  ;;  %v4020_v52 = vpack.c.bf16 %v3995_v25, %v11188_v17  ;;  %v13140_v17 = vld [vmem:[#allocation20_spill] sm:$0xff]  ;;  %v13158_v30 = vld [vmem:[#allocation77_spill] sm:$0xff]  ;;  %v13159_v56 = vld [vmem:[#allocation78_spill] sm:$0xff] }
 0x453   : > { %6826 = vmatprep.subr.bf16.mxu1 %v13128_v22  ;;  %v13155_v16 = vld [vmem:[#allocation92_spill] sm:$0xff]  ;;  %v13160_v25 = vld [vmem:[#allocation81_spill] sm:$0xff] }
 0x454   : > { %7147 = vmatpush3.bf16.msra.mxu0 %v13129_v46  ;;  %v3532_v37 = vadd.f32 %v13130_v11, %v3491_v15  ;;  %v13156_v59 = vld [vmem:[#allocation36_spill] sm:$0xff]  ;;  %v13161_v11 = vld [vmem:[#allocation29_spill] sm:$0xff] }
 0x455   : > { %7148 = vmatprep.subr.bf16.mxu0 %v13131_v20 }
 0x456   : > { %6827 = vmatpush3.bf16.msra.mxu1 %v13132_v1  ;;  %v13162_v1 = vld [vmem:[#allocation19_spill] sm:$0xff] }
 0x457   : > { %6856 = vmatprep.subr.bf16.mxu1 %v13133_v44 }
 0x458   : > { %7149 = vmatpush3.bf16.msra.mxu0 %v13134_v31 }
 0x459   : > { %4186 = vmatmul.mubr.bf16.vlgmr.msra.gmra.mrb[100].mxu1 %v4020_v52  ;;  %7150 = vmatprep.subr.bf16.mxu0 %v13135_v21  ;;  %v13163_v52 = vld [vmem:[#allocation85_spill] sm:$0xff]  ;;  %v11336_v21 = vld [vmem:[#allocation2 + $0xf1] sm:$0xff] }
 0x45a   : > { %6857 = vmatpush3.bf16.msra.mxu1 %v13136_v36  ;;  %4267 = vmatprep.mubr.bf16.mxu1 %v4025_v6  ;;  %v13164_v6 = vld [vmem:[#allocation54_spill] sm:$0xff]  ;;  %v5819_v36 = vld [vmem:[%s10060_s14 + $0x1c] sm:$0x1] }
 0x45b   : > { %6858 = vmatprep.subr.bf16.mxu1 %v13137_v54  ;;  %v13165_v54 = vld [vmem:[#allocation3_spill] sm:$0xff] }
 0x45c   : > { %7151 = vmatpush3.bf16.msra.mxu0 %v13138_v18  ;;  %v11340_v18 = vld [vmem:[#allocation2 + $0x10f] sm:$0xff] }
 0x45d   : > { %7152 = vmatprep.subr.bf16.mxu0 %v13139_v32  ;;  %v4013_v32 = vld [vmem:[#allocation2 + $0x117] sm:$0x1] }
 0x45e   : > { %v6850_v4 = vpop.f32.mrb[172].mxu0  ;;  %6859 = vmatpush3.bf16.msra.mxu1 %v13140_v17  ;;  %v11348_v17 = vld [vmem:[%s12408_s3 + $0x3c0] sm:$0xff]  }
 0x45f   : > { %v6851_v2 = vpop.f32.mrb[173].mxu0  ;;  %6860 = vmatprep.subr.bf16.mxu1 %v13141_v8  ;;  %v11356_v8 = vld [vmem:[%s12408_s3 + $0x218] sm:$0xff]  }
 0x460   : > { %v11307_v58 = vadd.f32 %v6851_v2, %v6850_v4  ;;  %v6853_v50 = vpop.f32.mrb[174].mxu0  ;;  %7153 = vmatpush3.bf16.msra.mxu0 %v13143_v33  ;;  %v11370_v33 = vld [vmem:[%s12408_s3 + $0x380] sm:$0xff]  }
 0x461   : > { %v6854_v38 = vpop.f32.mrb[175].mxu0  ;;  %7154 = vmatprep.subr.bf16.mxu0 %v13144_v63  ;;  %v11382_v63 = vld [vmem:[%s12408_s3 + $0x220] sm:$0xff]  }
 0x462   : > { %13142 = vst [vmem:[#allocation37_spill] sm:$0xff] %v11307_v58  ;;  %v11311_v34 = vadd.f32 %v6854_v38, %v6853_v50  ;;  %6861 = vmatpush3.bf16.msra.mxu1 %v13146_v29  ;;  %v11364_v50 = vld [vmem:[%s12408_s3 + $0x260] sm:$0xff]   ;;  %v11376_v38 = vld [vmem:[%s12408_s3 + $0x3c8] sm:$0xff]  }
 0x463   : > { %6862 = vmatprep.subr.bf16.mxu1 %v13147_v42  ;;  %v11388_v29 = vld [vmem:[%s12408_s3 + $0x268] sm:$0xff]  }
 0x464   : > { %13145 = vst [vmem:[#allocation57_spill] sm:$0xff] %v11311_v34  ;;  %7155 = vmatpush3.bf16.msra.mxu0 %v13148_v12  ;;  %v11394_v12 = vld [vmem:[%s12408_s3 + $0x388] sm:$0xff]  }
 0x465   : > { %7156 = vmatprep.subr.bf16.mxu0 %v13149_v49 }
 0x466   : > { %6863 = vmatpush3.bf16.msra.mxu1 %v13150_v62  ;;  %v11400_v62 = vld [vmem:[%s12408_s3 + $0x3d0] sm:$0xff]  }
 0x467   : > { %6864 = vmatprep.subr.bf16.mxu1 %v13151_v45 }
 0x468   : > { %7157 = vmatpush3.bf16.msra.mxu0 %v13152_v26 }
 0x469   : > { %7186 = vmatprep.subr.bf16.mxu0 %v13153_v41 }
 0x46a   : > { %6865 = vmatpush3.bf16.msra.mxu1 %v13154_v14  ;;  %v11422_v14 = vld [vmem:[%s12408_s3 + $0x390] sm:$0xff]  }
 0x46b   : > { %4927 = vmatmul.mubr.bf16.vlgmr.msra.gmra.mrb[200].mxu0 %v4800_v19  ;;  %6866 = vmatprep.subr.bf16.mxu1 %v13155_v16  ;;  %v11414_v19 = vld [vmem:[%s12408_s3 + $0x270] sm:$0xff]  }
 0x46c   : > { %v6564_v9 = vpop.f32.mrb[76].mxu1  ;;  %7187 = vmatpush3.bf16.msra.mxu0 %v13156_v59  ;;  %5008 = vmatprep.mubr.bf16.mxu0 %v4805_v43  ;;  %v11428_v43 = vld [vmem:[%s12408_s3 + $0x3d8] sm:$0xff]   ;;  %v11434_v16 = vld [vmem:[%s12408_s3 + $0x230] sm:$0xff]  }
 0x46d   : > { %v6565_v53 = vpop.f32.mrb[77].mxu1  ;;  %7188 = vmatprep.subr.bf16.mxu0 %v13157_v40  ;;  %v11446_v59 = vld [vmem:[%s12408_s3 + $0x398] sm:$0xff]   ;;  %v4781_v40 = vld [vmem:[#allocation2 + $0x148] sm:$0x1] }
 0x46e   : > { %v6566_v60 = vadd.f32 %v6565_v53, %v6564_v9  ;;  %v6567_v15 = vpop.f32.mrb[78].mxu1  ;;  %6867 = vmatpush3.bf16.msra.mxu1 %v13158_v30  ;;  %v11440_v9 = vld [vmem:[%s12408_s3 + $0x278] sm:$0xff]   ;;  %v11449_v53 = vld [vmem:[#allocation2 + $0x140] sm:$0xff] }
 0x46f   : > { %v6568_v57 = vpop.f32.mrb[79].mxu1  ;;  %6868 = vmatprep.subr.bf16.mxu1 %v13159_v56  ;;  %v4791_v30 = vld [vmem:[#allocation2 + $0x166] sm:$0x1]  ;;  %v4804_v56 = vpack.c.bf16 %v4781_v40, %v11449_v53  ;;  %v11533_v40 = vld [vmem:[%s12408_s3 + $0x3b0] sm:$0xff]  }
 0x470   : > { %v3570_v22 = vadd.f32 %v6566_v60, %v3529_v5  ;;  %v6569_v46 = vadd.f32 %v6568_v57, %v6567_v15  ;;  %7189 = vmatpush3.bf16.msra.mxu0 %v13160_v25  ;;  %v4003_v5 = vld [vmem:[#allocation2 + $0xf9] sm:$0x1]  ;;  %v11454_v60 = vld [vmem:[%s12408_s3 + $0x3e0] sm:$0xff]  }
 0x471   : > { %7190 = vmatprep.subr.bf16.mxu0 %v13161_v11  ;;  %v4024_v4 = vpack.c.bf16 %v4003_v5, %v11336_v21  ;;  %v11457_v15 = vld [vmem:[#allocation2 + $0x15e] sm:$0xff]  ;;  %v11482_v11 = vld [vmem:[%s12408_s3 + $0x3e8] sm:$0xff]  }
 0x472   : > { %v3576_v20 = vmax.f32 %v3570_v22, 0.0  ;;  %v3573_v24 = vadd.f32 %v6569_v46, %v3532_v37  ;;  %6869 = vmatpush3.bf16.msra.mxu1 %v13162_v1  ;;  %v11462_v57 = vld [vmem:[%s12408_s3 + $0x238] sm:$0xff]   ;;  %v11469_v22 = vld [vmem:[%s12408_s3 + $0x340] sm:$0xff]   ;;  %v4809_v25 = vpack.c.bf16 %v4791_v30, %v11457_v15 }
 0x473   : > { %6870 = vmatprep.subr.bf16.mxu1 %v13163_v52  ;;  %v11475_v46 = vld [vmem:[%s12408_s3 + $0x3a0] sm:$0xff]   ;;  %v11494_v52 = vld [vmem:[%s12408_s3 + $0x348] sm:$0xff]  }
 0x474   : > { %v5854_v44 = vpack.c.bf16 %v3576_v20, %v3576_v20  ;;  %v3577_v31 = vmax.f32 %v3573_v24, 0.0  ;;  %7191 = vmatpush3.bf16.msra.mxu0 %v13164_v6  ;;  %v11488_v24 = vld [vmem:[%s12408_s3 + $0x300] sm:$0xff]  }
 0x475   : > { %7192 = vmatprep.subr.bf16.mxu0 %v13165_v54  ;;  %v11507_v54 = vld [vmem:[%s12408_s3 + $0x3a8] sm:$0xff]   ;;  %v13170_v30 = vld [vmem:[#allocation13_spill] sm:$0xff] }
 0x476   : > { %5818 = vst [vmem:[%s10060_s14 + $0x18] sm:$0xf] %v5854_v44  ;;  %v5855_v37 = vpack.c.bf16 %v3577_v31, %v3577_v31  ;;  %6871 = vmatpush3.bf16.msra.mxu1 %v11135_v0  ;;  %v4029_v0 = vpack.c.bf16 %v4013_v32, %v11340_v18  ;;  %v11500_v44 = vld [vmem:[%s12409_s4] ss:$0 sm:$0xff]  ;;  %v13168_v31 = vld [vmem:[#allocation38_spill] sm:$0xff] }
 0x477   : > { %6900 = vmatprep.subr.bf16.mxu1 %v11348_v17  ;;  %v3674_v6 = vadd.f32 %v11500_v44, %v13168_v31  ;;  %v4011_v31 = vld [vmem:[#allocation2 + $0x10d] sm:$0x1] }
 0x478   : > { %v3589_v2 = vsel %vm10080_vm2, %v5855_v37, %v5819_v36  ;;  %7193 = vmatpush3.bf16.msra.mxu0 %v11356_v8  ;;  %v11513_v37 = vld [vmem:[%s12408_s3 + $0x3f0] sm:$0xff]  }
 0x479   : > { %5820 = vst [vmem:[%s10060_s14 + $0x1c] sm:$0x1] %v3589_v2  ;;  %4268 = vmatmul.mubr.bf16.vlgmr.msra.gmra.mrb[104].mxu1 %v4024_v4  ;;  %7194 = vmatprep.subr.bf16.mxu0 %v11364_v50  ;;  %v13169_v4 = vld [vmem:[#allocation39_spill] sm:$0xff] }
 0x47a   : > { %6901 = vmatpush3.bf16.msra.mxu1 %v11370_v33  ;;  %4349 = vmatprep.mubr.bf16.mxu1 %v4029_v0  ;;  %v3677_v2 = vadd.f32 %v11500_v44, %v13169_v4  ;;  %v11565_v4 = vld [vmem:[%s12408_s3 + $0x3b8] sm:$0xff]  }
 0x47b   : > { %6902 = vmatprep.subr.bf16.mxu1 %v11376_v38 }
 0x47c   : > { %7195 = vmatpush3.bf16.msra.mxu0 %v11382_v63 }
 0x47d   : > { %7196 = vmatprep.subr.bf16.mxu0 %v11388_v29 }
 0x47e   : > { %v6894_v42 = vpop.f32.mrb[176].mxu0  ;;  %6903 = vmatpush3.bf16.msra.mxu1 %v11394_v12 }
 0x47f   : > { %v6895_v49 = vpop.f32.mrb[177].mxu0  ;;  %6904 = vmatprep.subr.bf16.mxu1 %v11400_v62 }
 0x480   : > { %v11403_v27 = vadd.f32 %v6895_v49, %v6894_v42  ;;  %v6897_v45 = vpop.f32.mrb[178].mxu0  ;;  %7197 = vmatpush3.bf16.msra.mxu0 %v11408_v10  ;;  %v11521_v49 = vld [vmem:[%s12408_s3 + $0x308] sm:$0xff]  }
 0x481   : > { %v6898_v26 = vpop.f32.mrb[179].mxu0  ;;  %7198 = vmatprep.subr.bf16.mxu0 %v11414_v19 }
 0x482   : > { %13166 = vst [vmem:[#allocation58_spill] sm:$0xff] %v11403_v27  ;;  %v11417_v41 = vadd.f32 %v6898_v26, %v6897_v45  ;;  %6905 = vmatpush3.bf16.msra.mxu1 %v11422_v14  ;;  %v11527_v45 = vld [vmem:[%s12408_s3 + $0x350] sm:$0xff]  }
 0x483   : > { %6906 = vmatprep.subr.bf16.mxu1 %v11428_v43  ;;  %v11621_v27 = vld [vmem:[%s12408_s3 + $0xd0] sm:$0xff]  }
 0x484   : > { %13167 = vst [vmem:[#allocation59_spill] sm:$0xff] %v11417_v41  ;;  %7199 = vmatpush3.bf16.msra.mxu0 %v11434_v16  ;;  %13177 = vst [vmem:[#allocation45_spill] sm:$0xff] %v11621_v27 }
 0x485   : > { %7200 = vmatprep.subr.bf16.mxu0 %v11440_v9 }
 0x486   : > { %6907 = vmatpush3.bf16.msra.mxu1 %v11446_v59 }
 0x487   : > { %6908 = vmatprep.subr.bf16.mxu1 %v11454_v60 }
 0x488   : > { %7201 = vmatpush3.bf16.msra.mxu0 %v11462_v57 }
 0x489   : > { %7230 = vmatprep.subr.bf16.mxu0 %v11469_v22 }
 0x48a   : > { %6909 = vmatpush3.bf16.msra.mxu1 %v11475_v46 }
 0x48b   : > { %5009 = vmatmul.mubr.bf16.vlgmr.msra.gmra.mrb[204].mxu0 %v4804_v56  ;;  %6910 = vmatprep.subr.bf16.mxu1 %v11482_v11 }
 0x48c   : > { %v6608_v20 = vpop.f32.mrb[80].mxu1  ;;  %7231 = vmatpush3.bf16.msra.mxu0 %v11488_v24  ;;  %5090 = vmatprep.mubr.bf16.mxu0 %v4809_v25  ;;  %v11542_v25 = vld [vmem:[%s12408_s3 + $0x3f8] sm:$0xff]  }
 0x48d   : > { %v6609_v1 = vpop.f32.mrb[81].mxu1  ;;  %7232 = vmatprep.subr.bf16.mxu0 %v11494_v52 }
 0x48e   : > { %v6610_v5 = vadd.f32 %v6609_v1, %v6608_v20  ;;  %v6611_v36 = vpop.f32.mrb[82].mxu1  ;;  %6911 = vmatpush3.bf16.msra.mxu1 %v11507_v54  ;;  %v11548_v20 = vld [vmem:[%s12408_s3 + $0x310] sm:$0xff]   ;;  %v11551_v1 = vld [vmem:[#allocation2 + $0x105] sm:$0xff] }
 0x48f   : > { %v6612_v32 = vpop.f32.mrb[83].mxu1  ;;  %6912 = vmatprep.subr.bf16.mxu1 %v11513_v37 }
 0x490   : > { %v3715_v0 = vadd.f32 %v6610_v5, %v3674_v6  ;;  %v6613_v42 = vadd.f32 %v6612_v32, %v6611_v36  ;;  %7233 = vmatpush3.bf16.msra.mxu0 %v11521_v49  ;;  %v13171_v6 = vld [vmem:[#allocation14_spill] sm:$0xff]  ;;  %v11559_v36 = vld [vmem:[%s12408_s3 + $0x358] sm:$0xff]   ;;  %v4380_v32 = vld [vmem:[#allocation2 + $0x103] sm:$0x1] }
 0x491   : > { %7234 = vmatprep.subr.bf16.mxu0 %v11527_v45 }
 0x492   : > { %v3718_v26 = vadd.f32 %v6613_v42, %v3677_v2  ;;  %6913 = vmatpush3.bf16.msra.mxu1 %v11533_v40  ;;  %v11537_v56 = vadd.f32 %v13170_v30, %v3715_v0  ;;  %v4028_v2 = vpack.c.bf16 %v4011_v31, %v11551_v1  ;;  %v11572_v0 = vld [vmem:[%s12408_s3 + $0xc0] sm:$0xff]   ;;  %v11578_v42 = vld [vmem:[%s12408_s3 + $0x318] sm:$0xff]  }
 0x493   : > { %6914 = vmatprep.subr.bf16.mxu1 %v11542_v25  ;;  %v11585_v30 = vld [vmem:[%s12408_s3 + $0x360] sm:$0xff]  }
 0x494   : > { %7235 = vmatpush3.bf16.msra.mxu0 %v11548_v20  ;;  %v11554_v5 = vadd.f32 %v13171_v6, %v3718_v26  ;;  %v4408_v26 = vpack.c.bf16 %v4380_v32, %v11293_v61  ;;  %v11591_v31 = vld [vmem:[%s12408_s3 + $0x80] sm:$0xff]   ;;  %v11597_v61 = vld [vmem:[%s12408_s3 + $0xc8] sm:$0xff]  }
 0x495   : > { %7236 = vmatprep.subr.bf16.mxu0 %v11559_v36  ;;  %13172 = vst [vmem:[#allocation60_spill] sm:$0xff] %v11591_v31  ;;  %13173 = vst [vmem:[#allocation6_spill] sm:$0xff] %v11597_v61  ;;  %v11603_v6 = vld [vmem:[%s12408_s3 + $0x320] sm:$0xff]   ;;  %v11609_v32 = vld [vmem:[%s12408_s3 + $0x368] sm:$0xff]  }
 0x496   : > { %6915 = vmatpush3.bf16.msra.mxu1 %v11565_v4  ;;  %13174 = vst [vmem:[#allocation61_spill] sm:$0xff] %v11603_v6  ;;  %13175 = vst [vmem:[#allocation50_spill] sm:$0xff] %v11609_v32 }
 0x497   : > { %6944 = vmatprep.subr.bf16.mxu1 %v11572_v0 }
 0x498   : > { %7237 = vmatpush3.bf16.msra.mxu0 %v11578_v42 }
 0x499   : > { %4350 = vmatmul.mubr.bf16.vlgmr.msra.gmra.mrb[108].mxu1 %v4028_v2  ;;  %7238 = vmatprep.subr.bf16.mxu0 %v11585_v30 }
 0x49a   : > { %6945 = vmatpush3.bf16.msra.mxu1 %v11591_v31  ;;  %4494 = vmatprep.mubr.bf16.mxu1 %v4408_v26  ;;  %v11615_v26 = vld [vmem:[%s12408_s3 + $0x88] sm:$0xff]   ;;  %v11730_v31 = vld [vmem:[%s12408_s3 + $0xb0] sm:$0xff]  }
 0x49b   : > { %6946 = vmatprep.subr.bf16.mxu1 %v11597_v61  ;;  %13176 = vst [vmem:[#allocation43_spill] sm:$0xff] %v11615_v26 }
 0x49c   : > { %7239 = vmatpush3.bf16.msra.mxu0 %v11603_v6 }
 0x49d   : > { %7240 = vmatprep.subr.bf16.mxu0 %v11609_v32  ;;  %v11629_v32 = vld [vmem:[%s12408_s3 + $0x328] sm:$0xff]  }
 0x49e   : > { %v6938_v2 = vpop.f32.mrb[180].mxu0  ;;  %6947 = vmatpush3.bf16.msra.mxu1 %v11615_v26  ;;  %13179 = vst [vmem:[#allocation40_spill] sm:$0xff] %v11629_v32  ;;  %v11635_v26 = vld [vmem:[%s12408_s3 + $0x370] sm:$0xff]  }
 0x49f   : > { %v6939_v41 = vpop.f32.mrb[181].mxu0  ;;  %6948 = vmatprep.subr.bf16.mxu1 %v11621_v27  ;;  %13180 = vst [vmem:[#allocation62_spill] sm:$0xff] %v11635_v26 }
 0x4a0   : > { %v11624_v34 = vadd.f32 %v6939_v41, %v6938_v2  ;;  %v6941_v58 = vpop.f32.mrb[182].mxu0  ;;  %7241 = vmatpush3.bf16.msra.mxu0 %v11629_v32  ;;  %v11643_v41 = vld [vmem:[%s12408_s3 + $0x90] sm:$0xff]   ;;  %v11649_v2 = vld [vmem:[%s12408_s3 + $0xd8] sm:$0xff]   ;;  %v11691_v32 = vld [vmem:[%s12408_s3 + $0xa0] sm:$0xff]  }
 0x4a1   : > { %v6942_v6 = vpop.f32.mrb[183].mxu0  ;;  %7242 = vmatprep.subr.bf16.mxu0 %v11635_v26  ;;  %13182 = vst [vmem:[#allocation63_spill] sm:$0xff] %v11643_v41  ;;  %13183 = vst [vmem:[#allocation41_spill] sm:$0xff] %v11649_v2  ;;  %v7992_v26 = vld [vmem:[%s12408_s3 + $0x40] sm:$0xff]  }
 0x4a2   : > { %13178 = vst [vmem:[#allocation18_spill] sm:$0xff] %v11624_v34  ;;  %v11638_v61 = vadd.f32 %v6942_v6, %v6941_v58  ;;  %6949 = vmatpush3.bf16.msra.mxu1 %v11643_v41  ;;  %v11655_v34 = vld [vmem:[%s12408_s3 + $0x330] sm:$0xff]   ;;  %v11661_v58 = vld [vmem:[%s12408_s3 + $0x378] sm:$0xff]   ;;  %13189 = vst [vmem:[#allocation46_spill] sm:$0xff] %v11691_v32 }
 0x4a3   : > { %6950 = vmatprep.subr.bf16.mxu1 %v11649_v2  ;;  %13184 = vst [vmem:[#allocation42_spill] sm:$0xff] %v11655_v34  ;;  %13185 = vst [vmem:[#allocation64_spill] sm:$0xff] %v11661_v58  ;;  %v11667_v6 = vld [vmem:[%s12408_s3 + $0x98] sm:$0xff]   ;;  %v5158_v41 = vld [vmem:[#allocation2 + $0x152] sm:$0x1] }
 0x4a4   : > { %13181 = vst [vmem:[#allocation21_spill] sm:$0xff] %v11638_v61  ;;  %7243 = vmatpush3.bf16.msra.mxu0 %v11655_v34  ;;  %13186 = vst [vmem:[#allocation65_spill] sm:$0xff] %v11667_v6  ;;  %v11670_v61 = vld [vmem:[#allocation2 + $0x154] sm:$0xff]  ;;  %v4789_v2 = vld [vmem:[#allocation2 + $0x15c] sm:$0x1] }
 0x4a5   : > { %7244 = vmatprep.subr.bf16.mxu0 %v11661_v58  ;;  %v11675_v34 = vld [vmem:[%s12408_s3 + $0xe0] sm:$0xff]   ;;  %v11681_v58 = vld [vmem:[%s12408_s3 + $0x338] sm:$0xff]  }
 0x4a6   : > { %6951 = vmatpush3.bf16.msra.mxu1 %v11667_v6  ;;  %13187 = vst [vmem:[#allocation44_spill] sm:$0xff] %v11675_v34  ;;  %13188 = vst [vmem:[#allocation5_spill] sm:$0xff] %v11681_v58  ;;  %v4808_v6 = vpack.c.bf16 %v4789_v2, %v11670_v61 }
 0x4a7   : > { %6952 = vmatprep.subr.bf16.mxu1 %v11675_v34  ;;  %v5188_v34 = vpack.c.bf16 %v5158_v41, %v11319_v51  ;;  %v7996_v51 = vld [vmem:[%s12408_s3 + $0x48] sm:$0xff]  }
 0x4a8   : > { %7245 = vmatpush3.bf16.msra.mxu0 %v11681_v58  ;;  %v11698_v58 = vld [vmem:[%s12408_s3 + $0xe8] sm:$0xff]  }
 0x4a9   : > { %7274 = vmatprep.subr.bf16.mxu0 %v7992_v26  ;;  %13190 = vst [vmem:[#allocation66_spill] sm:$0xff] %v11698_v58  ;;  %v7995_v26 = vld [vmem:[%s12408_s3] sm:$0xff]  }
 0x4aa   : > { %6953 = vmatpush3.bf16.msra.mxu1 %v11691_v32  ;;  %v11710_v32 = vld [vmem:[%s12408_s3 + $0xa8] sm:$0xff]  }
 0x4ab   : > { %5091 = vmatmul.mubr.bf16.vlgmr.msra.gmra.mrb[208].mxu0 %v4808_v6  ;;  %6954 = vmatprep.subr.bf16.mxu1 %v11698_v58  ;;  %13191 = vst [vmem:[#allocation55_spill] sm:$0xff] %v11710_v32 }
 0x4ac   : > { %v6652_v2 = vpop.f32.mrb[84].mxu1  ;;  %7275 = vmatpush3.bf16.msra.mxu0 %v7995_v26  ;;  %5235 = vmatprep.mubr.bf16.mxu0 %v5188_v34  ;;  %v11716_v34 = vld [vmem:[%s12408_s3 + $0xf0] sm:$0xff]  }
 0x4ad   : > { %v6653_v27 = vpop.f32.mrb[85].mxu1  ;;  %7276 = vmatprep.subr.bf16.mxu0 %v7996_v51 }
 0x4ae   : > { %v6654_v41 = vadd.f32 %v6653_v27, %v6652_v2  ;;  %v6655_v6 = vpop.f32.mrb[86].mxu1  ;;  %6955 = vmatpush3.bf16.msra.mxu1 %v11710_v32  ;;  %v7999_v27 = vld [vmem:[%s12408_s3 + $0x8] sm:$0xff]   ;;  %v8000_v2 = vld [vmem:[%s12408_s3 + $0x50] sm:$0xff]  }
 0x4af   : > { %v6656_v58 = vpop.f32.mrb[87].mxu1  ;;  %6956 = vmatprep.subr.bf16.mxu1 %v11716_v34 }
 0x4b0   : > { %v3797_v26 = vadd.f32 %v6654_v41, %v11537_v56  ;;  %v6657_v51 = vadd.f32 %v6656_v58, %v6655_v6  ;;  %7277 = vmatpush3.bf16.msra.mxu0 %v7999_v27  ;;  %v13192_v56 = vld [vmem:[#allocation23_spill] sm:$0xff]  ;;  %v11739_v41 = vld [vmem:[%s12408_s3 + $0xf8] sm:$0xff]  }
 0x4b1   : > { %7278 = vmatprep.subr.bf16.mxu0 %v8000_v2  ;;  %13193 = vst [vmem:[#allocation67_spill] sm:$0xff] %v11739_v41  ;;  %v4378_v6 = vld [vmem:[#allocation2 + $0xf9] sm:$0x1]  ;;  %v4388_v2 = vld [vmem:[#allocation2 + $0x117] sm:$0x1] }
 0x4b2   : > { %v3800_v32 = vadd.f32 %v6657_v51, %v11554_v5  ;;  %6957 = vmatpush3.bf16.msra.mxu1 %v11730_v31  ;;  %v11734_v58 = vadd.f32 %v13192_v56, %v3797_v26  ;;  %v8003_v5 = vld [vmem:[%s12408_s3 + $0x10] sm:$0xff]   ;;  %v13194_v51 = vld [vmem:[#allocation88_spill] sm:$0xff] }
 0x4b3   : > { %6958 = vmatprep.subr.bf16.mxu1 %v11739_v41  ;;  %v8004_v26 = vld [vmem:[%s12408_s3 + $0x58] sm:$0xff]   ;;  %v4407_v41 = vpack.c.bf16 %v4378_v6, %v11336_v21  ;;  %v11774_v21 = vld [vmem:[%s12408_s3 + $0x180] sm:$0xff]   ;;  %v11780_v6 = vld [vmem:[%s12408_s3 + $0x1c8] sm:$0xff]  }
 0x4b4   : > { %7279 = vmatpush3.bf16.msra.mxu0 %v8003_v5  ;;  %v11746_v27 = vadd.f32 %v13194_v51, %v3800_v32  ;;  %v11754_v56 = vld [vmem:[%s12408_s3 + $0xb8] sm:$0xff]   ;;  %v11761_v32 = vld [vmem:[%s12408_s3 + $0x1c0] sm:$0xff]   ;;  %v4412_v51 = vpack.c.bf16 %v4388_v2, %v11340_v18  ;;  %13196 = vst [vmem:[#allocation48_spill] sm:$0xff] %v11774_v21  ;;  %13197 = vst [vmem:[#allocation68_spill] sm:$0xff] %v11780_v6 }
 0x4b5   : > { %7280 = vmatprep.subr.bf16.mxu0 %v8004_v26  ;;  %13195 = vst [vmem:[#allocation47_spill] sm:$0xff] %v11761_v32  ;;  %v8007_v5 = vld [vmem:[%s12408_s3 + $0x18] sm:$0xff]   ;;  %v8008_v26 = vld [vmem:[%s12408_s3 + $0x60] sm:$0xff]  }
 0x4b6   : > { %6959 = vmatpush3.bf16.msra.mxu1 %v11754_v56  ;;  %v8011_v18 = vld [vmem:[%s12408_s3 + $0x20] sm:$0xff]  }
 0x4b7   : > { %6988 = vmatprep.subr.bf16.mxu1 %v11761_v32 }
 0x4b8   : > { %7281 = vmatpush3.bf16.msra.mxu0 %v8007_v5  ;;  %v11792_v5 = vld [vmem:[%s12408_s3 + $0x188] sm:$0xff]  }
 0x4b9   : > { %4495 = vmatmul.mubr.bf16.vlgmr.msra.gmra.mrb[112].mxu1 %v4407_v41  ;;  %7282 = vmatprep.subr.bf16.mxu0 %v8008_v26  ;;  %v8012_v41 = vld [vmem:[%s12408_s3 + $0x68] sm:$0xff]   ;;  %13198 = vst [vmem:[#allocation69_spill] sm:$0xff] %v11792_v5  ;;  %v11798_v26 = vld [vmem:[%s12408_s3 + $0x1d0] sm:$0xff]  }
 0x4ba   : > { %6989 = vmatpush3.bf16.msra.mxu1 %v11774_v21  ;;  %4576 = vmatprep.mubr.bf16.mxu1 %v4412_v51  ;;  %13199 = vst [vmem:[#allocation49_spill] sm:$0xff] %v11798_v26 }
 0x4bb   : > { %6990 = vmatprep.subr.bf16.mxu1 %v11780_v6 }
 0x4bc   : > { %7283 = vmatpush3.bf16.msra.mxu0 %v8011_v18 }
 0x4bd   : > { %7284 = vmatprep.subr.bf16.mxu0 %v8012_v41  ;;  %v8015_v41 = vld [vmem:[%s12408_s3 + $0x28] sm:$0xff]  }
 0x4be   : > { %v6982_v2 = vpop.f32.mrb[184].mxu0  ;;  %6991 = vmatpush3.bf16.msra.mxu1 %v11792_v5  ;;  %v8016_v5 = vld [vmem:[%s12408_s3 + $0x70] sm:$0xff]  }
 0x4bf   : > { %v6983_v51 = vpop.f32.mrb[185].mxu0  ;;  %6992 = vmatprep.subr.bf16.mxu1 %v11798_v26  ;;  %v11814_v26 = vld [vmem:[%s12408_s3 + $0x190] sm:$0xff]  }
 0x4c0   : > { %v11801_v18 = vadd.f32 %v6983_v51, %v6982_v2  ;;  %v6985_v6 = vpop.f32.mrb[186].mxu0  ;;  %7285 = vmatpush3.bf16.msra.mxu0 %v8015_v41  ;;  %v11820_v2 = vld [vmem:[%s12408_s3 + $0x1d8] sm:$0xff]   ;;  %v11836_v51 = vld [vmem:[%s12408_s3 + $0x1e0] sm:$0xff]  }
 0x4c1   : > { %v6986_v21 = vpop.f32.mrb[187].mxu0  ;;  %7286 = vmatprep.subr.bf16.mxu0 %v8016_v5  ;;  %v8019_v5 = vld [vmem:[%s12408_s3 + $0x30] sm:$0xff]   ;;  %13202 = vst [vmem:[#allocation12_spill] sm:$0xff] %v11836_v51  ;;  %v5166_v41 = vld [vmem:[#allocation2 + $0x166] sm:$0x1] }
 0x4c2   : > { %13200 = vst [vmem:[#allocation51_spill] sm:$0xff] %v11801_v18  ;;  %v11809_v32 = vadd.f32 %v6986_v21, %v6985_v6  ;;  %6993 = vmatpush3.bf16.msra.mxu1 %v11814_v26  ;;  %v11830_v21 = vld [vmem:[%s12408_s3 + $0x198] sm:$0xff]   ;;  %v5156_v6 = vld [vmem:[#allocation2 + $0x148] sm:$0x1] }
 0x4c3   : > { %6994 = vmatprep.subr.bf16.mxu1 %v11820_v2  ;;  %v11852_v18 = vld [vmem:[%s12408_s3 + $0x1e8] sm:$0xff]  }
 0x4c4   : > { %13201 = vst [vmem:[#allocation70_spill] sm:$0xff] %v11809_v32  ;;  %7287 = vmatpush3.bf16.msra.mxu0 %v8019_v5  ;;  %v11845_v5 = vld [vmem:[%s12408_s3 + $0x1a0] sm:$0xff]   ;;  %v5192_v32 = vpack.c.bf16 %v5166_v41, %v11457_v15  ;;  %13204 = vst [vmem:[#allocation72_spill] sm:$0xff] %v11852_v18  ;;  %v8025_v15 = vld [vmem:[%s12408_s3 + $0x148] sm:$0xff]  }
 0x4c5   : > { %7288 = vmatprep.subr.bf16.mxu0 %v11260_v7  ;;  %v5187_v7 = vpack.c.bf16 %v5156_v6, %v11449_v53  ;;  %13203 = vst [vmem:[#allocation71_spill] sm:$0xff] %v11845_v5 }
 0x4c6   : > { %6995 = vmatpush3.bf16.msra.mxu1 %v11830_v21 }
 0x4c7   : > { %6996 = vmatprep.subr.bf16.mxu1 %v11836_v51 }
 0x4c8   : > { %7289 = vmatpush3.bf16.msra.mxu0 %v11268_v48 }
 0x4c9   : > { %7318 = vmatprep.subr.bf16.mxu0 %v11275_v13  ;;  %v8024_v13 = vld [vmem:[%s12408_s3 + $0x100] sm:$0xff]  }
 0x4ca   : > { %6997 = vmatpush3.bf16.msra.mxu1 %v11845_v5  ;;  %v11884_v5 = vld [vmem:[%s12408_s3 + $0x1b0] sm:$0xff]  }
 0x4cb   : > { %5236 = vmatmul.mubr.bf16.vlgmr.msra.gmra.mrb[212].mxu0 %v5187_v7  ;;  %6998 = vmatprep.subr.bf16.mxu1 %v11852_v18  ;;  %v11864_v7 = vld [vmem:[%s12408_s3 + $0x1a8] sm:$0xff]  }
 0x4cc   : > { %v6696_v48 = vpop.f32.mrb[88].mxu1  ;;  %7319 = vmatpush3.bf16.msra.mxu0 %v8024_v13  ;;  %5317 = vmatprep.mubr.bf16.mxu0 %v5192_v32  ;;  %13205 = vst [vmem:[#allocation73_spill] sm:$0xff] %v11864_v7  ;;  %v11870_v32 = vld [vmem:[%s12408_s3 + $0x1f0] sm:$0xff]  }
 0x4cd   : > { %v6697_v53 = vpop.f32.mrb[89].mxu1  ;;  %7320 = vmatprep.subr.bf16.mxu0 %v8025_v15  ;;  %13206 = vst [vmem:[#allocation74_spill] sm:$0xff] %v11870_v32 }
 0x4ce   : > { %v6698_v6 = vadd.f32 %v6697_v53, %v6696_v48  ;;  %v6699_v41 = vpop.f32.mrb[90].mxu1  ;;  %6999 = vmatpush3.bf16.msra.mxu1 %v11864_v7  ;;  %v8028_v48 = vld [vmem:[%s12408_s3 + $0x108] sm:$0xff]   ;;  %v8029_v53 = vld [vmem:[%s12408_s3 + $0x150] sm:$0xff]  }
 0x4cf   : > { %v6700_v18 = vpop.f32.mrb[91].mxu1  ;;  %7000 = vmatprep.subr.bf16.mxu1 %v11870_v32 }
 0x4d0   : > { %v3879_v13 = vadd.f32 %v6698_v6, %v11734_v58  ;;  %v6701_v15 = vadd.f32 %v6700_v18, %v6699_v41  ;;  %7321 = vmatpush3.bf16.msra.mxu0 %v8028_v48  ;;  %v11893_v18 = vld [vmem:[%s12408_s3 + $0x1f8] sm:$0xff]   ;;  %v4386_v6 = vld [vmem:[#allocation2 + $0x10d] sm:$0x1] }
 0x4d1   : > { %7322 = vmatprep.subr.bf16.mxu0 %v8029_v53  ;;  %13207 = vst [vmem:[#allocation15_spill] sm:$0xff] %v11893_v18  ;;  %v11910_v48 = vld [vmem:[%s12408_s3 + $0x1b8] sm:$0xff]   ;;  %v4411_v53 = vpack.c.bf16 %v4386_v6, %v11551_v1  ;;  %v11930_v1 = vld [vmem:[%s12408_s3 + $0x280] sm:$0xff]   ;;  %v11936_v6 = vld [vmem:[%s12408_s3 + $0x2c8] sm:$0xff]  }
 0x4d2   : > { %v3882_v7 = vadd.f32 %v6701_v15, %v11746_v27  ;;  %7001 = vmatpush3.bf16.msra.mxu1 %v11884_v5  ;;  %v11888_v58 = vadd.f32 %v11152_v23, %v3879_v13  ;;  %v8032_v27 = vld [vmem:[%s12408_s3 + $0x110] sm:$0xff]   ;;  %v8033_v23 = vld [vmem:[%s12408_s3 + $0x158] sm:$0xff]   ;;  %v11905_v13 = vld [vmem:[#allocation2 + $0x123] sm:$0xff]  ;;  %13208 = vst [vmem:[#allocation17_spill] sm:$0xff] %v11910_v48 }
 0x4d3   : > { %7002 = vmatprep.subr.bf16.mxu1 %v11893_v18  ;;  %v4396_v15 = vld [vmem:[#allocation2 + $0x12b] sm:$0x1]  ;;  %13210 = vst [vmem:[#allocation22_spill] sm:$0xff] %v11930_v1  ;;  %13211 = vst [vmem:[#allocation80_spill] sm:$0xff] %v11936_v6 }
 0x4d4   : > { %7323 = vmatpush3.bf16.msra.mxu0 %v8032_v27  ;;  %v11900_v41 = vadd.f32 %v11156_v47, %v3882_v7  ;;  %v11917_v47 = vld [vmem:[%s12408_s3 + $0x2c0] sm:$0xff]   ;;  %v8036_v7 = vld [vmem:[%s12408_s3 + $0x118] sm:$0xff]   ;;  %v4416_v27 = vpack.c.bf16 %v4396_v15, %v11905_v13 }
 0x4d5   : > { %7324 = vmatprep.subr.bf16.mxu0 %v8033_v23  ;;  %13209 = vst [vmem:[#allocation75_spill] sm:$0xff] %v11917_v47  ;;  %v8037_v23 = vld [vmem:[%s12408_s3 + $0x160] sm:$0xff]  }
 0x4d6   : > { %7003 = vmatpush3.bf16.msra.mxu1 %v11910_v48  ;;  %v8040_v15 = vld [vmem:[%s12408_s3 + $0x120] sm:$0xff]  }
 0x4d7   : > { %7032 = vmatprep.subr.bf16.mxu1 %v11917_v47 }
 0x4d8   : > { %7325 = vmatpush3.bf16.msra.mxu0 %v8036_v7 }
 0x4d9   : > { %4577 = vmatmul.mubr.bf16.vlgmr.msra.gmra.mrb[116].mxu1 %v4411_v53  ;;  %7326 = vmatprep.subr.bf16.mxu0 %v8037_v23  ;;  %v8041_v53 = vld [vmem:[%s12408_s3 + $0x168] sm:$0xff]  }
 0x4da   : > { %7033 = vmatpush3.bf16.msra.mxu1 %v11930_v1  ;;  %4658 = vmatprep.mubr.bf16.mxu1 %v4416_v27  ;;  %v11948_v27 = vld [vmem:[%s12408_s3 + $0x288] sm:$0xff]  }
 0x4db   : > { %7034 = vmatprep.subr.bf16.mxu1 %v11936_v6  ;;  %13212 = vst [vmem:[#allocation25_spill] sm:$0xff] %v11948_v27  ;;  %v11954_v6 = vld [vmem:[%s12408_s3 + $0x2d0] sm:$0xff]  }
 0x4dc   : > { %7327 = vmatpush3.bf16.msra.mxu0 %v8040_v15  ;;  %13213 = vst [vmem:[#allocation26_spill] sm:$0xff] %v11954_v6 }
 0x4dd   : > { %7328 = vmatprep.subr.bf16.mxu0 %v8041_v53  ;;  %v8044_v53 = vld [vmem:[%s12408_s3 + $0x128] sm:$0xff]  }
 0x4de   : > { %v7026_v7 = vpop.f32.mrb[188].mxu0  ;;  %7035 = vmatpush3.bf16.msra.mxu1 %v11948_v27  ;;  %v8045_v27 = vld [vmem:[%s12408_s3 + $0x170] sm:$0xff]  }
 0x4df   : > { %v7027_v23 = vpop.f32.mrb[189].mxu0  ;;  %7036 = vmatprep.subr.bf16.mxu1 %v11954_v6  ;;  %v11970_v6 = vld [vmem:[%s12408_s3 + $0x290] sm:$0xff]  }
 0x4e0   : > { %v11957_v15 = vadd.f32 %v7027_v23, %v7026_v7  ;;  %v7029_v1 = vpop.f32.mrb[190].mxu0  ;;  %7329 = vmatpush3.bf16.msra.mxu0 %v8044_v53  ;;  %13216 = vst [vmem:[#allocation79_spill] sm:$0xff] %v11970_v6  ;;  %v11976_v7 = vld [vmem:[%s12408_s3 + $0x2d8] sm:$0xff]   ;;  %v11994_v53 = vld [vmem:[%s12408_s3 + $0x2e0] sm:$0xff]  }
 0x4e1   : > { %v7030_v47 = vpop.f32.mrb[191].mxu0  ;;  %7330 = vmatprep.subr.bf16.mxu0 %v8045_v27  ;;  %13217 = vst [vmem:[#allocation56_spill] sm:$0xff] %v11976_v7  ;;  %v8048_v27 = vld [vmem:[%s12408_s3 + $0x130] sm:$0xff]   ;;  %v5164_v23 = vld [vmem:[#allocation2 + $0x15c] sm:$0x1]  ;;  %13219 = vst [vmem:[#allocation30_spill] sm:$0xff] %v11994_v53 }
 0x4e2   : > { %13214 = vst [vmem:[#allocation76_spill] sm:$0xff] %v11957_v15  ;;  %v11965_v48 = vadd.f32 %v7030_v47, %v7029_v1  ;;  %7037 = vmatpush3.bf16.msra.mxu1 %v11970_v6  ;;  %v8049_v47 = vld [vmem:[%s12408_s3 + $0x178] sm:$0xff]   ;;  %v5191_v15 = vpack.c.bf16 %v5164_v23, %v11670_v61 }
 0x4e3   : > { %7038 = vmatprep.subr.bf16.mxu1 %v11976_v7  ;;  %v11988_v1 = vld [vmem:[%s12408_s3 + $0x298] sm:$0xff]   ;;  %v12007_v7 = vld [vmem:[%s12408_s3 + $0x2a0] sm:$0xff]  }
 0x4e4   : > { %13215 = vst [vmem:[#allocation7_spill] sm:$0xff] %v11965_v48  ;;  %7331 = vmatpush3.bf16.msra.mxu0 %v8048_v27  ;;  %13218 = vst [vmem:[#allocation8_spill] sm:$0xff] %v11988_v1  ;;  %v5173_v27 = vld [vmem:[#allocation2 + $0x172] sm:$0xff]  ;;  %v5174_v48 = vld [vmem:[#allocation2 + $0x17a] sm:$0x1] }
 0x4e5   : > { %7332 = vmatprep.subr.bf16.mxu0 %v8049_v47  ;;  %v8052_v47 = vld [vmem:[%s12408_s3 + $0x138] sm:$0xff]   ;;  %13220 = vst [vmem:[#allocation4_spill] sm:$0xff] %v12007_v7 }
 0x4e6   : > { %7039 = vmatpush3.bf16.msra.mxu1 %v11988_v1  ;;  %v8053_v1 = vld [vmem:[%s12408_s3 + $0x240] sm:$0xff]  }
 0x4e7   : > { %7040 = vmatprep.subr.bf16.mxu1 %v11994_v53  ;;  %v5196_v53 = vpack.c.bf16 %v5174_v48, %v5173_v27  ;;  %v8057_v48 = vld [vmem:[%s12408_s3 + $0x248] sm:$0xff]  }
 0x4e8   : > { %7333 = vmatpush3.bf16.msra.mxu0 %v8052_v47  ;;  %v12013_v47 = vld [vmem:[%s12408_s3 + $0x2e8] sm:$0xff]  }
 0x4e9   : > { %7362 = vmatprep.subr.bf16.mxu0 %v8053_v1  ;;  %13221 = vst [vmem:[#allocation34_spill] sm:$0xff] %v12013_v47  ;;  %v8056_v1 = vld [vmem:[%s12408_s3 + $0x200] sm:$0xff]  }
 0x4ea   : > { %7041 = vmatpush3.bf16.msra.mxu1 %v12007_v7  ;;  %v12025_v7 = vld [vmem:[%s12408_s3 + $0x2a8] sm:$0xff]  }
 0x4eb   : > { %5318 = vmatmul.mubr.bf16.vlgmr.msra.gmra.mrb[216].mxu0 %v5191_v15  ;;  %7042 = vmatprep.subr.bf16.mxu1 %v12013_v47  ;;  %13222 = vst [vmem:[#allocation9_spill] sm:$0xff] %v12025_v7 }
 0x4ec   : > { %v6740_v61 = vpop.f32.mrb[92].mxu1  ;;  %7363 = vmatpush3.bf16.msra.mxu0 %v8056_v1  ;;  %5399 = vmatprep.mubr.bf16.mxu0 %v5196_v53  ;;  %v12031_v53 = vld [vmem:[%s12408_s3 + $0x2f0] sm:$0xff]  }
 0x4ed   : > { %v6741_v23 = vpop.f32.mrb[93].mxu1  ;;  %7364 = vmatprep.subr.bf16.mxu0 %v8057_v48  ;;  %13223 = vst [vmem:[#allocation10_spill] sm:$0xff] %v12031_v53 }
 0x4ee   : > { %v6742_v15 = vadd.f32 %v6741_v23, %v6740_v61  ;;  %v6743_v27 = vpop.f32.mrb[94].mxu1  ;;  %7043 = vmatpush3.bf16.msra.mxu1 %v12025_v7  ;;  %v8060_v61 = vld [vmem:[%s12408_s3 + $0x208] sm:$0xff]   ;;  %v8061_v23 = vld [vmem:[%s12408_s3 + $0x250] sm:$0xff]  }
 0x4ef   : > { %v6744_v47 = vpop.f32.mrb[95].mxu1  ;;  %7044 = vmatprep.subr.bf16.mxu1 %v12031_v53 }
 0x4f0   : > { %v3961_v1 = vadd.f32 %v6742_v15, %v11888_v58  ;;  %v6745_v48 = vadd.f32 %v6744_v47, %v6743_v27  ;;  %7365 = vmatpush3.bf16.msra.mxu0 %v8060_v61  ;;  %v12045_v58 = vld [vmem:[%s12408_s3 + $0x2b0] sm:$0xff]   ;;  %v12051_v47 = vld [vmem:[%s12408_s3 + $0x2f8] sm:$0xff]   ;;  %v5824_v61 = vld [vmem:[%s10060_s14 + $0x24] sm:$0x1] }
 0x4f1   : > { %7366 = vmatprep.subr.bf16.mxu0 %v8061_v23  ;;  %13224 = vst [vmem:[#allocation35_spill] sm:$0xff] %v12045_v58  ;;  %13225 = vst [vmem:[#allocation82_spill] sm:$0xff] %v12051_v47  ;;  %v8065_v23 = vld [vmem:[%s12408_s3 + $0x258] sm:$0xff]  }
 0x4f2   : > { %v3967_v7 = vmax.f32 %v3961_v1, 0.0  ;;  %v3964_v6 = vadd.f32 %v6745_v48, %v11900_v41  ;;  %7045 = vmatpush3.bf16.msra.mxu1 %v12045_v58  ;;  %v8064_v41 = vld [vmem:[%s12408_s3 + $0x210] sm:$0xff]   ;;  %v12057_v1 = vld [vmem:[#allocation2 + $0x119] sm:$0xff]  ;;  %v4394_v48 = vld [vmem:[#allocation2 + $0x121] sm:$0x1] }
 0x4f3   : > { %7046 = vmatprep.subr.bf16.mxu1 %v12051_v47  ;;  %v12063_v58 = vld [vmem:[#allocation2 + $0x137] sm:$0xff]  ;;  %v4404_v47 = vld [vmem:[#allocation2 + $0x13f] sm:$0x1] }
 0x4f4   : > { %v5856_v15 = vpack.c.bf16 %v3967_v7, %v3967_v7  ;;  %v3968_v27 = vmax.f32 %v3964_v6, 0.0  ;;  %7367 = vmatpush3.bf16.msra.mxu0 %v8064_v41  ;;  %v12069_v7 = vld [vmem:[%s12408_s3 + $0x2b8] sm:$0xff]   ;;  %v4415_v41 = vpack.c.bf16 %v4394_v48, %v12057_v1  ;;  %v5182_v48 = vld [vmem:[#allocation2 + $0x18e] sm:$0x1] }
 0x4f5   : > { %7368 = vmatprep.subr.bf16.mxu0 %v8065_v23  ;;  %v4420_v23 = vpack.c.bf16 %v4404_v47, %v12063_v58 }
 0x4f6   : > { %5823 = vst [vmem:[%s10060_s14 + $0x20] sm:$0xf] %v5856_v15  ;;  %v5857_v6 = vpack.c.bf16 %v3968_v27, %v3968_v27  ;;  %7047 = vmatpush3.bf16.msra.mxu1 %v12069_v7 }
 0x4f7   : > { %7076 = vmatprep.subr.bf16.mxu1 %v11348_v17 }
 0x4f8   : > { %v3980_v53 = vsel %vm10080_vm2, %v5857_v6, %v5824_v61  ;;  %7369 = vmatpush3.bf16.msra.mxu0 %v11356_v8  ;;  %v4065_v6 = vadd.f32 %v11500_v44, %v11204_v35 }
 0x4f9   : > { %5825 = vst [vmem:[%s10060_s14 + $0x24] sm:$0x1] %v3980_v53  ;;  %4659 = vmatmul.mubr.bf16.vlgmr.msra.gmra.mrb[120].mxu1 %v4415_v41  ;;  %7370 = vmatprep.subr.bf16.mxu0 %v11364_v50 }
 0x4fa   : > { %7077 = vmatpush3.bf16.msra.mxu1 %v11370_v33  ;;  %4740 = vmatprep.mubr.bf16.mxu1 %v4420_v23  ;;  %v4068_v23 = vadd.f32 %v11500_v44, %v11208_v55 }
 0x4fb   : > { %7078 = vmatprep.subr.bf16.mxu1 %v11376_v38 }
 0x4fc   : > { %7371 = vmatpush3.bf16.msra.mxu0 %v11382_v63  ;;  %v5171_v63 = vld [vmem:[#allocation2 + $0x168] sm:$0xff] }
 0x4fd   : > { %7372 = vmatprep.subr.bf16.mxu0 %v11388_v29  ;;  %v5172_v29 = vld [vmem:[#allocation2 + $0x170] sm:$0x1] }
 0x4fe   : > { %v7070_v15 = vpop.f32.mrb[192].mxu0  ;;  %7079 = vmatpush3.bf16.msra.mxu1 %v11394_v12 }
 0x4ff   : > { %v7071_v27 = vpop.f32.mrb[193].mxu0  ;;  %7080 = vmatprep.subr.bf16.mxu1 %v11400_v62 }
 0x500   : > { %v12086_v8 = vadd.f32 %v7071_v27, %v7070_v15  ;;  %v7073_v53 = vpop.f32.mrb[194].mxu0  ;;  %7373 = vmatpush3.bf16.msra.mxu0 %v11408_v10  ;;  %v5181_v10 = vld [vmem:[#allocation2 + $0x186] sm:$0xff] }
 0x501   : > { %v7074_v50 = vpop.f32.mrb[195].mxu0  ;;  %7374 = vmatprep.subr.bf16.mxu0 %v11414_v19  ;;  %v5195_v19 = vpack.c.bf16 %v5172_v29, %v5171_v63  ;;  %v5200_v61 = vpack.c.bf16 %v5182_v48, %v5181_v10  ;;  %v13232_v29 = vld [vmem:[#allocation43_spill] sm:$0xff]  ;;  %v13233_v48 = vld [vmem:[#allocation45_spill] sm:$0xff] }
 0x502   : > { %13226 = vst [vmem:[#allocation11_spill] sm:$0xff] %v12086_v8  ;;  %v12090_v47 = vadd.f32 %v7074_v50, %v7073_v53  ;;  %7081 = vmatpush3.bf16.msra.mxu1 %v11422_v14  ;;  %v4402_v53 = vld [vmem:[#allocation2 + $0x135] sm:$0x1]  ;;  %v4771_v50 = vld [vmem:[#allocation2 + $0x12b] sm:$0x1] }
 0x503   : > { %7082 = vmatprep.subr.bf16.mxu1 %v11428_v43  ;;  %v4777_v8 = vld [vmem:[#allocation2 + $0x135] sm:$0x1] }
 0x504   : > { %13227 = vst [vmem:[#allocation16_spill] sm:$0xff] %v12090_v47  ;;  %7375 = vmatpush3.bf16.msra.mxu0 %v11434_v16 }
 0x505   : > { %7376 = vmatprep.subr.bf16.mxu0 %v11440_v9 }
 0x506   : > { %7083 = vmatpush3.bf16.msra.mxu1 %v11446_v59 }
 0x507   : > { %7084 = vmatprep.subr.bf16.mxu1 %v11454_v60 }
 0x508   : > { %7377 = vmatpush3.bf16.msra.mxu0 %v11462_v57 }
 0x509   : > { %7406 = vmatprep.subr.bf16.mxu0 %v11469_v22 }
 0x50a   : > { %7085 = vmatpush3.bf16.msra.mxu1 %v11475_v46 }
 0x50b   : > { %5400 = vmatmul.mubr.bf16.vlgmr.msra.gmra.mrb[220].mxu0 %v5195_v19  ;;  %7086 = vmatprep.subr.bf16.mxu1 %v11482_v11  ;;  %v13235_v19 = vld [vmem:[#allocation40_spill] sm:$0xff] }
 0x50c   : > { %v6784_v16 = vpop.f32.mrb[96].mxu1  ;;  %7407 = vmatpush3.bf16.msra.mxu0 %v11488_v24  ;;  %5481 = vmatprep.mubr.bf16.mxu0 %v5200_v61  ;;  %v13236_v61 = vld [vmem:[#allocation62_spill] sm:$0xff] }
 0x50d   : > { %v6785_v9 = vpop.f32.mrb[97].mxu1  ;;  %7408 = vmatprep.subr.bf16.mxu0 %v11494_v52  ;;  %v12116_v52 = vld [vmem:[#allocation2 + $0x12d] sm:$0xff] }
 0x50e   : > { %v6786_v57 = vadd.f32 %v6785_v9, %v6784_v16  ;;  %v6787_v41 = vpop.f32.mrb[98].mxu1  ;;  %7087 = vmatpush3.bf16.msra.mxu1 %v11507_v54  ;;  %v13238_v9 = vld [vmem:[#allocation63_spill] sm:$0xff] }
 0x50f   : > { %v6788_v22 = vpop.f32.mrb[99].mxu1  ;;  %7088 = vmatprep.subr.bf16.mxu1 %v11513_v37 }
 0x510   : > { %v4106_v15 = vadd.f32 %v6786_v57, %v4065_v6  ;;  %v6789_v27 = vadd.f32 %v6788_v22, %v6787_v41  ;;  %7409 = vmatpush3.bf16.msra.mxu0 %v11521_v49  ;;  %v4419_v49 = vpack.c.bf16 %v4402_v53, %v12116_v52  ;;  %v13239_v6 = vld [vmem:[#allocation41_spill] sm:$0xff]  ;;  %v13240_v57 = vld [vmem:[#allocation42_spill] sm:$0xff]  ;;  %v13241_v41 = vld [vmem:[#allocation64_spill] sm:$0xff] }
 0x511   : > { %7410 = vmatprep.subr.bf16.mxu0 %v11527_v45  ;;  %v13228_v45 = vld [vmem:[#allocation60_spill] sm:$0xff]  ;;  %v13242_v22 = vld [vmem:[#allocation65_spill] sm:$0xff] }
 0x512   : > { %v4109_v24 = vadd.f32 %v6789_v27, %v4068_v23  ;;  %7089 = vmatpush3.bf16.msra.mxu1 %v11533_v40  ;;  %v4147_v35 = vadd.f32 %v11248_v39, %v4106_v15  ;;  %v4799_v39 = vpack.c.bf16 %v4771_v50, %v11905_v13  ;;  %v5179_v23 = vld [vmem:[#allocation2 + $0x17c] sm:$0xff]  ;;  %v5180_v15 = vld [vmem:[#allocation2 + $0x184] sm:$0x1]  ;;  %v13245_v50 = vld [vmem:[#allocation46_spill] sm:$0xff] }
 0x513   : > { %7090 = vmatprep.subr.bf16.mxu1 %v11542_v25  ;;  %v13243_v27 = vld [vmem:[#allocation44_spill] sm:$0xff]  ;;  %v5199_v53 = vpack.c.bf16 %v5180_v15, %v5179_v23  ;;  %v13249_v23 = vld [vmem:[#allocation67_spill] sm:$0xff]  ;;  %v4769_v15 = vld [vmem:[#allocation2 + $0x121] sm:$0x1] }
 0x514   : > { %7411 = vmatpush3.bf16.msra.mxu0 %v11548_v20  ;;  %v4150_v55 = vadd.f32 %v11252_v28, %v4109_v24  ;;  %v13229_v28 = vld [vmem:[#allocation6_spill] sm:$0xff]  ;;  %v13230_v20 = vld [vmem:[#allocation61_spill] sm:$0xff] }
 0x515   : > { %7412 = vmatprep.subr.bf16.mxu0 %v11559_v36  ;;  %v13231_v36 = vld [vmem:[#allocation50_spill] sm:$0xff]  ;;  %v13244_v24 = vld [vmem:[#allocation5_spill] sm:$0xff] }
 0x516   : > { %7091 = vmatpush3.bf16.msra.mxu1 %v11565_v4 }
 0x517   : > { %7120 = vmatprep.subr.bf16.mxu1 %v11572_v0 }
 0x518   : > { %7413 = vmatpush3.bf16.msra.mxu0 %v11578_v42 }
 0x519   : > { %4741 = vmatmul.mubr.bf16.vlgmr.msra.gmra.mrb[124].mxu1 %v4419_v49  ;;  %7414 = vmatprep.subr.bf16.mxu0 %v11585_v30  ;;  %v13246_v49 = vld [vmem:[#allocation66_spill] sm:$0xff] }
 0x51a   : > { %7121 = vmatpush3.bf16.msra.mxu1 %v13228_v45  ;;  %4885 = vmatprep.mubr.bf16.mxu1 %v4799_v39 }
 0x51b   : > { %7122 = vmatprep.subr.bf16.mxu1 %v13229_v28 }
 0x51c   : > { %7415 = vmatpush3.bf16.msra.mxu0 %v13230_v20 }
 0x51d   : > { %7416 = vmatprep.subr.bf16.mxu0 %v13231_v36 }
 0x51e   : > { %v7114_v63 = vpop.f32.mrb[196].mxu0  ;;  %7123 = vmatpush3.bf16.msra.mxu1 %v13232_v29 }
 0x51f   : > { %v7115_v10 = vpop.f32.mrb[197].mxu0  ;;  %7124 = vmatprep.subr.bf16.mxu1 %v13233_v48 }
 0x520   : > { %v12132_v42 = vadd.f32 %v7115_v10, %v7114_v63  ;;  %v7117_v13 = vpop.f32.mrb[198].mxu0  ;;  %7417 = vmatpush3.bf16.msra.mxu0 %v13235_v19  ;;  %v13247_v10 = vld [vmem:[#allocation55_spill] sm:$0xff] }
 0x521   : > { %v7118_v30 = vpop.f32.mrb[199].mxu0  ;;  %7418 = vmatprep.subr.bf16.mxu0 %v13236_v61 }
 0x522   : > { %13234 = vst [vmem:[#allocation83_spill] sm:$0xff] %v12132_v42  ;;  %v12136_v16 = vadd.f32 %v7118_v30, %v7117_v13  ;;  %7125 = vmatpush3.bf16.msra.mxu1 %v13238_v9  ;;  %v13261_v42 = vld [vmem:[#allocation58_spill] sm:$0xff] }
 0x523   : > { %7126 = vmatprep.subr.bf16.mxu1 %v13239_v6 }
 0x524   : > { %13237 = vst [vmem:[#allocation84_spill] sm:$0xff] %v12136_v16  ;;  %7419 = vmatpush3.bf16.msra.mxu0 %v13240_v57  ;;  %v13248_v57 = vld [vmem:[#allocation37_spill] sm:$0xff]  ;;  %v4779_v16 = vld [vmem:[#allocation2 + $0x13f] sm:$0x1] }
 0x525   : > { %7420 = vmatprep.subr.bf16.mxu0 %v13241_v41 }
 0x526   : > { %7127 = vmatpush3.bf16.msra.mxu1 %v13242_v22 }
 0x527   : > { %7128 = vmatprep.subr.bf16.mxu1 %v13243_v27 }
 0x528   : > { %7421 = vmatpush3.bf16.msra.mxu0 %v13244_v24  ;;  %v13250_v24 = vld [vmem:[#allocation57_spill] sm:$0xff] }
 0x52a   : > { %7129 = vmatpush3.bf16.msra.mxu1 %v13245_v50 }
 0x52b   : > { %5482 = vmatmul.mubr.bf16.vlgmr.msra.gmra.mrb[224].mxu0 %v5199_v53  ;;  %7130 = vmatprep.subr.bf16.mxu1 %v13246_v49 }
 0x52c   : > { %v6828_v39 = vpop.f32.mrb[100].mxu1 }
 0x52d   : > { %v6829_v20 = vpop.f32.mrb[101].mxu1 }
 0x52e   : > { %v6830_v36 = vadd.f32 %v6829_v20, %v6828_v39  ;;  %v6831_v63 = vpop.f32.mrb[102].mxu1  ;;  %7131 = vmatpush3.bf16.msra.mxu1 %v13247_v10  ;;  %v4798_v39 = vpack.c.bf16 %v4769_v15, %v12057_v1  ;;  %v13251_v20 = vld [vmem:[#allocation47_spill] sm:$0xff] }
 0x52f   : > { %v6832_v13 = vpop.f32.mrb[103].mxu1  ;;  %7132 = vmatprep.subr.bf16.mxu1 %v11716_v34 }
 0x530   : > { %v4188_v19 = vadd.f32 %v6830_v36, %v4147_v35  ;;  %v6833_v30 = vadd.f32 %v6832_v13, %v6831_v63  ;;  %v4803_v35 = vpack.c.bf16 %v4779_v16, %v12063_v58  ;;  %v13253_v36 = vld [vmem:[#allocation68_spill] sm:$0xff]  ;;  %v13254_v13 = vld [vmem:[#allocation69_spill] sm:$0xff]  ;;  %v13258_v58 = vld [vmem:[#allocation71_spill] sm:$0xff] }
 0x531   : > { %v13259_v16 = vld [vmem:[#allocation72_spill] sm:$0xff] }
 0x532   : > { %v4191_v61 = vadd.f32 %v6833_v30, %v4150_v55  ;;  %7133 = vmatpush3.bf16.msra.mxu1 %v11730_v31  ;;  %v4229_v41 = vadd.f32 %v13248_v57, %v4188_v19  ;;  %v13252_v55 = vld [vmem:[#allocation48_spill] sm:$0xff]  ;;  %v13255_v30 = vld [vmem:[#allocation49_spill] sm:$0xff] }
 0x533   : > { %7134 = vmatprep.subr.bf16.mxu1 %v13249_v23 }
 0x534   : > { %v4232_v53 = vadd.f32 %v13250_v24, %v4191_v61 }
 0x536   : > { %7135 = vmatpush3.bf16.msra.mxu1 %v11754_v56 }
 0x537   : > { %7164 = vmatprep.subr.bf16.mxu1 %v13251_v20 }
 0x539   : > { %4886 = vmatmul.mubr.bf16.vlgmr.msra.gmra.mrb[128].mxu1 %v4798_v39 }
 0x53a   : > { %7165 = vmatpush3.bf16.msra.mxu1 %v13252_v55  ;;  %4967 = vmatprep.mubr.bf16.mxu1 %v4803_v35 }
 0x53b   : > { %7166 = vmatprep.subr.bf16.mxu1 %v13253_v36 }
 0x53e   : > { %v7158_v63 = vpop.f32.mrb[200].mxu0  ;;  %7167 = vmatpush3.bf16.msra.mxu1 %v13254_v13 }
 0x53f   : > { %v7159_v19 = vpop.f32.mrb[201].mxu0  ;;  %7168 = vmatprep.subr.bf16.mxu1 %v13255_v30 }
 0x540   : > { %v12161_v61 = vadd.f32 %v7159_v19, %v7158_v63  ;;  %v7161_v57 = vpop.f32.mrb[202].mxu0  ;;  %v13260_v19 = vld [vmem:[#allocation73_spill] sm:$0xff] }
 0x541   : > { %v7162_v1 = vpop.f32.mrb[203].mxu0 }
 0x542   : > { %13256 = vst [vmem:[#allocation20_spill] sm:$0xff] %v12161_v61  ;;  %v12163_v15 = vadd.f32 %v7162_v1, %v7161_v57  ;;  %7169 = vmatpush3.bf16.msra.mxu1 %v11814_v26 }
 0x543   : > { %7170 = vmatprep.subr.bf16.mxu1 %v11820_v2 }
 0x544   : > { %13257 = vst [vmem:[#allocation86_spill] sm:$0xff] %v12163_v15 }
 0x546   : > { %7171 = vmatpush3.bf16.msra.mxu1 %v11830_v21 }
 0x547   : > { %7172 = vmatprep.subr.bf16.mxu1 %v11836_v51  ;;  %v12177_v51 = vld [vmem:[#allocation2 + $0x14b] sm:$0xff] }
 0x54a   : > { %7173 = vmatpush3.bf16.msra.mxu1 %v13258_v58 }
 0x54b   : > { %7174 = vmatprep.subr.bf16.mxu1 %v13259_v16  ;;  %v13262_v16 = vld [vmem:[#allocation59_spill] sm:$0xff] }
 0x54c   : > { %v6872_v24 = vpop.f32.mrb[104].mxu1 }
 0x54d   : > { %v6873_v39 = vpop.f32.mrb[105].mxu1 }
 0x54e   : > { %v6874_v35 = vadd.f32 %v6873_v39, %v6872_v24  ;;  %v6875_v63 = vpop.f32.mrb[106].mxu1  ;;  %7175 = vmatpush3.bf16.msra.mxu1 %v13260_v19  ;;  %v4787_v24 = vld [vmem:[#allocation2 + $0x153] sm:$0x1]  ;;  %v13263_v39 = vld [vmem:[#allocation17_spill] sm:$0xff]  ;;  %v4802_v19 = vpack.c.bf16 %v4777_v8, %v12116_v52 }
 0x54f   : > { %v6876_v57 = vpop.f32.mrb[107].mxu1  ;;  %7176 = vmatprep.subr.bf16.mxu1 %v11870_v32  ;;  %v13264_v32 = vld [vmem:[#allocation75_spill] sm:$0xff] }
 0x550   : > { %v4270_v1 = vadd.f32 %v6874_v35, %v4229_v41  ;;  %v6877_v15 = vadd.f32 %v6876_v57, %v6875_v63  ;;  %v4807_v41 = vpack.c.bf16 %v4787_v24, %v12177_v51  ;;  %v13267_v35 = vld [vmem:[#allocation25_spill] sm:$0xff]  ;;  %v13273_v24 = vld [vmem:[#allocation8_spill] sm:$0xff] }
 0x552   : > { %v4273_v61 = vadd.f32 %v6877_v15, %v4232_v53  ;;  %7177 = vmatpush3.bf16.msra.mxu1 %v11884_v5  ;;  %v4311_v47 = vadd.f32 %v13261_v42, %v4270_v1  ;;  %v13265_v53 = vld [vmem:[#allocation22_spill] sm:$0xff]  ;;  %v13266_v42 = vld [vmem:[#allocation80_spill] sm:$0xff]  ;;  %v13271_v1 = vld [vmem:[#allocation79_spill] sm:$0xff] }
 0x553   : > { %7178 = vmatprep.subr.bf16.mxu1 %v11893_v18  ;;  %v4795_v18 = vld [vmem:[#allocation2 + $0x167] sm:$0x1] }
 0x554   : > { %v4314_v58 = vadd.f32 %v13262_v16, %v4273_v61  ;;  %v13268_v16 = vld [vmem:[#allocation26_spill] sm:$0xff] }
 0x556   : > { %7179 = vmatpush3.bf16.msra.mxu1 %v13263_v39  ;;  %v12201_v39 = vld [vmem:[#allocation2 + $0x141] sm:$0xff] }
 0x557   : > { %7208 = vmatprep.subr.bf16.mxu1 %v13264_v32 }
 0x559   : > { %4968 = vmatmul.mubr.bf16.vlgmr.msra.gmra.mrb[132].mxu1 %v4802_v19  ;;  %v13272_v19 = vld [vmem:[#allocation56_spill] sm:$0xff] }
 0x55a   : > { %7209 = vmatpush3.bf16.msra.mxu1 %v13265_v53  ;;  %5049 = vmatprep.mubr.bf16.mxu1 %v4807_v41  ;;  %v13274_v41 = vld [vmem:[#allocation30_spill] sm:$0xff] }
 0x55b   : > { %7210 = vmatprep.subr.bf16.mxu1 %v13266_v42  ;;  %v13275_v42 = vld [vmem:[#allocation4_spill] sm:$0xff] }
 0x55e   : > { %v7202_v15 = vpop.f32.mrb[204].mxu0  ;;  %7211 = vmatpush3.bf16.msra.mxu1 %v13267_v35  ;;  %v13276_v35 = vld [vmem:[#allocation34_spill] sm:$0xff] }
 0x55f   : > { %v7203_v61 = vpop.f32.mrb[205].mxu0  ;;  %7212 = vmatprep.subr.bf16.mxu1 %v13268_v16 }
 0x560   : > { %v12187_v63 = vadd.f32 %v7203_v61, %v7202_v15  ;;  %v7205_v57 = vpop.f32.mrb[206].mxu0 }
 0x561   : > { %v7206_v8 = vpop.f32.mrb[207].mxu0 }
 0x562   : > { %13269 = vst [vmem:[#allocation24_spill] sm:$0xff] %v12187_v63  ;;  %v12189_v52 = vadd.f32 %v7206_v8, %v7205_v57  ;;  %7213 = vmatpush3.bf16.msra.mxu1 %v13271_v1  ;;  %v13277_v63 = vld [vmem:[#allocation9_spill] sm:$0xff]  ;;  %v13278_v8 = vld [vmem:[#allocation10_spill] sm:$0xff] }
 0x563   : > { %7214 = vmatprep.subr.bf16.mxu1 %v13272_v19 }
 0x564   : > { %13270 = vst [vmem:[#allocation87_spill] sm:$0xff] %v12189_v52 }
 0x566   : > { %7215 = vmatpush3.bf16.msra.mxu1 %v13273_v24 }
 0x567   : > { %7216 = vmatprep.subr.bf16.mxu1 %v13274_v41  ;;  %v13279_v41 = vld [vmem:[#allocation35_spill] sm:$0xff] }
 0x56a   : > { %7217 = vmatpush3.bf16.msra.mxu1 %v13275_v42  ;;  %v13280_v42 = vld [vmem:[#allocation82_spill] sm:$0xff] }
 0x56b   : > { %7218 = vmatprep.subr.bf16.mxu1 %v13276_v35 }
 0x56c   : > { %v6916_v53 = vpop.f32.mrb[108].mxu1 }
 0x56d   : > { %v6917_v16 = vpop.f32.mrb[109].mxu1 }
 0x56e   : > { %v6918_v15 = vadd.f32 %v6917_v16, %v6916_v53  ;;  %v6919_v61 = vpop.f32.mrb[110].mxu1  ;;  %7219 = vmatpush3.bf16.msra.mxu1 %v13277_v63  ;;  %v4785_v53 = vld [vmem:[#allocation2 + $0x149] sm:$0x1]  ;;  %v5829_v16 = vld [vmem:[%s10060_s14 + $0x2c] sm:$0x1]  ;;  %v12204_v63 = vld [vmem:[#allocation2 + $0x15f] sm:$0xff] }
 0x56f   : > { %v6920_v57 = vpop.f32.mrb[111].mxu1  ;;  %7220 = vmatprep.subr.bf16.mxu1 %v13278_v8 }
 0x570   : > { %v4352_v52 = vadd.f32 %v6918_v15, %v4311_v47  ;;  %v6921_v19 = vadd.f32 %v6920_v57, %v6919_v61  ;;  %v4806_v47 = vpack.c.bf16 %v4785_v53, %v12201_v39  ;;  %v4793_v53 = vld [vmem:[#allocation2 + $0x15d] sm:$0x1] }
 0x572   : > { %v4358_v24 = vmax.f32 %v4352_v52, 0.0  ;;  %v4355_v1 = vadd.f32 %v6921_v19, %v4314_v58  ;;  %7221 = vmatpush3.bf16.msra.mxu1 %v13279_v41  ;;  %v4811_v52 = vpack.c.bf16 %v4795_v18, %v12204_v63 }
 0x573   : > { %7222 = vmatprep.subr.bf16.mxu1 %v13280_v42 }
 0x574   : > { %v5858_v35 = vpack.c.bf16 %v4358_v24, %v4358_v24  ;;  %v4359_v32 = vmax.f32 %v4355_v1, 0.0 }
 0x576   : > { %5828 = vst [vmem:[%s10060_s14 + $0x28] sm:$0xf] %v5858_v35  ;;  %v5859_v8 = vpack.c.bf16 %v4359_v32, %v4359_v32  ;;  %7223 = vmatpush3.bf16.msra.mxu1 %v12069_v7 }
 0x577   : > { %7252 = vmatprep.subr.bf16.mxu1 %v11348_v17 }
 0x578   : > { %v4371_v58 = vsel %vm10080_vm2, %v5859_v8, %v5829_v16  ;;  %v12237_v8 = vld [vmem:[#allocation2 + $0x155] sm:$0xff]  ;;  %v13284_v16 = vld [vmem:[#allocation70_spill] sm:$0xff] }
 0x579   : > { %5830 = vst [vmem:[%s10060_s14 + $0x2c] sm:$0x1] %v4371_v58  ;;  %5050 = vmatmul.mubr.bf16.vlgmr.msra.gmra.mrb[136].mxu1 %v4806_v47  ;;  %v5162_v47 = vld [vmem:[#allocation2 + $0x153] sm:$0x1] }
 0x57a   : > { %7253 = vmatpush3.bf16.msra.mxu1 %v11370_v33  ;;  %5131 = vmatprep.mubr.bf16.mxu1 %v4811_v52 }
 0x57b   : > { %7254 = vmatprep.subr.bf16.mxu1 %v11376_v38 }
 0x57e   : > { %v7246_v35 = vpop.f32.mrb[208].mxu0  ;;  %7255 = vmatpush3.bf16.msra.mxu1 %v11394_v12  ;;  %v13281_v12 = vld [vmem:[#allocation18_spill] sm:$0xff] }
 0x57f   : > { %v7247_v32 = vpop.f32.mrb[209].mxu0  ;;  %7256 = vmatprep.subr.bf16.mxu1 %v11400_v62  ;;  %v4456_v62 = vadd.f32 %v11500_v44, %v13281_v12  ;;  %v13290_v12 = vld [vmem:[#allocation73_spill] sm:$0xff] }
 0x580   : > { %v12218_v1 = vadd.f32 %v7247_v32, %v7246_v35  ;;  %v7249_v17 = vpop.f32.mrb[210].mxu0 }
 0x581   : > { %v7250_v19 = vpop.f32.mrb[211].mxu0 }
 0x582   : > { %v12220_v24 = vadd.f32 %v7250_v19, %v7249_v17  ;;  %7257 = vmatpush3.bf16.msra.mxu1 %v11422_v14  ;;  %v5170_v17 = vld [vmem:[#allocation2 + $0x167] sm:$0x1] }
 0x583   : > { %7258 = vmatprep.subr.bf16.mxu1 %v11428_v43  ;;  %v13282_v43 = vld [vmem:[#allocation21_spill] sm:$0xff] }
 0x586   : > { %7259 = vmatpush3.bf16.msra.mxu1 %v11446_v59  ;;  %v4459_v59 = vadd.f32 %v11500_v44, %v13282_v43  ;;  %v5190_v44 = vpack.c.bf16 %v5162_v47, %v12177_v51  ;;  %v13293_v43 = vld [vmem:[#allocation15_spill] sm:$0xff]  ;;  %v13297_v47 = vld [vmem:[#allocation22_spill] sm:$0xff] }
 0x587   : > { %7260 = vmatprep.subr.bf16.mxu1 %v11454_v60 }
 0x58a   : > { %7261 = vmatpush3.bf16.msra.mxu1 %v11475_v46 }
 0x58b   : > { %7262 = vmatprep.subr.bf16.mxu1 %v11482_v11  ;;  %v13283_v11 = vld [vmem:[#allocation51_spill] sm:$0xff] }
 0x58c   : > { %v6960_v33 = vpop.f32.mrb[112].mxu1 }
 0x58d   : > { %v6961_v38 = vpop.f32.mrb[113].mxu1 }
 0x58e   : > { %v6962_v18 = vadd.f32 %v6961_v38, %v6960_v33  ;;  %v6963_v15 = vpop.f32.mrb[114].mxu1  ;;  %7263 = vmatpush3.bf16.msra.mxu1 %v11507_v54 }
 0x58f   : > { %v6964_v14 = vpop.f32.mrb[115].mxu1  ;;  %7264 = vmatprep.subr.bf16.mxu1 %v11513_v37  ;;  %v4810_v37 = vpack.c.bf16 %v4793_v53, %v12237_v8 }
 0x590   : > { %v4497_v60 = vadd.f32 %v6962_v18, %v4456_v62  ;;  %v6965_v61 = vadd.f32 %v6964_v14, %v6963_v15  ;;  %v13291_v18 = vld [vmem:[#allocation74_spill] sm:$0xff] }
 0x592   : > { %v4500_v46 = vadd.f32 %v6965_v61, %v4459_v59  ;;  %7265 = vmatpush3.bf16.msra.mxu1 %v11533_v40  ;;  %v4538_v57 = vadd.f32 %v13283_v11, %v4497_v60  ;;  %v5168_v59 = vld [vmem:[#allocation2 + $0x15d] sm:$0x1]  ;;  %v5178_v11 = vld [vmem:[#allocation2 + $0x17b] sm:$0x1] }
 0x593   : > { %7266 = vmatprep.subr.bf16.mxu1 %v11542_v25  ;;  %v13294_v60 = vld [vmem:[#allocation16_spill] sm:$0xff]  ;;  %v5193_v53 = vpack.c.bf16 %v5168_v59, %v12237_v8 }
 0x594   : > { %v4541_v54 = vadd.f32 %v13284_v16, %v4500_v46  ;;  %v5177_v46 = vld [vmem:[#allocation2 + $0x173] sm:$0xff] }
 0x595   : > { %v13296_v16 = vld [vmem:[#allocation75_spill] sm:$0xff] }
 0x596   : > { %7267 = vmatpush3.bf16.msra.mxu1 %v11565_v4 }
 0x597   : > { %7296 = vmatprep.subr.bf16.mxu1 %v11572_v0 }
 0x599   : > { %5132 = vmatmul.mubr.bf16.vlgmr.msra.gmra.mrb[140].mxu1 %v4810_v37 }
 0x59a   : > { %7297 = vmatpush3.bf16.msra.mxu1 %v13228_v45  ;;  %5276 = vmatprep.mubr.bf16.mxu1 %v5190_v44  ;;  %v13299_v44 = vld [vmem:[#allocation25_spill] sm:$0xff] }
 0x59b   : > { %7298 = vmatprep.subr.bf16.mxu1 %v13229_v28 }
 0x59e   : > { %v7290_v40 = vpop.f32.mrb[212].mxu0  ;;  %7299 = vmatpush3.bf16.msra.mxu1 %v13232_v29 }
 0x59f   : > { %v7291_v25 = vpop.f32.mrb[213].mxu0  ;;  %7300 = vmatprep.subr.bf16.mxu1 %v13233_v48 }
 0x5a0   : > { %v12248_v58 = vadd.f32 %v7291_v25, %v7290_v40  ;;  %v7293_v4 = vpop.f32.mrb[214].mxu0  ;;  %v13300_v25 = vld [vmem:[#allocation26_spill] sm:$0xff] }
 0x5a1   : > { %v7294_v52 = vpop.f32.mrb[215].mxu0 }
 0x5a2   : > { %v12250_v35 = vadd.f32 %v7294_v52, %v7293_v4  ;;  %7301 = vmatpush3.bf16.msra.mxu1 %v13238_v9 }
 0x5a3   : > { %7302 = vmatprep.subr.bf16.mxu1 %v13239_v6 }
 0x5a6   : > { %7303 = vmatpush3.bf16.msra.mxu1 %v13242_v22  ;;  %v13285_v22 = vld [vmem:[#allocation76_spill] sm:$0xff] }
 0x5a7   : > { %7304 = vmatprep.subr.bf16.mxu1 %v13243_v27 }
 0x5aa   : > { %7305 = vmatpush3.bf16.msra.mxu1 %v13245_v50  ;;  %v5160_v50 = vld [vmem:[#allocation2 + $0x149] sm:$0x1] }
 0x5ab   : > { %7306 = vmatprep.subr.bf16.mxu1 %v13246_v49  ;;  %v13286_v49 = vld [vmem:[#allocation7_spill] sm:$0xff] }
 0x5ac   : > { %v7004_v0 = vpop.f32.mrb[116].mxu1 }
 0x5ad   : > { %v7005_v51 = vpop.f32.mrb[117].mxu1 }
 0x5ae   : > { %v7006_v45 = vadd.f32 %v7005_v51, %v7004_v0  ;;  %v7007_v28 = vpop.f32.mrb[118].mxu1  ;;  %7307 = vmatpush3.bf16.msra.mxu1 %v13247_v10  ;;  %v5189_v10 = vpack.c.bf16 %v5160_v50, %v12201_v39  ;;  %v13301_v51 = vld [vmem:[#allocation79_spill] sm:$0xff] }
 0x5af   : > { %v7008_v29 = vpop.f32.mrb[119].mxu1  ;;  %7308 = vmatprep.subr.bf16.mxu1 %v11716_v34  ;;  %v5194_v34 = vpack.c.bf16 %v5170_v17, %v12204_v63  ;;  %v13308_v17 = vld [vmem:[#allocation10_spill] sm:$0xff] }
 0x5b0   : > { %v4579_v48 = vadd.f32 %v7006_v45, %v4538_v57  ;;  %v7009_v9 = vadd.f32 %v7008_v29, %v7007_v28  ;;  %v13295_v57 = vld [vmem:[#allocation17_spill] sm:$0xff]  ;;  %v13302_v45 = vld [vmem:[#allocation56_spill] sm:$0xff]  ;;  %v13304_v29 = vld [vmem:[#allocation30_spill] sm:$0xff] }
 0x5b1   : > { %v13303_v28 = vld [vmem:[#allocation8_spill] sm:$0xff] }
 0x5b2   : > { %v4582_v6 = vadd.f32 %v7009_v9, %v4541_v54  ;;  %7309 = vmatpush3.bf16.msra.mxu1 %v11730_v31  ;;  %v4620_v27 = vadd.f32 %v13285_v22, %v4579_v48  ;;  %v5198_v54 = vpack.c.bf16 %v5178_v11, %v5177_v46  ;;  %v13305_v48 = vld [vmem:[#allocation4_spill] sm:$0xff]  ;;  %v13306_v9 = vld [vmem:[#allocation34_spill] sm:$0xff]  ;;  %v8075_v11 = vld [vmem:[%s12408_s3 + $0x3e0] sm:$0xff]  }
 0x5b3   : > { %7310 = vmatprep.subr.bf16.mxu1 %v13249_v23  ;;  %v8074_v46 = vld [vmem:[%s12408_s3 + $0x398] sm:$0xff]  }
 0x5b4   : > { %v4623_v32 = vadd.f32 %v13286_v49, %v4582_v6  ;;  %v13307_v49 = vld [vmem:[#allocation9_spill] sm:$0xff] }
 0x5b6   : > { %7311 = vmatpush3.bf16.msra.mxu1 %v11754_v56 }
 0x5b7   : > { %7340 = vmatprep.subr.bf16.mxu1 %v13251_v20  ;;  %v13287_v20 = vld [vmem:[#allocation12_spill] sm:$0xff] }
 0x5b9   : > { %5277 = vmatmul.mubr.bf16.vlgmr.msra.gmra.mrb[144].mxu1 %v5189_v10 }
 0x5ba   : > { %7341 = vmatpush3.bf16.msra.mxu1 %v13252_v55  ;;  %5358 = vmatprep.mubr.bf16.mxu1 %v5194_v34  ;;  %v13288_v55 = vld [vmem:[#allocation71_spill] sm:$0xff] }
 0x5bb   : > { %7342 = vmatprep.subr.bf16.mxu1 %v13253_v36  ;;  %v13289_v36 = vld [vmem:[#allocation72_spill] sm:$0xff] }
 0x5be   : > { %v7334_v31 = vpop.f32.mrb[216].mxu0  ;;  %7343 = vmatpush3.bf16.msra.mxu1 %v13254_v13 }
 0x5bf   : > { %v7335_v23 = vpop.f32.mrb[217].mxu0  ;;  %7344 = vmatprep.subr.bf16.mxu1 %v13255_v30 }
 0x5c0   : > { %v12272_v19 = vadd.f32 %v7335_v23, %v7334_v31  ;;  %v7337_v56 = vpop.f32.mrb[218].mxu0 }
 0x5c1   : > { %v7338_v39 = vpop.f32.mrb[219].mxu0 }
 0x5c2   : > { %v12274_v33 = vadd.f32 %v7338_v39, %v7337_v56  ;;  %7345 = vmatpush3.bf16.msra.mxu1 %v11814_v26 }
 0x5c3   : > { %7346 = vmatprep.subr.bf16.mxu1 %v11820_v2 }
 0x5c6   : > { %7347 = vmatpush3.bf16.msra.mxu1 %v11830_v21  ;;  %v13292_v21 = vld [vmem:[#allocation11_spill] sm:$0xff] }
 0x5c7   : > { %7348 = vmatprep.subr.bf16.mxu1 %v13287_v20  ;;  %v5175_v20 = vld [vmem:[#allocation2 + $0x169] sm:$0xff] }
 0x5ca   : > { %7349 = vmatpush3.bf16.msra.mxu1 %v13288_v55  ;;  %v5176_v55 = vld [vmem:[#allocation2 + $0x171] sm:$0x1] }
 0x5cb   : > { %7350 = vmatprep.subr.bf16.mxu1 %v13289_v36  ;;  %v5834_v36 = vld [vmem:[%s10060_s14 + $0x34] sm:$0x1] }
 0x5cc   : > { %v7048_v13 = vpop.f32.mrb[120].mxu1 }
 0x5cd   : > { %v7049_v30 = vpop.f32.mrb[121].mxu1 }
 0x5ce   : > { %v7050_v63 = vadd.f32 %v7049_v30, %v7048_v13  ;;  %v7051_v38 = vpop.f32.mrb[122].mxu1  ;;  %7351 = vmatpush3.bf16.msra.mxu1 %v13290_v12  ;;  %v5185_v13 = vld [vmem:[#allocation2 + $0x187] sm:$0xff]  ;;  %v5186_v30 = vld [vmem:[#allocation2 + $0x18f] sm:$0x1] }
 0x5cf   : > { %v7052_v62 = vpop.f32.mrb[123].mxu1  ;;  %7352 = vmatprep.subr.bf16.mxu1 %v13291_v18  ;;  %v8067_v12 = vld [vmem:[%s12408_s3 + $0x3c0] sm:$0xff]  }
 0x5d0   : > { %v4661_v26 = vadd.f32 %v7050_v63, %v4620_v27  ;;  %v7053_v15 = vadd.f32 %v7052_v62, %v7051_v38  ;;  %v5197_v38 = vpack.c.bf16 %v5176_v55, %v5175_v20  ;;  %v8068_v62 = vld [vmem:[%s12408_s3 + $0x380] sm:$0xff]  }
 0x5d2   : > { %v4664_v2 = vadd.f32 %v7053_v15, %v4623_v32  ;;  %7353 = vmatpush3.bf16.msra.mxu1 %v11884_v5  ;;  %v4702_v14 = vadd.f32 %v13292_v21, %v4661_v26  ;;  %v13298_v5 = vld [vmem:[#allocation80_spill] sm:$0xff]  ;;  %v8070_v26 = vld [vmem:[%s12408_s3 + $0x388] sm:$0xff]  }
 0x5d3   : > { %7354 = vmatprep.subr.bf16.mxu1 %v13293_v43 }
 0x5d4   : > { %v4705_v61 = vadd.f32 %v13294_v60, %v4664_v2  ;;  %v8071_v2 = vld [vmem:[%s12408_s3 + $0x3d0] sm:$0xff]  }
 0x5d5   : > { %v8072_v60 = vld [vmem:[%s12408_s3 + $0x390] sm:$0xff]  }
 0x5d6   : > { %7355 = vmatpush3.bf16.msra.mxu1 %v13295_v57  ;;  %v8076_v57 = vld [vmem:[%s12408_s3 + $0x3a0] sm:$0xff]  }
 0x5d7   : > { %7384 = vmatprep.subr.bf16.mxu1 %v13296_v16 }
 0x5d9   : > { %5359 = vmatmul.mubr.bf16.vlgmr.msra.gmra.mrb[148].mxu1 %v5193_v53  ;;  %v8077_v53 = vld [vmem:[%s12408_s3 + $0x3e8] sm:$0xff]  }
 0x5da   : > { %7385 = vmatpush3.bf16.msra.mxu1 %v13297_v47  ;;  %5440 = vmatprep.mubr.bf16.mxu1 %v5198_v54  ;;  %v12355_v47 = vld [vmem:[%s12409_s4] ss:$0 sm:$0xff] }
 0x5db   : > { %7386 = vmatprep.subr.bf16.mxu1 %v13298_v5  ;;  %v13309_v5 = vld [vmem:[#allocation83_spill] sm:$0xff] }
 0x5de   : > { %v7378_v37 = vpop.f32.mrb[220].mxu0  ;;  %7387 = vmatpush3.bf16.msra.mxu1 %v13299_v44 }
 0x5df   : > { %v7379_v40 = vpop.f32.mrb[221].mxu0  ;;  %7388 = vmatprep.subr.bf16.mxu1 %v13300_v25  ;;  %v8079_v25 = vld [vmem:[%s12408_s3 + $0x3a8] sm:$0xff]  }
 0x5e0   : > { %v12295_v4 = vadd.f32 %v7379_v40, %v7378_v37  ;;  %v7381_v52 = vpop.f32.mrb[222].mxu0  ;;  %v4847_v37 = vadd.f32 %v12355_v47, %v13309_v5 }
 0x5e1   : > { %v7382_v0 = vpop.f32.mrb[223].mxu0 }
 0x5e2   : > { %v12297_v8 = vadd.f32 %v7382_v0, %v7381_v52  ;;  %7389 = vmatpush3.bf16.msra.mxu1 %v13301_v51  ;;  %v8080_v0 = vld [vmem:[%s12408_s3 + $0x3f0] sm:$0xff]   ;;  %v13310_v51 = vld [vmem:[#allocation84_spill] sm:$0xff] }
 0x5e3   : > { %7390 = vmatprep.subr.bf16.mxu1 %v13302_v45  ;;  %v4850_v45 = vadd.f32 %v12355_v47, %v13310_v51 }
 0x5e6   : > { %7391 = vmatpush3.bf16.msra.mxu1 %v13303_v28 }
 0x5e7   : > { %7392 = vmatprep.subr.bf16.mxu1 %v13304_v29 }
 0x5ea   : > { %7393 = vmatpush3.bf16.msra.mxu1 %v13305_v48 }
 0x5eb   : > { %7394 = vmatprep.subr.bf16.mxu1 %v13306_v9  ;;  %v8081_v9 = vld [vmem:[%s12408_s3 + $0x3b0] sm:$0xff]  }
 0x5ec   : > { %v7092_v6 = vpop.f32.mrb[124].mxu1 }
 0x5ed   : > { %v7093_v22 = vpop.f32.mrb[125].mxu1 }
 0x5ee   : > { %v7094_v27 = vadd.f32 %v7093_v22, %v7092_v6  ;;  %v7095_v50 = vpop.f32.mrb[126].mxu1  ;;  %7395 = vmatpush3.bf16.msra.mxu1 %v13307_v49  ;;  %v13311_v6 = vld [vmem:[#allocation20_spill] sm:$0xff]  ;;  %v5184_v49 = vld [vmem:[#allocation2 + $0x185] sm:$0x1] }
 0x5ef   : > { %v7096_v32 = vpop.f32.mrb[127].mxu1  ;;  %7396 = vmatprep.subr.bf16.mxu1 %v13308_v17 }
 0x5f0   : > { %v4743_v10 = vadd.f32 %v7094_v27, %v4702_v14  ;;  %v7097_v34 = vadd.f32 %v7096_v32, %v7095_v50  ;;  %v8082_v27 = vld [vmem:[%s12408_s3 + $0x3f8] sm:$0xff]   ;;  %v13312_v32 = vld [vmem:[#allocation86_spill] sm:$0xff] }
 0x5f1   : > { %v5183_v50 = vld [vmem:[#allocation2 + $0x17d] sm:$0xff] }
 0x5f2   : > { %v4749_v31 = vmax.f32 %v4743_v10, 0.0  ;;  %v4746_v23 = vadd.f32 %v7097_v34, %v4705_v61  ;;  %7397 = vmatpush3.bf16.msra.mxu1 %v13279_v41  ;;  %v5202_v41 = vpack.c.bf16 %v5186_v30, %v5185_v13  ;;  %v8073_v61 = vld [vmem:[%s12408_s3 + $0x3d8] sm:$0xff]   ;;  %v5201_v34 = vpack.c.bf16 %v5184_v49, %v5183_v50 }
 0x5f3   : > { %7398 = vmatprep.subr.bf16.mxu1 %v13280_v42  ;;  %v8083_v10 = vld [vmem:[%s12408_s3 + $0x3b8] sm:$0xff]  }
 0x5f4   : > { %v5860_v56 = vpack.c.bf16 %v4749_v31, %v4749_v31  ;;  %v4750_v39 = vmax.f32 %v4746_v23, 0.0  ;;  %v13313_v30 = vld [vmem:[#allocation24_spill] sm:$0xff] }
 0x5f6   : > { %5833 = vst [vmem:[%s10060_s14 + $0x30] sm:$0xf] %v5860_v56  ;;  %v5861_v63 = vpack.c.bf16 %v4750_v39, %v4750_v39  ;;  %7399 = vmatpush3.bf16.msra.mxu1 %v12069_v7  ;;  %v8069_v7 = vld [vmem:[%s12408_s3 + $0x3c8] sm:$0xff]  }
 0x5f7   : > { %7428 = vmatprep.subr.bf16.mxu1 %v8067_v12 }
 0x5f8   : > { %v4762_v42 = vsel %vm10080_vm2, %v5861_v63, %v5834_v36 }
 0x5f9   : > { %5835 = vst [vmem:[%s10060_s14 + $0x34] sm:$0x1] %v4762_v42  ;;  %5441 = vmatmul.mubr.bf16.vlgmr.msra.gmra.mrb[152].mxu1 %v5197_v38  ;;  %v13314_v38 = vld [vmem:[#allocation87_spill] sm:$0xff] }
 0x5fa   : > { %7429 = vmatpush3.bf16.msra.mxu1 %v8068_v62  ;;  %5522 = vmatprep.mubr.bf16.mxu1 %v5202_v41 }
 0x5fb   : > { %7430 = vmatprep.subr.bf16.mxu1 %v8069_v7 }
 0x5fe   : > { %v7422_v18 = vpop.f32.mrb[224].mxu0  ;;  %7431 = vmatpush3.bf16.msra.mxu1 %v8070_v26 }
 0x5ff   : > { %v7423_v15 = vpop.f32.mrb[225].mxu0  ;;  %7432 = vmatprep.subr.bf16.mxu1 %v8071_v2 }
 0x600   : > { %v12330_v21 = vadd.f32 %v7423_v15, %v7422_v18  ;;  %v7425_v14 = vpop.f32.mrb[226].mxu0 }
 0x601   : > { %v7426_v43 = vpop.f32.mrb[227].mxu0 }
 0x602   : > { %v12332_v59 = vadd.f32 %v7426_v43, %v7425_v14  ;;  %7433 = vmatpush3.bf16.msra.mxu1 %v8072_v60 }
 0x603   : > { %7434 = vmatprep.subr.bf16.mxu1 %v8073_v61 }
 0x606   : > { %7435 = vmatpush3.bf16.msra.mxu1 %v8074_v46 }
 0x607   : > { %7436 = vmatprep.subr.bf16.mxu1 %v8075_v11 }
 0x60a   : > { %7437 = vmatpush3.bf16.msra.mxu1 %v8076_v57 }
 0x60b   : > { %7438 = vmatprep.subr.bf16.mxu1 %v8077_v53 }
 0x60c   : > { %v7136_v16 = vpop.f32.mrb[128].mxu1 }
 0x60d   : > { %v7137_v54 = vpop.f32.mrb[129].mxu1 }
 0x60e   : > { %v7138_v44 = vadd.f32 %v7137_v54, %v7136_v16  ;;  %v7139_v40 = vpop.f32.mrb[130].mxu1  ;;  %7439 = vmatpush3.bf16.msra.mxu1 %v8079_v25 }
 0x60f   : > { %v7140_v52 = vpop.f32.mrb[131].mxu1  ;;  %7440 = vmatprep.subr.bf16.mxu1 %v8080_v0  ;;  %v5238_v0 = vadd.f32 %v12355_v47, %v12248_v58 }
 0x610   : > { %v4888_v28 = vadd.f32 %v7138_v44, %v4847_v37  ;;  %v7141_v29 = vadd.f32 %v7140_v52, %v7139_v40  ;;  %v5839_v40 = vld [vmem:[%s10060_s14 + $0x3c] sm:$0x1] }
 0x612   : > { %v4891_v48 = vadd.f32 %v7141_v29, %v4850_v45  ;;  %7441 = vmatpush3.bf16.msra.mxu1 %v8081_v9  ;;  %v4929_v22 = vadd.f32 %v13311_v6, %v4888_v28  ;;  %v5241_v29 = vadd.f32 %v12355_v47, %v12250_v35 }
 0x613   : > { %7442 = vmatprep.subr.bf16.mxu1 %v8082_v27 }
 0x614   : > { %v4932_v17 = vadd.f32 %v13312_v32, %v4891_v48 }
 0x616   : > { %7443 = vmatpush3.bf16.msra.mxu1 %v8083_v10 }
 0x619   : > { %5523 = vmatmul.mubr.bf16.vlgmr.msra.gmra.mrb[156].mxu1 %v5201_v34 }
 0x62c   : > { %v7180_v31 = vpop.f32.mrb[132].mxu1 }
 0x62d   : > { %v7181_v23 = vpop.f32.mrb[133].mxu1 }
 0x62e   : > { %v7182_v56 = vadd.f32 %v7181_v23, %v7180_v31  ;;  %v7183_v39 = vpop.f32.mrb[134].mxu1 }
 0x62f   : > { %v7184_v20 = vpop.f32.mrb[135].mxu1 }
 0x630   : > { %v4970_v55 = vadd.f32 %v7182_v56, %v4929_v22  ;;  %v7185_v36 = vadd.f32 %v7184_v20, %v7183_v39 }
 0x632   : > { %v4973_v13 = vadd.f32 %v7185_v36, %v4932_v17  ;;  %v5011_v63 = vadd.f32 %v13313_v30, %v4970_v55 }
 0x634   : > { %v5014_v12 = vadd.f32 %v13314_v38, %v4973_v13 }
 0x64c   : > { %v7224_v42 = vpop.f32.mrb[136].mxu1 }
 0x64d   : > { %v7225_v41 = vpop.f32.mrb[137].mxu1 }
 0x64e   : > { %v7226_v62 = vadd.f32 %v7225_v41, %v7224_v42  ;;  %v7227_v7 = vpop.f32.mrb[138].mxu1 }
 0x64f   : > { %v7228_v18 = vpop.f32.mrb[139].mxu1 }
 0x650   : > { %v5052_v26 = vadd.f32 %v7226_v62, %v5011_v63  ;;  %v7229_v15 = vadd.f32 %v7228_v18, %v7227_v7 }
 0x652   : > { %v5055_v2 = vadd.f32 %v7229_v15, %v5014_v12  ;;  %v5093_v14 = vadd.f32 %v12218_v1, %v5052_v26  ;;  %v5844_v15 = vld [vmem:[%s10060_s14 + $0x44] sm:$0x1] }
 0x654   : > { %v5096_v43 = vadd.f32 %v12220_v24, %v5055_v2 }
 0x66c   : > { %v7268_v60 = vpop.f32.mrb[140].mxu1 }
 0x66d   : > { %v7269_v61 = vpop.f32.mrb[141].mxu1 }
 0x66e   : > { %v7270_v46 = vadd.f32 %v7269_v61, %v7268_v60  ;;  %v7271_v11 = vpop.f32.mrb[142].mxu1 }
 0x66f   : > { %v7272_v57 = vpop.f32.mrb[143].mxu1 }
 0x670   : > { %v5134_v53 = vadd.f32 %v7270_v46, %v5093_v14  ;;  %v7273_v16 = vadd.f32 %v7272_v57, %v7271_v11 }
 0x672   : > { %v5140_v54 = vmax.f32 %v5134_v53, 0.0  ;;  %v5137_v5 = vadd.f32 %v7273_v16, %v5096_v43 }
 0x674   : > { %v5862_v37 = vpack.c.bf16 %v5140_v54, %v5140_v54  ;;  %v5141_v44 = vmax.f32 %v5137_v5, 0.0 }
 0x676   : > { %5838 = vst [vmem:[%s10060_s14 + $0x38] sm:$0xf] %v5862_v37  ;;  %v5863_v25 = vpack.c.bf16 %v5141_v44, %v5141_v44 }
 0x678   : > { %v5153_v1 = vsel %vm10080_vm2, %v5863_v25, %v5839_v40 }
 0x679   : > { %5840 = vst [vmem:[%s10060_s14 + $0x3c] sm:$0x1] %v5153_v1 }
 0x68c   : > { %v7312_v24 = vpop.f32.mrb[144].mxu1 }
 0x68d   : > { %v7313_v52 = vpop.f32.mrb[145].mxu1 }
 0x68e   : > { %v7314_v51 = vadd.f32 %v7313_v52, %v7312_v24  ;;  %v7315_v45 = vpop.f32.mrb[146].mxu1 }
 0x68f   : > { %v7316_v28 = vpop.f32.mrb[147].mxu1 }
 0x690   : > { %v5279_v48 = vadd.f32 %v7314_v51, %v5238_v0  ;;  %v7317_v9 = vadd.f32 %v7316_v28, %v7315_v45 }
 0x692   : > { %v5282_v6 = vadd.f32 %v7317_v9, %v5241_v29  ;;  %v5320_v22 = vadd.f32 %v12272_v19, %v5279_v48 }
 0x694   : > { %v5323_v27 = vadd.f32 %v12274_v33, %v5282_v6 }
 0x6ac   : > { %v7356_v50 = vpop.f32.mrb[148].mxu1 }
 0x6ad   : > { %v7357_v49 = vpop.f32.mrb[149].mxu1 }
 0x6ae   : > { %v7358_v32 = vadd.f32 %v7357_v49, %v7356_v50  ;;  %v7359_v17 = vpop.f32.mrb[150].mxu1 }
 0x6af   : > { %v7360_v10 = vpop.f32.mrb[151].mxu1 }
 0x6b0   : > { %v5361_v34 = vadd.f32 %v7358_v32, %v5320_v22  ;;  %v7361_v58 = vadd.f32 %v7360_v10, %v7359_v17 }
 0x6b2   : > { %v5364_v31 = vadd.f32 %v7361_v58, %v5323_v27  ;;  %v5402_v23 = vadd.f32 %v12295_v4, %v5361_v34 }
 0x6b4   : > { %v5405_v56 = vadd.f32 %v12297_v8, %v5364_v31 }
 0x6cc   : > { %v7400_v35 = vpop.f32.mrb[152].mxu1 }
 0x6cd   : > { %v7401_v47 = vpop.f32.mrb[153].mxu1 }
 0x6ce   : > { %v7402_v39 = vadd.f32 %v7401_v47, %v7400_v35  ;;  %v7403_v20 = vpop.f32.mrb[154].mxu1 }
 0x6cf   : > { %v7404_v55 = vpop.f32.mrb[155].mxu1 }
 0x6d0   : > { %v5443_v19 = vadd.f32 %v7402_v39, %v5402_v23  ;;  %v7405_v33 = vadd.f32 %v7404_v55, %v7403_v20 }
 0x6d2   : > { %v5446_v36 = vadd.f32 %v7405_v33, %v5405_v56  ;;  %v5484_v13 = vadd.f32 %v12330_v21, %v5443_v19 }
 0x6d4   : > { %v5487_v30 = vadd.f32 %v12332_v59, %v5446_v36 }
 0x6ec   : > { %v7444_v63 = vpop.f32.mrb[156].mxu1 }
 0x6ed   : > { %v7445_v38 = vpop.f32.mrb[157].mxu1 }
 0x6ee   : > { %v7446_v4 = vadd.f32 %v7445_v38, %v7444_v63  ;;  %v7447_v12 = vpop.f32.mrb[158].mxu1 }
 0x6ef   : > { %v7448_v8 = vpop.f32.mrb[159].mxu1 }
 0x6f0   : > { %v5525_v42 = vadd.f32 %v7446_v4, %v5484_v13  ;;  %v7449_v41 = vadd.f32 %v7448_v8, %v7447_v12 }
 0x6f2   : > { %v5531_v62 = vmax.f32 %v5525_v42, 0.0  ;;  %v5528_v7 = vadd.f32 %v7449_v41, %v5487_v30 }
 0x6f4   : > { %v5864_v18 = vpack.c.bf16 %v5531_v62, %v5531_v62  ;;  %v5532_v26 = vmax.f32 %v5528_v7, 0.0 }
 0x6f6   : > { %5843 = vst [vmem:[%s10060_s14 + $0x40] sm:$0xf] %v5864_v18  ;;  %v5865_v2 = vpack.c.bf16 %v5532_v26, %v5532_v26 }
 0x6f8   : > { %v5544_v21 = vsel %vm10080_vm2, %v5865_v2, %v5844_v15 }
 0x6f9   : > { %5845 = vst [vmem:[%s10060_s14 + $0x44] sm:$0x1] %v5544_v21 }
 0x6fa PF: > { %s15_s18 = sadd.s32 1, %s8090_s18  }
 0x6fb   : > { %p12_p4 = scmp.ge.s32.totalorder %s15_s18, 4  }
 0x6fd   :  { %14 = sbr.rel (!%p12_p4) target bundleno = 1 (0x1), region = 78 }

</bundles_post_ra>
